<compile_context>
chip_gen: v7x
topology: tpu7x:2x2x1
jax: 0.10.0
libtpu: 0.0.40
codegen_flags: <defaults>
</compile_context>

<pallas_src>
import jax
import jax.numpy as jnp
from jax import lax
from jax.experimental import pallas as pl
from jax.experimental.pallas import tpu as pltpu


# --------------------------------------------------------------------------
# Pallas kernel: bidirectional single-layer LSTM (packed semantics) + FC head
# --------------------------------------------------------------------------
def bilstm_fc_kernel(
    emb_ref,     # [T*B, E]  bf16  time-major embeddings, flattened over (T, B)
    len_ref,     # [B, 1]    i32   valid lengths
    wih_ref,     # [E, 8H]   bf16  [W_ih_fwd^T | W_ih_bwd^T]
    bih_ref,     # [1, 8H]   f32   [b_fwd | b_bwd]   (b_ih + b_hh per direction)
    whh_f_ref,   # [H, 4H]   bf16  forward  W_hh^T
    whh_b_ref,   # [H, 4H]   bf16  backward W_hh^T
    wfc_ref,     # [2H, O]   bf16  fc weight^T
    bfc_ref,     # [1, O]    f32   fc bias
    out_ref,     # [B, O]    f32   output logits
    xpf_ref,     # scratch VMEM [T*B, 4H] f32: precomputed forward  input gates
    xpb_ref,     # scratch VMEM [T*B, 4H] f32: precomputed backward input gates
):
    TB, E = emb_ref.shape
    B = len_ref.shape[0]
    T = TB // B
    H = whh_f_ref.shape[0]
    G = 4 * H

    # ---- (1) hoisted input projection: one big MXU op for every timestep ----
    xp = (jnp.dot(emb_ref[...], wih_ref[...],
                  preferred_element_type=jnp.float32)
          + bih_ref[...])                                  # [T*B, 8H] f32
    xpf_ref[...] = xp[:, 0:G]                              # vreg-aligned split
    xpb_ref[...] = xp[:, G:2 * G]

    lengths = len_ref[...]                                 # [B, 1] int32

    def cell(gates, c):
        # gates: [B, 4H] f32, PyTorch gate order i | f | g | o ; c: [B, H] f32
        # Full-tile activations (EUP slot) + lane-mask select for the tanh gate,
        # then vreg-aligned slices (H is a multiple of 128 in the example).
        sig = jax.nn.sigmoid(gates)
        th = jnp.tanh(gates)
        lane = lax.broadcasted_iota(jnp.int32, gates.shape, 1)
        act = jnp.where((lane >= 2 * H) & (lane < 3 * H), th, sig)
        i_g = act[:, 0 * H:1 * H]
        f_g = act[:, 1 * H:2 * H]
        g_g = act[:, 2 * H:3 * H]
        o_g = act[:, 3 * H:4 * H]
        c_new = f_g * c + i_g * g_g
        h_new = o_g * jnp.tanh(c_new)
        return h_new, c_new

    # ---- (2)+(3)+(4) fused fwd/bwd recurrence, carried state, fully unrolled ----
    def body(j, carry):
        h_f, c_f, h_b, c_b = carry
        t_b = T - 1 - j

        row_f = pl.multiple_of(j * B, B)
        row_b = pl.multiple_of(t_b * B, B)
        xg_f = xpf_ref[pl.ds(row_f, B), :]                 # [B, 4H] f32
        xg_b = xpb_ref[pl.ds(row_b, B), :]                 # [B, 4H] f32

        gates_f = xg_f + jnp.dot(h_f.astype(jnp.bfloat16), whh_f_ref[...],
                                 preferred_element_type=jnp.float32)
        gates_b = xg_b + jnp.dot(h_b.astype(jnp.bfloat16), whh_b_ref[...],
                                 preferred_element_type=jnp.float32)

        h_f_new, c_f_new = cell(gates_f, c_f)
        h_b_new, c_b_new = cell(gates_b, c_b)

        # packed-sequence masking: fwd stops at t >= len[b]; bwd only runs
        # while t < len[b] (so it effectively starts at t = len[b]-1).
        valid_f = j < lengths                              # [B, 1] bool
        valid_b = t_b < lengths
        h_f = jnp.where(valid_f, h_f_new, h_f)
        c_f = jnp.where(valid_f, c_f_new, c_f)
        h_b = jnp.where(valid_b, h_b_new, h_b)
        c_b = jnp.where(valid_b, c_b_new, c_b)
        return h_f, c_f, h_b, c_b

    zeros = jnp.zeros((B, H), jnp.float32)
    # NOTE: for heavily padded batches the trip count could be max(lengths)
    # via scalar prefetch, at the cost of losing the full unroll (T is small
    # and fixed here, so the static unrolled loop wins).
    h_f, c_f, h_b, c_b = lax.fori_loop(
        0, T, body, (zeros, zeros, zeros, zeros), unroll=True)

    # hidden = cat(hidden[-2], hidden[-1], dim=1) -> [B, 2H]; fc -> [B, O]
    hidden = jnp.concatenate([h_f, h_b], axis=1)
    out_ref[...] = (jnp.dot(hidden.astype(jnp.bfloat16), wfc_ref[...],
                            preferred_element_type=jnp.float32)
                    + bfc_ref[...])


# --------------------------------------------------------------------------
# Wrapper
# --------------------------------------------------------------------------
def rnn_bilstm_forward(embedded, text_lengths, lstm_params, fc_params,
                       hidden_dim, output_dim):
    """embedded: [T, B, E] f32, text_lengths: [B] -> logits [B, output_dim] f32."""
    T, B, E = embedded.shape
    H = hidden_dim
    (wih_f, whh_f, b_f, wih_b, whh_b, b_b) = lstm_params
    (wfc, bfc) = fc_params

    # Concatenate the two directions' input projections so the kernel hoists
    # them into ONE [T*B, E] x [E, 8H] matmul covering all timesteps.
    wih_cat = jnp.concatenate([wih_f, wih_b], axis=1).astype(jnp.bfloat16)   # [E, 8H]
    bih_cat = jnp.concatenate([b_f, b_b], axis=1).astype(jnp.float32)        # [1, 8H]

    emb2d = embedded.reshape(T * B, E).astype(jnp.bfloat16)   # time-major flatten (free)
    lengths = text_lengths.astype(jnp.int32).reshape(B, 1)

    vmem = pl.BlockSpec(memory_space=pltpu.MemorySpace.VMEM)
    # TODO(synk): for production T*B*E that no longer fits VMEM (notably v7x's
    # 64 MiB), stream time chunks via a grid / manual double-buffering and add
    # a batch-sharded "parallel" grid axis for the second v7x TensorCore.
    return pl.pallas_call(
        bilstm_fc_kernel,
        out_shape=jax.ShapeDtypeStruct((B, output_dim), jnp.float32),
        in_specs=[vmem] * 8,
        out_specs=vmem,
        scratch_shapes=[pltpu.VMEM((T * B, 4 * H), jnp.float32),
                        pltpu.VMEM((T * B, 4 * H), jnp.float32)],
    )(emb2d, lengths, wih_cat, bih_cat,
      whh_f.astype(jnp.bfloat16), whh_b.astype(jnp.bfloat16),
      wfc.astype(jnp.bfloat16), bfc.astype(jnp.float32))


# --------------------------------------------------------------------------
# Main: deterministic params + example inputs
# --------------------------------------------------------------------------
if __name__ == "__main__":
    # Hyperparameters. H and E are multiples of 128 (lane width) so every gate
    # slice is vreg-aligned, and B = 8 fills one full sublane group.
    vocab_size = 100
    embedding_dim = 128
    hidden_dim = 128
    output_dim = 4
    n_layers = 1            # TODO(synk): n_layers > 1 stacked LSTM not implemented
    bidirectional = True
    dropout_p = 0.0         # dropout is identity in eval / p=0
    pad_idx = 1

    B = 8
    T = 12

    key = jax.random.PRNGKey(0)
    keys = jax.random.split(key, 12)

    def init(k, shape, scale=0.1):
        return (scale * jax.random.normal(k, shape)).astype(jnp.float32)

    # Embedding table (padding_idx row zeroed, as nn.Embedding does).
    emb_table = init(keys[0], (vocab_size, embedding_dim)).at[pad_idx].set(0.0)

    H, E = hidden_dim, embedding_dim
    # LSTM weights, PyTorch layout [4H, E]/[4H, H]; pass transposed to kernel.
    wih_f = init(keys[1], (4 * H, E)).T                       # [E, 4H]
    whh_f = init(keys[2], (4 * H, H)).T                       # [H, 4H]
    b_f = (init(keys[3], (4 * H,)) + init(keys[4], (4 * H,))).reshape(1, 4 * H)
    wih_b = init(keys[5], (4 * H, E)).T
    whh_b = init(keys[6], (4 * H, H)).T
    b_b = (init(keys[7], (4 * H,)) + init(keys[8], (4 * H,))).reshape(1, 4 * H)
    # FC: [output_dim, 2H] -> transposed, bias [1, output_dim]
    wfc = init(keys[9], (output_dim, 2 * H)).T                # [2H, O]
    bfc = init(keys[10], (output_dim,)).reshape(1, output_dim)

    # Example time-major batch (descending lengths, as pack_padded_sequence expects).
    text_lengths = jnp.array([12, 11, 10, 9, 7, 5, 3, 2], dtype=jnp.int32)
    text = jax.random.randint(keys[11], (T, B), 2, vocab_size, dtype=jnp.int32)
    t_idx = jnp.arange(T)[:, None]
    text = jnp.where(t_idx < text_lengths[None, :], text, pad_idx)

    # ---- glue: embedding gather (nn.Embedding); dropout is identity here ----
    embedded = emb_table[text]                                # [T, B, E]

    out = rnn_bilstm_forward(
        embedded, text_lengths,
        (wih_f, whh_f, b_f, wih_b, whh_b, b_b),
        (wfc, bfc),
        hidden_dim, output_dim)
    out = jax.block_until_ready(out)
    assert out.shape == (B, output_dim)
    print("KERNEL_OK")
</pallas_src>

<mosaic_0001>
module attributes {stable_mosaic.version = 11 : i64} {
  func.func @bilstm_fc_kernel(%arg0: memref<96x128xbf16, #tpu.memory_space<vmem>>, %arg1: memref<8x1xi32, #tpu.memory_space<vmem>>, %arg2: memref<128x1024xbf16, #tpu.memory_space<vmem>>, %arg3: memref<1x1024xf32, #tpu.memory_space<vmem>>, %arg4: memref<128x512xbf16, #tpu.memory_space<vmem>>, %arg5: memref<128x512xbf16, #tpu.memory_space<vmem>>, %arg6: memref<256x4xbf16, #tpu.memory_space<vmem>>, %arg7: memref<1x4xf32, #tpu.memory_space<vmem>>, %arg8: memref<8x4xf32, #tpu.memory_space<vmem>>, %arg9: memref<96x512xf32, #tpu.memory_space<vmem>>, %arg10: memref<96x512xf32, #tpu.memory_space<vmem>>) attributes {dimension_semantics = [], scalar_prefetch = 0 : i64, scratch_operands = 2 : i64, tpu.core_type = #tpu.core_type<tc>} {
    %c0 = arith.constant 0 : index
    %c0_0 = arith.constant 0 : index
    %0 = vector.load %arg0[%c0, %c0_0] : memref<96x128xbf16, #tpu.memory_space<vmem>>, vector<96x128xbf16>
    %c0_1 = arith.constant 0 : index
    %c0_2 = arith.constant 0 : index
    %1 = vector.load %arg2[%c0_1, %c0_2] : memref<128x1024xbf16, #tpu.memory_space<vmem>>, vector<128x1024xbf16>
    %cst = arith.constant dense<0.000000e+00> : vector<96x1024xf32>
    %2 = tpu.matmul %0, %1, %cst {dimension_numbers = #tpu.dot_dimension_numbers<[1], [0], [0], [1], [0, 0, 1, 1], [], []>} : vector<96x128xbf16>, vector<128x1024xbf16>, vector<96x1024xf32> -> vector<96x1024xf32>
    %c0_3 = arith.constant 0 : index
    %c0_4 = arith.constant 0 : index
    %3 = vector.load %arg3[%c0_3, %c0_4] : memref<1x1024xf32, #tpu.memory_space<vmem>>, vector<1x1024xf32>
    %4 = vector.broadcast %3 : vector<1x1024xf32> to vector<96x1024xf32>
    %5 = arith.addf %2, %4 : vector<96x1024xf32>
    %6 = vector.extract_strided_slice %5 {offsets = [0, 0], sizes = [96, 512], strides = [1, 1]} : vector<96x1024xf32> to vector<96x512xf32>
    %c0_5 = arith.constant 0 : index
    %c0_6 = arith.constant 0 : index
    %7 = vector.load %arg9[%c0_5, %c0_6] : memref<96x512xf32, #tpu.memory_space<vmem>>, vector<96x512xf32>
    tpu.vector_store %arg9[%c0_5, %c0_6], %6 {strides = array<i32>} : memref<96x512xf32, #tpu.memory_space<vmem>>, vector<96x512xf32>,
    %8 = vector.extract_strided_slice %5 {offsets = [0, 512], sizes = [96, 512], strides = [1, 1]} : vector<96x1024xf32> to vector<96x512xf32>
    %c0_7 = arith.constant 0 : index
    %c0_8 = arith.constant 0 : index
    %9 = vector.load %arg10[%c0_7, %c0_8] : memref<96x512xf32, #tpu.memory_space<vmem>>, vector<96x512xf32>
    tpu.vector_store %arg10[%c0_7, %c0_8], %8 {strides = array<i32>} : memref<96x512xf32, #tpu.memory_space<vmem>>, vector<96x512xf32>,
    %c0_9 = arith.constant 0 : index
    %c0_10 = arith.constant 0 : index
    %10 = vector.load %arg1[%c0_9, %c0_10] : memref<8x1xi32, #tpu.memory_space<vmem>>, vector<8x1xi32>
    %cst_11 = arith.constant 0.000000e+00 : f32
    %11 = vector.broadcast %cst_11 : f32 to vector<8x128xf32>
    %c0_i32 = arith.constant 0 : i32
    %c11_i32 = arith.constant 11 : i32
    %12 = arith.subi %c11_i32, %c0_i32 : i32
    %c8_i32 = arith.constant 8 : i32
    %13 = arith.muli %c0_i32, %c8_i32 : i32
    %14 = tpu.assume_multiple %13, 8 : i32
    %c8_i32_12 = arith.constant 8 : i32
    %15 = arith.muli %12, %c8_i32_12 : i32
    %16 = tpu.assume_multiple %15, 8 : i32
    %17 = arith.index_cast %14 : i32 to index
    %c0_13 = arith.constant 0 : index
    %18 = vector.load %arg9[%17, %c0_13] : memref<96x512xf32, #tpu.memory_space<vmem>>, vector<8x512xf32>
    %19 = arith.index_cast %16 : i32 to index
    %c0_14 = arith.constant 0 : index
    %20 = vector.load %arg10[%19, %c0_14] : memref<96x512xf32, #tpu.memory_space<vmem>>, vector<8x512xf32>
    %21 = arith.truncf %11 : vector<8x128xf32> to vector<8x128xbf16>
    %c0_15 = arith.constant 0 : index
    %c0_16 = arith.constant 0 : index
    %22 = vector.load %arg4[%c0_15, %c0_16] : memref<128x512xbf16, #tpu.memory_space<vmem>>, vector<128x512xbf16>
    %cst_17 = arith.constant dense<0.000000e+00> : vector<8x512xf32>
    %23 = tpu.matmul %21, %22, %cst_17 {dimension_numbers = #tpu.dot_dimension_numbers<[1], [0], [0], [1], [0, 0, 1, 1], [], []>} : vector<8x128xbf16>, vector<128x512xbf16>, vector<8x512xf32> -> vector<8x512xf32>
    %24 = arith.addf %18, %23 : vector<8x512xf32>
    %25 = arith.truncf %11 : vector<8x128xf32> to vector<8x128xbf16>
    %c0_18 = arith.constant 0 : index
    %c0_19 = arith.constant 0 : index
    %26 = vector.load %arg5[%c0_18, %c0_19] : memref<128x512xbf16, #tpu.memory_space<vmem>>, vector<128x512xbf16>
    %cst_20 = arith.constant dense<0.000000e+00> : vector<8x512xf32>
    %27 = tpu.matmul %25, %26, %cst_20 {dimension_numbers = #tpu.dot_dimension_numbers<[1], [0], [0], [1], [0, 0, 1, 1], [], []>} : vector<8x128xbf16>, vector<128x512xbf16>, vector<8x512xf32> -> vector<8x512xf32>
    %28 = arith.addf %20, %27 : vector<8x512xf32>
    %29 = arith.negf %24 : vector<8x512xf32>
    %30 = math.exp %29 : vector<8x512xf32>
    %cst_21 = arith.constant 1.000000e+00 : f32
    %31 = vector.broadcast %cst_21 : f32 to vector<8x512xf32>
    %32 = arith.addf %31, %30 : vector<8x512xf32>
    %33 = arith.divf %31, %32 : vector<8x512xf32>
    %34 = math.tanh %24 : vector<8x512xf32>
    %35 = tpu.iota {dimensions = array<i32: 1>} : vector<8x512xi32>
    %c256_i32 = arith.constant 256 : i32
    %36 = vector.broadcast %c256_i32 : i32 to vector<8x512xi32>
    %37 = arith.cmpi sge, %35, %36 : vector<8x512xi32>
    %c384_i32 = arith.constant 384 : i32
    %38 = vector.broadcast %c384_i32 : i32 to vector<8x512xi32>
    %39 = arith.cmpi slt, %35, %38 : vector<8x512xi32>
    %40 = arith.andi %37, %39 : vector<8x512xi1>
    %41 = arith.select %40, %34, %33 : vector<8x512xi1>, vector<8x512xf32>
    %42 = vector.extract_strided_slice %41 {offsets = [0, 0], sizes = [8, 128], strides = [1, 1]} : vector<8x512xf32> to vector<8x128xf32>
    %43 = vector.extract_strided_slice %41 {offsets = [0, 128], sizes = [8, 128], strides = [1, 1]} : vector<8x512xf32> to vector<8x128xf32>
    %44 = vector.extract_strided_slice %41 {offsets = [0, 256], sizes = [8, 128], strides = [1, 1]} : vector<8x512xf32> to vector<8x128xf32>
    %45 = vector.extract_strided_slice %41 {offsets = [0, 384], sizes = [8, 128], strides = [1, 1]} : vector<8x512xf32> to vector<8x128xf32>
    %46 = arith.mulf %43, %11 : vector<8x128xf32>
    %47 = arith.mulf %42, %44 : vector<8x128xf32>
    %48 = arith.addf %46, %47 : vector<8x128xf32>
    %49 = math.tanh %48 : vector<8x128xf32>
    %50 = arith.mulf %45, %49 : vector<8x128xf32>
    %51 = arith.negf %28 : vector<8x512xf32>
    %52 = math.exp %51 : vector<8x512xf32>
    %cst_22 = arith.constant 1.000000e+00 : f32
    %53 = vector.broadcast %cst_22 : f32 to vector<8x512xf32>
    %54 = arith.addf %53, %52 : vector<8x512xf32>
    %55 = arith.divf %53, %54 : vector<8x512xf32>
    %56 = math.tanh %28 : vector<8x512xf32>
    %57 = tpu.iota {dimensions = array<i32: 1>} : vector<8x512xi32>
    %c256_i32_23 = arith.constant 256 : i32
    %58 = vector.broadcast %c256_i32_23 : i32 to vector<8x512xi32>
    %59 = arith.cmpi sge, %57, %58 : vector<8x512xi32>
    %c384_i32_24 = arith.constant 384 : i32
    %60 = vector.broadcast %c384_i32_24 : i32 to vector<8x512xi32>
    %61 = arith.cmpi slt, %57, %60 : vector<8x512xi32>
    %62 = arith.andi %59, %61 : vector<8x512xi1>
    %63 = arith.select %62, %56, %55 : vector<8x512xi1>, vector<8x512xf32>
    %64 = vector.extract_strided_slice %63 {offsets = [0, 0], sizes = [8, 128], strides = [1, 1]} : vector<8x512xf32> to vector<8x128xf32>
    %65 = vector.extract_strided_slice %63 {offsets = [0, 128], sizes = [8, 128], strides = [1, 1]} : vector<8x512xf32> to vector<8x128xf32>
    %66 = vector.extract_strided_slice %63 {offsets = [0, 256], sizes = [8, 128], strides = [1, 1]} : vector<8x512xf32> to vector<8x128xf32>
    %67 = vector.extract_strided_slice %63 {offsets = [0, 384], sizes = [8, 128], strides = [1, 1]} : vector<8x512xf32> to vector<8x128xf32>
    %68 = arith.mulf %65, %11 : vector<8x128xf32>
    %69 = arith.mulf %64, %66 : vector<8x128xf32>
    %70 = arith.addf %68, %69 : vector<8x128xf32>
    %71 = math.tanh %70 : vector<8x128xf32>
    %72 = arith.mulf %67, %71 : vector<8x128xf32>
    %73 = vector.broadcast %c0_i32 : i32 to vector<8x1xi32>
    %74 = arith.cmpi slt, %73, %10 : vector<8x1xi32>
    %75 = vector.broadcast %12 : i32 to vector<8x1xi32>
    %76 = arith.cmpi slt, %75, %10 : vector<8x1xi32>
    %77 = vector.shape_cast %74 : vector<8x1xi1> to vector<8x1xi1>
    %78 = vector.broadcast %77 : vector<8x1xi1> to vector<8x128xi1>
    %79 = arith.select %78, %50, %11 : vector<8x128xi1>, vector<8x128xf32>
    %80 = vector.shape_cast %74 : vector<8x1xi1> to vector<8x1xi1>
    %81 = vector.broadcast %80 : vector<8x1xi1> to vector<8x128xi1>
    %82 = arith.select %81, %48, %11 : vector<8x128xi1>, vector<8x128xf32>
    %83 = vector.shape_cast %76 : vector<8x1xi1> to vector<8x1xi1>
    %84 = vector.broadcast %83 : vector<8x1xi1> to vector<8x128xi1>
    %85 = arith.select %84, %72, %11 : vector<8x128xi1>, vector<8x128xf32>
    %86 = vector.shape_cast %76 : vector<8x1xi1> to vector<8x1xi1>
    %87 = vector.broadcast %86 : vector<8x1xi1> to vector<8x128xi1>
    %88 = arith.select %87, %70, %11 : vector<8x128xi1>, vector<8x128xf32>
    %c1_i32 = arith.constant 1 : i32
    %c11_i32_25 = arith.constant 11 : i32
    %89 = arith.subi %c11_i32_25, %c1_i32 : i32
    %c8_i32_26 = arith.constant 8 : i32
    %90 = arith.muli %c1_i32, %c8_i32_26 : i32
    %91 = tpu.assume_multiple %90, 8 : i32
    %c8_i32_27 = arith.constant 8 : i32
    %92 = arith.muli %89, %c8_i32_27 : i32
    %93 = tpu.assume_multiple %92, 8 : i32
    %94 = arith.index_cast %91 : i32 to index
    %c0_28 = arith.constant 0 : index
    %95 = vector.load %arg9[%94, %c0_28] : memref<96x512xf32, #tpu.memory_space<vmem>>, vector<8x512xf32>
    %96 = arith.index_cast %93 : i32 to index
    %c0_29 = arith.constant 0 : index
    %97 = vector.load %arg10[%96, %c0_29] : memref<96x512xf32, #tpu.memory_space<vmem>>, vector<8x512xf32>
    %98 = arith.truncf %79 : vector<8x128xf32> to vector<8x128xbf16>
    %c0_30 = arith.constant 0 : index
    %c0_31 = arith.constant 0 : index
    %99 = vector.load %arg4[%c0_30, %c0_31] : memref<128x512xbf16, #tpu.memory_space<vmem>>, vector<128x512xbf16>
    %cst_32 = arith.constant dense<0.000000e+00> : vector<8x512xf32>
    %100 = tpu.matmul %98, %99, %cst_32 {dimension_numbers = #tpu.dot_dimension_numbers<[1], [0], [0], [1], [0, 0, 1, 1], [], []>} : vector<8x128xbf16>, vector<128x512xbf16>, vector<8x512xf32> -> vector<8x512xf32>
    %101 = arith.addf %95, %100 : vector<8x512xf32>
    %102 = arith.truncf %85 : vector<8x128xf32> to vector<8x128xbf16>
    %c0_33 = arith.constant 0 : index
    %c0_34 = arith.constant 0 : index
    %103 = vector.load %arg5[%c0_33, %c0_34] : memref<128x512xbf16, #tpu.memory_space<vmem>>, vector<128x512xbf16>
    %cst_35 = arith.constant dense<0.000000e+00> : vector<8x512xf32>
    %104 = tpu.matmul %102, %103, %cst_35 {dimension_numbers = #tpu.dot_dimension_numbers<[1], [0], [0], [1], [0, 0, 1, 1], [], []>} : vector<8x128xbf16>, vector<128x512xbf16>, vector<8x512xf32> -> vector<8x512xf32>
    %105 = arith.addf %97, %104 : vector<8x512xf32>
    %106 = arith.negf %101 : vector<8x512xf32>
    %107 = math.exp %106 : vector<8x512xf32>
    %cst_36 = arith.constant 1.000000e+00 : f32
    %108 = vector.broadcast %cst_36 : f32 to vector<8x512xf32>
    %109 = arith.addf %108, %107 : vector<8x512xf32>
    %110 = arith.divf %108, %109 : vector<8x512xf32>
    %111 = math.tanh %101 : vector<8x512xf32>
    %112 = tpu.iota {dimensions = array<i32: 1>} : vector<8x512xi32>
    %c256_i32_37 = arith.constant 256 : i32
    %113 = vector.broadcast %c256_i32_37 : i32 to vector<8x512xi32>
    %114 = arith.cmpi sge, %112, %113 : vector<8x512xi32>
    %c384_i32_38 = arith.constant 384 : i32
    %115 = vector.broadcast %c384_i32_38 : i32 to vector<8x512xi32>
    %116 = arith.cmpi slt, %112, %115 : vector<8x512xi32>
    %117 = arith.andi %114, %116 : vector<8x512xi1>
    %118 = arith.select %117, %111, %110 : vector<8x512xi1>, vector<8x512xf32>
    %119 = vector.extract_strided_slice %118 {offsets = [0, 0], sizes = [8, 128], strides = [1, 1]} : vector<8x512xf32> to vector<8x128xf32>
    %120 = vector.extract_strided_slice %118 {offsets = [0, 128], sizes = [8, 128], strides = [1, 1]} : vector<8x512xf32> to vector<8x128xf32>
    %121 = vector.extract_strided_slice %118 {offsets = [0, 256], sizes = [8, 128], strides = [1, 1]} : vector<8x512xf32> to vector<8x128xf32>
    %122 = vector.extract_strided_slice %118 {offsets = [0, 384], sizes = [8, 128], strides = [1, 1]} : vector<8x512xf32> to vector<8x128xf32>
    %123 = arith.mulf %120, %82 : vector<8x128xf32>
    %124 = arith.mulf %119, %121 : vector<8x128xf32>
    %125 = arith.addf %123, %124 : vector<8x128xf32>
    %126 = math.tanh %125 : vector<8x128xf32>
    %127 = arith.mulf %122, %126 : vector<8x128xf32>
    %128 = arith.negf %105 : vector<8x512xf32>
    %129 = math.exp %128 : vector<8x512xf32>
    %cst_39 = arith.constant 1.000000e+00 : f32
    %130 = vector.broadcast %cst_39 : f32 to vector<8x512xf32>
    %131 = arith.addf %130, %129 : vector<8x512xf32>
    %132 = arith.divf %130, %131 : vector<8x512xf32>
    %133 = math.tanh %105 : vector<8x512xf32>
    %134 = tpu.iota {dimensions = array<i32: 1>} : vector<8x512xi32>
    %c256_i32_40 = arith.constant 256 : i32
    %135 = vector.broadcast %c256_i32_40 : i32 to vector<8x512xi32>
    %136 = arith.cmpi sge, %134, %135 : vector<8x512xi32>
    %c384_i32_41 = arith.constant 384 : i32
    %137 = vector.broadcast %c384_i32_41 : i32 to vector<8x512xi32>
    %138 = arith.cmpi slt, %134, %137 : vector<8x512xi32>
    %139 = arith.andi %136, %138 : vector<8x512xi1>
    %140 = arith.select %139, %133, %132 : vector<8x512xi1>, vector<8x512xf32>
    %141 = vector.extract_strided_slice %140 {offsets = [0, 0], sizes = [8, 128], strides = [1, 1]} : vector<8x512xf32> to vector<8x128xf32>
    %142 = vector.extract_strided_slice %140 {offsets = [0, 128], sizes = [8, 128], strides = [1, 1]} : vector<8x512xf32> to vector<8x128xf32>
    %143 = vector.extract_strided_slice %140 {offsets = [0, 256], sizes = [8, 128], strides = [1, 1]} : vector<8x512xf32> to vector<8x128xf32>
    %144 = vector.extract_strided_slice %140 {offsets = [0, 384], sizes = [8, 128], strides = [1, 1]} : vector<8x512xf32> to vector<8x128xf32>
    %145 = arith.mulf %142, %88 : vector<8x128xf32>
    %146 = arith.mulf %141, %143 : vector<8x128xf32>
    %147 = arith.addf %145, %146 : vector<8x128xf32>
    %148 = math.tanh %147 : vector<8x128xf32>
    %149 = arith.mulf %144, %148 : vector<8x128xf32>
    %150 = vector.broadcast %c1_i32 : i32 to vector<8x1xi32>
    %151 = arith.cmpi slt, %150, %10 : vector<8x1xi32>
    %152 = vector.broadcast %89 : i32 to vector<8x1xi32>
    %153 = arith.cmpi slt, %152, %10 : vector<8x1xi32>
    %154 = vector.shape_cast %151 : vector<8x1xi1> to vector<8x1xi1>
    %155 = vector.broadcast %154 : vector<8x1xi1> to vector<8x128xi1>
    %156 = arith.select %155, %127, %79 : vector<8x128xi1>, vector<8x128xf32>
    %157 = vector.shape_cast %151 : vector<8x1xi1> to vector<8x1xi1>
    %158 = vector.broadcast %157 : vector<8x1xi1> to vector<8x128xi1>
    %159 = arith.select %158, %125, %82 : vector<8x128xi1>, vector<8x128xf32>
    %160 = vector.shape_cast %153 : vector<8x1xi1> to vector<8x1xi1>
    %161 = vector.broadcast %160 : vector<8x1xi1> to vector<8x128xi1>
    %162 = arith.select %161, %149, %85 : vector<8x128xi1>, vector<8x128xf32>
    %163 = vector.shape_cast %153 : vector<8x1xi1> to vector<8x1xi1>
    %164 = vector.broadcast %163 : vector<8x1xi1> to vector<8x128xi1>
    %165 = arith.select %164, %147, %88 : vector<8x128xi1>, vector<8x128xf32>
    %c2_i32 = arith.constant 2 : i32
    %c11_i32_42 = arith.constant 11 : i32
    %166 = arith.subi %c11_i32_42, %c2_i32 : i32
    %c8_i32_43 = arith.constant 8 : i32
    %167 = arith.muli %c2_i32, %c8_i32_43 : i32
    %168 = tpu.assume_multiple %167, 8 : i32
    %c8_i32_44 = arith.constant 8 : i32
    %169 = arith.muli %166, %c8_i32_44 : i32
    %170 = tpu.assume_multiple %169, 8 : i32
    %171 = arith.index_cast %168 : i32 to index
    %c0_45 = arith.constant 0 : index
    %172 = vector.load %arg9[%171, %c0_45] : memref<96x512xf32, #tpu.memory_space<vmem>>, vector<8x512xf32>
    %173 = arith.index_cast %170 : i32 to index
    %c0_46 = arith.constant 0 : index
    %174 = vector.load %arg10[%173, %c0_46] : memref<96x512xf32, #tpu.memory_space<vmem>>, vector<8x512xf32>
    %175 = arith.truncf %156 : vector<8x128xf32> to vector<8x128xbf16>
    %c0_47 = arith.constant 0 : index
    %c0_48 = arith.constant 0 : index
    %176 = vector.load %arg4[%c0_47, %c0_48] : memref<128x512xbf16, #tpu.memory_space<vmem>>, vector<128x512xbf16>
    %cst_49 = arith.constant dense<0.000000e+00> : vector<8x512xf32>
    %177 = tpu.matmul %175, %176, %cst_49 {dimension_numbers = #tpu.dot_dimension_numbers<[1], [0], [0], [1], [0, 0, 1, 1], [], []>} : vector<8x128xbf16>, vector<128x512xbf16>, vector<8x512xf32> -> vector<8x512xf32>
    %178 = arith.addf %172, %177 : vector<8x512xf32>
    %179 = arith.truncf %162 : vector<8x128xf32> to vector<8x128xbf16>
    %c0_50 = arith.constant 0 : index
    %c0_51 = arith.constant 0 : index
    %180 = vector.load %arg5[%c0_50, %c0_51] : memref<128x512xbf16, #tpu.memory_space<vmem>>, vector<128x512xbf16>
    %cst_52 = arith.constant dense<0.000000e+00> : vector<8x512xf32>
    %181 = tpu.matmul %179, %180, %cst_52 {dimension_numbers = #tpu.dot_dimension_numbers<[1], [0], [0], [1], [0, 0, 1, 1], [], []>} : vector<8x128xbf16>, vector<128x512xbf16>, vector<8x512xf32> -> vector<8x512xf32>
    %182 = arith.addf %174, %181 : vector<8x512xf32>
    %183 = arith.negf %178 : vector<8x512xf32>
    %184 = math.exp %183 : vector<8x512xf32>
    %cst_53 = arith.constant 1.000000e+00 : f32
    %185 = vector.broadcast %cst_53 : f32 to vector<8x512xf32>
    %186 = arith.addf %185, %184 : vector<8x512xf32>
    %187 = arith.divf %185, %186 : vector<8x512xf32>
    %188 = math.tanh %178 : vector<8x512xf32>
    %189 = tpu.iota {dimensions = array<i32: 1>} : vector<8x512xi32>
    %c256_i32_54 = arith.constant 256 : i32
    %190 = vector.broadcast %c256_i32_54 : i32 to vector<8x512xi32>
    %191 = arith.cmpi sge, %189, %190 : vector<8x512xi32>
    %c384_i32_55 = arith.constant 384 : i32
    %192 = vector.broadcast %c384_i32_55 : i32 to vector<8x512xi32>
    %193 = arith.cmpi slt, %189, %192 : vector<8x512xi32>
    %194 = arith.andi %191, %193 : vector<8x512xi1>
    %195 = arith.select %194, %188, %187 : vector<8x512xi1>, vector<8x512xf32>
    %196 = vector.extract_strided_slice %195 {offsets = [0, 0], sizes = [8, 128], strides = [1, 1]} : vector<8x512xf32> to vector<8x128xf32>
    %197 = vector.extract_strided_slice %195 {offsets = [0, 128], sizes = [8, 128], strides = [1, 1]} : vector<8x512xf32> to vector<8x128xf32>
    %198 = vector.extract_strided_slice %195 {offsets = [0, 256], sizes = [8, 128], strides = [1, 1]} : vector<8x512xf32> to vector<8x128xf32>
    %199 = vector.extract_strided_slice %195 {offsets = [0, 384], sizes = [8, 128], strides = [1, 1]} : vector<8x512xf32> to vector<8x128xf32>
    %200 = arith.mulf %197, %159 : vector<8x128xf32>
    %201 = arith.mulf %196, %198 : vector<8x128xf32>
    %202 = arith.addf %200, %201 : vector<8x128xf32>
    %203 = math.tanh %202 : vector<8x128xf32>
    %204 = arith.mulf %199, %203 : vector<8x128xf32>
    %205 = arith.negf %182 : vector<8x512xf32>
    %206 = math.exp %205 : vector<8x512xf32>
    %cst_56 = arith.constant 1.000000e+00 : f32
    %207 = vector.broadcast %cst_56 : f32 to vector<8x512xf32>
    %208 = arith.addf %207, %206 : vector<8x512xf32>
    %209 = arith.divf %207, %208 : vector<8x512xf32>
    %210 = math.tanh %182 : vector<8x512xf32>
    %211 = tpu.iota {dimensions = array<i32: 1>} : vector<8x512xi32>
    %c256_i32_57 = arith.constant 256 : i32
    %212 = vector.broadcast %c256_i32_57 : i32 to vector<8x512xi32>
    %213 = arith.cmpi sge, %211, %212 : vector<8x512xi32>
    %c384_i32_58 = arith.constant 384 : i32
    %214 = vector.broadcast %c384_i32_58 : i32 to vector<8x512xi32>
    %215 = arith.cmpi slt, %211, %214 : vector<8x512xi32>
    %216 = arith.andi %213, %215 : vector<8x512xi1>
    %217 = arith.select %216, %210, %209 : vector<8x512xi1>, vector<8x512xf32>
    %218 = vector.extract_strided_slice %217 {offsets = [0, 0], sizes = [8, 128], strides = [1, 1]} : vector<8x512xf32> to vector<8x128xf32>
    %219 = vector.extract_strided_slice %217 {offsets = [0, 128], sizes = [8, 128], strides = [1, 1]} : vector<8x512xf32> to vector<8x128xf32>
    %220 = vector.extract_strided_slice %217 {offsets = [0, 256], sizes = [8, 128], strides = [1, 1]} : vector<8x512xf32> to vector<8x128xf32>
    %221 = vector.extract_strided_slice %217 {offsets = [0, 384], sizes = [8, 128], strides = [1, 1]} : vector<8x512xf32> to vector<8x128xf32>
    %222 = arith.mulf %219, %165 : vector<8x128xf32>
    %223 = arith.mulf %218, %220 : vector<8x128xf32>
    %224 = arith.addf %222, %223 : vector<8x128xf32>
    %225 = math.tanh %224 : vector<8x128xf32>
    %226 = arith.mulf %221, %225 : vector<8x128xf32>
    %227 = vector.broadcast %c2_i32 : i32 to vector<8x1xi32>
    %228 = arith.cmpi slt, %227, %10 : vector<8x1xi32>
    %229 = vector.broadcast %166 : i32 to vector<8x1xi32>
    %230 = arith.cmpi slt, %229, %10 : vector<8x1xi32>
    %231 = vector.shape_cast %228 : vector<8x1xi1> to vector<8x1xi1>
    %232 = vector.broadcast %231 : vector<8x1xi1> to vector<8x128xi1>
    %233 = arith.select %232, %204, %156 : vector<8x128xi1>, vector<8x128xf32>
    %234 = vector.shape_cast %228 : vector<8x1xi1> to vector<8x1xi1>
    %235 = vector.broadcast %234 : vector<8x1xi1> to vector<8x128xi1>
    %236 = arith.select %235, %202, %159 : vector<8x128xi1>, vector<8x128xf32>
    %237 = vector.shape_cast %230 : vector<8x1xi1> to vector<8x1xi1>
    %238 = vector.broadcast %237 : vector<8x1xi1> to vector<8x128xi1>
    %239 = arith.select %238, %226, %162 : vector<8x128xi1>, vector<8x128xf32>
    %240 = vector.shape_cast %230 : vector<8x1xi1> to vector<8x1xi1>
    %241 = vector.broadcast %240 : vector<8x1xi1> to vector<8x128xi1>
    %242 = arith.select %241, %224, %165 : vector<8x128xi1>, vector<8x128xf32>
    %c3_i32 = arith.constant 3 : i32
    %c11_i32_59 = arith.constant 11 : i32
    %243 = arith.subi %c11_i32_59, %c3_i32 : i32
    %c8_i32_60 = arith.constant 8 : i32
    %244 = arith.muli %c3_i32, %c8_i32_60 : i32
    %245 = tpu.assume_multiple %244, 8 : i32
    %c8_i32_61 = arith.constant 8 : i32
    %246 = arith.muli %243, %c8_i32_61 : i32
    %247 = tpu.assume_multiple %246, 8 : i32
    %248 = arith.index_cast %245 : i32 to index
    %c0_62 = arith.constant 0 : index
    %249 = vector.load %arg9[%248, %c0_62] : memref<96x512xf32, #tpu.memory_space<vmem>>, vector<8x512xf32>
    %250 = arith.index_cast %247 : i32 to index
    %c0_63 = arith.constant 0 : index
    %251 = vector.load %arg10[%250, %c0_63] : memref<96x512xf32, #tpu.memory_space<vmem>>, vector<8x512xf32>
    %252 = arith.truncf %233 : vector<8x128xf32> to vector<8x128xbf16>
    %c0_64 = arith.constant 0 : index
    %c0_65 = arith.constant 0 : index
    %253 = vector.load %arg4[%c0_64, %c0_65] : memref<128x512xbf16, #tpu.memory_space<vmem>>, vector<128x512xbf16>
    %cst_66 = arith.constant dense<0.000000e+00> : vector<8x512xf32>
    %254 = tpu.matmul %252, %253, %cst_66 {dimension_numbers = #tpu.dot_dimension_numbers<[1], [0], [0], [1], [0, 0, 1, 1], [], []>} : vector<8x128xbf16>, vector<128x512xbf16>, vector<8x512xf32> -> vector<8x512xf32>
    %255 = arith.addf %249, %254 : vector<8x512xf32>
    %256 = arith.truncf %239 : vector<8x128xf32> to vector<8x128xbf16>
    %c0_67 = arith.constant 0 : index
    %c0_68 = arith.constant 0 : index
    %257 = vector.load %arg5[%c0_67, %c0_68] : memref<128x512xbf16, #tpu.memory_space<vmem>>, vector<128x512xbf16>
    %cst_69 = arith.constant dense<0.000000e+00> : vector<8x512xf32>
    %258 = tpu.matmul %256, %257, %cst_69 {dimension_numbers = #tpu.dot_dimension_numbers<[1], [0], [0], [1], [0, 0, 1, 1], [], []>} : vector<8x128xbf16>, vector<128x512xbf16>, vector<8x512xf32> -> vector<8x512xf32>
    %259 = arith.addf %251, %258 : vector<8x512xf32>
    %260 = arith.negf %255 : vector<8x512xf32>
    %261 = math.exp %260 : vector<8x512xf32>
    %cst_70 = arith.constant 1.000000e+00 : f32
    %262 = vector.broadcast %cst_70 : f32 to vector<8x512xf32>
    %263 = arith.addf %262, %261 : vector<8x512xf32>
    %264 = arith.divf %262, %263 : vector<8x512xf32>
    %265 = math.tanh %255 : vector<8x512xf32>
    %266 = tpu.iota {dimensions = array<i32: 1>} : vector<8x512xi32>
    %c256_i32_71 = arith.constant 256 : i32
    %267 = vector.broadcast %c256_i32_71 : i32 to vector<8x512xi32>
    %268 = arith.cmpi sge, %266, %267 : vector<8x512xi32>
    %c384_i32_72 = arith.constant 384 : i32
    %269 = vector.broadcast %c384_i32_72 : i32 to vector<8x512xi32>
    %270 = arith.cmpi slt, %266, %269 : vector<8x512xi32>
    %271 = arith.andi %268, %270 : vector<8x512xi1>
    %272 = arith.select %271, %265, %264 : vector<8x512xi1>, vector<8x512xf32>
    %273 = vector.extract_strided_slice %272 {offsets = [0, 0], sizes = [8, 128], strides = [1, 1]} : vector<8x512xf32> to vector<8x128xf32>
    %274 = vector.extract_strided_slice %272 {offsets = [0, 128], sizes = [8, 128], strides = [1, 1]} : vector<8x512xf32> to vector<8x128xf32>
    %275 = vector.extract_strided_slice %272 {offsets = [0, 256], sizes = [8, 128], strides = [1, 1]} : vector<8x512xf32> to vector<8x128xf32>
    %276 = vector.extract_strided_slice %272 {offsets = [0, 384], sizes = [8, 128], strides = [1, 1]} : vector<8x512xf32> to vector<8x128xf32>
    %277 = arith.mulf %274, %236 : vector<8x128xf32>
    %278 = arith.mulf %273, %275 : vector<8x128xf32>
    %279 = arith.addf %277, %278 : vector<8x128xf32>
    %280 = math.tanh %279 : vector<8x128xf32>
    %281 = arith.mulf %276, %280 : vector<8x128xf32>
    %282 = arith.negf %259 : vector<8x512xf32>
    %283 = math.exp %282 : vector<8x512xf32>
    %cst_73 = arith.constant 1.000000e+00 : f32
    %284 = vector.broadcast %cst_73 : f32 to vector<8x512xf32>
    %285 = arith.addf %284, %283 : vector<8x512xf32>
    %286 = arith.divf %284, %285 : vector<8x512xf32>
    %287 = math.tanh %259 : vector<8x512xf32>
    %288 = tpu.iota {dimensions = array<i32: 1>} : vector<8x512xi32>
    %c256_i32_74 = arith.constant 256 : i32
    %289 = vector.broadcast %c256_i32_74 : i32 to vector<8x512xi32>
    %290 = arith.cmpi sge, %288, %289 : vector<8x512xi32>
    %c384_i32_75 = arith.constant 384 : i32
    %291 = vector.broadcast %c384_i32_75 : i32 to vector<8x512xi32>
    %292 = arith.cmpi slt, %288, %291 : vector<8x512xi32>
    %293 = arith.andi %290, %292 : vector<8x512xi1>
    %294 = arith.select %293, %287, %286 : vector<8x512xi1>, vector<8x512xf32>
    %295 = vector.extract_strided_slice %294 {offsets = [0, 0], sizes = [8, 128], strides = [1, 1]} : vector<8x512xf32> to vector<8x128xf32>
    %296 = vector.extract_strided_slice %294 {offsets = [0, 128], sizes = [8, 128], strides = [1, 1]} : vector<8x512xf32> to vector<8x128xf32>
    %297 = vector.extract_strided_slice %294 {offsets = [0, 256], sizes = [8, 128], strides = [1, 1]} : vector<8x512xf32> to vector<8x128xf32>
    %298 = vector.extract_strided_slice %294 {offsets = [0, 384], sizes = [8, 128], strides = [1, 1]} : vector<8x512xf32> to vector<8x128xf32>
    %299 = arith.mulf %296, %242 : vector<8x128xf32>
    %300 = arith.mulf %295, %297 : vector<8x128xf32>
    %301 = arith.addf %299, %300 : vector<8x128xf32>
    %302 = math.tanh %301 : vector<8x128xf32>
    %303 = arith.mulf %298, %302 : vector<8x128xf32>
    %304 = vector.broadcast %c3_i32 : i32 to vector<8x1xi32>
    %305 = arith.cmpi slt, %304, %10 : vector<8x1xi32>
    %306 = vector.broadcast %243 : i32 to vector<8x1xi32>
    %307 = arith.cmpi slt, %306, %10 : vector<8x1xi32>
    %308 = vector.shape_cast %305 : vector<8x1xi1> to vector<8x1xi1>
    %309 = vector.broadcast %308 : vector<8x1xi1> to vector<8x128xi1>
    %310 = arith.select %309, %281, %233 : vector<8x128xi1>, vector<8x128xf32>
    %311 = vector.shape_cast %305 : vector<8x1xi1> to vector<8x1xi1>
    %312 = vector.broadcast %311 : vector<8x1xi1> to vector<8x128xi1>
    %313 = arith.select %312, %279, %236 : vector<8x128xi1>, vector<8x128xf32>
    %314 = vector.shape_cast %307 : vector<8x1xi1> to vector<8x1xi1>
    %315 = vector.broadcast %314 : vector<8x1xi1> to vector<8x128xi1>
    %316 = arith.select %315, %303, %239 : vector<8x128xi1>, vector<8x128xf32>
    %317 = vector.shape_cast %307 : vector<8x1xi1> to vector<8x1xi1>
    %318 = vector.broadcast %317 : vector<8x1xi1> to vector<8x128xi1>
    %319 = arith.select %318, %301, %242 : vector<8x128xi1>, vector<8x128xf32>
    %c4_i32 = arith.constant 4 : i32
    %c11_i32_76 = arith.constant 11 : i32
    %320 = arith.subi %c11_i32_76, %c4_i32 : i32
    %c8_i32_77 = arith.constant 8 : i32
    %321 = arith.muli %c4_i32, %c8_i32_77 : i32
    %322 = tpu.assume_multiple %321, 8 : i32
    %c8_i32_78 = arith.constant 8 : i32
    %323 = arith.muli %320, %c8_i32_78 : i32
    %324 = tpu.assume_multiple %323, 8 : i32
    %325 = arith.index_cast %322 : i32 to index
    %c0_79 = arith.constant 0 : index
    %326 = vector.load %arg9[%325, %c0_79] : memref<96x512xf32, #tpu.memory_space<vmem>>, vector<8x512xf32>
    %327 = arith.index_cast %324 : i32 to index
    %c0_80 = arith.constant 0 : index
    %328 = vector.load %arg10[%327, %c0_80] : memref<96x512xf32, #tpu.memory_space<vmem>>, vector<8x512xf32>
    %329 = arith.truncf %310 : vector<8x128xf32> to vector<8x128xbf16>
    %c0_81 = arith.constant 0 : index
    %c0_82 = arith.constant 0 : index
    %330 = vector.load %arg4[%c0_81, %c0_82] : memref<128x512xbf16, #tpu.memory_space<vmem>>, vector<128x512xbf16>
    %cst_83 = arith.constant dense<0.000000e+00> : vector<8x512xf32>
    %331 = tpu.matmul %329, %330, %cst_83 {dimension_numbers = #tpu.dot_dimension_numbers<[1], [0], [0], [1], [0, 0, 1, 1], [], []>} : vector<8x128xbf16>, vector<128x512xbf16>, vector<8x512xf32> -> vector<8x512xf32>
    %332 = arith.addf %326, %331 : vector<8x512xf32>
    %333 = arith.truncf %316 : vector<8x128xf32> to vector<8x128xbf16>
    %c0_84 = arith.constant 0 : index
    %c0_85 = arith.constant 0 : index
    %334 = vector.load %arg5[%c0_84, %c0_85] : memref<128x512xbf16, #tpu.memory_space<vmem>>, vector<128x512xbf16>
    %cst_86 = arith.constant dense<0.000000e+00> : vector<8x512xf32>
    %335 = tpu.matmul %333, %334, %cst_86 {dimension_numbers = #tpu.dot_dimension_numbers<[1], [0], [0], [1], [0, 0, 1, 1], [], []>} : vector<8x128xbf16>, vector<128x512xbf16>, vector<8x512xf32> -> vector<8x512xf32>
    %336 = arith.addf %328, %335 : vector<8x512xf32>
    %337 = arith.negf %332 : vector<8x512xf32>
    %338 = math.exp %337 : vector<8x512xf32>
    %cst_87 = arith.constant 1.000000e+00 : f32
    %339 = vector.broadcast %cst_87 : f32 to vector<8x512xf32>
    %340 = arith.addf %339, %338 : vector<8x512xf32>
    %341 = arith.divf %339, %340 : vector<8x512xf32>
    %342 = math.tanh %332 : vector<8x512xf32>
    %343 = tpu.iota {dimensions = array<i32: 1>} : vector<8x512xi32>
    %c256_i32_88 = arith.constant 256 : i32
    %344 = vector.broadcast %c256_i32_88 : i32 to vector<8x512xi32>
    %345 = arith.cmpi sge, %343, %344 : vector<8x512xi32>
    %c384_i32_89 = arith.constant 384 : i32
    %346 = vector.broadcast %c384_i32_89 : i32 to vector<8x512xi32>
    %347 = arith.cmpi slt, %343, %346 : vector<8x512xi32>
    %348 = arith.andi %345, %347 : vector<8x512xi1>
    %349 = arith.select %348, %342, %341 : vector<8x512xi1>, vector<8x512xf32>
    %350 = vector.extract_strided_slice %349 {offsets = [0, 0], sizes = [8, 128], strides = [1, 1]} : vector<8x512xf32> to vector<8x128xf32>
    %351 = vector.extract_strided_slice %349 {offsets = [0, 128], sizes = [8, 128], strides = [1, 1]} : vector<8x512xf32> to vector<8x128xf32>
    %352 = vector.extract_strided_slice %349 {offsets = [0, 256], sizes = [8, 128], strides = [1, 1]} : vector<8x512xf32> to vector<8x128xf32>
    %353 = vector.extract_strided_slice %349 {offsets = [0, 384], sizes = [8, 128], strides = [1, 1]} : vector<8x512xf32> to vector<8x128xf32>
    %354 = arith.mulf %351, %313 : vector<8x128xf32>
    %355 = arith.mulf %350, %352 : vector<8x128xf32>
    %356 = arith.addf %354, %355 : vector<8x128xf32>
    %357 = math.tanh %356 : vector<8x128xf32>
    %358 = arith.mulf %353, %357 : vector<8x128xf32>
    %359 = arith.negf %336 : vector<8x512xf32>
    %360 = math.exp %359 : vector<8x512xf32>
    %cst_90 = arith.constant 1.000000e+00 : f32
    %361 = vector.broadcast %cst_90 : f32 to vector<8x512xf32>
    %362 = arith.addf %361, %360 : vector<8x512xf32>
    %363 = arith.divf %361, %362 : vector<8x512xf32>
    %364 = math.tanh %336 : vector<8x512xf32>
    %365 = tpu.iota {dimensions = array<i32: 1>} : vector<8x512xi32>
    %c256_i32_91 = arith.constant 256 : i32
    %366 = vector.broadcast %c256_i32_91 : i32 to vector<8x512xi32>
    %367 = arith.cmpi sge, %365, %366 : vector<8x512xi32>
    %c384_i32_92 = arith.constant 384 : i32
    %368 = vector.broadcast %c384_i32_92 : i32 to vector<8x512xi32>
    %369 = arith.cmpi slt, %365, %368 : vector<8x512xi32>
    %370 = arith.andi %367, %369 : vector<8x512xi1>
    %371 = arith.select %370, %364, %363 : vector<8x512xi1>, vector<8x512xf32>
    %372 = vector.extract_strided_slice %371 {offsets = [0, 0], sizes = [8, 128], strides = [1, 1]} : vector<8x512xf32> to vector<8x128xf32>
    %373 = vector.extract_strided_slice %371 {offsets = [0, 128], sizes = [8, 128], strides = [1, 1]} : vector<8x512xf32> to vector<8x128xf32>
    %374 = vector.extract_strided_slice %371 {offsets = [0, 256], sizes = [8, 128], strides = [1, 1]} : vector<8x512xf32> to vector<8x128xf32>
    %375 = vector.extract_strided_slice %371 {offsets = [0, 384], sizes = [8, 128], strides = [1, 1]} : vector<8x512xf32> to vector<8x128xf32>
    %376 = arith.mulf %373, %319 : vector<8x128xf32>
    %377 = arith.mulf %372, %374 : vector<8x128xf32>
    %378 = arith.addf %376, %377 : vector<8x128xf32>
    %379 = math.tanh %378 : vector<8x128xf32>
    %380 = arith.mulf %375, %379 : vector<8x128xf32>
    %381 = vector.broadcast %c4_i32 : i32 to vector<8x1xi32>
    %382 = arith.cmpi slt, %381, %10 : vector<8x1xi32>
    %383 = vector.broadcast %320 : i32 to vector<8x1xi32>
    %384 = arith.cmpi slt, %383, %10 : vector<8x1xi32>
    %385 = vector.shape_cast %382 : vector<8x1xi1> to vector<8x1xi1>
    %386 = vector.broadcast %385 : vector<8x1xi1> to vector<8x128xi1>
    %387 = arith.select %386, %358, %310 : vector<8x128xi1>, vector<8x128xf32>
    %388 = vector.shape_cast %382 : vector<8x1xi1> to vector<8x1xi1>
    %389 = vector.broadcast %388 : vector<8x1xi1> to vector<8x128xi1>
    %390 = arith.select %389, %356, %313 : vector<8x128xi1>, vector<8x128xf32>
    %391 = vector.shape_cast %384 : vector<8x1xi1> to vector<8x1xi1>
    %392 = vector.broadcast %391 : vector<8x1xi1> to vector<8x128xi1>
    %393 = arith.select %392, %380, %316 : vector<8x128xi1>, vector<8x128xf32>
    %394 = vector.shape_cast %384 : vector<8x1xi1> to vector<8x1xi1>
    %395 = vector.broadcast %394 : vector<8x1xi1> to vector<8x128xi1>
    %396 = arith.select %395, %378, %319 : vector<8x128xi1>, vector<8x128xf32>
    %c5_i32 = arith.constant 5 : i32
    %c11_i32_93 = arith.constant 11 : i32
    %397 = arith.subi %c11_i32_93, %c5_i32 : i32
    %c8_i32_94 = arith.constant 8 : i32
    %398 = arith.muli %c5_i32, %c8_i32_94 : i32
    %399 = tpu.assume_multiple %398, 8 : i32
    %c8_i32_95 = arith.constant 8 : i32
    %400 = arith.muli %397, %c8_i32_95 : i32
    %401 = tpu.assume_multiple %400, 8 : i32
    %402 = arith.index_cast %399 : i32 to index
    %c0_96 = arith.constant 0 : index
    %403 = vector.load %arg9[%402, %c0_96] : memref<96x512xf32, #tpu.memory_space<vmem>>, vector<8x512xf32>
    %404 = arith.index_cast %401 : i32 to index
    %c0_97 = arith.constant 0 : index
    %405 = vector.load %arg10[%404, %c0_97] : memref<96x512xf32, #tpu.memory_space<vmem>>, vector<8x512xf32>
    %406 = arith.truncf %387 : vector<8x128xf32> to vector<8x128xbf16>
    %c0_98 = arith.constant 0 : index
    %c0_99 = arith.constant 0 : index
    %407 = vector.load %arg4[%c0_98, %c0_99] : memref<128x512xbf16, #tpu.memory_space<vmem>>, vector<128x512xbf16>
    %cst_100 = arith.constant dense<0.000000e+00> : vector<8x512xf32>
    %408 = tpu.matmul %406, %407, %cst_100 {dimension_numbers = #tpu.dot_dimension_numbers<[1], [0], [0], [1], [0, 0, 1, 1], [], []>} : vector<8x128xbf16>, vector<128x512xbf16>, vector<8x512xf32> -> vector<8x512xf32>
    %409 = arith.addf %403, %408 : vector<8x512xf32>
    %410 = arith.truncf %393 : vector<8x128xf32> to vector<8x128xbf16>
    %c0_101 = arith.constant 0 : index
    %c0_102 = arith.constant 0 : index
    %411 = vector.load %arg5[%c0_101, %c0_102] : memref<128x512xbf16, #tpu.memory_space<vmem>>, vector<128x512xbf16>
    %cst_103 = arith.constant dense<0.000000e+00> : vector<8x512xf32>
    %412 = tpu.matmul %410, %411, %cst_103 {dimension_numbers = #tpu.dot_dimension_numbers<[1], [0], [0], [1], [0, 0, 1, 1], [], []>} : vector<8x128xbf16>, vector<128x512xbf16>, vector<8x512xf32> -> vector<8x512xf32>
    %413 = arith.addf %405, %412 : vector<8x512xf32>
    %414 = arith.negf %409 : vector<8x512xf32>
    %415 = math.exp %414 : vector<8x512xf32>
    %cst_104 = arith.constant 1.000000e+00 : f32
    %416 = vector.broadcast %cst_104 : f32 to vector<8x512xf32>
    %417 = arith.addf %416, %415 : vector<8x512xf32>
    %418 = arith.divf %416, %417 : vector<8x512xf32>
    %419 = math.tanh %409 : vector<8x512xf32>
    %420 = tpu.iota {dimensions = array<i32: 1>} : vector<8x512xi32>
    %c256_i32_105 = arith.constant 256 : i32
    %421 = vector.broadcast %c256_i32_105 : i32 to vector<8x512xi32>
    %422 = arith.cmpi sge, %420, %421 : vector<8x512xi32>
    %c384_i32_106 = arith.constant 384 : i32
    %423 = vector.broadcast %c384_i32_106 : i32 to vector<8x512xi32>
    %424 = arith.cmpi slt, %420, %423 : vector<8x512xi32>
    %425 = arith.andi %422, %424 : vector<8x512xi1>
    %426 = arith.select %425, %419, %418 : vector<8x512xi1>, vector<8x512xf32>
    %427 = vector.extract_strided_slice %426 {offsets = [0, 0], sizes = [8, 128], strides = [1, 1]} : vector<8x512xf32> to vector<8x128xf32>
    %428 = vector.extract_strided_slice %426 {offsets = [0, 128], sizes = [8, 128], strides = [1, 1]} : vector<8x512xf32> to vector<8x128xf32>
    %429 = vector.extract_strided_slice %426 {offsets = [0, 256], sizes = [8, 128], strides = [1, 1]} : vector<8x512xf32> to vector<8x128xf32>
    %430 = vector.extract_strided_slice %426 {offsets = [0, 384], sizes = [8, 128], strides = [1, 1]} : vector<8x512xf32> to vector<8x128xf32>
    %431 = arith.mulf %428, %390 : vector<8x128xf32>
    %432 = arith.mulf %427, %429 : vector<8x128xf32>
    %433 = arith.addf %431, %432 : vector<8x128xf32>
    %434 = math.tanh %433 : vector<8x128xf32>
    %435 = arith.mulf %430, %434 : vector<8x128xf32>
    %436 = arith.negf %413 : vector<8x512xf32>
    %437 = math.exp %436 : vector<8x512xf32>
    %cst_107 = arith.constant 1.000000e+00 : f32
    %438 = vector.broadcast %cst_107 : f32 to vector<8x512xf32>
    %439 = arith.addf %438, %437 : vector<8x512xf32>
    %440 = arith.divf %438, %439 : vector<8x512xf32>
    %441 = math.tanh %413 : vector<8x512xf32>
    %442 = tpu.iota {dimensions = array<i32: 1>} : vector<8x512xi32>
    %c256_i32_108 = arith.constant 256 : i32
    %443 = vector.broadcast %c256_i32_108 : i32 to vector<8x512xi32>
    %444 = arith.cmpi sge, %442, %443 : vector<8x512xi32>
    %c384_i32_109 = arith.constant 384 : i32
    %445 = vector.broadcast %c384_i32_109 : i32 to vector<8x512xi32>
    %446 = arith.cmpi slt, %442, %445 : vector<8x512xi32>
    %447 = arith.andi %444, %446 : vector<8x512xi1>
    %448 = arith.select %447, %441, %440 : vector<8x512xi1>, vector<8x512xf32>
    %449 = vector.extract_strided_slice %448 {offsets = [0, 0], sizes = [8, 128], strides = [1, 1]} : vector<8x512xf32> to vector<8x128xf32>
    %450 = vector.extract_strided_slice %448 {offsets = [0, 128], sizes = [8, 128], strides = [1, 1]} : vector<8x512xf32> to vector<8x128xf32>
    %451 = vector.extract_strided_slice %448 {offsets = [0, 256], sizes = [8, 128], strides = [1, 1]} : vector<8x512xf32> to vector<8x128xf32>
    %452 = vector.extract_strided_slice %448 {offsets = [0, 384], sizes = [8, 128], strides = [1, 1]} : vector<8x512xf32> to vector<8x128xf32>
    %453 = arith.mulf %450, %396 : vector<8x128xf32>
    %454 = arith.mulf %449, %451 : vector<8x128xf32>
    %455 = arith.addf %453, %454 : vector<8x128xf32>
    %456 = math.tanh %455 : vector<8x128xf32>
    %457 = arith.mulf %452, %456 : vector<8x128xf32>
    %458 = vector.broadcast %c5_i32 : i32 to vector<8x1xi32>
    %459 = arith.cmpi slt, %458, %10 : vector<8x1xi32>
    %460 = vector.broadcast %397 : i32 to vector<8x1xi32>
    %461 = arith.cmpi slt, %460, %10 : vector<8x1xi32>
    %462 = vector.shape_cast %459 : vector<8x1xi1> to vector<8x1xi1>
    %463 = vector.broadcast %462 : vector<8x1xi1> to vector<8x128xi1>
    %464 = arith.select %463, %435, %387 : vector<8x128xi1>, vector<8x128xf32>
    %465 = vector.shape_cast %459 : vector<8x1xi1> to vector<8x1xi1>
    %466 = vector.broadcast %465 : vector<8x1xi1> to vector<8x128xi1>
    %467 = arith.select %466, %433, %390 : vector<8x128xi1>, vector<8x128xf32>
    %468 = vector.shape_cast %461 : vector<8x1xi1> to vector<8x1xi1>
    %469 = vector.broadcast %468 : vector<8x1xi1> to vector<8x128xi1>
    %470 = arith.select %469, %457, %393 : vector<8x128xi1>, vector<8x128xf32>
    %471 = vector.shape_cast %461 : vector<8x1xi1> to vector<8x1xi1>
    %472 = vector.broadcast %471 : vector<8x1xi1> to vector<8x128xi1>
    %473 = arith.select %472, %455, %396 : vector<8x128xi1>, vector<8x128xf32>
    %c6_i32 = arith.constant 6 : i32
    %c11_i32_110 = arith.constant 11 : i32
    %474 = arith.subi %c11_i32_110, %c6_i32 : i32
    %c8_i32_111 = arith.constant 8 : i32
    %475 = arith.muli %c6_i32, %c8_i32_111 : i32
    %476 = tpu.assume_multiple %475, 8 : i32
    %c8_i32_112 = arith.constant 8 : i32
    %477 = arith.muli %474, %c8_i32_112 : i32
    %478 = tpu.assume_multiple %477, 8 : i32
    %479 = arith.index_cast %476 : i32 to index
    %c0_113 = arith.constant 0 : index
    %480 = vector.load %arg9[%479, %c0_113] : memref<96x512xf32, #tpu.memory_space<vmem>>, vector<8x512xf32>
    %481 = arith.index_cast %478 : i32 to index
    %c0_114 = arith.constant 0 : index
    %482 = vector.load %arg10[%481, %c0_114] : memref<96x512xf32, #tpu.memory_space<vmem>>, vector<8x512xf32>
    %483 = arith.truncf %464 : vector<8x128xf32> to vector<8x128xbf16>
    %c0_115 = arith.constant 0 : index
    %c0_116 = arith.constant 0 : index
    %484 = vector.load %arg4[%c0_115, %c0_116] : memref<128x512xbf16, #tpu.memory_space<vmem>>, vector<128x512xbf16>
    %cst_117 = arith.constant dense<0.000000e+00> : vector<8x512xf32>
    %485 = tpu.matmul %483, %484, %cst_117 {dimension_numbers = #tpu.dot_dimension_numbers<[1], [0], [0], [1], [0, 0, 1, 1], [], []>} : vector<8x128xbf16>, vector<128x512xbf16>, vector<8x512xf32> -> vector<8x512xf32>
    %486 = arith.addf %480, %485 : vector<8x512xf32>
    %487 = arith.truncf %470 : vector<8x128xf32> to vector<8x128xbf16>
    %c0_118 = arith.constant 0 : index
    %c0_119 = arith.constant 0 : index
    %488 = vector.load %arg5[%c0_118, %c0_119] : memref<128x512xbf16, #tpu.memory_space<vmem>>, vector<128x512xbf16>
    %cst_120 = arith.constant dense<0.000000e+00> : vector<8x512xf32>
    %489 = tpu.matmul %487, %488, %cst_120 {dimension_numbers = #tpu.dot_dimension_numbers<[1], [0], [0], [1], [0, 0, 1, 1], [], []>} : vector<8x128xbf16>, vector<128x512xbf16>, vector<8x512xf32> -> vector<8x512xf32>
    %490 = arith.addf %482, %489 : vector<8x512xf32>
    %491 = arith.negf %486 : vector<8x512xf32>
    %492 = math.exp %491 : vector<8x512xf32>
    %cst_121 = arith.constant 1.000000e+00 : f32
    %493 = vector.broadcast %cst_121 : f32 to vector<8x512xf32>
    %494 = arith.addf %493, %492 : vector<8x512xf32>
    %495 = arith.divf %493, %494 : vector<8x512xf32>
    %496 = math.tanh %486 : vector<8x512xf32>
    %497 = tpu.iota {dimensions = array<i32: 1>} : vector<8x512xi32>
    %c256_i32_122 = arith.constant 256 : i32
    %498 = vector.broadcast %c256_i32_122 : i32 to vector<8x512xi32>
    %499 = arith.cmpi sge, %497, %498 : vector<8x512xi32>
    %c384_i32_123 = arith.constant 384 : i32
    %500 = vector.broadcast %c384_i32_123 : i32 to vector<8x512xi32>
    %501 = arith.cmpi slt, %497, %500 : vector<8x512xi32>
    %502 = arith.andi %499, %501 : vector<8x512xi1>
    %503 = arith.select %502, %496, %495 : vector<8x512xi1>, vector<8x512xf32>
    %504 = vector.extract_strided_slice %503 {offsets = [0, 0], sizes = [8, 128], strides = [1, 1]} : vector<8x512xf32> to vector<8x128xf32>
    %505 = vector.extract_strided_slice %503 {offsets = [0, 128], sizes = [8, 128], strides = [1, 1]} : vector<8x512xf32> to vector<8x128xf32>
    %506 = vector.extract_strided_slice %503 {offsets = [0, 256], sizes = [8, 128], strides = [1, 1]} : vector<8x512xf32> to vector<8x128xf32>
    %507 = vector.extract_strided_slice %503 {offsets = [0, 384], sizes = [8, 128], strides = [1, 1]} : vector<8x512xf32> to vector<8x128xf32>
    %508 = arith.mulf %505, %467 : vector<8x128xf32>
    %509 = arith.mulf %504, %506 : vector<8x128xf32>
    %510 = arith.addf %508, %509 : vector<8x128xf32>
    %511 = math.tanh %510 : vector<8x128xf32>
    %512 = arith.mulf %507, %511 : vector<8x128xf32>
    %513 = arith.negf %490 : vector<8x512xf32>
    %514 = math.exp %513 : vector<8x512xf32>
    %cst_124 = arith.constant 1.000000e+00 : f32
    %515 = vector.broadcast %cst_124 : f32 to vector<8x512xf32>
    %516 = arith.addf %515, %514 : vector<8x512xf32>
    %517 = arith.divf %515, %516 : vector<8x512xf32>
    %518 = math.tanh %490 : vector<8x512xf32>
    %519 = tpu.iota {dimensions = array<i32: 1>} : vector<8x512xi32>
    %c256_i32_125 = arith.constant 256 : i32
    %520 = vector.broadcast %c256_i32_125 : i32 to vector<8x512xi32>
    %521 = arith.cmpi sge, %519, %520 : vector<8x512xi32>
    %c384_i32_126 = arith.constant 384 : i32
    %522 = vector.broadcast %c384_i32_126 : i32 to vector<8x512xi32>
    %523 = arith.cmpi slt, %519, %522 : vector<8x512xi32>
    %524 = arith.andi %521, %523 : vector<8x512xi1>
    %525 = arith.select %524, %518, %517 : vector<8x512xi1>, vector<8x512xf32>
    %526 = vector.extract_strided_slice %525 {offsets = [0, 0], sizes = [8, 128], strides = [1, 1]} : vector<8x512xf32> to vector<8x128xf32>
    %527 = vector.extract_strided_slice %525 {offsets = [0, 128], sizes = [8, 128], strides = [1, 1]} : vector<8x512xf32> to vector<8x128xf32>
    %528 = vector.extract_strided_slice %525 {offsets = [0, 256], sizes = [8, 128], strides = [1, 1]} : vector<8x512xf32> to vector<8x128xf32>
    %529 = vector.extract_strided_slice %525 {offsets = [0, 384], sizes = [8, 128], strides = [1, 1]} : vector<8x512xf32> to vector<8x128xf32>
    %530 = arith.mulf %527, %473 : vector<8x128xf32>
    %531 = arith.mulf %526, %528 : vector<8x128xf32>
    %532 = arith.addf %530, %531 : vector<8x128xf32>
    %533 = math.tanh %532 : vector<8x128xf32>
    %534 = arith.mulf %529, %533 : vector<8x128xf32>
    %535 = vector.broadcast %c6_i32 : i32 to vector<8x1xi32>
    %536 = arith.cmpi slt, %535, %10 : vector<8x1xi32>
    %537 = vector.broadcast %474 : i32 to vector<8x1xi32>
    %538 = arith.cmpi slt, %537, %10 : vector<8x1xi32>
    %539 = vector.shape_cast %536 : vector<8x1xi1> to vector<8x1xi1>
    %540 = vector.broadcast %539 : vector<8x1xi1> to vector<8x128xi1>
    %541 = arith.select %540, %512, %464 : vector<8x128xi1>, vector<8x128xf32>
    %542 = vector.shape_cast %536 : vector<8x1xi1> to vector<8x1xi1>
    %543 = vector.broadcast %542 : vector<8x1xi1> to vector<8x128xi1>
    %544 = arith.select %543, %510, %467 : vector<8x128xi1>, vector<8x128xf32>
    %545 = vector.shape_cast %538 : vector<8x1xi1> to vector<8x1xi1>
    %546 = vector.broadcast %545 : vector<8x1xi1> to vector<8x128xi1>
    %547 = arith.select %546, %534, %470 : vector<8x128xi1>, vector<8x128xf32>
    %548 = vector.shape_cast %538 : vector<8x1xi1> to vector<8x1xi1>
    %549 = vector.broadcast %548 : vector<8x1xi1> to vector<8x128xi1>
    %550 = arith.select %549, %532, %473 : vector<8x128xi1>, vector<8x128xf32>
    %c7_i32 = arith.constant 7 : i32
    %c11_i32_127 = arith.constant 11 : i32
    %551 = arith.subi %c11_i32_127, %c7_i32 : i32
    %c8_i32_128 = arith.constant 8 : i32
    %552 = arith.muli %c7_i32, %c8_i32_128 : i32
    %553 = tpu.assume_multiple %552, 8 : i32
    %c8_i32_129 = arith.constant 8 : i32
    %554 = arith.muli %551, %c8_i32_129 : i32
    %555 = tpu.assume_multiple %554, 8 : i32
    %556 = arith.index_cast %553 : i32 to index
    %c0_130 = arith.constant 0 : index
    %557 = vector.load %arg9[%556, %c0_130] : memref<96x512xf32, #tpu.memory_space<vmem>>, vector<8x512xf32>
    %558 = arith.index_cast %555 : i32 to index
    %c0_131 = arith.constant 0 : index
    %559 = vector.load %arg10[%558, %c0_131] : memref<96x512xf32, #tpu.memory_space<vmem>>, vector<8x512xf32>
    %560 = arith.truncf %541 : vector<8x128xf32> to vector<8x128xbf16>
    %c0_132 = arith.constant 0 : index
    %c0_133 = arith.constant 0 : index
    %561 = vector.load %arg4[%c0_132, %c0_133] : memref<128x512xbf16, #tpu.memory_space<vmem>>, vector<128x512xbf16>
    %cst_134 = arith.constant dense<0.000000e+00> : vector<8x512xf32>
    %562 = tpu.matmul %560, %561, %cst_134 {dimension_numbers = #tpu.dot_dimension_numbers<[1], [0], [0], [1], [0, 0, 1, 1], [], []>} : vector<8x128xbf16>, vector<128x512xbf16>, vector<8x512xf32> -> vector<8x512xf32>
    %563 = arith.addf %557, %562 : vector<8x512xf32>
    %564 = arith.truncf %547 : vector<8x128xf32> to vector<8x128xbf16>
    %c0_135 = arith.constant 0 : index
    %c0_136 = arith.constant 0 : index
    %565 = vector.load %arg5[%c0_135, %c0_136] : memref<128x512xbf16, #tpu.memory_space<vmem>>, vector<128x512xbf16>
    %cst_137 = arith.constant dense<0.000000e+00> : vector<8x512xf32>
    %566 = tpu.matmul %564, %565, %cst_137 {dimension_numbers = #tpu.dot_dimension_numbers<[1], [0], [0], [1], [0, 0, 1, 1], [], []>} : vector<8x128xbf16>, vector<128x512xbf16>, vector<8x512xf32> -> vector<8x512xf32>
    %567 = arith.addf %559, %566 : vector<8x512xf32>
    %568 = arith.negf %563 : vector<8x512xf32>
    %569 = math.exp %568 : vector<8x512xf32>
    %cst_138 = arith.constant 1.000000e+00 : f32
    %570 = vector.broadcast %cst_138 : f32 to vector<8x512xf32>
    %571 = arith.addf %570, %569 : vector<8x512xf32>
    %572 = arith.divf %570, %571 : vector<8x512xf32>
    %573 = math.tanh %563 : vector<8x512xf32>
    %574 = tpu.iota {dimensions = array<i32: 1>} : vector<8x512xi32>
    %c256_i32_139 = arith.constant 256 : i32
    %575 = vector.broadcast %c256_i32_139 : i32 to vector<8x512xi32>
    %576 = arith.cmpi sge, %574, %575 : vector<8x512xi32>
    %c384_i32_140 = arith.constant 384 : i32
    %577 = vector.broadcast %c384_i32_140 : i32 to vector<8x512xi32>
    %578 = arith.cmpi slt, %574, %577 : vector<8x512xi32>
    %579 = arith.andi %576, %578 : vector<8x512xi1>
    %580 = arith.select %579, %573, %572 : vector<8x512xi1>, vector<8x512xf32>
    %581 = vector.extract_strided_slice %580 {offsets = [0, 0], sizes = [8, 128], strides = [1, 1]} : vector<8x512xf32> to vector<8x128xf32>
    %582 = vector.extract_strided_slice %580 {offsets = [0, 128], sizes = [8, 128], strides = [1, 1]} : vector<8x512xf32> to vector<8x128xf32>
    %583 = vector.extract_strided_slice %580 {offsets = [0, 256], sizes = [8, 128], strides = [1, 1]} : vector<8x512xf32> to vector<8x128xf32>
    %584 = vector.extract_strided_slice %580 {offsets = [0, 384], sizes = [8, 128], strides = [1, 1]} : vector<8x512xf32> to vector<8x128xf32>
    %585 = arith.mulf %582, %544 : vector<8x128xf32>
    %586 = arith.mulf %581, %583 : vector<8x128xf32>
    %587 = arith.addf %585, %586 : vector<8x128xf32>
    %588 = math.tanh %587 : vector<8x128xf32>
    %589 = arith.mulf %584, %588 : vector<8x128xf32>
    %590 = arith.negf %567 : vector<8x512xf32>
    %591 = math.exp %590 : vector<8x512xf32>
    %cst_141 = arith.constant 1.000000e+00 : f32
    %592 = vector.broadcast %cst_141 : f32 to vector<8x512xf32>
    %593 = arith.addf %592, %591 : vector<8x512xf32>
    %594 = arith.divf %592, %593 : vector<8x512xf32>
    %595 = math.tanh %567 : vector<8x512xf32>
    %596 = tpu.iota {dimensions = array<i32: 1>} : vector<8x512xi32>
    %c256_i32_142 = arith.constant 256 : i32
    %597 = vector.broadcast %c256_i32_142 : i32 to vector<8x512xi32>
    %598 = arith.cmpi sge, %596, %597 : vector<8x512xi32>
    %c384_i32_143 = arith.constant 384 : i32
    %599 = vector.broadcast %c384_i32_143 : i32 to vector<8x512xi32>
    %600 = arith.cmpi slt, %596, %599 : vector<8x512xi32>
    %601 = arith.andi %598, %600 : vector<8x512xi1>
    %602 = arith.select %601, %595, %594 : vector<8x512xi1>, vector<8x512xf32>
    %603 = vector.extract_strided_slice %602 {offsets = [0, 0], sizes = [8, 128], strides = [1, 1]} : vector<8x512xf32> to vector<8x128xf32>
    %604 = vector.extract_strided_slice %602 {offsets = [0, 128], sizes = [8, 128], strides = [1, 1]} : vector<8x512xf32> to vector<8x128xf32>
    %605 = vector.extract_strided_slice %602 {offsets = [0, 256], sizes = [8, 128], strides = [1, 1]} : vector<8x512xf32> to vector<8x128xf32>
    %606 = vector.extract_strided_slice %602 {offsets = [0, 384], sizes = [8, 128], strides = [1, 1]} : vector<8x512xf32> to vector<8x128xf32>
    %607 = arith.mulf %604, %550 : vector<8x128xf32>
    %608 = arith.mulf %603, %605 : vector<8x128xf32>
    %609 = arith.addf %607, %608 : vector<8x128xf32>
    %610 = math.tanh %609 : vector<8x128xf32>
    %611 = arith.mulf %606, %610 : vector<8x128xf32>
    %612 = vector.broadcast %c7_i32 : i32 to vector<8x1xi32>
    %613 = arith.cmpi slt, %612, %10 : vector<8x1xi32>
    %614 = vector.broadcast %551 : i32 to vector<8x1xi32>
    %615 = arith.cmpi slt, %614, %10 : vector<8x1xi32>
    %616 = vector.shape_cast %613 : vector<8x1xi1> to vector<8x1xi1>
    %617 = vector.broadcast %616 : vector<8x1xi1> to vector<8x128xi1>
    %618 = arith.select %617, %589, %541 : vector<8x128xi1>, vector<8x128xf32>
    %619 = vector.shape_cast %613 : vector<8x1xi1> to vector<8x1xi1>
    %620 = vector.broadcast %619 : vector<8x1xi1> to vector<8x128xi1>
    %621 = arith.select %620, %587, %544 : vector<8x128xi1>, vector<8x128xf32>
    %622 = vector.shape_cast %615 : vector<8x1xi1> to vector<8x1xi1>
    %623 = vector.broadcast %622 : vector<8x1xi1> to vector<8x128xi1>
    %624 = arith.select %623, %611, %547 : vector<8x128xi1>, vector<8x128xf32>
    %625 = vector.shape_cast %615 : vector<8x1xi1> to vector<8x1xi1>
    %626 = vector.broadcast %625 : vector<8x1xi1> to vector<8x128xi1>
    %627 = arith.select %626, %609, %550 : vector<8x128xi1>, vector<8x128xf32>
    %c8_i32_144 = arith.constant 8 : i32
    %c11_i32_145 = arith.constant 11 : i32
    %628 = arith.subi %c11_i32_145, %c8_i32_144 : i32
    %c8_i32_146 = arith.constant 8 : i32
    %629 = arith.muli %c8_i32_144, %c8_i32_146 : i32
    %630 = tpu.assume_multiple %629, 8 : i32
    %c8_i32_147 = arith.constant 8 : i32
    %631 = arith.muli %628, %c8_i32_147 : i32
    %632 = tpu.assume_multiple %631, 8 : i32
    %633 = arith.index_cast %630 : i32 to index
    %c0_148 = arith.constant 0 : index
    %634 = vector.load %arg9[%633, %c0_148] : memref<96x512xf32, #tpu.memory_space<vmem>>, vector<8x512xf32>
    %635 = arith.index_cast %632 : i32 to index
    %c0_149 = arith.constant 0 : index
    %636 = vector.load %arg10[%635, %c0_149] : memref<96x512xf32, #tpu.memory_space<vmem>>, vector<8x512xf32>
    %637 = arith.truncf %618 : vector<8x128xf32> to vector<8x128xbf16>
    %c0_150 = arith.constant 0 : index
    %c0_151 = arith.constant 0 : index
    %638 = vector.load %arg4[%c0_150, %c0_151] : memref<128x512xbf16, #tpu.memory_space<vmem>>, vector<128x512xbf16>
    %cst_152 = arith.constant dense<0.000000e+00> : vector<8x512xf32>
    %639 = tpu.matmul %637, %638, %cst_152 {dimension_numbers = #tpu.dot_dimension_numbers<[1], [0], [0], [1], [0, 0, 1, 1], [], []>} : vector<8x128xbf16>, vector<128x512xbf16>, vector<8x512xf32> -> vector<8x512xf32>
    %640 = arith.addf %634, %639 : vector<8x512xf32>
    %641 = arith.truncf %624 : vector<8x128xf32> to vector<8x128xbf16>
    %c0_153 = arith.constant 0 : index
    %c0_154 = arith.constant 0 : index
    %642 = vector.load %arg5[%c0_153, %c0_154] : memref<128x512xbf16, #tpu.memory_space<vmem>>, vector<128x512xbf16>
    %cst_155 = arith.constant dense<0.000000e+00> : vector<8x512xf32>
    %643 = tpu.matmul %641, %642, %cst_155 {dimension_numbers = #tpu.dot_dimension_numbers<[1], [0], [0], [1], [0, 0, 1, 1], [], []>} : vector<8x128xbf16>, vector<128x512xbf16>, vector<8x512xf32> -> vector<8x512xf32>
    %644 = arith.addf %636, %643 : vector<8x512xf32>
    %645 = arith.negf %640 : vector<8x512xf32>
    %646 = math.exp %645 : vector<8x512xf32>
    %cst_156 = arith.constant 1.000000e+00 : f32
    %647 = vector.broadcast %cst_156 : f32 to vector<8x512xf32>
    %648 = arith.addf %647, %646 : vector<8x512xf32>
    %649 = arith.divf %647, %648 : vector<8x512xf32>
    %650 = math.tanh %640 : vector<8x512xf32>
    %651 = tpu.iota {dimensions = array<i32: 1>} : vector<8x512xi32>
    %c256_i32_157 = arith.constant 256 : i32
    %652 = vector.broadcast %c256_i32_157 : i32 to vector<8x512xi32>
    %653 = arith.cmpi sge, %651, %652 : vector<8x512xi32>
    %c384_i32_158 = arith.constant 384 : i32
    %654 = vector.broadcast %c384_i32_158 : i32 to vector<8x512xi32>
    %655 = arith.cmpi slt, %651, %654 : vector<8x512xi32>
    %656 = arith.andi %653, %655 : vector<8x512xi1>
    %657 = arith.select %656, %650, %649 : vector<8x512xi1>, vector<8x512xf32>
    %658 = vector.extract_strided_slice %657 {offsets = [0, 0], sizes = [8, 128], strides = [1, 1]} : vector<8x512xf32> to vector<8x128xf32>
    %659 = vector.extract_strided_slice %657 {offsets = [0, 128], sizes = [8, 128], strides = [1, 1]} : vector<8x512xf32> to vector<8x128xf32>
    %660 = vector.extract_strided_slice %657 {offsets = [0, 256], sizes = [8, 128], strides = [1, 1]} : vector<8x512xf32> to vector<8x128xf32>
    %661 = vector.extract_strided_slice %657 {offsets = [0, 384], sizes = [8, 128], strides = [1, 1]} : vector<8x512xf32> to vector<8x128xf32>
    %662 = arith.mulf %659, %621 : vector<8x128xf32>
    %663 = arith.mulf %658, %660 : vector<8x128xf32>
    %664 = arith.addf %662, %663 : vector<8x128xf32>
    %665 = math.tanh %664 : vector<8x128xf32>
    %666 = arith.mulf %661, %665 : vector<8x128xf32>
    %667 = arith.negf %644 : vector<8x512xf32>
    %668 = math.exp %667 : vector<8x512xf32>
    %cst_159 = arith.constant 1.000000e+00 : f32
    %669 = vector.broadcast %cst_159 : f32 to vector<8x512xf32>
    %670 = arith.addf %669, %668 : vector<8x512xf32>
    %671 = arith.divf %669, %670 : vector<8x512xf32>
    %672 = math.tanh %644 : vector<8x512xf32>
    %673 = tpu.iota {dimensions = array<i32: 1>} : vector<8x512xi32>
    %c256_i32_160 = arith.constant 256 : i32
    %674 = vector.broadcast %c256_i32_160 : i32 to vector<8x512xi32>
    %675 = arith.cmpi sge, %673, %674 : vector<8x512xi32>
    %c384_i32_161 = arith.constant 384 : i32
    %676 = vector.broadcast %c384_i32_161 : i32 to vector<8x512xi32>
    %677 = arith.cmpi slt, %673, %676 : vector<8x512xi32>
    %678 = arith.andi %675, %677 : vector<8x512xi1>
    %679 = arith.select %678, %672, %671 : vector<8x512xi1>, vector<8x512xf32>
    %680 = vector.extract_strided_slice %679 {offsets = [0, 0], sizes = [8, 128], strides = [1, 1]} : vector<8x512xf32> to vector<8x128xf32>
    %681 = vector.extract_strided_slice %679 {offsets = [0, 128], sizes = [8, 128], strides = [1, 1]} : vector<8x512xf32> to vector<8x128xf32>
    %682 = vector.extract_strided_slice %679 {offsets = [0, 256], sizes = [8, 128], strides = [1, 1]} : vector<8x512xf32> to vector<8x128xf32>
    %683 = vector.extract_strided_slice %679 {offsets = [0, 384], sizes = [8, 128], strides = [1, 1]} : vector<8x512xf32> to vector<8x128xf32>
    %684 = arith.mulf %681, %627 : vector<8x128xf32>
    %685 = arith.mulf %680, %682 : vector<8x128xf32>
    %686 = arith.addf %684, %685 : vector<8x128xf32>
    %687 = math.tanh %686 : vector<8x128xf32>
    %688 = arith.mulf %683, %687 : vector<8x128xf32>
    %689 = vector.broadcast %c8_i32_144 : i32 to vector<8x1xi32>
    %690 = arith.cmpi slt, %689, %10 : vector<8x1xi32>
    %691 = vector.broadcast %628 : i32 to vector<8x1xi32>
    %692 = arith.cmpi slt, %691, %10 : vector<8x1xi32>
    %693 = vector.shape_cast %690 : vector<8x1xi1> to vector<8x1xi1>
    %694 = vector.broadcast %693 : vector<8x1xi1> to vector<8x128xi1>
    %695 = arith.select %694, %666, %618 : vector<8x128xi1>, vector<8x128xf32>
    %696 = vector.shape_cast %690 : vector<8x1xi1> to vector<8x1xi1>
    %697 = vector.broadcast %696 : vector<8x1xi1> to vector<8x128xi1>
    %698 = arith.select %697, %664, %621 : vector<8x128xi1>, vector<8x128xf32>
    %699 = vector.shape_cast %692 : vector<8x1xi1> to vector<8x1xi1>
    %700 = vector.broadcast %699 : vector<8x1xi1> to vector<8x128xi1>
    %701 = arith.select %700, %688, %624 : vector<8x128xi1>, vector<8x128xf32>
    %702 = vector.shape_cast %692 : vector<8x1xi1> to vector<8x1xi1>
    %703 = vector.broadcast %702 : vector<8x1xi1> to vector<8x128xi1>
    %704 = arith.select %703, %686, %627 : vector<8x128xi1>, vector<8x128xf32>
    %c9_i32 = arith.constant 9 : i32
    %c11_i32_162 = arith.constant 11 : i32
    %705 = arith.subi %c11_i32_162, %c9_i32 : i32
    %c8_i32_163 = arith.constant 8 : i32
    %706 = arith.muli %c9_i32, %c8_i32_163 : i32
    %707 = tpu.assume_multiple %706, 8 : i32
    %c8_i32_164 = arith.constant 8 : i32
    %708 = arith.muli %705, %c8_i32_164 : i32
    %709 = tpu.assume_multiple %708, 8 : i32
    %710 = arith.index_cast %707 : i32 to index
    %c0_165 = arith.constant 0 : index
    %711 = vector.load %arg9[%710, %c0_165] : memref<96x512xf32, #tpu.memory_space<vmem>>, vector<8x512xf32>
    %712 = arith.index_cast %709 : i32 to index
    %c0_166 = arith.constant 0 : index
    %713 = vector.load %arg10[%712, %c0_166] : memref<96x512xf32, #tpu.memory_space<vmem>>, vector<8x512xf32>
    %714 = arith.truncf %695 : vector<8x128xf32> to vector<8x128xbf16>
    %c0_167 = arith.constant 0 : index
    %c0_168 = arith.constant 0 : index
    %715 = vector.load %arg4[%c0_167, %c0_168] : memref<128x512xbf16, #tpu.memory_space<vmem>>, vector<128x512xbf16>
    %cst_169 = arith.constant dense<0.000000e+00> : vector<8x512xf32>
    %716 = tpu.matmul %714, %715, %cst_169 {dimension_numbers = #tpu.dot_dimension_numbers<[1], [0], [0], [1], [0, 0, 1, 1], [], []>} : vector<8x128xbf16>, vector<128x512xbf16>, vector<8x512xf32> -> vector<8x512xf32>
    %717 = arith.addf %711, %716 : vector<8x512xf32>
    %718 = arith.truncf %701 : vector<8x128xf32> to vector<8x128xbf16>
    %c0_170 = arith.constant 0 : index
    %c0_171 = arith.constant 0 : index
    %719 = vector.load %arg5[%c0_170, %c0_171] : memref<128x512xbf16, #tpu.memory_space<vmem>>, vector<128x512xbf16>
    %cst_172 = arith.constant dense<0.000000e+00> : vector<8x512xf32>
    %720 = tpu.matmul %718, %719, %cst_172 {dimension_numbers = #tpu.dot_dimension_numbers<[1], [0], [0], [1], [0, 0, 1, 1], [], []>} : vector<8x128xbf16>, vector<128x512xbf16>, vector<8x512xf32> -> vector<8x512xf32>
    %721 = arith.addf %713, %720 : vector<8x512xf32>
    %722 = arith.negf %717 : vector<8x512xf32>
    %723 = math.exp %722 : vector<8x512xf32>
    %cst_173 = arith.constant 1.000000e+00 : f32
    %724 = vector.broadcast %cst_173 : f32 to vector<8x512xf32>
    %725 = arith.addf %724, %723 : vector<8x512xf32>
    %726 = arith.divf %724, %725 : vector<8x512xf32>
    %727 = math.tanh %717 : vector<8x512xf32>
    %728 = tpu.iota {dimensions = array<i32: 1>} : vector<8x512xi32>
    %c256_i32_174 = arith.constant 256 : i32
    %729 = vector.broadcast %c256_i32_174 : i32 to vector<8x512xi32>
    %730 = arith.cmpi sge, %728, %729 : vector<8x512xi32>
    %c384_i32_175 = arith.constant 384 : i32
    %731 = vector.broadcast %c384_i32_175 : i32 to vector<8x512xi32>
    %732 = arith.cmpi slt, %728, %731 : vector<8x512xi32>
    %733 = arith.andi %730, %732 : vector<8x512xi1>
    %734 = arith.select %733, %727, %726 : vector<8x512xi1>, vector<8x512xf32>
    %735 = vector.extract_strided_slice %734 {offsets = [0, 0], sizes = [8, 128], strides = [1, 1]} : vector<8x512xf32> to vector<8x128xf32>
    %736 = vector.extract_strided_slice %734 {offsets = [0, 128], sizes = [8, 128], strides = [1, 1]} : vector<8x512xf32> to vector<8x128xf32>
    %737 = vector.extract_strided_slice %734 {offsets = [0, 256], sizes = [8, 128], strides = [1, 1]} : vector<8x512xf32> to vector<8x128xf32>
    %738 = vector.extract_strided_slice %734 {offsets = [0, 384], sizes = [8, 128], strides = [1, 1]} : vector<8x512xf32> to vector<8x128xf32>
    %739 = arith.mulf %736, %698 : vector<8x128xf32>
    %740 = arith.mulf %735, %737 : vector<8x128xf32>
    %741 = arith.addf %739, %740 : vector<8x128xf32>
    %742 = math.tanh %741 : vector<8x128xf32>
    %743 = arith.mulf %738, %742 : vector<8x128xf32>
    %744 = arith.negf %721 : vector<8x512xf32>
    %745 = math.exp %744 : vector<8x512xf32>
    %cst_176 = arith.constant 1.000000e+00 : f32
    %746 = vector.broadcast %cst_176 : f32 to vector<8x512xf32>
    %747 = arith.addf %746, %745 : vector<8x512xf32>
    %748 = arith.divf %746, %747 : vector<8x512xf32>
    %749 = math.tanh %721 : vector<8x512xf32>
    %750 = tpu.iota {dimensions = array<i32: 1>} : vector<8x512xi32>
    %c256_i32_177 = arith.constant 256 : i32
    %751 = vector.broadcast %c256_i32_177 : i32 to vector<8x512xi32>
    %752 = arith.cmpi sge, %750, %751 : vector<8x512xi32>
    %c384_i32_178 = arith.constant 384 : i32
    %753 = vector.broadcast %c384_i32_178 : i32 to vector<8x512xi32>
    %754 = arith.cmpi slt, %750, %753 : vector<8x512xi32>
    %755 = arith.andi %752, %754 : vector<8x512xi1>
    %756 = arith.select %755, %749, %748 : vector<8x512xi1>, vector<8x512xf32>
    %757 = vector.extract_strided_slice %756 {offsets = [0, 0], sizes = [8, 128], strides = [1, 1]} : vector<8x512xf32> to vector<8x128xf32>
    %758 = vector.extract_strided_slice %756 {offsets = [0, 128], sizes = [8, 128], strides = [1, 1]} : vector<8x512xf32> to vector<8x128xf32>
    %759 = vector.extract_strided_slice %756 {offsets = [0, 256], sizes = [8, 128], strides = [1, 1]} : vector<8x512xf32> to vector<8x128xf32>
    %760 = vector.extract_strided_slice %756 {offsets = [0, 384], sizes = [8, 128], strides = [1, 1]} : vector<8x512xf32> to vector<8x128xf32>
    %761 = arith.mulf %758, %704 : vector<8x128xf32>
    %762 = arith.mulf %757, %759 : vector<8x128xf32>
    %763 = arith.addf %761, %762 : vector<8x128xf32>
    %764 = math.tanh %763 : vector<8x128xf32>
    %765 = arith.mulf %760, %764 : vector<8x128xf32>
    %766 = vector.broadcast %c9_i32 : i32 to vector<8x1xi32>
    %767 = arith.cmpi slt, %766, %10 : vector<8x1xi32>
    %768 = vector.broadcast %705 : i32 to vector<8x1xi32>
    %769 = arith.cmpi slt, %768, %10 : vector<8x1xi32>
    %770 = vector.shape_cast %767 : vector<8x1xi1> to vector<8x1xi1>
    %771 = vector.broadcast %770 : vector<8x1xi1> to vector<8x128xi1>
    %772 = arith.select %771, %743, %695 : vector<8x128xi1>, vector<8x128xf32>
    %773 = vector.shape_cast %767 : vector<8x1xi1> to vector<8x1xi1>
    %774 = vector.broadcast %773 : vector<8x1xi1> to vector<8x128xi1>
    %775 = arith.select %774, %741, %698 : vector<8x128xi1>, vector<8x128xf32>
    %776 = vector.shape_cast %769 : vector<8x1xi1> to vector<8x1xi1>
    %777 = vector.broadcast %776 : vector<8x1xi1> to vector<8x128xi1>
    %778 = arith.select %777, %765, %701 : vector<8x128xi1>, vector<8x128xf32>
    %779 = vector.shape_cast %769 : vector<8x1xi1> to vector<8x1xi1>
    %780 = vector.broadcast %779 : vector<8x1xi1> to vector<8x128xi1>
    %781 = arith.select %780, %763, %704 : vector<8x128xi1>, vector<8x128xf32>
    %c10_i32 = arith.constant 10 : i32
    %c11_i32_179 = arith.constant 11 : i32
    %782 = arith.subi %c11_i32_179, %c10_i32 : i32
    %c8_i32_180 = arith.constant 8 : i32
    %783 = arith.muli %c10_i32, %c8_i32_180 : i32
    %784 = tpu.assume_multiple %783, 8 : i32
    %c8_i32_181 = arith.constant 8 : i32
    %785 = arith.muli %782, %c8_i32_181 : i32
    %786 = tpu.assume_multiple %785, 8 : i32
    %787 = arith.index_cast %784 : i32 to index
    %c0_182 = arith.constant 0 : index
    %788 = vector.load %arg9[%787, %c0_182] : memref<96x512xf32, #tpu.memory_space<vmem>>, vector<8x512xf32>
    %789 = arith.index_cast %786 : i32 to index
    %c0_183 = arith.constant 0 : index
    %790 = vector.load %arg10[%789, %c0_183] : memref<96x512xf32, #tpu.memory_space<vmem>>, vector<8x512xf32>
    %791 = arith.truncf %772 : vector<8x128xf32> to vector<8x128xbf16>
    %c0_184 = arith.constant 0 : index
    %c0_185 = arith.constant 0 : index
    %792 = vector.load %arg4[%c0_184, %c0_185] : memref<128x512xbf16, #tpu.memory_space<vmem>>, vector<128x512xbf16>
    %cst_186 = arith.constant dense<0.000000e+00> : vector<8x512xf32>
    %793 = tpu.matmul %791, %792, %cst_186 {dimension_numbers = #tpu.dot_dimension_numbers<[1], [0], [0], [1], [0, 0, 1, 1], [], []>} : vector<8x128xbf16>, vector<128x512xbf16>, vector<8x512xf32> -> vector<8x512xf32>
    %794 = arith.addf %788, %793 : vector<8x512xf32>
    %795 = arith.truncf %778 : vector<8x128xf32> to vector<8x128xbf16>
    %c0_187 = arith.constant 0 : index
    %c0_188 = arith.constant 0 : index
    %796 = vector.load %arg5[%c0_187, %c0_188] : memref<128x512xbf16, #tpu.memory_space<vmem>>, vector<128x512xbf16>
    %cst_189 = arith.constant dense<0.000000e+00> : vector<8x512xf32>
    %797 = tpu.matmul %795, %796, %cst_189 {dimension_numbers = #tpu.dot_dimension_numbers<[1], [0], [0], [1], [0, 0, 1, 1], [], []>} : vector<8x128xbf16>, vector<128x512xbf16>, vector<8x512xf32> -> vector<8x512xf32>
    %798 = arith.addf %790, %797 : vector<8x512xf32>
    %799 = arith.negf %794 : vector<8x512xf32>
    %800 = math.exp %799 : vector<8x512xf32>
    %cst_190 = arith.constant 1.000000e+00 : f32
    %801 = vector.broadcast %cst_190 : f32 to vector<8x512xf32>
    %802 = arith.addf %801, %800 : vector<8x512xf32>
    %803 = arith.divf %801, %802 : vector<8x512xf32>
    %804 = math.tanh %794 : vector<8x512xf32>
    %805 = tpu.iota {dimensions = array<i32: 1>} : vector<8x512xi32>
    %c256_i32_191 = arith.constant 256 : i32
    %806 = vector.broadcast %c256_i32_191 : i32 to vector<8x512xi32>
    %807 = arith.cmpi sge, %805, %806 : vector<8x512xi32>
    %c384_i32_192 = arith.constant 384 : i32
    %808 = vector.broadcast %c384_i32_192 : i32 to vector<8x512xi32>
    %809 = arith.cmpi slt, %805, %808 : vector<8x512xi32>
    %810 = arith.andi %807, %809 : vector<8x512xi1>
    %811 = arith.select %810, %804, %803 : vector<8x512xi1>, vector<8x512xf32>
    %812 = vector.extract_strided_slice %811 {offsets = [0, 0], sizes = [8, 128], strides = [1, 1]} : vector<8x512xf32> to vector<8x128xf32>
    %813 = vector.extract_strided_slice %811 {offsets = [0, 128], sizes = [8, 128], strides = [1, 1]} : vector<8x512xf32> to vector<8x128xf32>
    %814 = vector.extract_strided_slice %811 {offsets = [0, 256], sizes = [8, 128], strides = [1, 1]} : vector<8x512xf32> to vector<8x128xf32>
    %815 = vector.extract_strided_slice %811 {offsets = [0, 384], sizes = [8, 128], strides = [1, 1]} : vector<8x512xf32> to vector<8x128xf32>
    %816 = arith.mulf %813, %775 : vector<8x128xf32>
    %817 = arith.mulf %812, %814 : vector<8x128xf32>
    %818 = arith.addf %816, %817 : vector<8x128xf32>
    %819 = math.tanh %818 : vector<8x128xf32>
    %820 = arith.mulf %815, %819 : vector<8x128xf32>
    %821 = arith.negf %798 : vector<8x512xf32>
    %822 = math.exp %821 : vector<8x512xf32>
    %cst_193 = arith.constant 1.000000e+00 : f32
    %823 = vector.broadcast %cst_193 : f32 to vector<8x512xf32>
    %824 = arith.addf %823, %822 : vector<8x512xf32>
    %825 = arith.divf %823, %824 : vector<8x512xf32>
    %826 = math.tanh %798 : vector<8x512xf32>
    %827 = tpu.iota {dimensions = array<i32: 1>} : vector<8x512xi32>
    %c256_i32_194 = arith.constant 256 : i32
    %828 = vector.broadcast %c256_i32_194 : i32 to vector<8x512xi32>
    %829 = arith.cmpi sge, %827, %828 : vector<8x512xi32>
    %c384_i32_195 = arith.constant 384 : i32
    %830 = vector.broadcast %c384_i32_195 : i32 to vector<8x512xi32>
    %831 = arith.cmpi slt, %827, %830 : vector<8x512xi32>
    %832 = arith.andi %829, %831 : vector<8x512xi1>
    %833 = arith.select %832, %826, %825 : vector<8x512xi1>, vector<8x512xf32>
    %834 = vector.extract_strided_slice %833 {offsets = [0, 0], sizes = [8, 128], strides = [1, 1]} : vector<8x512xf32> to vector<8x128xf32>
    %835 = vector.extract_strided_slice %833 {offsets = [0, 128], sizes = [8, 128], strides = [1, 1]} : vector<8x512xf32> to vector<8x128xf32>
    %836 = vector.extract_strided_slice %833 {offsets = [0, 256], sizes = [8, 128], strides = [1, 1]} : vector<8x512xf32> to vector<8x128xf32>
    %837 = vector.extract_strided_slice %833 {offsets = [0, 384], sizes = [8, 128], strides = [1, 1]} : vector<8x512xf32> to vector<8x128xf32>
    %838 = arith.mulf %835, %781 : vector<8x128xf32>
    %839 = arith.mulf %834, %836 : vector<8x128xf32>
    %840 = arith.addf %838, %839 : vector<8x128xf32>
    %841 = math.tanh %840 : vector<8x128xf32>
    %842 = arith.mulf %837, %841 : vector<8x128xf32>
    %843 = vector.broadcast %c10_i32 : i32 to vector<8x1xi32>
    %844 = arith.cmpi slt, %843, %10 : vector<8x1xi32>
    %845 = vector.broadcast %782 : i32 to vector<8x1xi32>
    %846 = arith.cmpi slt, %845, %10 : vector<8x1xi32>
    %847 = vector.shape_cast %844 : vector<8x1xi1> to vector<8x1xi1>
    %848 = vector.broadcast %847 : vector<8x1xi1> to vector<8x128xi1>
    %849 = arith.select %848, %820, %772 : vector<8x128xi1>, vector<8x128xf32>
    %850 = vector.shape_cast %844 : vector<8x1xi1> to vector<8x1xi1>
    %851 = vector.broadcast %850 : vector<8x1xi1> to vector<8x128xi1>
    %852 = arith.select %851, %818, %775 : vector<8x128xi1>, vector<8x128xf32>
    %853 = vector.shape_cast %846 : vector<8x1xi1> to vector<8x1xi1>
    %854 = vector.broadcast %853 : vector<8x1xi1> to vector<8x128xi1>
    %855 = arith.select %854, %842, %778 : vector<8x128xi1>, vector<8x128xf32>
    %856 = vector.shape_cast %846 : vector<8x1xi1> to vector<8x1xi1>
    %857 = vector.broadcast %856 : vector<8x1xi1> to vector<8x128xi1>
    %858 = arith.select %857, %840, %781 : vector<8x128xi1>, vector<8x128xf32>
    %c11_i32_196 = arith.constant 11 : i32
    %c11_i32_197 = arith.constant 11 : i32
    %859 = arith.subi %c11_i32_197, %c11_i32_196 : i32
    %c8_i32_198 = arith.constant 8 : i32
    %860 = arith.muli %c11_i32_196, %c8_i32_198 : i32
    %861 = tpu.assume_multiple %860, 8 : i32
    %c8_i32_199 = arith.constant 8 : i32
    %862 = arith.muli %859, %c8_i32_199 : i32
    %863 = tpu.assume_multiple %862, 8 : i32
    %864 = arith.index_cast %861 : i32 to index
    %c0_200 = arith.constant 0 : index
    %865 = vector.load %arg9[%864, %c0_200] : memref<96x512xf32, #tpu.memory_space<vmem>>, vector<8x512xf32>
    %866 = arith.index_cast %863 : i32 to index
    %c0_201 = arith.constant 0 : index
    %867 = vector.load %arg10[%866, %c0_201] : memref<96x512xf32, #tpu.memory_space<vmem>>, vector<8x512xf32>
    %868 = arith.truncf %849 : vector<8x128xf32> to vector<8x128xbf16>
    %c0_202 = arith.constant 0 : index
    %c0_203 = arith.constant 0 : index
    %869 = vector.load %arg4[%c0_202, %c0_203] : memref<128x512xbf16, #tpu.memory_space<vmem>>, vector<128x512xbf16>
    %cst_204 = arith.constant dense<0.000000e+00> : vector<8x512xf32>
    %870 = tpu.matmul %868, %869, %cst_204 {dimension_numbers = #tpu.dot_dimension_numbers<[1], [0], [0], [1], [0, 0, 1, 1], [], []>} : vector<8x128xbf16>, vector<128x512xbf16>, vector<8x512xf32> -> vector<8x512xf32>
    %871 = arith.addf %865, %870 : vector<8x512xf32>
    %872 = arith.truncf %855 : vector<8x128xf32> to vector<8x128xbf16>
    %c0_205 = arith.constant 0 : index
    %c0_206 = arith.constant 0 : index
    %873 = vector.load %arg5[%c0_205, %c0_206] : memref<128x512xbf16, #tpu.memory_space<vmem>>, vector<128x512xbf16>
    %cst_207 = arith.constant dense<0.000000e+00> : vector<8x512xf32>
    %874 = tpu.matmul %872, %873, %cst_207 {dimension_numbers = #tpu.dot_dimension_numbers<[1], [0], [0], [1], [0, 0, 1, 1], [], []>} : vector<8x128xbf16>, vector<128x512xbf16>, vector<8x512xf32> -> vector<8x512xf32>
    %875 = arith.addf %867, %874 : vector<8x512xf32>
    %876 = arith.negf %871 : vector<8x512xf32>
    %877 = math.exp %876 : vector<8x512xf32>
    %cst_208 = arith.constant 1.000000e+00 : f32
    %878 = vector.broadcast %cst_208 : f32 to vector<8x512xf32>
    %879 = arith.addf %878, %877 : vector<8x512xf32>
    %880 = arith.divf %878, %879 : vector<8x512xf32>
    %881 = math.tanh %871 : vector<8x512xf32>
    %882 = tpu.iota {dimensions = array<i32: 1>} : vector<8x512xi32>
    %c256_i32_209 = arith.constant 256 : i32
    %883 = vector.broadcast %c256_i32_209 : i32 to vector<8x512xi32>
    %884 = arith.cmpi sge, %882, %883 : vector<8x512xi32>
    %c384_i32_210 = arith.constant 384 : i32
    %885 = vector.broadcast %c384_i32_210 : i32 to vector<8x512xi32>
    %886 = arith.cmpi slt, %882, %885 : vector<8x512xi32>
    %887 = arith.andi %884, %886 : vector<8x512xi1>
    %888 = arith.select %887, %881, %880 : vector<8x512xi1>, vector<8x512xf32>
    %889 = vector.extract_strided_slice %888 {offsets = [0, 0], sizes = [8, 128], strides = [1, 1]} : vector<8x512xf32> to vector<8x128xf32>
    %890 = vector.extract_strided_slice %888 {offsets = [0, 128], sizes = [8, 128], strides = [1, 1]} : vector<8x512xf32> to vector<8x128xf32>
    %891 = vector.extract_strided_slice %888 {offsets = [0, 256], sizes = [8, 128], strides = [1, 1]} : vector<8x512xf32> to vector<8x128xf32>
    %892 = vector.extract_strided_slice %888 {offsets = [0, 384], sizes = [8, 128], strides = [1, 1]} : vector<8x512xf32> to vector<8x128xf32>
    %893 = arith.mulf %890, %852 : vector<8x128xf32>
    %894 = arith.mulf %889, %891 : vector<8x128xf32>
    %895 = arith.addf %893, %894 : vector<8x128xf32>
    %896 = math.tanh %895 : vector<8x128xf32>
    %897 = arith.mulf %892, %896 : vector<8x128xf32>
    %898 = arith.negf %875 : vector<8x512xf32>
    %899 = math.exp %898 : vector<8x512xf32>
    %cst_211 = arith.constant 1.000000e+00 : f32
    %900 = vector.broadcast %cst_211 : f32 to vector<8x512xf32>
    %901 = arith.addf %900, %899 : vector<8x512xf32>
    %902 = arith.divf %900, %901 : vector<8x512xf32>
    %903 = math.tanh %875 : vector<8x512xf32>
    %904 = tpu.iota {dimensions = array<i32: 1>} : vector<8x512xi32>
    %c256_i32_212 = arith.constant 256 : i32
    %905 = vector.broadcast %c256_i32_212 : i32 to vector<8x512xi32>
    %906 = arith.cmpi sge, %904, %905 : vector<8x512xi32>
    %c384_i32_213 = arith.constant 384 : i32
    %907 = vector.broadcast %c384_i32_213 : i32 to vector<8x512xi32>
    %908 = arith.cmpi slt, %904, %907 : vector<8x512xi32>
    %909 = arith.andi %906, %908 : vector<8x512xi1>
    %910 = arith.select %909, %903, %902 : vector<8x512xi1>, vector<8x512xf32>
    %911 = vector.extract_strided_slice %910 {offsets = [0, 0], sizes = [8, 128], strides = [1, 1]} : vector<8x512xf32> to vector<8x128xf32>
    %912 = vector.extract_strided_slice %910 {offsets = [0, 128], sizes = [8, 128], strides = [1, 1]} : vector<8x512xf32> to vector<8x128xf32>
    %913 = vector.extract_strided_slice %910 {offsets = [0, 256], sizes = [8, 128], strides = [1, 1]} : vector<8x512xf32> to vector<8x128xf32>
    %914 = vector.extract_strided_slice %910 {offsets = [0, 384], sizes = [8, 128], strides = [1, 1]} : vector<8x512xf32> to vector<8x128xf32>
    %915 = arith.mulf %912, %858 : vector<8x128xf32>
    %916 = arith.mulf %911, %913 : vector<8x128xf32>
    %917 = arith.addf %915, %916 : vector<8x128xf32>
    %918 = math.tanh %917 : vector<8x128xf32>
    %919 = arith.mulf %914, %918 : vector<8x128xf32>
    %920 = vector.broadcast %c11_i32_196 : i32 to vector<8x1xi32>
    %921 = arith.cmpi slt, %920, %10 : vector<8x1xi32>
    %922 = vector.broadcast %859 : i32 to vector<8x1xi32>
    %923 = arith.cmpi slt, %922, %10 : vector<8x1xi32>
    %924 = vector.shape_cast %921 : vector<8x1xi1> to vector<8x1xi1>
    %925 = vector.broadcast %924 : vector<8x1xi1> to vector<8x128xi1>
    %926 = arith.select %925, %897, %849 : vector<8x128xi1>, vector<8x128xf32>
    %927 = vector.shape_cast %921 : vector<8x1xi1> to vector<8x1xi1>
    %928 = vector.broadcast %927 : vector<8x1xi1> to vector<8x128xi1>
    %929 = arith.select %928, %895, %852 : vector<8x128xi1>, vector<8x128xf32>
    %930 = vector.shape_cast %923 : vector<8x1xi1> to vector<8x1xi1>
    %931 = vector.broadcast %930 : vector<8x1xi1> to vector<8x128xi1>
    %932 = arith.select %931, %919, %855 : vector<8x128xi1>, vector<8x128xf32>
    %933 = vector.shape_cast %923 : vector<8x1xi1> to vector<8x1xi1>
    %934 = vector.broadcast %933 : vector<8x1xi1> to vector<8x128xi1>
    %935 = arith.select %934, %917, %858 : vector<8x128xi1>, vector<8x128xf32>
    %c12_i32 = arith.constant 12 : i32
    %936 = tpu.concatenate %926, %932 in 1 : vector<8x128xf32>, vector<8x128xf32> -> vector<8x256xf32>
    %937 = arith.truncf %936 : vector<8x256xf32> to vector<8x256xbf16>
    %c0_214 = arith.constant 0 : index
    %c0_215 = arith.constant 0 : index
    %938 = vector.load %arg6[%c0_214, %c0_215] : memref<256x4xbf16, #tpu.memory_space<vmem>>, vector<256x4xbf16>
    %cst_216 = arith.constant dense<0.000000e+00> : vector<8x4xf32>
    %939 = tpu.matmul %937, %938, %cst_216 {dimension_numbers = #tpu.dot_dimension_numbers<[1], [0], [0], [1], [0, 0, 1, 1], [], []>} : vector<8x256xbf16>, vector<256x4xbf16>, vector<8x4xf32> -> vector<8x4xf32>
    %c0_217 = arith.constant 0 : index
    %c0_218 = arith.constant 0 : index
    %940 = vector.load %arg7[%c0_217, %c0_218] : memref<1x4xf32, #tpu.memory_space<vmem>>, vector<1x4xf32>
    %941 = vector.broadcast %940 : vector<1x4xf32> to vector<8x4xf32>
    %942 = arith.addf %939, %941 : vector<8x4xf32>
    %c0_219 = arith.constant 0 : index
    %c0_220 = arith.constant 0 : index
    %943 = vector.load %arg8[%c0_219, %c0_220] : memref<8x4xf32, #tpu.memory_space<vmem>>, vector<8x4xf32>
    tpu.vector_store %arg8[%c0_219, %c0_220], %942 {strides = array<i32>} : memref<8x4xf32, #tpu.memory_space<vmem>>, vector<8x4xf32>,
    return
  }
}

</mosaic_0001>

<bundles_post_ra>
// kernel: tpu_custom_call.1
= control target key start
LH: loop header
LB: loop body
LE: loop exit
PB: predicated region body
PF: predicated region fallthrough
CT: control target
= control target key end

     0   :  { %13 = vsyncpa [#allocation5], 0  ;;  %s8253_s0 = inlined_call_operand.vmem [shape: bf16[96,128], index: 0, kind: input, shape index: {}]   ;;  %s8254_s1 = inlined_call_operand.vmem [shape: s32[8,1], index: 1, kind: input, shape index: {}]   ;;  %s8255_s2 = inlined_call_operand.hbm [shape: bf16[128,1024], index: 2, kind: input, shape index: {}]   ;;  %s8256_s3 = inlined_call_operand.vmem [shape: f32[1,1024], index: 3, kind: input, shape index: {}]   ;;  %s8257_s4 = inlined_call_operand.hbm [shape: bf16[128,512], index: 4, kind: input, shape index: {}]   ;;  %s8258_s5 = inlined_call_operand.hbm [shape: bf16[128,512], index: 5, kind: input, shape index: {}]   ;;  %s8259_s6 = inlined_call_operand.vmem [shape: bf16[256,4], index: 6, kind: input, shape index: {}]   ;;  %s8260_s7 = inlined_call_operand.vmem [shape: f32[1,4], index: 7, kind: input, shape index: {}]   ;;  %s8261_s8 = inlined_call_operand.vmem [shape: f32[8,4], index: 8, kind: output, shape index: {}]  }
   0x1   :  { %14 = vsyncpa [#allocation7], 0  ;;  %s5925_s27 = smov [#allocation6]   ;;  %s5855_s9 = scalar_lea.hbm %s8257_s4, 4096 }
   0x2   :  { %s38_s28 = sshll.u32 %s5925_s27, 4  ;;  %p5856_p0 = scmp.ne.s32.totalorder %s8257_s4, %s5855_s9  ;;  %s39_s28 = int_to_ptr.vmem [resolvable:$true] %s38_s28 }
   0x3   :  { %p5859_p1 = scmp.lt.u32.totalorder %s5855_s9, %s8257_s4 }
   0x5   :  { %p5861_p2 = pnand %p5859_p1, %p5856_p0 }
   0x7   :  { %5864 = shalt.err (!%p5861_p2)
}
   0x8   :  { %s5865_s14 = scalar_lea.vmem %s39_s28, 4096  ;;  %p5870_p4 = scmp.lt.s32.totalorder %s39_s28, %s39_s28 }
   0x9   :  { %p5866_p3 = scmp.ne.s32.totalorder %s39_s28, %s5865_s14  ;;  %p5871_p5 = scmp.lt.s32.totalorder %s5865_s14, %s5865_s14 }
   0xb   :  { %p5872_p6 = por %p5871_p5, %p5870_p4 }
   0xd   :  { %p5873_p7 = pnand %p5872_p6, %p5866_p3 }
   0xf   :  { %5876 = shalt.err (!%p5873_p7)
}
  0x10   :  { %s5926_s15 = smov 256   ;;  %s5927_s16 = smov 16  }
  0x11   :  { %44 = dma.hbm_to_vmem [thread:$0]  %s8257_s4, 4096, %s39_s28, [#allocation7], %s5926_s15, %s5926_s15, %s5927_s16  }
  0x12   :  { %s5928_s19 = smov [#allocation4]   ;;  %s5877_s23 = scalar_lea.hbm %s8255_s2, 8192 }
  0x13   :  { %s24_s20 = sshll.u32 %s5928_s19, 4  ;;  %p5878_p8 = scmp.ne.s32.totalorder %s8255_s2, %s5877_s23  ;;  %s25_s20 = int_to_ptr.vmem [resolvable:$true] %s24_s20 }
  0x14   :  { %p5881_p9 = scmp.lt.u32.totalorder %s5877_s23, %s8255_s2 }
  0x16   :  { %p5883_p10 = pnand %p5881_p9, %p5878_p8 }
  0x18   :  { %5886 = shalt.err (!%p5883_p10)
}
  0x19   :  { %s5887_s29 = scalar_lea.vmem %s25_s20, 8192  ;;  %p5892_p12 = scmp.lt.s32.totalorder %s25_s20, %s25_s20 }
  0x1a   :  { %p5888_p11 = scmp.ne.s32.totalorder %s25_s20, %s5887_s29  ;;  %p5893_p13 = scmp.lt.s32.totalorder %s5887_s29, %s5887_s29 }
  0x1c   :  { %p5894_p0 = por %p5893_p13, %p5892_p12 }
  0x1e   :  { %p5895_p1 = pnand %p5894_p0, %p5888_p11 }
  0x20   :  { %5898 = shalt.err (!%p5895_p1)
}
  0x21   :  { %s5929_s4 = smov 512   ;;  %s5930_s28 = smov 32  }
  0x22   :  { %30 = dma.hbm_to_vmem [thread:$0]  %s8255_s2, 8192, %s25_s20, [#allocation5], %s5929_s4, %s5929_s4, %s5930_s28  }
  0x23   :  { %s5931_s10 = smov [#allocation8]   ;;  %s5899_s14 = scalar_lea.hbm %s8258_s5, 4096 }
  0x24   :  { %s50_s11 = sshll.u32 %s5931_s10, 4  ;;  %p5900_p2 = scmp.ne.s32.totalorder %s8258_s5, %s5899_s14  ;;  %s51_s11 = int_to_ptr.vmem [resolvable:$true] %s50_s11 }
  0x25   :  { %p5903_p3 = scmp.lt.u32.totalorder %s5899_s14, %s8258_s5 }
  0x27   :  { %p5905_p4 = pnand %p5903_p3, %p5900_p2 }
  0x29   :  { %5908 = shalt.err (!%p5905_p4)
}
  0x2a   :  { %s5909_s22 = scalar_lea.vmem %s51_s11, 4096  ;;  %p5914_p6 = scmp.lt.s32.totalorder %s51_s11, %s51_s11 }
  0x2b   :  { %p5910_p5 = scmp.ne.s32.totalorder %s51_s11, %s5909_s22  ;;  %p5915_p7 = scmp.lt.s32.totalorder %s5909_s22, %s5909_s22 }
  0x2d   :  { %p5916_p8 = por %p5915_p7, %p5914_p6 }
  0x2f   :  { %p5917_p9 = pnand %p5916_p8, %p5910_p5 }
  0x31   :  { %5920 = shalt.err (!%p5917_p9)
}
  0x32   :  { %56 = dma.hbm_to_vmem [thread:$0]  %s8258_s5, 4096, %s51_s11, [#allocation7], %s5926_s15, %s5926_s15, %s5927_s16  }
  0x33   :  { %5921 = dma.done.wait [#allocation5], 8192  }
  0x34   :  { %5922 = vsyncadd [#allocation5], 4294959104 }
  0x35   :  { %5923 = dma.done.wait [#allocation7], 8192  }
  0x36   :  { %5924 = vsyncadd [#allocation7], 4294959104  ;;  %v8262_v0 = vmov 0   ;;  %v83_v1 = vld [vmem:[#allocation4] sm:$0xff]  ;;  %v84_v3 = vld [vmem:[#allocation4 + $0x8] sm:$0xff] }
  0x37   :  { %577 = vmatprep.mubr.bf16.mxu0 %v8262_v0  ;;  %670 = vmatprep.mubr.bf16.mxu1 %v8262_v0  ;;  %v87_v2 = vld [vmem:[#allocation4 + $0x20] sm:$0xff]  ;;  %v88_v5 = vld [vmem:[#allocation4 + $0x28] sm:$0xff]  ;;  %v85_v63 = vld [vmem:[#allocation4 + $0x10] sm:$0xff] }
  0x38   :  { %5159 = vset.pattern.permute.xlu0 %v8262_v0  ;;  %5160 = vset.pattern.permute.xlu1 %v8262_v0  ;;  %v4877_v4 = vcombine.high %v83_v1, %v87_v2  ;;  %v4876_v6 = vcombine.low %v83_v1, %v87_v2  ;;  %v91_v7 = vld [vmem:[#allocation4 + $0x40] sm:$0xff]  ;;  %v4879_v9 = vcombine.high %v84_v3, %v88_v5  ;;  %v92_v12 = vld [vmem:[#allocation4 + $0x48] sm:$0xff]  ;;  %v89_v1 = vld [vmem:[#allocation4 + $0x30] sm:$0xff] }
  0x39   :  { %v95_v8 = vld [vmem:[#allocation4 + $0x60] sm:$0xff]  ;;  %v4878_v10 = vcombine.low %v84_v3, %v88_v5  ;;  %v96_v13 = vld [vmem:[#allocation4 + $0x68] sm:$0xff]  ;;  %v86_v2 = vld [vmem:[#allocation4 + $0x18] sm:$0xff] }
  0x3a   :  { %v4885_v11 = vcombine.high %v91_v7, %v95_v8  ;;  %v99_v14 = vld [vmem:[#allocation4 + $0x80] sm:$0xff]  ;;  %545 = vmatprep.subr.bf16.mxu0 %v4877_v4  ;;  %v4887_v15 = vcombine.high %v92_v12, %v96_v13  ;;  %v100_v17 = vld [vmem:[#allocation4 + $0x88] sm:$0xff]  ;;  %638 = vmatprep.subr.bf16.mxu1 %v4879_v9  ;;  %v4884_v19 = vcombine.low %v91_v7, %v95_v8  ;;  %v90_v3 = vld [vmem:[#allocation4 + $0x38] sm:$0xff] }
  0x3b   :  { %v103_v16 = vld [vmem:[#allocation4 + $0xa0] sm:$0xff]  ;;  %v104_v18 = vld [vmem:[#allocation4 + $0xa8] sm:$0xff]  ;;  %546 = vmatpush1.bf16.msra.mxu0 %v4876_v6  ;;  %639 = vmatpush1.bf16.msra.mxu1 %v4878_v10  ;;  %v4886_v20 = vcombine.low %v92_v12, %v96_v13  ;;  %v4881_v6 = vcombine.high %v85_v63, %v89_v1  ;;  %v93_v7 = vld [vmem:[#allocation4 + $0x50] sm:$0xff]  ;;  %v4883_v9 = vcombine.high %v86_v2, %v90_v3 }
  0x3c   :  { %547 = vmatprep.subr.bf16.mxu0 %v4885_v11  ;;  %v4893_v21 = vcombine.high %v99_v14, %v103_v16  ;;  %640 = vmatprep.subr.bf16.mxu1 %v4887_v15  ;;  %v4895_v22 = vcombine.high %v100_v17, %v104_v18  ;;  %v107_v23 = vld [vmem:[#allocation4 + $0xc0] sm:$0xff]  ;;  %v108_v25 = vld [vmem:[#allocation4 + $0xc8] sm:$0xff]  ;;  %v4892_v27 = vcombine.low %v99_v14, %v103_v16  ;;  %v97_v8 = vld [vmem:[#allocation4 + $0x70] sm:$0xff] }
  0x3d   :  { %v111_v24 = vld [vmem:[#allocation4 + $0xe0] sm:$0xff]  ;;  %v112_v26 = vld [vmem:[#allocation4 + $0xe8] sm:$0xff]  ;;  %v4894_v28 = vcombine.low %v100_v17, %v104_v18  ;;  %v4880_v11 = vcombine.low %v85_v63, %v89_v1  ;;  %v94_v12 = vld [vmem:[#allocation4 + $0x58] sm:$0xff]  ;;  %v4889_v14 = vcombine.high %v93_v7, %v97_v8  ;;  %v4882_v17 = vcombine.low %v86_v2, %v90_v3 }
  0x3e   :  { %v4901_v29 = vcombine.high %v107_v23, %v111_v24  ;;  %v4903_v30 = vcombine.high %v108_v25, %v112_v26  ;;  %v115_v31 = vld [vmem:[#allocation4 + $0x100] sm:$0xff]  ;;  %v116_v33 = vld [vmem:[#allocation4 + $0x108] sm:$0xff]  ;;  %v4900_v35 = vcombine.low %v107_v23, %v111_v24  ;;  %v4902_v36 = vcombine.low %v108_v25, %v112_v26  ;;  %v98_v13 = vld [vmem:[#allocation4 + $0x78] sm:$0xff] }
  0x3f   :  { %548 = vmatpush1.bf16.msra.mxu0 %v4884_v19  ;;  %641 = vmatpush1.bf16.msra.mxu1 %v4886_v20  ;;  %v119_v32 = vld [vmem:[#allocation4 + $0x120] sm:$0xff]  ;;  %v120_v34 = vld [vmem:[#allocation4 + $0x128] sm:$0xff]  ;;  %v101_v15 = vld [vmem:[#allocation4 + $0x90] sm:$0xff]  ;;  %v4891_v18 = vcombine.high %v94_v12, %v98_v13  ;;  %v4888_v20 = vcombine.low %v93_v7, %v97_v8  ;;  %v4890_v25 = vcombine.low %v94_v12, %v98_v13 }
  0x40   :  { %549 = vmatprep.subr.bf16.mxu0 %v4893_v21  ;;  %642 = vmatprep.subr.bf16.mxu1 %v4895_v22  ;;  %v4909_v37 = vcombine.high %v115_v31, %v119_v32  ;;  %v4911_v38 = vcombine.high %v116_v33, %v120_v34  ;;  %v123_v39 = vld [vmem:[#allocation4 + $0x140] sm:$0xff]  ;;  %v124_v41 = vld [vmem:[#allocation4 + $0x148] sm:$0xff]  ;;  %v4908_v43 = vcombine.low %v115_v31, %v119_v32  ;;  %v105_v16 = vld [vmem:[#allocation4 + $0xb0] sm:$0xff] }
  0x41   :  { %v127_v40 = vld [vmem:[#allocation4 + $0x160] sm:$0xff]  ;;  %v128_v42 = vld [vmem:[#allocation4 + $0x168] sm:$0xff]  ;;  %v4910_v44 = vcombine.low %v116_v33, %v120_v34  ;;  %v102_v19 = vld [vmem:[#allocation4 + $0x98] sm:$0xff]  ;;  %v4897_v23 = vcombine.high %v101_v15, %v105_v16 }
  0x42   :  { %v4917_v45 = vcombine.high %v123_v39, %v127_v40  ;;  %v4919_v46 = vcombine.high %v124_v41, %v128_v42  ;;  %v131_v47 = vld [vmem:[#allocation4 + $0x180] sm:$0xff]  ;;  %v132_v49 = vld [vmem:[#allocation4 + $0x188] sm:$0xff]  ;;  %v4916_v51 = vcombine.low %v123_v39, %v127_v40  ;;  %v4918_v52 = vcombine.low %v124_v41, %v128_v42  ;;  %v106_v21 = vld [vmem:[#allocation4 + $0xb8] sm:$0xff] }
  0x43   :  { %550 = vmatpush1.bf16.msra.mxu0 %v4892_v27  ;;  %643 = vmatpush1.bf16.msra.mxu1 %v4894_v28  ;;  %v135_v48 = vld [vmem:[#allocation4 + $0x1a0] sm:$0xff]  ;;  %v136_v50 = vld [vmem:[#allocation4 + $0x1a8] sm:$0xff]  ;;  %v109_v24 = vld [vmem:[#allocation4 + $0xd0] sm:$0xff]  ;;  %v4899_v27 = vcombine.high %v102_v19, %v106_v21  ;;  %v4896_v28 = vcombine.low %v101_v15, %v105_v16  ;;  %v4898_v34 = vcombine.low %v102_v19, %v106_v21 }
  0x44   :  { %551 = vmatprep.subr.bf16.mxu0 %v4901_v29  ;;  %644 = vmatprep.subr.bf16.mxu1 %v4903_v30  ;;  %v4925_v53 = vcombine.high %v131_v47, %v135_v48  ;;  %v4927_v54 = vcombine.high %v132_v49, %v136_v50  ;;  %v139_v55 = vld [vmem:[#allocation4 + $0x1c0] sm:$0xff]  ;;  %v140_v57 = vld [vmem:[#allocation4 + $0x1c8] sm:$0xff]  ;;  %v4924_v59 = vcombine.low %v131_v47, %v135_v48  ;;  %v113_v26 = vld [vmem:[#allocation4 + $0xf0] sm:$0xff] }
  0x45   :  { %v143_v56 = vld [vmem:[#allocation4 + $0x1e0] sm:$0xff]  ;;  %v144_v58 = vld [vmem:[#allocation4 + $0x1e8] sm:$0xff]  ;;  %v4926_v60 = vcombine.low %v132_v49, %v136_v50  ;;  %v110_v29 = vld [vmem:[#allocation4 + $0xd8] sm:$0xff]  ;;  %v4905_v32 = vcombine.high %v109_v24, %v113_v26 }
  0x46   :  { %v4933_v61 = vcombine.high %v139_v55, %v143_v56  ;;  %v4935_v62 = vcombine.high %v140_v57, %v144_v58  ;;  %v4932_v4 = vcombine.low %v139_v55, %v143_v56  ;;  %v4934_v5 = vcombine.low %v140_v57, %v144_v58  ;;  %v6027_v10 = vld [vmem:[%s8253_s0] sm:$0xff]   ;;  %v6035_v22 = vld [vmem:[%s8253_s0 + $0x8] sm:$0xff]   ;;  %v114_v30 = vld [vmem:[#allocation4 + $0xf8] sm:$0xff] }
  0x47   :  { %552 = vmatpush1.bf16.msra.mxu0 %v4900_v35  ;;  %645 = vmatpush1.bf16.msra.mxu1 %v4902_v36  ;;  %v117_v31 = vld [vmem:[#allocation4 + $0x110] sm:$0xff]  ;;  %v4907_v35 = vcombine.high %v110_v29, %v114_v30  ;;  %v4904_v36 = vcombine.low %v109_v24, %v113_v26  ;;  %v4906_v41 = vcombine.low %v110_v29, %v114_v30  ;;  %v6054_v55 = vld [vmem:[%s8253_s0 + $0x18] sm:$0xff]   ;;  %v6083_v12 = vld [vmem:[%s8254_s1] sm:$0xff] }
  0x48   :  { %553 = vmatprep.subr.bf16.mxu0 %v4909_v37  ;;  %646 = vmatprep.subr.bf16.mxu1 %v4911_v38  ;;  %v121_v33 = vld [vmem:[#allocation4 + $0x130] sm:$0xff]  ;;  %v118_v37 = vld [vmem:[#allocation4 + $0x118] sm:$0xff]  ;;  %vm1675_vm0 = vcmp.gt.s32.totalorder %v6083_v12, 0  ;;  %vm1676_vm1 = vcmp.gt.s32.totalorder %v6083_v12, 11  ;;  %vm2231_vm2 = vcmp.gt.s32.totalorder %v6083_v12, 2  ;;  %vm2509_vm3 = vcmp.gt.s32.totalorder %v6083_v12, 3 }
  0x49   :  { %v122_v38 = vld [vmem:[#allocation4 + $0x138] sm:$0xff]  ;;  %v6045_v39 = vld [vmem:[%s8253_s0 + $0x10] sm:$0xff]   ;;  %v4913_v40 = vcombine.high %v117_v31, %v121_v33  ;;  %v4912_v47 = vcombine.low %v117_v31, %v121_v33  ;;  %v1677_v13 = vsel %vm1675_vm0, 1, %v8262_v0  ;;  %vm2787_vm4 = vcmp.gt.s32.totalorder %v6083_v12, 4 }
  0x4a   :  { %v125_v42 = vld [vmem:[#allocation4 + $0x150] sm:$0xff]  ;;  %v4914_v49 = vcombine.low %v118_v37, %v122_v38  ;;  %v146_v63 = vld [vmem:[#allocation4 + $0x1f8] sm:$0xff]  ;;  %1679 = vperm.xlu0 %5159, %v1677_v13   ;;  %vm3065_vm5 = vcmp.gt.s32.totalorder %v6083_v12, 5  ;;  %vm1953_vm6 = vcmp.gt.s32.totalorder %v6083_v12, 1  ;;  %vm1954_vm7 = vcmp.gt.s32.totalorder %v6083_v12, 10 }
  0x4b   :  { %554 = vmatpush1.bf16.msra.mxu0 %v4908_v43  ;;  %647 = vmatpush1.bf16.msra.mxu1 %v4910_v44  ;;  %v129_v43 = vld [vmem:[#allocation4 + $0x170] sm:$0xff]  ;;  %v4915_v44 = vcombine.high %v118_v37, %v122_v38  ;;  %v6112_v21 = vld [vmem:[#allocation6 + $0x28] ss:$16 sps:$4 sm:$0xff]   ;;  %v6128_v26 = vld [vmem:[#allocation6 + $0x6c] ss:$16 sps:$4 sm:$0xff]   ;;  %vm2232_vm8 = vcmp.gt.s32.totalorder %v6083_v12, 9 }
  0x4c   :  { %555 = vmatprep.subr.bf16.mxu0 %v4917_v45  ;;  %648 = vmatprep.subr.bf16.mxu1 %v4919_v46  ;;  %v126_v45 = vld [vmem:[#allocation4 + $0x158] sm:$0xff]  ;;  %v4921_v48 = vcombine.high %v125_v42, %v129_v43  ;;  %v133_v50 = vld [vmem:[#allocation4 + $0x190] sm:$0xff]  ;;  %v4920_v56 = vcombine.low %v125_v42, %v129_v43  ;;  %vm2510_vm9 = vcmp.gt.s32.totalorder %v6083_v12, 8  ;;  %vm2788_vm10 = vcmp.gt.s32.totalorder %v6083_v12, 7 }
  0x4d   :  { %v130_v46 = vld [vmem:[#allocation4 + $0x178] sm:$0xff]  ;;  %v6065_v8 = vld [vmem:[#allocation6 + $0x4] ss:$16 sps:$4 sm:$0xff]   ;;  %v6093_v15 = vld [vmem:[#allocation6] ss:$16 sps:$4 sm:$0xff]   ;;  %vm3066_vm11 = vcmp.gt.s32.totalorder %v6083_v12, 6 }
  0x4e   :  { %v4922_v58 = vcombine.low %v126_v45, %v130_v46  ;;  %v6095_v16 = vld [vmem:[#allocation6 + $0x24] ss:$16 sps:$4 sm:$0xff]   ;;  %v6104_v19 = vld [vmem:[#allocation6 + $0x20] ss:$16 sps:$4 sm:$0xff]   ;;  %v6140_v29 = vld [vmem:[#allocation6 + $0x68] ss:$16 sps:$4 sm:$0xff]  }
  0x4f   :  { %556 = vmatpush1.bf16.msra.mxu0 %v4916_v51  ;;  %649 = vmatpush1.bf16.msra.mxu1 %v4918_v52  ;;  %v137_v51 = vld [vmem:[#allocation4 + $0x1b0] sm:$0xff]  ;;  %v4923_v52 = vcombine.high %v126_v45, %v130_v46  ;;  %v6143_v30 = vld [vmem:[#allocation6 + $0x8c] ss:$16 sps:$4 sm:$0xff]   ;;  %v6194_v43 = vld [vmem:[#allocation6 + $0xe8] ss:$16 sps:$4 sm:$0xff]   ;;  %v2233_v46 = vsel %vm2231_vm2, 1, %v8262_v0 }
  0x50   :  { %557 = vmatprep.subr.bf16.mxu0 %v4925_v53  ;;  %650 = vmatprep.subr.bf16.mxu1 %v4927_v54  ;;  %v134_v53 = vld [vmem:[#allocation4 + $0x198] sm:$0xff]  ;;  %v4929_v57 = vcombine.high %v133_v50, %v137_v51  ;;  %v4928_v1 = vcombine.low %v133_v50, %v137_v51  ;;  %v6121_v24 = vld [vmem:[#allocation6 + $0x64] ss:$16 sps:$4 sm:$0xff]   ;;  %v6174_v38 = vld [vmem:[#allocation6 + $0xc0] ss:$16 sps:$4 sm:$0xff]  }
  0x51   :  { %v138_v54 = vld [vmem:[#allocation4 + $0x1b8] sm:$0xff]  ;;  %v6150_v31 = vld [vmem:[#allocation6 + $0xa4] ss:$16 sps:$4 sm:$0xff]   ;;  %v6190_v42 = vld [vmem:[#allocation6 + $0xe0] ss:$16 sps:$4 sm:$0xff]  }
  0x52   :  { %v4930_v2 = vcombine.low %v134_v53, %v138_v54  ;;  %v6156_v33 = vld [vmem:[#allocation6 + $0xac] ss:$16 sps:$4 sm:$0xff]   ;;  %v6221_v50 = vld [vmem:[#allocation8 + $0x24] ss:$16 sps:$4 sm:$0xff]  }
  0x53   :  { %558 = vmatpush1.bf16.msra.mxu0 %v4924_v59  ;;  %651 = vmatpush1.bf16.msra.mxu1 %v4926_v60  ;;  %v141_v59 = vld [vmem:[#allocation4 + $0x1d0] sm:$0xff]  ;;  %v4931_v60 = vcombine.high %v134_v53, %v138_v54  ;;  %v6171_v37 = vld [vmem:[#allocation6 + $0xcc] ss:$16 sps:$4 sm:$0xff]   ;;  %v3067_v54 = vsel %vm3065_vm5, 1, %v8262_v0 }
  0x54   :  { %559 = vmatprep.subr.bf16.mxu0 %v4933_v61  ;;  %652 = vmatprep.subr.bf16.mxu1 %v4935_v62  ;;  %v145_v61 = vld [vmem:[#allocation4 + $0x1f0] sm:$0xff]  ;;  %v142_v62 = vld [vmem:[#allocation4 + $0x1d8] sm:$0xff] }
  0x55   :  { %v4937_v3 = vcombine.high %v141_v59, %v145_v61  ;;  %v4938_v7 = vcombine.low %v142_v62, %v146_v63  ;;  %v6199_v45 = vld [vmem:[#allocation8 + $0xc] ss:$16 sps:$4 sm:$0xff]   ;;  %v6231_v53 = vld [vmem:[#allocation8 + $0x20] ss:$16 sps:$4 sm:$0xff]   ;;  %v6288_v13 = vld [vmem:[#allocation8 + $0xc4] ss:$16 sps:$4 sm:$0xff]  }
  0x56   :  { %v6224_v51 = vld [vmem:[#allocation8 + $0x2c] ss:$16 sps:$4 sm:$0xff]  }
  0x57   :  { %560 = vmatpush1.bf16.msra.mxu0 %v4932_v4  ;;  %653 = vmatpush1.bf16.msra.mxu1 %v4934_v5  ;;  %v4939_v4 = vcombine.high %v142_v62, %v146_v63  ;;  %v6063_v5 = vld [vmem:[%s8253_s0 + $0x20] sm:$0xff]   ;;  %v6262_v63 = vld [vmem:[#allocation8 + $0x68] ss:$16 sps:$4 sm:$0xff]  }
  0x58   :  { %731 = vmatprep.subr.bf16.mxu0 %v4881_v6  ;;  %824 = vmatprep.subr.bf16.mxu1 %v4883_v9  ;;  %v4936_v6 = vcombine.low %v141_v59, %v145_v61  ;;  %v6067_v9 = vld [vmem:[#allocation6 + $0xc] ss:$16 sps:$4 sm:$0xff]   ;;  %v6250_v59 = vld [vmem:[#allocation8 + $0x48] ss:$16 sps:$4 sm:$0xff]   ;;  %v6258_v62 = vld [vmem:[#allocation8 + $0x60] ss:$16 sps:$4 sm:$0xff]  }
  0x59   :  { %v6255_v61 = vld [vmem:[#allocation8 + $0x6c] ss:$16 sps:$4 sm:$0xff]  }
  0x5a   :  { %578 = vmatmul.mubr.bf16.vlgmr.msra.gmra.mrb[0].mxu0 %v6027_v10  ;;  %671 = vmatmul.mubr.bf16.vlgmr.msra.gmra.mrb[0].mxu1 %v6027_v10 }
  0x5b   :  { %732 = vmatpush1.bf16.msra.mxu0 %v4880_v11  ;;  %587 = vmatprep.mubr.bf16.mxu0 %v8262_v0  ;;  %v6078_v11 = vld [vmem:[%s8253_s0 + $0x28] sm:$0xff]  }
  0x5c   :  { %733 = vmatprep.subr.bf16.mxu0 %v4889_v14  ;;  %680 = vmatprep.mubr.bf16.mxu1 %v8262_v0  ;;  %v1684_v14 = vsel %vm1676_vm1, 1, %v8262_v0 }
  0x5d   :  { %825 = vmatpush1.bf16.msra.mxu1 %v4882_v17  ;;  %1686 = vperm.xlu0 %5159, %v1684_v14   ;;  %v6097_v17 = vld [vmem:[#allocation6 + $0x8] ss:$16 sps:$4 sm:$0xff]   ;;  %v6291_v14 = vld [vmem:[#allocation8 + $0xcc] ss:$16 sps:$4 sm:$0xff]  }
  0x5e   :  { %826 = vmatprep.subr.bf16.mxu1 %v4891_v18  ;;  %v6100_v18 = vld [vmem:[#allocation6 + $0x2c] ss:$16 sps:$4 sm:$0xff]   ;;  %8424 = vst [vmem:[#allocation12_spill] sm:$0xff] %v6291_v14 }
  0x5f   :  { %734 = vmatpush1.bf16.msra.mxu0 %v4888_v20  ;;  %v6108_v20 = vld [vmem:[#allocation6 + $0x44] ss:$16 sps:$4 sm:$0xff]  }
  0x60   :  { %735 = vmatprep.subr.bf16.mxu0 %v4897_v23  ;;  %v6115_v23 = vld [vmem:[#allocation6 + $0x4c] ss:$16 sps:$4 sm:$0xff]  }
  0x61   :  { %827 = vmatpush1.bf16.msra.mxu1 %v4890_v25  ;;  %v6124_v25 = vld [vmem:[#allocation6 + $0x48] ss:$16 sps:$4 sm:$0xff]   ;;  %2235 = vperm.xlu0 %5159, %v2233_v46   ;;  %v6294_v46 = vld [vmem:[#allocation8 + $0xc0] ss:$16 sps:$4 sm:$0xff]  }
  0x62   :  { %588 = vmatmul.mubr.bf16.gmra.mrb[4].mxu0 %v6035_v22  ;;  %828 = vmatprep.subr.bf16.mxu1 %v4899_v27  ;;  %v6132_v27 = vld [vmem:[#allocation6 + $0x60] ss:$16 sps:$4 sm:$0xff]  }
  0x63   :  { %681 = vmatmul.mubr.bf16.gmra.mrb[4].mxu1 %v6035_v22  ;;  %736 = vmatpush1.bf16.msra.mxu0 %v4896_v28  ;;  %v6136_v28 = vld [vmem:[#allocation6 + $0x84] ss:$16 sps:$4 sm:$0xff]  }
  0x64   :  { %597 = vmatprep.mubr.bf16.mxu0 %v8262_v0  ;;  %690 = vmatprep.mubr.bf16.mxu1 %v8262_v0 }
  0x65   :  { %737 = vmatprep.subr.bf16.mxu0 %v4905_v32  ;;  %829 = vmatpush1.bf16.msra.mxu1 %v4898_v34  ;;  %v6152_v32 = vld [vmem:[#allocation6 + $0x88] ss:$16 sps:$4 sm:$0xff]   ;;  %v6162_v34 = vld [vmem:[#allocation6 + $0xa0] ss:$16 sps:$4 sm:$0xff]  }
  0x66   :  { %830 = vmatprep.subr.bf16.mxu1 %v4907_v35  ;;  %v6166_v35 = vld [vmem:[#allocation6 + $0xc4] ss:$16 sps:$4 sm:$0xff]  }
  0x67   :  { %738 = vmatpush1.bf16.msra.mxu0 %v4904_v36  ;;  %v6168_v36 = vld [vmem:[#allocation6 + $0xa8] ss:$16 sps:$4 sm:$0xff]  }
  0x68   :  { %739 = vmatprep.subr.bf16.mxu0 %v4913_v40  ;;  %v6180_v40 = vld [vmem:[#allocation6 + $0xe4] ss:$16 sps:$4 sm:$0xff]  }
  0x69   :  { %831 = vmatpush1.bf16.msra.mxu1 %v4906_v41  ;;  %v6184_v41 = vld [vmem:[#allocation6 + $0xec] ss:$16 sps:$4 sm:$0xff]  }
  0x6a   :  { %598 = vmatmul.mubr.bf16.gmra.mrb[8].mxu0 %v6045_v39  ;;  %832 = vmatprep.subr.bf16.mxu1 %v4915_v44  ;;  %v6196_v44 = vld [vmem:[#allocation8 + $0x4] ss:$16 sps:$4 sm:$0xff]  }
  0x6b   :  { %691 = vmatmul.mubr.bf16.gmra.mrb[8].mxu1 %v6045_v39  ;;  %607 = vmatprep.mubr.bf16.mxu0 %v8262_v0 }
  0x6c   :  { %700 = vmatprep.mubr.bf16.mxu1 %v8262_v0  ;;  %740 = vmatpush1.bf16.msra.mxu0 %v4912_v47  ;;  %v2511_v47 = vsel %vm2509_vm3, 1, %v8262_v0 }
  0x6d   :  { %741 = vmatprep.subr.bf16.mxu0 %v4921_v48  ;;  %833 = vmatpush1.bf16.msra.mxu1 %v4914_v49  ;;  %v6217_v48 = vld [vmem:[#allocation8] ss:$16 sps:$4 sm:$0xff]   ;;  %v6219_v49 = vld [vmem:[#allocation8 + $0x8] ss:$16 sps:$4 sm:$0xff]  }
  0x6e   :  { %834 = vmatprep.subr.bf16.mxu1 %v4923_v52  ;;  %2513 = vperm.xlu0 %5159, %v2511_v47   ;;  %v2789_v52 = vsel %vm2787_vm4, 1, %v8262_v0  ;;  %v6298_v47 = vld [vmem:[#allocation8 + $0xc8] ss:$16 sps:$4 sm:$0xff]  }
  0x70   :  { %742 = vmatpush1.bf16.msra.mxu0 %v4920_v56  ;;  %v6238_v56 = vld [vmem:[#allocation8 + $0x44] ss:$16 sps:$4 sm:$0xff]  }
  0x71   :  { %743 = vmatprep.subr.bf16.mxu0 %v4929_v57  ;;  %835 = vmatpush1.bf16.msra.mxu1 %v4922_v58  ;;  %v6241_v57 = vld [vmem:[#allocation8 + $0x4c] ss:$16 sps:$4 sm:$0xff]   ;;  %v6246_v58 = vld [vmem:[#allocation8 + $0x40] ss:$16 sps:$4 sm:$0xff]  }
  0x72   :  { %608 = vmatmul.mubr.bf16.gmra.mrb[12].mxu0 %v6054_v55  ;;  %836 = vmatprep.subr.bf16.mxu1 %v4931_v60  ;;  %v6252_v60 = vld [vmem:[#allocation8 + $0x64] ss:$16 sps:$4 sm:$0xff]  }
  0x73   :  { %701 = vmatmul.mubr.bf16.gmra.mrb[12].mxu1 %v6054_v55  ;;  %617 = vmatprep.mubr.bf16.mxu0 %v8262_v0 }
  0x74   :  { %710 = vmatprep.mubr.bf16.mxu1 %v8262_v0  ;;  %744 = vmatpush1.bf16.msra.mxu0 %v4928_v1  ;;  %v6264_v1 = vld [vmem:[#allocation8 + $0x84] ss:$16 sps:$4 sm:$0xff]  }
  0x75   :  { %837 = vmatpush1.bf16.msra.mxu1 %v4930_v2  ;;  %745 = vmatprep.subr.bf16.mxu0 %v4937_v3  ;;  %v6267_v2 = vld [vmem:[#allocation8 + $0x8c] ss:$16 sps:$4 sm:$0xff]   ;;  %v6270_v3 = vld [vmem:[#allocation8 + $0x80] ss:$16 sps:$4 sm:$0xff]  }
  0x76   :  { %838 = vmatprep.subr.bf16.mxu1 %v4939_v4  ;;  %2791 = vperm.xlu0 %5159, %v2789_v52   ;;  %v6274_v4 = vld [vmem:[#allocation8 + $0x88] ss:$16 sps:$4 sm:$0xff]   ;;  %v6300_v52 = vld [vmem:[#allocation8 + $0xe4] ss:$16 sps:$4 sm:$0xff]  }
  0x78   :  { %746 = vmatpush1.bf16.msra.mxu0 %v4936_v6  ;;  %v6279_v6 = vld [vmem:[#allocation8 + $0xac] ss:$16 sps:$4 sm:$0xff]  }
  0x79   :  { %839 = vmatpush1.bf16.msra.mxu1 %v4938_v7  ;;  %1220 = vmatprep.subr.bf16.mxu0 %v6065_v8  ;;  %v6282_v7 = vld [vmem:[#allocation8 + $0xa0] ss:$16 sps:$4 sm:$0xff]  }
  0x7a   :  { %618 = vmatmul.mubr.bf16.gmra.mrb[16].mxu0 %v6063_v5  ;;  %1261 = vmatprep.subr.bf16.mxu1 %v6067_v9  ;;  %8423 = vst [vmem:[#allocation11_spill] sm:$0xff] %v6282_v7 }
  0x7b   :  { %711 = vmatmul.mubr.bf16.gmra.mrb[16].mxu1 %v6063_v5  ;;  %627 = vmatprep.mubr.bf16.mxu0 %v8262_v0 }
  0x7c   :  { %720 = vmatprep.mubr.bf16.mxu1 %v8262_v0  ;;  %3069 = vperm.xlu0 %5159, %v3067_v54   ;;  %v6303_v54 = vld [vmem:[#allocation8 + $0xec] ss:$16 sps:$4 sm:$0xff]  }
  0x82   :  { %628 = vmatmul.mubr.bf16.gmra.mrb[20].mxu0 %v6078_v11 }
  0x83   :  { %721 = vmatmul.mubr.bf16.gmra.mrb[20].mxu1 %v6078_v11  ;;  %763 = vmatprep.mubr.bf16.mxu0 %v8262_v0 }
  0x84   :  { %856 = vmatprep.mubr.bf16.mxu1 %v8262_v0 }
  0x8a   :  { %764 = vmatmul.mubr.bf16.vlgmr.msra.gmra.mrb[24].mxu0 %v6027_v10 }
  0x8b   :  { %857 = vmatmul.mubr.bf16.vlgmr.msra.gmra.mrb[24].mxu1 %v6027_v10  ;;  %1221 = vmatpush1.bf16.msra.mxu0 %v6093_v15  ;;  %v6118_v10 = vld [vmem:[#allocation6 + $0x40] ss:$16 sps:$4 sm:$0xff]  }
  0x8c   :  { %1222 = vmatprep.subr.bf16.mxu0 %v6095_v16  ;;  %773 = vmatprep.mubr.bf16.mxu0 %v8262_v0 }
  0x8d   :  { %866 = vmatprep.mubr.bf16.mxu1 %v8262_v0  ;;  %1262 = vmatpush1.bf16.msra.mxu1 %v6097_v17 }
  0x8e   :  { %1263 = vmatprep.subr.bf16.mxu1 %v6100_v18 }
  0x8f   :  { %1223 = vmatpush1.bf16.msra.mxu0 %v6104_v19 }
  0x90   :  { %1224 = vmatprep.subr.bf16.mxu0 %v6108_v20 }
  0x91   :  { %1264 = vmatpush1.bf16.msra.mxu1 %v6112_v21 }
  0x92   :  { %774 = vmatmul.mubr.bf16.gmra.mrb[28].mxu0 %v6035_v22  ;;  %1265 = vmatprep.subr.bf16.mxu1 %v6115_v23 }
  0x93   :  { %867 = vmatmul.mubr.bf16.gmra.mrb[28].mxu1 %v6035_v22  ;;  %1225 = vmatpush1.bf16.msra.mxu0 %v6118_v10  ;;  %v6147_v22 = vld [vmem:[#allocation6 + $0x80] ss:$16 sps:$4 sm:$0xff]  }
  0x94   :  { %783 = vmatprep.mubr.bf16.mxu0 %v8262_v0  ;;  %876 = vmatprep.mubr.bf16.mxu1 %v8262_v0 }
  0x95   :  { %1226 = vmatprep.subr.bf16.mxu0 %v6121_v24  ;;  %1266 = vmatpush1.bf16.msra.mxu1 %v6124_v25 }
  0x96   :  { %1267 = vmatprep.subr.bf16.mxu1 %v6128_v26 }
  0x97   :  { %1227 = vmatpush1.bf16.msra.mxu0 %v6132_v27 }
  0x98   :  { %1228 = vmatprep.subr.bf16.mxu0 %v6136_v28 }
  0x99   :  { %1268 = vmatpush1.bf16.msra.mxu1 %v6140_v29 }
  0x9a   :  { %784 = vmatmul.mubr.bf16.gmra.mrb[32].mxu0 %v6045_v39  ;;  %1269 = vmatprep.subr.bf16.mxu1 %v6143_v30 }
  0x9b   :  { %877 = vmatmul.mubr.bf16.gmra.mrb[32].mxu1 %v6045_v39  ;;  %793 = vmatprep.mubr.bf16.mxu0 %v8262_v0  ;;  %v6178_v39 = vld [vmem:[#allocation6 + $0xc8] ss:$16 sps:$4 sm:$0xff]  }
  0x9c   :  { %886 = vmatprep.mubr.bf16.mxu1 %v8262_v0  ;;  %1229 = vmatpush1.bf16.msra.mxu0 %v6147_v22 }
  0x9d   :  { %1230 = vmatprep.subr.bf16.mxu0 %v6150_v31  ;;  %1270 = vmatpush1.bf16.msra.mxu1 %v6152_v32 }
  0x9e   :  { %1271 = vmatprep.subr.bf16.mxu1 %v6156_v33 }
  0xa0   :  { %1231 = vmatpush1.bf16.msra.mxu0 %v6162_v34 }
  0xa1   :  { %1232 = vmatprep.subr.bf16.mxu0 %v6166_v35  ;;  %1272 = vmatpush1.bf16.msra.mxu1 %v6168_v36 }
  0xa2   :  { %794 = vmatmul.mubr.bf16.gmra.mrb[36].mxu0 %v6054_v55  ;;  %1273 = vmatprep.subr.bf16.mxu1 %v6171_v37 }
  0xa3   :  { %887 = vmatmul.mubr.bf16.gmra.mrb[36].mxu1 %v6054_v55  ;;  %803 = vmatprep.mubr.bf16.mxu0 %v8262_v0  ;;  %v6236_v55 = vld [vmem:[#allocation8 + $0x28] ss:$16 sps:$4 sm:$0xff]  }
  0xa4   :  { %896 = vmatprep.mubr.bf16.mxu1 %v8262_v0  ;;  %1233 = vmatpush1.bf16.msra.mxu0 %v6174_v38 }
  0xa5   :  { %1274 = vmatpush1.bf16.msra.mxu1 %v6178_v39  ;;  %1234 = vmatprep.subr.bf16.mxu0 %v6180_v40 }
  0xa6   :  { %1275 = vmatprep.subr.bf16.mxu1 %v6184_v41 }
  0xa8   :  { %1235 = vmatpush1.bf16.msra.mxu0 %v6190_v42 }
  0xa9   :  { %1276 = vmatpush1.bf16.msra.mxu1 %v6194_v43  ;;  %1498 = vmatprep.subr.bf16.mxu0 %v6196_v44 }
  0xaa   :  { %804 = vmatmul.mubr.bf16.gmra.mrb[40].mxu0 %v6063_v5  ;;  %1539 = vmatprep.subr.bf16.mxu1 %v6199_v45 }
  0xab   :  { %897 = vmatmul.mubr.bf16.gmra.mrb[40].mxu1 %v6063_v5  ;;  %813 = vmatprep.mubr.bf16.mxu0 %v8262_v0  ;;  %v6276_v5 = vld [vmem:[#allocation8 + $0xa4] ss:$16 sps:$4 sm:$0xff]  }
  0xac   :  { %906 = vmatprep.mubr.bf16.mxu1 %v8262_v0 }
  0xb2   :  { %814 = vmatmul.mubr.bf16.gmra.mrb[44].mxu0 %v6078_v11 }
  0xb3   :  { %907 = vmatmul.mubr.bf16.gmra.mrb[44].mxu1 %v6078_v11  ;;  %1252 = vmatprep.mubr.bf16.mxu0 %v8262_v0  ;;  %v6286_v11 = vld [vmem:[#allocation8 + $0xa8] ss:$16 sps:$4 sm:$0xff]  }
  0xb4   :  { %1293 = vmatprep.mubr.bf16.mxu1 %v8262_v0 }
  0xba   :  { %1253 = vmatmul.mubr.bf16.vlgmr.msra.gmra.mrb[48].mxu0 %v8262_v0 }
  0xbb   :  { %1294 = vmatmul.mubr.bf16.vlgmr.msra.gmra.mrb[48].mxu1 %v8262_v0  ;;  %1499 = vmatpush1.bf16.msra.mxu0 %v6217_v48 }
  0xbc   :  { %1540 = vmatpush1.bf16.msra.mxu1 %v6219_v49  ;;  %1500 = vmatprep.subr.bf16.mxu0 %v6221_v50 }
  0xbd   :  { %1541 = vmatprep.subr.bf16.mxu1 %v6224_v51  ;;  %1530 = vmatprep.mubr.bf16.mxu0 %v8262_v0 }
  0xbe   :  { %1571 = vmatprep.mubr.bf16.mxu1 %v8262_v0  ;;  %v6306_v0 = vld [vmem:[#allocation8 + $0xe0] ss:$16 sps:$4 sm:$0xff]  }
  0xbf   :  { %1501 = vmatpush1.bf16.msra.mxu0 %v6231_v53 }
  0xc0   :  { %1542 = vmatpush1.bf16.msra.mxu1 %v6236_v55  ;;  %1502 = vmatprep.subr.bf16.mxu0 %v6238_v56 }
  0xc1   :  { %1543 = vmatprep.subr.bf16.mxu1 %v6241_v57 }
  0xc3   :  { %1503 = vmatpush1.bf16.msra.mxu0 %v6246_v58 }
  0xc4   :  { %1544 = vmatpush1.bf16.msra.mxu1 %v6250_v59  ;;  %1504 = vmatprep.subr.bf16.mxu0 %v6252_v60 }
  0xc5   :  { %1545 = vmatprep.subr.bf16.mxu1 %v6255_v61 }
  0xc7   :  { %1505 = vmatpush1.bf16.msra.mxu0 %v6258_v62 }
  0xc8   :  { %1546 = vmatpush1.bf16.msra.mxu1 %v6262_v63  ;;  %1506 = vmatprep.subr.bf16.mxu0 %v6264_v1 }
  0xc9   :  { %1547 = vmatprep.subr.bf16.mxu1 %v6267_v2 }
  0xcb   :  { %1507 = vmatpush1.bf16.msra.mxu0 %v6270_v3 }
  0xcc   :  { %1548 = vmatpush1.bf16.msra.mxu1 %v6274_v4  ;;  %1508 = vmatprep.subr.bf16.mxu0 %v6276_v5 }
  0xcd   :  { %1549 = vmatprep.subr.bf16.mxu1 %v6279_v6 }
  0xcf   :  { %1509 = vmatpush1.bf16.msra.mxu0 %v6282_v7  ;;  %v6310_v7 = vld [vmem:[#allocation8 + $0xe8] ss:$16 sps:$4 sm:$0xff]  }
  0xd0   :  { %1550 = vmatpush1.bf16.msra.mxu1 %v6286_v11  ;;  %1510 = vmatprep.subr.bf16.mxu0 %v6288_v13 }
  0xd1   :  { %1551 = vmatprep.subr.bf16.mxu1 %v6291_v14  ;;  %v8425_v14 = vmov 0  }
  0xd3   :  { %1511 = vmatpush1.bf16.msra.mxu0 %v6294_v46 }
  0xd4   :  { %1552 = vmatpush1.bf16.msra.mxu1 %v6298_v47  ;;  %1512 = vmatprep.subr.bf16.mxu0 %v6300_v52 }
  0xd5   :  { %1553 = vmatprep.subr.bf16.mxu1 %v6303_v54 }
  0xd7   :  { %1513 = vmatpush1.bf16.msra.mxu0 %v6306_v0 }
  0xd8   :  { %1554 = vmatpush1.bf16.msra.mxu1 %v6310_v7  ;;  %1706 = vmatprep.subr.bf16.mxu0 %v6065_v8  ;;  %v149_v8 = vlaneseq }
  0xd9   :  { %1747 = vmatprep.subr.bf16.mxu1 %v6067_v9 }
  0xda   :  { %1531 = vmatmul.mubr.bf16.vlgmr.msra.gmra.mrb[52].mxu0 %v8425_v14  ;;  %v6353_v9 = vshrl.u32 %v149_v8, 7 }
  0xdb   :  { %1572 = vmatmul.mubr.bf16.vlgmr.msra.gmra.mrb[52].mxu1 %v8425_v14  ;;  %1707 = vmatpush1.bf16.msra.mxu0 %v6093_v15 }
  0xdc   :  { %1748 = vmatpush1.bf16.msra.mxu1 %v6097_v17  ;;  %1708 = vmatprep.subr.bf16.mxu0 %v6095_v16  ;;  %v159_v15 = vsub.s32 2, %v6353_v9  ;;  %v151_v16 = vsub.s32 0, %v6353_v9  ;;  %v163_v17 = vsub.s32 3, %v6353_v9 }
  0xdd   :  { %1749 = vmatprep.subr.bf16.mxu1 %v6100_v18  ;;  %1738 = vmatprep.mubr.bf16.mxu0 %v8425_v14  ;;  %v6361_v18 = vld [vmem:[%s8256_s3] sm:$0xff] }
  0xde   :  { %1779 = vmatprep.mubr.bf16.mxu1 %v8425_v14 }
  0xdf   :  { %1709 = vmatpush1.bf16.msra.mxu0 %v6104_v19  ;;  %v155_v19 = vsub.s32 1, %v6353_v9 }
  0xe0   :  { %1750 = vmatpush1.bf16.msra.mxu1 %v6112_v21  ;;  %1710 = vmatprep.subr.bf16.mxu0 %v6108_v20  ;;  %v6367_v21 = vrot.slane %v6361_v18, %v159_v15 }
  0xe1   :  { %1751 = vmatprep.subr.bf16.mxu1 %v6115_v23  ;;  %v6370_v23 = vrot.slane %v6361_v18, %v151_v16 }
  0xe3   :  { %1711 = vmatpush1.bf16.msra.mxu0 %v6118_v10 }
  0xe4   :  { %1752 = vmatpush1.bf16.msra.mxu1 %v6124_v25  ;;  %1712 = vmatprep.subr.bf16.mxu0 %v6121_v24  ;;  %v6377_v25 = vrot.slane %v6361_v18, %v163_v17 }
  0xe5   :  { %1753 = vmatprep.subr.bf16.mxu1 %v6128_v26  ;;  %v6380_v26 = vrot.slane %v6361_v18, %v155_v19 }
  0xe7   :  { %1713 = vmatpush1.bf16.msra.mxu0 %v6132_v27 }
  0xe8   :  { %1754 = vmatpush1.bf16.msra.mxu1 %v6140_v29  ;;  %1714 = vmatprep.subr.bf16.mxu0 %v6136_v28 }
  0xe9   :  { %1755 = vmatprep.subr.bf16.mxu1 %v6143_v30 }
  0xeb   :  { %1715 = vmatpush1.bf16.msra.mxu0 %v6147_v22 }
  0xec   :  { %1756 = vmatpush1.bf16.msra.mxu1 %v6152_v32  ;;  %1716 = vmatprep.subr.bf16.mxu0 %v6150_v31 }
  0xed   :  { %1757 = vmatprep.subr.bf16.mxu1 %v6156_v33 }
  0xef   :  { %1717 = vmatpush1.bf16.msra.mxu0 %v6162_v34 }
  0xf0   :  { %1758 = vmatpush1.bf16.msra.mxu1 %v6168_v36  ;;  %1718 = vmatprep.subr.bf16.mxu0 %v6166_v35 }
  0xf1   :  { %1759 = vmatprep.subr.bf16.mxu1 %v6171_v37 }
  0xf3   :  { %1719 = vmatpush1.bf16.msra.mxu0 %v6174_v38 }
  0xf4   :  { %1760 = vmatpush1.bf16.msra.mxu1 %v6178_v39  ;;  %1720 = vmatprep.subr.bf16.mxu0 %v6180_v40 }
  0xf5   :  { %1761 = vmatprep.subr.bf16.mxu1 %v6184_v41 }
  0xf7   :  { %1721 = vmatpush1.bf16.msra.mxu0 %v6190_v42 }
  0xf8   :  { %1762 = vmatpush1.bf16.msra.mxu1 %v6194_v43  ;;  %1793 = vmatprep.subr.bf16.mxu0 %v6196_v44 }
  0xf9   :  { %1834 = vmatprep.subr.bf16.mxu1 %v6199_v45 }
 0x12d   :  { %v6364_v20 = vpop.f32.mrb[0].mxu0  ;;  %v6374_v24 = vpop.f32.mrb[0].mxu1 }
 0x12e   :  { %v6372_v10 = vpop.f32.mrb[1].mxu0  ;;  %v6382_v28 = vpop.f32.mrb[1].mxu1 }
 0x12f   :  { %v583_v27 = vpop.f32.mrb[2].mxu0  ;;  %v676_v22 = vpop.f32.mrb[2].mxu1 }
 0x130   :  { %v6385_v29 = vadd.f32 %v583_v27, %v6370_v23  ;;  %v585_v30 = vpop.f32.mrb[3].mxu0  ;;  %v6391_v32 = vadd.f32 %v676_v22, %v6367_v21  ;;  %v678_v33 = vpop.f32.mrb[3].mxu1 }
 0x131   :  { %v6388_v31 = vadd.f32 %v585_v30, %v6380_v26  ;;  %v6394_v34 = vadd.f32 %v678_v33, %v6377_v25 }
 0x133   :  { %8426 = vst [vmem:[#allocation13_spill] sm:$0xff] %v6388_v31  ;;  %8427 = vst [vmem:[#allocation14_spill] sm:$0xff] %v6394_v34 }
 0x135   :  { %v589_v35 = vpop.f32.mrb[4].mxu0 }
 0x136   :  { %v6397_v36 = vadd.f32 %v589_v35, %v6370_v23  ;;  %v591_v37 = vpop.f32.mrb[5].mxu0  ;;  %v682_v38 = vpop.f32.mrb[4].mxu1 }
 0x137   :  { %v6400_v39 = vadd.f32 %v591_v37, %v6380_v26  ;;  %v593_v40 = vpop.f32.mrb[6].mxu0  ;;  %v6403_v41 = vadd.f32 %v682_v38, %v6367_v21  ;;  %v684_v42 = vpop.f32.mrb[5].mxu1 }
 0x138   :  { %8428 = vst [vmem:[#allocation15_spill] sm:$0xff] %v6397_v36  ;;  %v6406_v43 = vadd.f32 %v593_v40, %v6370_v23  ;;  %v595_v44 = vpop.f32.mrb[7].mxu0  ;;  %v6409_v8 = vadd.f32 %v684_v42, %v6377_v25  ;;  %v686_v15 = vpop.f32.mrb[6].mxu1 }
 0x139   :  { %8429 = vst [vmem:[#allocation16_spill] sm:$0xff] %v6400_v39  ;;  %8430 = vst [vmem:[#allocation17_spill] sm:$0xff] %v6403_v41  ;;  %v6412_v16 = vadd.f32 %v595_v44, %v6380_v26  ;;  %v6415_v17 = vadd.f32 %v686_v15, %v6367_v21  ;;  %v688_v19 = vpop.f32.mrb[7].mxu1 }
 0x13a   :  { %8431 = vst [vmem:[#allocation18_spill] sm:$0xff] %v6406_v43  ;;  %8432 = vst [vmem:[#allocation19_spill] sm:$0xff] %v6409_v8  ;;  %v6418_v27 = vadd.f32 %v688_v19, %v6377_v25 }
 0x13b   :  { %8433 = vst [vmem:[#allocation20_spill] sm:$0xff] %v6412_v16  ;;  %8434 = vst [vmem:[#allocation21_spill] sm:$0xff] %v6415_v17 }
 0x13c   :  { %8435 = vst [vmem:[#allocation22_spill] sm:$0xff] %v6418_v27 }
 0x13d   :  { %v599_v30 = vpop.f32.mrb[8].mxu0 }
 0x13e   :  { %v6421_v22 = vadd.f32 %v599_v30, %v6370_v23  ;;  %v601_v33 = vpop.f32.mrb[9].mxu0  ;;  %v692_v35 = vpop.f32.mrb[8].mxu1 }
 0x13f   :  { %v6424_v37 = vadd.f32 %v601_v33, %v6380_v26  ;;  %v603_v38 = vpop.f32.mrb[10].mxu0  ;;  %v6427_v40 = vadd.f32 %v692_v35, %v6367_v21  ;;  %v694_v42 = vpop.f32.mrb[9].mxu1 }
 0x140   :  { %8436 = vst [vmem:[#allocation23_spill] sm:$0xff] %v6421_v22  ;;  %v6430_v44 = vadd.f32 %v603_v38, %v6370_v23  ;;  %v605_v15 = vpop.f32.mrb[11].mxu0  ;;  %v6433_v19 = vadd.f32 %v694_v42, %v6377_v25  ;;  %v696_v27 = vpop.f32.mrb[10].mxu1 }
 0x141   :  { %8437 = vst [vmem:[#allocation24_spill] sm:$0xff] %v6424_v37  ;;  %8438 = vst [vmem:[#allocation25_spill] sm:$0xff] %v6427_v40  ;;  %v6436_v30 = vadd.f32 %v605_v15, %v6380_v26  ;;  %v6439_v22 = vadd.f32 %v696_v27, %v6367_v21  ;;  %v698_v33 = vpop.f32.mrb[11].mxu1 }
 0x142   :  { %8439 = vst [vmem:[#allocation26_spill] sm:$0xff] %v6430_v44  ;;  %8440 = vst [vmem:[#allocation27_spill] sm:$0xff] %v6433_v19  ;;  %v6442_v37 = vadd.f32 %v698_v33, %v6377_v25 }
 0x143   :  { %8441 = vst [vmem:[#allocation28_spill] sm:$0xff] %v6436_v30  ;;  %8442 = vst [vmem:[#allocation29_spill] sm:$0xff] %v6439_v22 }
 0x144   :  { %8443 = vst [vmem:[#allocation30_spill] sm:$0xff] %v6442_v37 }
 0x145   :  { %v609_v35 = vpop.f32.mrb[12].mxu0 }
 0x146   :  { %v6445_v40 = vadd.f32 %v609_v35, %v6370_v23  ;;  %v611_v38 = vpop.f32.mrb[13].mxu0  ;;  %v702_v44 = vpop.f32.mrb[12].mxu1 }
 0x147   :  { %v6448_v42 = vadd.f32 %v611_v38, %v6380_v26  ;;  %v613_v19 = vpop.f32.mrb[14].mxu0  ;;  %v6451_v15 = vadd.f32 %v702_v44, %v6367_v21  ;;  %v704_v30 = vpop.f32.mrb[13].mxu1 }
 0x148   :  { %8444 = vst [vmem:[#allocation31_spill] sm:$0xff] %v6445_v40  ;;  %v6454_v27 = vadd.f32 %v613_v19, %v6370_v23  ;;  %v615_v22 = vpop.f32.mrb[15].mxu0  ;;  %v6457_v33 = vadd.f32 %v704_v30, %v6377_v25  ;;  %v706_v37 = vpop.f32.mrb[14].mxu1 }
 0x149   :  { %8445 = vst [vmem:[#allocation32_spill] sm:$0xff] %v6448_v42  ;;  %8446 = vst [vmem:[#allocation33_spill] sm:$0xff] %v6451_v15  ;;  %v6460_v35 = vadd.f32 %v615_v22, %v6380_v26  ;;  %v6463_v40 = vadd.f32 %v706_v37, %v6367_v21  ;;  %v708_v38 = vpop.f32.mrb[15].mxu1 }
 0x14a   :  { %8447 = vst [vmem:[#allocation34_spill] sm:$0xff] %v6454_v27  ;;  %8448 = vst [vmem:[#allocation35_spill] sm:$0xff] %v6457_v33  ;;  %v6466_v42 = vadd.f32 %v708_v38, %v6377_v25 }
 0x14b   :  { %8449 = vst [vmem:[#allocation36_spill] sm:$0xff] %v6460_v35  ;;  %8450 = vst [vmem:[#allocation37_spill] sm:$0xff] %v6463_v40 }
 0x14c   :  { %8451 = vst [vmem:[#allocation38_spill] sm:$0xff] %v6466_v42 }
 0x14d   :  { %v619_v44 = vpop.f32.mrb[16].mxu0 }
 0x14e   :  { %v6469_v15 = vadd.f32 %v619_v44, %v6370_v23  ;;  %v621_v19 = vpop.f32.mrb[17].mxu0  ;;  %v712_v27 = vpop.f32.mrb[16].mxu1 }
 0x14f   :  { %v6472_v30 = vadd.f32 %v621_v19, %v6380_v26  ;;  %v623_v33 = vpop.f32.mrb[18].mxu0  ;;  %v6475_v22 = vadd.f32 %v712_v27, %v6367_v21  ;;  %v714_v35 = vpop.f32.mrb[17].mxu1 }
 0x150   :  { %8452 = vst [vmem:[#allocation39_spill] sm:$0xff] %v6469_v15  ;;  %v6478_v37 = vadd.f32 %v623_v33, %v6370_v23  ;;  %v625_v40 = vpop.f32.mrb[19].mxu0  ;;  %v6481_v38 = vadd.f32 %v714_v35, %v6377_v25  ;;  %v716_v42 = vpop.f32.mrb[18].mxu1 }
 0x151   :  { %8453 = vst [vmem:[#allocation40_spill] sm:$0xff] %v6472_v30  ;;  %8454 = vst [vmem:[#allocation41_spill] sm:$0xff] %v6475_v22  ;;  %v6484_v44 = vadd.f32 %v625_v40, %v6380_v26  ;;  %v6487_v15 = vadd.f32 %v716_v42, %v6367_v21  ;;  %v718_v19 = vpop.f32.mrb[19].mxu1 }
 0x152   :  { %8455 = vst [vmem:[#allocation42_spill] sm:$0xff] %v6478_v37  ;;  %8456 = vst [vmem:[#allocation43_spill] sm:$0xff] %v6481_v38  ;;  %v6490_v30 = vadd.f32 %v718_v19, %v6377_v25  ;;  %v167_v37 = vsub.s32 4, %v6353_v9  ;;  %v175_v19 = vsub.s32 6, %v6353_v9 }
 0x153   :  { %8457 = vst [vmem:[#allocation44_spill] sm:$0xff] %v6484_v44  ;;  %8458 = vst [vmem:[#allocation45_spill] sm:$0xff] %v6487_v15  ;;  %v171_v44 = vsub.s32 5, %v6353_v9 }
 0x154   :  { %8459 = vst [vmem:[#allocation46_spill] sm:$0xff] %v6490_v30 }
 0x155   :  { %v629_v27 = vpop.f32.mrb[20].mxu0 }
 0x156   :  { %v6493_v22 = vadd.f32 %v629_v27, %v6370_v23  ;;  %v631_v33 = vpop.f32.mrb[21].mxu0  ;;  %v722_v35 = vpop.f32.mrb[20].mxu1 }
 0x157   :  { %v6497_v38 = vadd.f32 %v631_v33, %v6380_v26  ;;  %v633_v40 = vpop.f32.mrb[22].mxu0  ;;  %v6501_v42 = vadd.f32 %v722_v35, %v6367_v21  ;;  %v724_v15 = vpop.f32.mrb[21].mxu1  ;;  %v179_v33 = vsub.s32 7, %v6353_v9 }
 0x158   :  { %8460 = vst [vmem:[#allocation47_spill] sm:$0xff] %v6493_v22  ;;  %v6505_v30 = vadd.f32 %v633_v40, %v6370_v23  ;;  %v635_v27 = vpop.f32.mrb[23].mxu0  ;;  %v6508_v22 = vadd.f32 %v724_v15, %v6377_v25  ;;  %v726_v16 = vpop.f32.mrb[22].mxu1  ;;  %v6527_v15 = vrot.slane %v6361_v18, %v175_v19 }
 0x159   :  { %8461 = vst [vmem:[#allocation48_spill] sm:$0xff] %v6497_v38  ;;  %8462 = vst [vmem:[#allocation49_spill] sm:$0xff] %v6501_v42  ;;  %v6512_v38 = vadd.f32 %v635_v27, %v6380_v26  ;;  %v6515_v17 = vadd.f32 %v726_v16, %v6367_v21  ;;  %v728_v35 = vpop.f32.mrb[23].mxu1  ;;  %v6518_v42 = vrot.slane %v6361_v18, %v167_v37 }
 0x15a   :  { %8463 = vst [vmem:[#allocation50_spill] sm:$0xff] %v6505_v30  ;;  %8464 = vst [vmem:[#allocation51_spill] sm:$0xff] %v6508_v22  ;;  %v6521_v40 = vadd.f32 %v728_v35, %v6377_v25  ;;  %v6524_v30 = vrot.slane %v6361_v18, %v171_v44  ;;  %v6530_v9 = vrot.slane %v6361_v18, %v179_v33  ;;  %v1955_v18 = vsel %vm1953_vm6, 1, %v8425_v14 }
 0x15b   :  { %8465 = vst [vmem:[#allocation52_spill] sm:$0xff] %v6512_v38  ;;  %8466 = vst [vmem:[#allocation53_spill] sm:$0xff] %v6515_v17  ;;  %1957 = vperm.xlu1 %5160, %v1955_v18  }
 0x15c   :  { %8467 = vst [vmem:[#allocation54_spill] sm:$0xff] %v6521_v40 }
 0x15d   :  { %v765_v27 = vpop.f32.mrb[24].mxu0 }
 0x15e   :  { %v6533_v16 = vadd.f32 %v765_v27, %v6518_v42  ;;  %v767_v38 = vpop.f32.mrb[25].mxu0  ;;  %v858_v17 = vpop.f32.mrb[24].mxu1 }
 0x15f   :  { %v6538_v37 = vadd.f32 %v767_v38, %v6524_v30  ;;  %v769_v44 = vpop.f32.mrb[26].mxu0  ;;  %v6541_v19 = vadd.f32 %v858_v17, %v6527_v15  ;;  %v860_v35 = vpop.f32.mrb[25].mxu1 }
 0x160   :  { %8468 = vst [vmem:[#allocation55_spill] sm:$0xff] %v6533_v16  ;;  %v6545_v33 = vadd.f32 %v769_v44, %v6518_v42  ;;  %v771_v27 = vpop.f32.mrb[27].mxu0  ;;  %v6548_v16 = vadd.f32 %v860_v35, %v6530_v9  ;;  %v862_v40 = vpop.f32.mrb[26].mxu1  ;;  %v2240_v35 = vsel %vm2232_vm8, 1, %v8425_v14 }
 0x161   :  { %8469 = vst [vmem:[#allocation56_spill] sm:$0xff] %v6538_v37  ;;  %8470 = vst [vmem:[#allocation57_spill] sm:$0xff] %v6541_v19  ;;  %v6551_v22 = vadd.f32 %v771_v27, %v6524_v30  ;;  %v6554_v38 = vadd.f32 %v862_v40, %v6527_v15  ;;  %v864_v17 = vpop.f32.mrb[27].mxu1  ;;  %v1962_v37 = vsel %vm1954_vm7, 1, %v8425_v14 }
 0x162   :  { %8471 = vst [vmem:[#allocation58_spill] sm:$0xff] %v6545_v33  ;;  %8472 = vst [vmem:[#allocation59_spill] sm:$0xff] %v6548_v16  ;;  %v6558_v19 = vadd.f32 %v864_v17, %v6530_v9  ;;  %1964 = vperm.xlu1 %5160, %v1962_v37  }
 0x163   :  { %8473 = vst [vmem:[#allocation60_spill] sm:$0xff] %v6551_v22  ;;  %8474 = vst [vmem:[#allocation61_spill] sm:$0xff] %v6554_v38 }
 0x164   :  { %8475 = vst [vmem:[#allocation62_spill] sm:$0xff] %v6558_v19 }
 0x165   :  { %v775_v44 = vpop.f32.mrb[28].mxu0 }
 0x166   :  { %v6563_v18 = vadd.f32 %v775_v44, %v6518_v42  ;;  %v777_v27 = vpop.f32.mrb[29].mxu0  ;;  %v868_v16 = vpop.f32.mrb[28].mxu1  ;;  %2242 = vperm.xlu1 %5160, %v2240_v35  }
 0x167   :  { %v6567_v40 = vadd.f32 %v777_v27, %v6524_v30  ;;  %v779_v22 = vpop.f32.mrb[30].mxu0  ;;  %v6570_v17 = vadd.f32 %v868_v16, %v6527_v15  ;;  %v870_v19 = vpop.f32.mrb[29].mxu1  ;;  %v2518_v16 = vsel %vm2510_vm9, 1, %v8425_v14 }
 0x168   :  { %8476 = vst [vmem:[#allocation63_spill] sm:$0xff] %v6563_v18  ;;  %v6573_v37 = vadd.f32 %v779_v22, %v6518_v42  ;;  %v781_v38 = vpop.f32.mrb[31].mxu0  ;;  %v6576_v33 = vadd.f32 %v870_v19, %v6530_v9  ;;  %v872_v44 = vpop.f32.mrb[30].mxu1  ;;  %v2796_v19 = vsel %vm2788_vm10, 1, %v8425_v14  ;;  %vm4840_vm10 = vcmask 31744  }
 0x169   :  { %8477 = vst [vmem:[#allocation64_spill] sm:$0xff] %v6567_v40  ;;  %8478 = vst [vmem:[#allocation65_spill] sm:$0xff] %v6570_v17  ;;  %v6579_v18 = vadd.f32 %v781_v38, %v6524_v30  ;;  %v6582_v27 = vadd.f32 %v872_v44, %v6527_v15  ;;  %v874_v40 = vpop.f32.mrb[31].mxu1 }
 0x16a   :  { %8479 = vst [vmem:[#allocation66_spill] sm:$0xff] %v6573_v37  ;;  %8480 = vst [vmem:[#allocation67_spill] sm:$0xff] %v6576_v33  ;;  %v6586_v17 = vadd.f32 %v874_v40, %v6530_v9  ;;  %2520 = vperm.xlu1 %5160, %v2518_v16  }
 0x16b   :  { %8481 = vst [vmem:[#allocation68_spill] sm:$0xff] %v6579_v18  ;;  %8482 = vst [vmem:[#allocation69_spill] sm:$0xff] %v6582_v27 }
 0x16c   :  { %8483 = vst [vmem:[#allocation70_spill] sm:$0xff] %v6586_v17 }
 0x16d   :  { %v785_v22 = vpop.f32.mrb[32].mxu0 }
 0x16e   :  { %v6591_v35 = vadd.f32 %v785_v22, %v6518_v42  ;;  %v787_v38 = vpop.f32.mrb[33].mxu0  ;;  %v878_v33 = vpop.f32.mrb[32].mxu1  ;;  %2798 = vperm.xlu1 %5160, %v2796_v19  }
 0x16f   :  { %v6595_v44 = vadd.f32 %v787_v38, %v6524_v30  ;;  %v789_v18 = vpop.f32.mrb[34].mxu0  ;;  %v6598_v40 = vadd.f32 %v878_v33, %v6527_v15  ;;  %v880_v17 = vpop.f32.mrb[33].mxu1  ;;  %v3074_v33 = vsel %vm3066_vm11, 1, %v8425_v14 }
 0x170   :  { %8484 = vst [vmem:[#allocation71_spill] sm:$0xff] %v6591_v35  ;;  %v6601_v16 = vadd.f32 %v789_v18, %v6518_v42  ;;  %v791_v27 = vpop.f32.mrb[35].mxu0  ;;  %v6604_v37 = vadd.f32 %v880_v17, %v6530_v9  ;;  %v882_v22 = vpop.f32.mrb[34].mxu1 }
 0x171   :  { %8485 = vst [vmem:[#allocation72_spill] sm:$0xff] %v6595_v44  ;;  %8486 = vst [vmem:[#allocation73_spill] sm:$0xff] %v6598_v40  ;;  %v6607_v35 = vadd.f32 %v791_v27, %v6524_v30  ;;  %v6610_v12 = vadd.f32 %v882_v22, %v6527_v15  ;;  %v884_v38 = vpop.f32.mrb[35].mxu1 }
 0x172   :  { %8487 = vst [vmem:[#allocation74_spill] sm:$0xff] %v6601_v16  ;;  %8488 = vst [vmem:[#allocation75_spill] sm:$0xff] %v6604_v37  ;;  %v6614_v44 = vadd.f32 %v884_v38, %v6530_v9  ;;  %3076 = vperm.xlu1 %5160, %v3074_v33  }
 0x173   :  { %8489 = vst [vmem:[#allocation76_spill] sm:$0xff] %v6607_v35  ;;  %8490 = vst [vmem:[#allocation77_spill] sm:$0xff] %v6610_v12 }
 0x174   :  { %8491 = vst [vmem:[#allocation78_spill] sm:$0xff] %v6614_v44 }
 0x175   :  { %v795_v18 = vpop.f32.mrb[36].mxu0 }
 0x176   :  { %v6617_v40 = vadd.f32 %v795_v18, %v6518_v42  ;;  %v797_v17 = vpop.f32.mrb[37].mxu0  ;;  %v888_v37 = vpop.f32.mrb[36].mxu1 }
 0x177   :  { %v6620_v19 = vadd.f32 %v797_v17, %v6524_v30  ;;  %v799_v27 = vpop.f32.mrb[38].mxu0  ;;  %v6623_v22 = vadd.f32 %v888_v37, %v6527_v15  ;;  %v890_v35 = vpop.f32.mrb[37].mxu1 }
 0x178   :  { %8492 = vst [vmem:[#allocation79_spill] sm:$0xff] %v6617_v40  ;;  %v6626_v12 = vadd.f32 %v799_v27, %v6518_v42  ;;  %v801_v38 = vpop.f32.mrb[39].mxu0  ;;  %v6629_v33 = vadd.f32 %v890_v35, %v6530_v9  ;;  %v892_v44 = vpop.f32.mrb[38].mxu1 }
 0x179   :  { %8493 = vst [vmem:[#allocation80_spill] sm:$0xff] %v6620_v19  ;;  %8494 = vst [vmem:[#allocation81_spill] sm:$0xff] %v6623_v22  ;;  %v6632_v18 = vadd.f32 %v801_v38, %v6524_v30  ;;  %v6635_v16 = vadd.f32 %v892_v44, %v6527_v15  ;;  %v894_v17 = vpop.f32.mrb[39].mxu1 }
 0x17a   :  { %8495 = vst [vmem:[#allocation82_spill] sm:$0xff] %v6626_v12  ;;  %8496 = vst [vmem:[#allocation83_spill] sm:$0xff] %v6629_v33  ;;  %v6638_v19 = vadd.f32 %v894_v17, %v6530_v9 }
 0x17b   :  { %8497 = vst [vmem:[#allocation84_spill] sm:$0xff] %v6632_v18  ;;  %8498 = vst [vmem:[#allocation85_spill] sm:$0xff] %v6635_v16 }
 0x17c   :  { %8499 = vst [vmem:[#allocation86_spill] sm:$0xff] %v6638_v19 }
 0x17d   :  { %v805_v37 = vpop.f32.mrb[40].mxu0 }
 0x17e   :  { %v6641_v22 = vadd.f32 %v805_v37, %v6518_v42  ;;  %v807_v27 = vpop.f32.mrb[41].mxu0  ;;  %v898_v40 = vpop.f32.mrb[40].mxu1 }
 0x17f   :  { %v6644_v35 = vadd.f32 %v807_v27, %v6524_v30  ;;  %v809_v33 = vpop.f32.mrb[42].mxu0  ;;  %v6647_v38 = vadd.f32 %v898_v40, %v6527_v15  ;;  %v900_v18 = vpop.f32.mrb[41].mxu1 }
 0x180   :  { %8500 = vst [vmem:[#allocation87_spill] sm:$0xff] %v6641_v22  ;;  %v6650_v44 = vadd.f32 %v809_v33, %v6518_v42  ;;  %v811_v16 = vpop.f32.mrb[43].mxu0  ;;  %v6653_v17 = vadd.f32 %v900_v18, %v6530_v9  ;;  %v902_v19 = vpop.f32.mrb[42].mxu1 }
 0x181   :  { %8501 = vst [vmem:[#allocation88_spill] sm:$0xff] %v6644_v35  ;;  %8502 = vst [vmem:[#allocation89_spill] sm:$0xff] %v6647_v38  ;;  %v6656_v37 = vadd.f32 %v811_v16, %v6524_v30  ;;  %v6659_v12 = vadd.f32 %v902_v19, %v6527_v15  ;;  %v904_v27 = vpop.f32.mrb[43].mxu1 }
 0x182   :  { %8503 = vst [vmem:[#allocation90_spill] sm:$0xff] %v6650_v44  ;;  %8504 = vst [vmem:[#allocation91_spill] sm:$0xff] %v6653_v17  ;;  %v6662_v35 = vadd.f32 %v904_v27, %v6530_v9 }
 0x183   :  { %8505 = vst [vmem:[#allocation92_spill] sm:$0xff] %v6656_v37  ;;  %8506 = vst [vmem:[#allocation93_spill] sm:$0xff] %v6659_v12  ;;  %v582_v12 = vadd.f32 %v6372_v10, %v6380_v26 }
 0x184   :  { %8507 = vst [vmem:[#allocation94_spill] sm:$0xff] %v6662_v35 }
 0x185   :  { %v815_v40 = vpop.f32.mrb[44].mxu0 }
 0x186   :  { %v6665_v38 = vadd.f32 %v815_v40, %v6518_v42  ;;  %v817_v33 = vpop.f32.mrb[45].mxu0  ;;  %v908_v22 = vpop.f32.mrb[44].mxu1  ;;  %v580_v40 = vadd.f32 %v6364_v20, %v6370_v23 }
 0x187   :  { %v6668_v18 = vadd.f32 %v817_v33, %v6524_v30  ;;  %v819_v17 = vpop.f32.mrb[46].mxu0  ;;  %v6671_v16 = vadd.f32 %v908_v22, %v6527_v15  ;;  %v910_v43 = vpop.f32.mrb[45].mxu1  ;;  %v673_v33 = vadd.f32 %v6374_v24, %v6367_v21  ;;  %v675_v22 = vadd.f32 %v6382_v28, %v6377_v25 }
 0x188   :  { %8508 = vst [vmem:[#allocation95_spill] sm:$0xff] %v6665_v38  ;;  %v821_v19 = vpop.f32.mrb[47].mxu0  ;;  %v6674_v37 = vadd.f32 %v910_v43, %v6530_v9  ;;  %v912_v27 = vpop.f32.mrb[46].mxu1 }
 0x189   :  { %8509 = vst [vmem:[#allocation96_spill] sm:$0xff] %v6668_v18  ;;  %8510 = vst [vmem:[#allocation97_spill] sm:$0xff] %v6671_v16  ;;  %v914_v35 = vpop.f32.mrb[47].mxu1 }
 0x18a   :  { %8511 = vst [vmem:[#allocation98_spill] sm:$0xff] %v6674_v37 }
 0x18d   :  { %v1254_v44 = vpop.f32.mrb[48].mxu0 }
 0x18e   :  { %v1302_v8 = vadd.f32 %v1254_v44, %v580_v40  ;;  %v1295_v39 = vpop.f32.mrb[48].mxu1  ;;  %v1256_v41 = vpop.f32.mrb[49].mxu0  ;;  %v915_v40 = vadd.f32 %v914_v35, %v6530_v9 }
 0x18f   :  { %v1304_v43 = vadd.f32 %v1295_v39, %v673_v33  ;;  %v1303_v36 = vadd.f32 %v1256_v41, %v582_v12  ;;  %v1297_v37 = vpop.f32.mrb[49].mxu1  ;;  %v1258_v18 = vpop.f32.mrb[50].mxu0 }
 0x190   :  { %v5004_v16 = vmul.f32 -1.442695, %v1302_v8  ;;  %v1305_v38 = vadd.f32 %v1297_v37, %v675_v22  ;;  %v1259_v20 = vpop.f32.mrb[51].mxu0  ;;  %v1299_v23 = vpop.f32.mrb[50].mxu1 }
 0x191   :  { %v5005_v34 = vmul.f32 -1.442695, %v1303_v36  ;;  %v1300_v10 = vpop.f32.mrb[51].mxu1  ;;  %v820_v36 = vadd.f32 %v819_v17, %v6518_v42  ;;  %v6691_v35 = vpop.permute.xlu0 %1679 }
 0x192   :  { %5279 = vpow2.f32 %v5004_v16  ;;  %v5007_v21 = vmul.f32 -1.442695, %v1305_v38  ;;  %v913_v38 = vadd.f32 %v912_v27, %v6527_v15  ;;  %8512 = vst [vmem:[#allocation99_spill] sm:$0xff] %v6691_v35  ;;  %vm1681_vm12 = vcmp.eq.s32.totalorder %v6691_v35, 1 }
 0x193   :  { %5281 = vpow2.f32 %v5005_v34  ;;  %v822_v34 = vadd.f32 %v821_v19, %v6524_v30  ;;  %vm5012_vm13 = vmpackc.low %vm1681_vm12, %vm1681_vm12 }
 0x194   :  { %5283 = vpow2.f32 %v5007_v21 }
 0x195   :  { %5285 = vtanh.f32 %v1304_v43 }
 0x19c   :  { %v5280_v24 = vpop.eup %5279 }
 0x19d   :  { %v5282_v26 = vpop.eup %5281  ;;  %v1596_v31 = vadd.f32 1.0, %v5280_v24 }
 0x19e   :  { %v1597_v25 = vadd.f32 1.0, %v5282_v26  ;;  %v5284_v28 = vpop.eup %5283 }
 0x19f   :  { %5287 = vrcp.f32 %v1596_v31  ;;  %v5286_v39 = vpop.eup %5285  ;;  %v1599_v12 = vadd.f32 1.0, %v5284_v28 }
 0x1a0   :  { %5289 = vrcp.f32 %v1597_v25 }
 0x1a1   :  { %5291 = vrcp.f32 %v1599_v12 }
 0x1a9   :  { %v5288_v41 = vpop.eup %5287 }
 0x1aa   :  { %v5290_v8 = vpop.eup %5289  ;;  %v1634_v44 = vmul.f32 %v5288_v41, %v5286_v39 }
 0x1ab   :  { %v1633_v37 = vmul.f32 0.0, %v5290_v8  ;;  %v5292_v21 = vpop.eup %5291 }
 0x1ad   :  { %v6687_v18 = vadd.f32 %v1634_v44, %v1633_v37  ;;  %v1532_v16 = vpop.f32.mrb[52].mxu0  ;;  %v6793_v37 = vld [vmem:[#allocation6 + $0x68] ss:$16 sps:$4 sm:$0xff]  }
 0x1ae   :  { %v1580_v31 = vadd.f32 %v1532_v16, %v820_v36  ;;  %v1573_v33 = vpop.f32.mrb[52].mxu1  ;;  %v1534_v22 = vpop.f32.mrb[53].mxu0  ;;  %8523 = vst [vmem:[#allocation106_spill] sm:$0xff] %v6793_v37  ;;  %v6796_v36 = vld [vmem:[#allocation6 + $0x84] ss:$16 sps:$4 sm:$0xff]  }
 0x1af   :  { %5293 = vtanh.f32 %v6687_v18  ;;  %v1582_v43 = vadd.f32 %v1573_v33, %v913_v38  ;;  %v1581_v20 = vadd.f32 %v1534_v22, %v822_v34  ;;  %v1575_v23 = vpop.f32.mrb[53].mxu1  ;;  %v1536_v10 = vpop.f32.mrb[54].mxu0  ;;  %8524 = vst [vmem:[#allocation107_spill] sm:$0xff] %v6796_v36  ;;  %v6799_v34 = vld [vmem:[#allocation6 + $0x8c] ss:$16 sps:$4 sm:$0xff]  }
 0x1b0   :  { %v5008_v42 = vmul.f32 -1.442695, %v1580_v31  ;;  %v1583_v17 = vadd.f32 %v1575_v23, %v915_v40  ;;  %v1537_v30 = vpop.f32.mrb[55].mxu0  ;;  %v1577_v19 = vpop.f32.mrb[54].mxu1  ;;  %8525 = vst [vmem:[#allocation108_spill] sm:$0xff] %v6799_v34 }
 0x1b1   :  { %v5009_v15 = vmul.f32 -1.442695, %v1581_v20  ;;  %v1578_v27 = vpop.f32.mrb[55].mxu1  ;;  %v6802_v38 = vld [vmem:[#allocation6 + $0x80] ss:$16 sps:$4 sm:$0xff]  }
 0x1b2   :  { %5295 = vpow2.f32 %v5008_v42  ;;  %v5011_v24 = vmul.f32 -1.442695, %v1583_v17  ;;  %8526 = vst [vmem:[#allocation109_spill] sm:$0xff] %v6802_v38  ;;  %v6805_v16 = vld [vmem:[#allocation6 + $0x88] ss:$16 sps:$4 sm:$0xff]  }
 0x1b3   :  { %5297 = vpow2.f32 %v5009_v15  ;;  %8527 = vst [vmem:[#allocation110_spill] sm:$0xff] %v6805_v16  ;;  %v6808_v40 = vld [vmem:[#allocation6 + $0xa4] ss:$16 sps:$4 sm:$0xff]   ;;  %v6811_v31 = vld [vmem:[#allocation6 + $0xac] ss:$16 sps:$4 sm:$0xff]  }
 0x1b4   :  { %5299 = vpow2.f32 %v5011_v24  ;;  %8528 = vst [vmem:[#allocation111_spill] sm:$0xff] %v6808_v40  ;;  %8529 = vst [vmem:[#allocation112_spill] sm:$0xff] %v6811_v31  ;;  %v6814_v33 = vld [vmem:[#allocation6 + $0xa0] ss:$16 sps:$4 sm:$0xff]   ;;  %v6817_v22 = vld [vmem:[#allocation6 + $0xa8] ss:$16 sps:$4 sm:$0xff]  }
 0x1b5   :  { %5301 = vtanh.f32 %v1582_v43  ;;  %8530 = vst [vmem:[#allocation113_spill] sm:$0xff] %v6814_v33  ;;  %8531 = vst [vmem:[#allocation114_spill] sm:$0xff] %v6817_v22  ;;  %v6820_v43 = vld [vmem:[#allocation6 + $0xc4] ss:$16 sps:$4 sm:$0xff]   ;;  %v6823_v20 = vld [vmem:[#allocation6 + $0xcc] ss:$16 sps:$4 sm:$0xff]  }
 0x1b6   :  { %8532 = vst [vmem:[#allocation115_spill] sm:$0xff] %v6820_v43  ;;  %8533 = vst [vmem:[#allocation116_spill] sm:$0xff] %v6823_v20  ;;  %v6826_v23 = vld [vmem:[#allocation6 + $0xc0] ss:$16 sps:$4 sm:$0xff]   ;;  %v6829_v10 = vld [vmem:[#allocation6 + $0xc8] ss:$16 sps:$4 sm:$0xff]  }
 0x1b7   :  { %8534 = vst [vmem:[#allocation117_spill] sm:$0xff] %v6826_v23  ;;  %8535 = vst [vmem:[#allocation118_spill] sm:$0xff] %v6829_v10  ;;  %v6832_v42 = vld [vmem:[#allocation6 + $0xe4] ss:$16 sps:$4 sm:$0xff]   ;;  %v6835_v17 = vld [vmem:[#allocation6 + $0xec] ss:$16 sps:$4 sm:$0xff]  }
 0x1b8   :  { %8536 = vst [vmem:[#allocation119_spill] sm:$0xff] %v6832_v42  ;;  %8537 = vst [vmem:[#allocation120_spill] sm:$0xff] %v6835_v17  ;;  %v6838_v30 = vld [vmem:[#allocation6 + $0xe0] ss:$16 sps:$4 sm:$0xff]   ;;  %v6841_v19 = vld [vmem:[#allocation6 + $0xe8] ss:$16 sps:$4 sm:$0xff]  }
 0x1b9   :  { %v5294_v9 = vpop.eup %5293  ;;  %8538 = vst [vmem:[#allocation121_spill] sm:$0xff] %v6838_v30  ;;  %8539 = vst [vmem:[#allocation122_spill] sm:$0xff] %v6841_v19  ;;  %v6844_v15 = vld [vmem:[#allocation8 + $0x4] ss:$16 sps:$4 sm:$0xff]  }
 0x1ba   :  { %v6693_v26 = vmul.f32 %v5294_v9, %v5292_v21  ;;  %8540 = vst [vmem:[#allocation123_spill] sm:$0xff] %v6844_v15 }
 0x1bc   :  { %v5296_v25 = vpop.eup %5295  ;;  %v5013_v28 = vpack.c.bf16 %v6693_v26, %v6693_v26 }
 0x1bd   :  { %v5298_v39 = vpop.eup %5297  ;;  %v1650_v41 = vadd.f32 1.0, %v5296_v25 }
 0x1be   :  { %v1651_v8 = vadd.f32 1.0, %v5298_v39  ;;  %5014 = vmatmul.mubr.msk.bf16.vlgmr.msra.gmra.mrb[56].mxu0 %vm5012_vm13, %v5013_v28  ;;  %5017 = vmatmul.mubr.msk.bf16.vlgmr.msra.gmra.mrb[56].mxu1 %vm5012_vm13, %v5013_v28  ;;  %v8541_v39 = vld [vmem:[#allocation13_spill] sm:$0xff] }
 0x1bf   :  { %5303 = vrcp.f32 %v1650_v41  ;;  %1794 = vmatpush1.bf16.msra.mxu0 %v6217_v48  ;;  %1835 = vmatpush1.bf16.msra.mxu1 %v6219_v49  ;;  %v5300_v48 = vpop.eup %5299 }
 0x1c0   :  { %5305 = vrcp.f32 %v1651_v8  ;;  %1795 = vmatprep.subr.bf16.mxu0 %v6221_v50  ;;  %1836 = vmatprep.subr.bf16.mxu1 %v6224_v51  ;;  %v5302_v49 = vpop.eup %5301  ;;  %v8542_v8 = vld [vmem:[#allocation14_spill] sm:$0xff] }
 0x1c1   :  { %1825 = vmatprep.mubr.bf16.mxu0 %v8425_v14  ;;  %1866 = vmatprep.mubr.bf16.mxu1 %v8425_v14 }
 0x1c3   :  { %1796 = vmatpush1.bf16.msra.mxu0 %v6231_v53  ;;  %1837 = vmatpush1.bf16.msra.mxu1 %v6236_v55  ;;  %v1653_v53 = vadd.f32 1.0, %v5300_v48 }
 0x1c4   :  { %1797 = vmatprep.subr.bf16.mxu0 %v6238_v56  ;;  %1838 = vmatprep.subr.bf16.mxu1 %v6241_v57  ;;  %v8513_v56 = vld [vmem:[#allocation11_spill] sm:$0xff]  ;;  %v8514_v57 = vld [vmem:[#allocation12_spill] sm:$0xff] }
 0x1c5   :  { %5307 = vrcp.f32 %v1653_v53 }
 0x1c7   :  { %1798 = vmatpush1.bf16.msra.mxu0 %v6246_v58  ;;  %1839 = vmatpush1.bf16.msra.mxu1 %v6250_v59 }
 0x1c8   :  { %1799 = vmatprep.subr.bf16.mxu0 %v6252_v60  ;;  %1840 = vmatprep.subr.bf16.mxu1 %v6255_v61  ;;  %v6734_v60 = vpop.permute.xlu0 %1686 }
 0x1c9   :  { %v5304_v50 = vpop.eup %5303  ;;  %8515 = vst [vmem:[#allocation11_spill] sm:$0xff] %v6734_v60  ;;  %vm1688_vm14 = vcmp.eq.s32.totalorder %v6734_v60, 1 }
 0x1ca   :  { %v5306_v51 = vpop.eup %5305  ;;  %v1671_v12 = vmul.f32 %v5304_v50, %v5302_v49  ;;  %vm5018_vm15 = vmpackc.low %vm1688_vm14, %vm1688_vm14 }
 0x1cb   :  { %v1670_v44 = vmul.f32 0.0, %v5306_v51  ;;  %1800 = vmatpush1.bf16.msra.mxu0 %v6258_v62  ;;  %1841 = vmatpush1.bf16.msra.mxu1 %v6262_v63  ;;  %v6743_v63 = vld [vmem:[#allocation6 + $0x4] ss:$16 sps:$4 sm:$0xff]  }
 0x1cc   :  { %1801 = vmatprep.subr.bf16.mxu0 %v6264_v1  ;;  %1842 = vmatprep.subr.bf16.mxu1 %v6267_v2  ;;  %v6746_v1 = vld [vmem:[#allocation6 + $0xc] ss:$16 sps:$4 sm:$0xff]   ;;  %v6755_v2 = vld [vmem:[#allocation6 + $0x8] ss:$16 sps:$4 sm:$0xff]  }
 0x1cd   :  { %v6719_v55 = vadd.f32 %v1671_v12, %v1670_v44 }
 0x1cf   :  { %5309 = vtanh.f32 %v6719_v55  ;;  %1802 = vmatpush1.bf16.msra.mxu0 %v6270_v3  ;;  %1843 = vmatpush1.bf16.msra.mxu1 %v6274_v4  ;;  %v5308_v58 = vpop.eup %5307  ;;  %v6758_v3 = vld [vmem:[#allocation6 + $0x24] ss:$16 sps:$4 sm:$0xff]   ;;  %v6761_v4 = vld [vmem:[#allocation6 + $0x2c] ss:$16 sps:$4 sm:$0xff]  }
 0x1d0   :  { %1803 = vmatprep.subr.bf16.mxu0 %v6276_v5  ;;  %1844 = vmatprep.subr.bf16.mxu1 %v6279_v6  ;;  %v6766_v5 = vld [vmem:[#allocation6 + $0x20] ss:$16 sps:$4 sm:$0xff]   ;;  %v6769_v6 = vld [vmem:[#allocation6 + $0x28] ss:$16 sps:$4 sm:$0xff]  }
 0x1d3   :  { %1804 = vmatpush1.bf16.msra.mxu0 %v8513_v56  ;;  %1845 = vmatpush1.bf16.msra.mxu1 %v6286_v11  ;;  %v6775_v11 = vld [vmem:[#allocation6 + $0x4c] ss:$16 sps:$4 sm:$0xff]  }
 0x1d4   :  { %1805 = vmatprep.subr.bf16.mxu0 %v6288_v13  ;;  %1846 = vmatprep.subr.bf16.mxu1 %v8514_v57  ;;  %8517 = vst [vmem:[#allocation100_spill] sm:$0xff] %v6775_v11  ;;  %v6778_v13 = vld [vmem:[#allocation6 + $0x40] ss:$16 sps:$4 sm:$0xff]  }
 0x1d5   :  { %8518 = vst [vmem:[#allocation101_spill] sm:$0xff] %v6778_v13 }
 0x1d7   :  { %1806 = vmatpush1.bf16.msra.mxu0 %v6294_v46  ;;  %1847 = vmatpush1.bf16.msra.mxu1 %v6298_v47  ;;  %v6781_v46 = vld [vmem:[#allocation6 + $0x48] ss:$16 sps:$4 sm:$0xff]   ;;  %v6784_v47 = vld [vmem:[#allocation6 + $0x64] ss:$16 sps:$4 sm:$0xff]  }
 0x1d8   :  { %1807 = vmatprep.subr.bf16.mxu0 %v6300_v52  ;;  %1848 = vmatprep.subr.bf16.mxu1 %v6303_v54  ;;  %8519 = vst [vmem:[#allocation102_spill] sm:$0xff] %v6781_v46  ;;  %8520 = vst [vmem:[#allocation103_spill] sm:$0xff] %v6784_v47  ;;  %v6787_v52 = vld [vmem:[#allocation6 + $0x6c] ss:$16 sps:$4 sm:$0xff]   ;;  %v6790_v54 = vld [vmem:[#allocation6 + $0x60] ss:$16 sps:$4 sm:$0xff]  }
 0x1d9   :  { %v5310_v59 = vpop.eup %5309  ;;  %8521 = vst [vmem:[#allocation104_spill] sm:$0xff] %v6787_v52  ;;  %8522 = vst [vmem:[#allocation105_spill] sm:$0xff] %v6790_v54 }
 0x1da   :  { %v6737_v61 = vmul.f32 %v5310_v59, %v5308_v58 }
 0x1db   :  { %1808 = vmatpush1.bf16.msra.mxu0 %v6306_v0  ;;  %1849 = vmatpush1.bf16.msra.mxu1 %v6310_v7  ;;  %v6752_v0 = vld [vmem:[#allocation6] ss:$16 sps:$4 sm:$0xff]   ;;  %v6772_v7 = vld [vmem:[#allocation6 + $0x44] ss:$16 sps:$4 sm:$0xff]  }
 0x1dc   :  { %v5019_v62 = vpack.c.bf16 %v6737_v61, %v6737_v61  ;;  %1984 = vmatprep.subr.bf16.mxu0 %v6743_v63  ;;  %2025 = vmatprep.subr.bf16.mxu1 %v6746_v1  ;;  %8516 = vst [vmem:[#allocation12_spill] sm:$0xff] %v6772_v7 }
 0x1de   :  { %5020 = vmatmul.mubr.msk.bf16.vlgmr.msra.gmra.mrb[60].mxu0 %vm5018_vm15, %v5019_v62  ;;  %5023 = vmatmul.mubr.msk.bf16.vlgmr.msra.gmra.mrb[60].mxu1 %vm5018_vm15, %v5019_v62 }
 0x1df   :  { %1985 = vmatpush1.bf16.msra.mxu0 %v6752_v0  ;;  %2026 = vmatpush1.bf16.msra.mxu1 %v6755_v2 }
 0x1e0   :  { %1986 = vmatprep.subr.bf16.mxu0 %v6758_v3  ;;  %2027 = vmatprep.subr.bf16.mxu1 %v6761_v4 }
 0x1e1   :  { %2016 = vmatprep.mubr.bf16.mxu0 %v8425_v14  ;;  %2057 = vmatprep.mubr.bf16.mxu1 %v8425_v14 }
 0x1e3   :  { %1987 = vmatpush1.bf16.msra.mxu0 %v6766_v5  ;;  %2028 = vmatpush1.bf16.msra.mxu1 %v6769_v6 }
 0x1e4   :  { %1988 = vmatprep.subr.bf16.mxu0 %v6772_v7  ;;  %2029 = vmatprep.subr.bf16.mxu1 %v6775_v11 }
 0x1e7   :  { %1989 = vmatpush1.bf16.msra.mxu0 %v6778_v13  ;;  %2030 = vmatpush1.bf16.msra.mxu1 %v6781_v46 }
 0x1e8   :  { %1990 = vmatprep.subr.bf16.mxu0 %v6784_v47  ;;  %2031 = vmatprep.subr.bf16.mxu1 %v6787_v52 }
 0x1eb   :  { %1991 = vmatpush1.bf16.msra.mxu0 %v6790_v54  ;;  %2032 = vmatpush1.bf16.msra.mxu1 %v6793_v37 }
 0x1ec   :  { %1992 = vmatprep.subr.bf16.mxu0 %v6796_v36  ;;  %2033 = vmatprep.subr.bf16.mxu1 %v6799_v34 }
 0x1ef   :  { %1993 = vmatpush1.bf16.msra.mxu0 %v6802_v38  ;;  %2034 = vmatpush1.bf16.msra.mxu1 %v6805_v16 }
 0x1f0   :  { %1994 = vmatprep.subr.bf16.mxu0 %v6808_v40  ;;  %2035 = vmatprep.subr.bf16.mxu1 %v6811_v31 }
 0x1f3   :  { %1995 = vmatpush1.bf16.msra.mxu0 %v6814_v33  ;;  %2036 = vmatpush1.bf16.msra.mxu1 %v6817_v22 }
 0x1f4   :  { %1996 = vmatprep.subr.bf16.mxu0 %v6820_v43  ;;  %2037 = vmatprep.subr.bf16.mxu1 %v6823_v20 }
 0x1f7   :  { %1997 = vmatpush1.bf16.msra.mxu0 %v6826_v23  ;;  %2038 = vmatpush1.bf16.msra.mxu1 %v6829_v10 }
 0x1f8   :  { %1998 = vmatprep.subr.bf16.mxu0 %v6832_v42  ;;  %2039 = vmatprep.subr.bf16.mxu1 %v6835_v17 }
 0x1fb   :  { %1999 = vmatpush1.bf16.msra.mxu0 %v6838_v30  ;;  %2040 = vmatpush1.bf16.msra.mxu1 %v6841_v19 }
 0x1fc   :  { %2071 = vmatprep.subr.bf16.mxu0 %v6844_v15  ;;  %2112 = vmatprep.subr.bf16.mxu1 %v6199_v45 }
 0x291   :  { %v1740_v27 = vpop.f32.mrb[56].mxu0  ;;  %v1781_v21 = vpop.f32.mrb[56].mxu1 }
 0x292   :  { %v1788_v9 = vadd.f32 %v1740_v27, %v6385_v29  ;;  %v1790_v24 = vadd.f32 %v1781_v21, %v6391_v32  ;;  %v1742_v25 = vpop.f32.mrb[57].mxu0  ;;  %v1783_v28 = vpop.f32.mrb[57].mxu1  ;;  %v1683_v21 = vsel %vm1681_vm12, %v6687_v18, 0.0 }
 0x293   :  { %v1789_v41 = vadd.f32 %v1742_v25, %v8541_v39  ;;  %v1791_v48 = vadd.f32 %v1783_v28, %v8542_v8  ;;  %v1744_v49 = vpop.f32.mrb[58].mxu0  ;;  %v1785_v50 = vpop.f32.mrb[58].mxu1 }
 0x294   :  { %v5024_v51 = vmul.f32 -1.442695, %v1788_v9  ;;  %v1745_v12 = vpop.f32.mrb[59].mxu0  ;;  %v1786_v53 = vpop.f32.mrb[59].mxu1  ;;  %v8545_v50 = vld [vmem:[#allocation97_spill] sm:$0xff] }
 0x295   :  { %v5025_v44 = vmul.f32 -1.442695, %v1789_v41  ;;  %v5027_v45 = vmul.f32 -1.442695, %v1791_v48  ;;  %v6855_v28 = vpop.permute.xlu1 %1957  ;;  %v8544_v48 = vld [vmem:[#allocation95_spill] sm:$0xff] }
 0x296   :  { %5311 = vpow2.f32 %v5024_v51  ;;  %8543 = vst [vmem:[#allocation13_spill] sm:$0xff] %v6855_v28  ;;  %vm1959_vm0 = vcmp.eq.s32.totalorder %v6855_v28, 1  ;;  %v6924_v28 = vld [vmem:[#allocation8 + $0x84] ss:$16 sps:$4 sm:$0xff]  }
 0x297   :  { %5313 = vpow2.f32 %v5025_v44  ;;  %v8546_v44 = vld [vmem:[#allocation96_spill] sm:$0xff] }
 0x298   :  { %5315 = vpow2.f32 %v5027_v45 }
 0x299   :  { %5317 = vtanh.f32 %v1790_v24 }
 0x2a0   :  { %v5312_v56 = vpop.eup %5311 }
 0x2a1   :  { %v5314_v57 = vpop.eup %5313  ;;  %v1891_v29 = vadd.f32 1.0, %v5312_v56  ;;  %v8547_v56 = vld [vmem:[#allocation98_spill] sm:$0xff] }
 0x2a2   :  { %v1892_v32 = vadd.f32 1.0, %v5314_v57  ;;  %v5316_v58 = vpop.eup %5315 }
 0x2a3   :  { %5319 = vrcp.f32 %v1891_v29  ;;  %v5318_v59 = vpop.eup %5317  ;;  %v1894_v9 = vadd.f32 1.0, %v5316_v58 }
 0x2a4   :  { %5321 = vrcp.f32 %v1892_v32 }
 0x2a5   :  { %5323 = vrcp.f32 %v1894_v9 }
 0x2ad   :  { %v5320_v62 = vpop.eup %5319 }
 0x2ae   :  { %v5322_v27 = vpop.eup %5321  ;;  %v1912_v25 = vmul.f32 %v5320_v62, %v5318_v59 }
 0x2af   :  { %v1911_v39 = vmul.f32 %v5322_v27, %v1683_v21  ;;  %v5324_v9 = vpop.eup %5323 }
 0x2b1   :  { %v1913_v41 = vadd.f32 %v1912_v25, %v1911_v39  ;;  %v1827_v24 = vpop.f32.mrb[60].mxu0  ;;  %v1868_v8 = vpop.f32.mrb[60].mxu1 }
 0x2b2   :  { %v1875_v49 = vadd.f32 %v1827_v24, %v8544_v48  ;;  %v1877_v51 = vadd.f32 %v1868_v8, %v8545_v50  ;;  %v1829_v12 = vpop.f32.mrb[61].mxu0  ;;  %v1870_v53 = vpop.f32.mrb[61].mxu1 }
 0x2b3   :  { %5325 = vtanh.f32 %v1913_v41  ;;  %v6862_v18 = vsel %vm1959_vm0, %v1913_v41, %v1683_v21  ;;  %v1876_v45 = vadd.f32 %v1829_v12, %v8546_v44  ;;  %v1878_v57 = vadd.f32 %v1870_v53, %v8547_v56  ;;  %v1831_v29 = vpop.f32.mrb[62].mxu0  ;;  %v1872_v32 = vpop.f32.mrb[62].mxu1  ;;  %v6875_v53 = vld [vmem:[#allocation8] ss:$16 sps:$4 sm:$0xff]   ;;  %v6881_v44 = vld [vmem:[#allocation8 + $0x24] ss:$16 sps:$4 sm:$0xff]  }
 0x2b4   :  { %v5028_v58 = vmul.f32 -1.442695, %v1875_v49  ;;  %v1832_v59 = vpop.f32.mrb[63].mxu0  ;;  %v1873_v62 = vpop.f32.mrb[63].mxu1  ;;  %v1682_v21 = vsel %vm1681_vm12, %v6693_v26, 0.0 }
 0x2b5   :  { %v5029_v27 = vmul.f32 -1.442695, %v1876_v45  ;;  %v5031_v39 = vmul.f32 -1.442695, %v1878_v57  ;;  %v6878_v26 = vld [vmem:[#allocation8 + $0x8] ss:$16 sps:$4 sm:$0xff]  }
 0x2b6   :  { %5327 = vpow2.f32 %v5028_v58  ;;  %v6884_v45 = vld [vmem:[#allocation8 + $0x2c] ss:$16 sps:$4 sm:$0xff]   ;;  %v6892_v56 = vld [vmem:[#allocation8 + $0x28] ss:$16 sps:$4 sm:$0xff]   ;;  %v6895_v57 = vld [vmem:[#allocation8 + $0x44] ss:$16 sps:$4 sm:$0xff]  }
 0x2b7   :  { %5329 = vpow2.f32 %v5029_v27  ;;  %v6898_v29 = vld [vmem:[#allocation8 + $0x4c] ss:$16 sps:$4 sm:$0xff]   ;;  %v6901_v59 = vld [vmem:[#allocation8 + $0x40] ss:$16 sps:$4 sm:$0xff]   ;;  %v6904_v62 = vld [vmem:[#allocation8 + $0x48] ss:$16 sps:$4 sm:$0xff]  }
 0x2b8   :  { %5331 = vpow2.f32 %v5031_v39 }
 0x2b9   :  { %5333 = vtanh.f32 %v1877_v51  ;;  %v6889_v51 = vld [vmem:[#allocation8 + $0x20] ss:$16 sps:$4 sm:$0xff]  }
 0x2bd   :  { %v5326_v25 = vpop.eup %5325 }
 0x2be   :  { %v1915_v24 = vmul.f32 %v5326_v25, %v5324_v9  ;;  %v6907_v9 = vld [vmem:[#allocation8 + $0x64] ss:$16 sps:$4 sm:$0xff]   ;;  %v6910_v25 = vld [vmem:[#allocation8 + $0x6c] ss:$16 sps:$4 sm:$0xff]  }
 0x2bf   :  { %8548 = vst [vmem:[#allocation14_spill] sm:$0xff] %v6910_v25 }
 0x2c0   :  { %v5328_v41 = vpop.eup %5327  ;;  %v6871_v8 = vsel %vm1959_vm0, %v1915_v24, %v1682_v21  ;;  %v1690_v24 = vsel %vm1688_vm14, %v6719_v55, 0.0 }
 0x2c1   :  { %v5330_v48 = vpop.eup %5329  ;;  %v1983_v49 = vpack.c.bf16 %v6871_v8, %v6871_v8  ;;  %v1928_v50 = vadd.f32 1.0, %v5328_v41 }
 0x2c2   :  { %v1929_v12 = vadd.f32 1.0, %v5330_v48  ;;  %v5332_v32 = vpop.eup %5331 }
 0x2c3   :  { %5335 = vrcp.f32 %v1928_v50  ;;  %2017 = vmatmul.mubr.bf16.vlgmr.msra.gmra.mrb[64].mxu0 %v1983_v49  ;;  %2058 = vmatmul.mubr.bf16.vlgmr.msra.gmra.mrb[64].mxu1 %v1983_v49  ;;  %v5334_v58 = vpop.eup %5333  ;;  %v1931_v41 = vadd.f32 1.0, %v5332_v32  ;;  %v6916_v49 = vld [vmem:[#allocation8 + $0x60] ss:$16 sps:$4 sm:$0xff]   ;;  %v6919_v50 = vld [vmem:[#allocation8 + $0x68] ss:$16 sps:$4 sm:$0xff]  }
 0x2c4   :  { %5337 = vrcp.f32 %v1929_v12  ;;  %2072 = vmatpush1.bf16.msra.mxu0 %v6875_v53  ;;  %2113 = vmatpush1.bf16.msra.mxu1 %v6878_v26  ;;  %v6922_v12 = vpop.permute.xlu1 %1964  ;;  %v6935_v32 = vld [vmem:[#allocation8 + $0x80] ss:$16 sps:$4 sm:$0xff]  }
 0x2c5   :  { %2073 = vmatprep.subr.bf16.mxu0 %v6881_v44  ;;  %2114 = vmatprep.subr.bf16.mxu1 %v6884_v45  ;;  %8549 = vst [vmem:[#allocation95_spill] sm:$0xff] %v6922_v12  ;;  %vm1966_vm1 = vcmp.eq.s32.totalorder %v6922_v12, 1  ;;  %5339 = vrcp.f32 %v1931_v41  ;;  %8550 = vst [vmem:[#allocation97_spill] sm:$0xff] %v6935_v32  ;;  %v6956_v41 = vld [vmem:[#allocation8 + $0xcc] ss:$16 sps:$4 sm:$0xff]  }
 0x2c6   :  { %2103 = vmatprep.mubr.bf16.mxu0 %v8425_v14  ;;  %2144 = vmatprep.mubr.bf16.mxu1 %v8425_v14  ;;  %8557 = vst [vmem:[#allocation128_spill] sm:$0xff] %v6956_v41 }
 0x2c8   :  { %2074 = vmatpush1.bf16.msra.mxu0 %v6889_v51  ;;  %2115 = vmatpush1.bf16.msra.mxu1 %v6892_v56 }
 0x2c9   :  { %2075 = vmatprep.subr.bf16.mxu0 %v6895_v57  ;;  %2116 = vmatprep.subr.bf16.mxu1 %v6898_v29 }
 0x2cc   :  { %2076 = vmatpush1.bf16.msra.mxu0 %v6901_v59  ;;  %2117 = vmatpush1.bf16.msra.mxu1 %v6904_v62 }
 0x2cd   :  { %v5336_v27 = vpop.eup %5335  ;;  %2077 = vmatprep.subr.bf16.mxu0 %v6907_v9  ;;  %2118 = vmatprep.subr.bf16.mxu1 %v6910_v25  ;;  %v6927_v25 = vld [vmem:[#allocation8 + $0x8c] ss:$16 sps:$4 sm:$0xff]  }
 0x2ce   :  { %v5338_v39 = vpop.eup %5337  ;;  %v1949_v21 = vmul.f32 %v5336_v27, %v5334_v58  ;;  %v6938_v58 = vld [vmem:[#allocation8 + $0x88] ss:$16 sps:$4 sm:$0xff]   ;;  %v6941_v27 = vld [vmem:[#allocation8 + $0xa4] ss:$16 sps:$4 sm:$0xff]  }
 0x2cf   :  { %v1948_v48 = vmul.f32 %v5338_v39, %v1690_v24  ;;  %8551 = vst [vmem:[#allocation96_spill] sm:$0xff] %v6938_v58  ;;  %8552 = vst [vmem:[#allocation98_spill] sm:$0xff] %v6941_v27  ;;  %v6944_v39 = vld [vmem:[#allocation8 + $0xac] ss:$16 sps:$4 sm:$0xff]  }
 0x2d0   :  { %2078 = vmatpush1.bf16.msra.mxu0 %v6916_v49  ;;  %2119 = vmatpush1.bf16.msra.mxu1 %v6919_v50  ;;  %8553 = vst [vmem:[#allocation124_spill] sm:$0xff] %v6944_v39 }
 0x2d1   :  { %v1950_v35 = vadd.f32 %v1949_v21, %v1948_v48  ;;  %2079 = vmatprep.subr.bf16.mxu0 %v6924_v28  ;;  %2120 = vmatprep.subr.bf16.mxu1 %v6927_v25  ;;  %v6947_v21 = vld [vmem:[#allocation8 + $0xa0] ss:$16 sps:$4 sm:$0xff]   ;;  %v5340_v48 = vpop.eup %5339 }
 0x2d2   :  { %8554 = vst [vmem:[#allocation125_spill] sm:$0xff] %v6947_v21 }
 0x2d3   :  { %5341 = vtanh.f32 %v1950_v35  ;;  %v6933_v55 = vsel %vm1966_vm1, %v1950_v35, %v1690_v24  ;;  %v6950_v35 = vld [vmem:[#allocation8 + $0xa8] ss:$16 sps:$4 sm:$0xff]   ;;  %v6953_v24 = vld [vmem:[#allocation8 + $0xc4] ss:$16 sps:$4 sm:$0xff]  }
 0x2d4   :  { %2080 = vmatpush1.bf16.msra.mxu0 %v6935_v32  ;;  %2121 = vmatpush1.bf16.msra.mxu1 %v6938_v58  ;;  %8555 = vst [vmem:[#allocation126_spill] sm:$0xff] %v6950_v35  ;;  %8556 = vst [vmem:[#allocation127_spill] sm:$0xff] %v6953_v24  ;;  %v6965_v58 = vld [vmem:[#allocation8 + $0xe4] ss:$16 sps:$4 sm:$0xff]   ;;  %v6974_v32 = vld [vmem:[#allocation8 + $0xe0] ss:$16 sps:$4 sm:$0xff]  }
 0x2d5   :  { %2081 = vmatprep.subr.bf16.mxu0 %v6941_v27  ;;  %2122 = vmatprep.subr.bf16.mxu1 %v6944_v39  ;;  %v6959_v27 = vld [vmem:[#allocation8 + $0xc0] ss:$16 sps:$4 sm:$0xff]   ;;  %v6962_v39 = vld [vmem:[#allocation8 + $0xc8] ss:$16 sps:$4 sm:$0xff]   ;;  %8559 = vst [vmem:[#allocation130_spill] sm:$0xff] %v6965_v58 }
 0x2d6   :  { %8558 = vst [vmem:[#allocation129_spill] sm:$0xff] %v6959_v27 }
 0x2d8   :  { %2082 = vmatpush1.bf16.msra.mxu0 %v6947_v21  ;;  %2123 = vmatpush1.bf16.msra.mxu1 %v6950_v35  ;;  %v6968_v35 = vld [vmem:[#allocation8 + $0xec] ss:$16 sps:$4 sm:$0xff]  }
 0x2d9   :  { %2083 = vmatprep.subr.bf16.mxu0 %v6953_v24  ;;  %2124 = vmatprep.subr.bf16.mxu1 %v6956_v41  ;;  %8560 = vst [vmem:[#allocation131_spill] sm:$0xff] %v6968_v35  ;;  %v1689_v41 = vsel %vm1688_vm14, %v6737_v61, 0.0  ;;  %v7021_v61 = vld [vmem:[#allocation8 + $0xc] ss:$16 sps:$4 sm:$0xff]  }
 0x2da   :  { %8561 = vst [vmem:[#allocation132_spill] sm:$0xff] %v7021_v61 }
 0x2dc   :  { %2084 = vmatpush1.bf16.msra.mxu0 %v6959_v27  ;;  %2125 = vmatpush1.bf16.msra.mxu1 %v6962_v39  ;;  %v6977_v27 = vld [vmem:[#allocation8 + $0xe8] ss:$16 sps:$4 sm:$0xff]  }
 0x2dd   :  { %v5342_v21 = vpop.eup %5341  ;;  %2085 = vmatprep.subr.bf16.mxu0 %v6965_v58  ;;  %2126 = vmatprep.subr.bf16.mxu1 %v6968_v35 }
 0x2de   :  { %v1952_v24 = vmul.f32 %v5342_v21, %v5340_v48  ;;  %v8563_v48 = vld [vmem:[#allocation17_spill] sm:$0xff] }
 0x2e0   :  { %2086 = vmatpush1.bf16.msra.mxu0 %v6974_v32  ;;  %2127 = vmatpush1.bf16.msra.mxu1 %v6977_v27  ;;  %v6982_v58 = vsel %vm1966_vm1, %v1952_v24, %v1689_v41  ;;  %v8562_v24 = vld [vmem:[#allocation15_spill] sm:$0xff] }
 0x2e1   :  { %v2070_v35 = vpack.c.bf16 %v6982_v58, %v6982_v58  ;;  %2262 = vmatprep.subr.bf16.mxu0 %v6743_v63  ;;  %2303 = vmatprep.subr.bf16.mxu1 %v6746_v1 }
 0x2e3   :  { %2104 = vmatmul.mubr.bf16.vlgmr.msra.gmra.mrb[68].mxu0 %v2070_v35  ;;  %2145 = vmatmul.mubr.bf16.vlgmr.msra.gmra.mrb[68].mxu1 %v2070_v35 }
 0x2e4   :  { %2263 = vmatpush1.bf16.msra.mxu0 %v6752_v0  ;;  %2304 = vmatpush1.bf16.msra.mxu1 %v6755_v2 }
 0x2e5   :  { %2264 = vmatprep.subr.bf16.mxu0 %v6758_v3  ;;  %2305 = vmatprep.subr.bf16.mxu1 %v6761_v4 }
 0x2e6   :  { %2294 = vmatprep.mubr.bf16.mxu0 %v8425_v14  ;;  %2335 = vmatprep.mubr.bf16.mxu1 %v8425_v14 }
 0x2e8   :  { %2265 = vmatpush1.bf16.msra.mxu0 %v6766_v5  ;;  %2306 = vmatpush1.bf16.msra.mxu1 %v6769_v6 }
 0x2e9   :  { %2266 = vmatprep.subr.bf16.mxu0 %v6772_v7  ;;  %2307 = vmatprep.subr.bf16.mxu1 %v6775_v11 }
 0x2ec   :  { %2267 = vmatpush1.bf16.msra.mxu0 %v6778_v13  ;;  %2308 = vmatpush1.bf16.msra.mxu1 %v6781_v46 }
 0x2ed   :  { %2268 = vmatprep.subr.bf16.mxu0 %v6784_v47  ;;  %2309 = vmatprep.subr.bf16.mxu1 %v6787_v52 }
 0x2f0   :  { %2269 = vmatpush1.bf16.msra.mxu0 %v6790_v54  ;;  %2310 = vmatpush1.bf16.msra.mxu1 %v6793_v37 }
 0x2f1   :  { %2270 = vmatprep.subr.bf16.mxu0 %v6796_v36  ;;  %2311 = vmatprep.subr.bf16.mxu1 %v6799_v34 }
 0x2f4   :  { %2271 = vmatpush1.bf16.msra.mxu0 %v6802_v38  ;;  %2312 = vmatpush1.bf16.msra.mxu1 %v6805_v16 }
 0x2f5   :  { %2272 = vmatprep.subr.bf16.mxu0 %v6808_v40  ;;  %2313 = vmatprep.subr.bf16.mxu1 %v6811_v31 }
 0x2f8   :  { %2273 = vmatpush1.bf16.msra.mxu0 %v6814_v33  ;;  %2314 = vmatpush1.bf16.msra.mxu1 %v6817_v22 }
 0x2f9   :  { %2274 = vmatprep.subr.bf16.mxu0 %v6820_v43  ;;  %2315 = vmatprep.subr.bf16.mxu1 %v6823_v20 }
 0x2fc   :  { %2275 = vmatpush1.bf16.msra.mxu0 %v6826_v23  ;;  %2316 = vmatpush1.bf16.msra.mxu1 %v6829_v10  ;;  %v8564_v10 = vld [vmem:[#allocation16_spill] sm:$0xff]  ;;  %v8565_v23 = vld [vmem:[#allocation19_spill] sm:$0xff] }
 0x2fd   :  { %2276 = vmatprep.subr.bf16.mxu0 %v6832_v42  ;;  %2317 = vmatprep.subr.bf16.mxu1 %v6835_v17 }
 0x300   :  { %2277 = vmatpush1.bf16.msra.mxu0 %v6838_v30  ;;  %2318 = vmatpush1.bf16.msra.mxu1 %v6841_v19 }
 0x301   :  { %2349 = vmatprep.subr.bf16.mxu0 %v6844_v15  ;;  %2390 = vmatprep.subr.bf16.mxu1 %v7021_v61 }
 0x396   :  { %v2018_v21 = vpop.f32.mrb[64].mxu0  ;;  %v2059_v35 = vpop.f32.mrb[64].mxu1 }
 0x397   :  { %v2066_v41 = vadd.f32 %v2018_v21, %v8562_v24  ;;  %v2068_v60 = vadd.f32 %v2059_v35, %v8563_v48  ;;  %v2020_v12 = vpop.f32.mrb[65].mxu0  ;;  %v2061_v42 = vpop.f32.mrb[65].mxu1 }
 0x398   :  { %v2067_v17 = vadd.f32 %v2020_v12, %v8564_v10  ;;  %v2069_v30 = vadd.f32 %v2061_v42, %v8565_v23  ;;  %v2022_v20 = vpop.f32.mrb[66].mxu0  ;;  %v2063_v19 = vpop.f32.mrb[66].mxu1 }
 0x399   :  { %v5032_v43 = vmul.f32 -1.442695, %v2066_v41  ;;  %v2023_v15 = vpop.f32.mrb[67].mxu0  ;;  %v2064_v22 = vpop.f32.mrb[67].mxu1  ;;  %v8569_v41 = vld [vmem:[#allocation92_spill] sm:$0xff] }
 0x39a   :  { %v5033_v33 = vmul.f32 -1.442695, %v2067_v17  ;;  %v5035_v61 = vmul.f32 -1.442695, %v2069_v30  ;;  %v7029_v17 = vpop.permute.xlu0 %2235 }
 0x39b   :  { %5343 = vpow2.f32 %v5032_v43  ;;  %8566 = vst [vmem:[#allocation15_spill] sm:$0xff] %v7029_v17  ;;  %vm2237_vm2 = vcmp.eq.s32.totalorder %v7029_v17, 1  ;;  %v8591_v17 = vld [vmem:[#allocation118_spill] sm:$0xff] }
 0x39c   :  { %5345 = vpow2.f32 %v5033_v33 }
 0x39d   :  { %5347 = vpow2.f32 %v5035_v61 }
 0x39e   :  { %5349 = vtanh.f32 %v2068_v60  ;;  %v8567_v60 = vld [vmem:[#allocation90_spill] sm:$0xff] }
 0x3a5   :  { %v5344_v31 = vpop.eup %5343 }
 0x3a6   :  { %v5346_v40 = vpop.eup %5345  ;;  %v2169_v21 = vadd.f32 1.0, %v5344_v31  ;;  %v8568_v31 = vld [vmem:[#allocation93_spill] sm:$0xff] }
 0x3a7   :  { %v2170_v35 = vadd.f32 1.0, %v5346_v40  ;;  %v5348_v10 = vpop.eup %5347 }
 0x3a8   :  { %5351 = vrcp.f32 %v2169_v21  ;;  %v5350_v12 = vpop.eup %5349  ;;  %v2172_v19 = vadd.f32 1.0, %v5348_v10  ;;  %v8570_v21 = vld [vmem:[#allocation94_spill] sm:$0xff] }
 0x3a9   :  { %5353 = vrcp.f32 %v2170_v35 }
 0x3aa   :  { %5355 = vrcp.f32 %v2172_v19 }
 0x3b2   :  { %v5352_v23 = vpop.eup %5351 }
 0x3b3   :  { %v5354_v20 = vpop.eup %5353  ;;  %v2190_v42 = vmul.f32 %v5352_v23, %v5350_v12 }
 0x3b4   :  { %v2189_v22 = vmul.f32 %v5354_v20, %v6862_v18 }
 0x3b6   :  { %v2191_v33 = vadd.f32 %v2190_v42, %v2189_v22  ;;  %v2105_v43 = vpop.f32.mrb[68].mxu0  ;;  %v2146_v30 = vpop.f32.mrb[68].mxu1 }
 0x3b7   :  { %v2153_v40 = vadd.f32 %v2105_v43, %v8567_v60  ;;  %v2155_v15 = vadd.f32 %v2146_v30, %v8568_v31  ;;  %v2107_v61 = vpop.f32.mrb[69].mxu0  ;;  %v2148_v24 = vpop.f32.mrb[69].mxu1 }
 0x3b8   :  { %5357 = vtanh.f32 %v2191_v33  ;;  %v2154_v48 = vadd.f32 %v2107_v61, %v8569_v41  ;;  %v2156_v35 = vadd.f32 %v2148_v24, %v8570_v21  ;;  %v2109_v10 = vpop.f32.mrb[70].mxu0  ;;  %v2150_v12 = vpop.f32.mrb[70].mxu1  ;;  %v7039_v23 = vsel %vm2237_vm2, %v2191_v33, %v6862_v18 }
 0x3b9   :  { %v5036_v20 = vmul.f32 -1.442695, %v2153_v40  ;;  %v2110_v42 = vpop.f32.mrb[71].mxu0  ;;  %v2151_v19 = vpop.f32.mrb[71].mxu1 }
 0x3ba   :  { %v5037_v22 = vmul.f32 -1.442695, %v2154_v48  ;;  %v5356_v43 = vpop.eup %5355  ;;  %v5039_v60 = vmul.f32 -1.442695, %v2156_v35  ;;  %v8571_v48 = vld [vmem:[#allocation14_spill] sm:$0xff]  ;;  %v7065_v42 = vpop.permute.xlu1 %2242 }
 0x3bb   :  { %5359 = vpow2.f32 %v5036_v20  ;;  %8572 = vst [vmem:[#allocation17_spill] sm:$0xff] %v7065_v42  ;;  %vm2244_vm3 = vcmp.eq.s32.totalorder %v7065_v42, 1  ;;  %v8592_v42 = vld [vmem:[#allocation119_spill] sm:$0xff] }
 0x3bc   :  { %5361 = vpow2.f32 %v5037_v22 }
 0x3bd   :  { %5363 = vpow2.f32 %v5039_v60  ;;  %v8575_v60 = vld [vmem:[#allocation98_spill] sm:$0xff] }
 0x3be   :  { %5365 = vtanh.f32 %v2155_v15 }
 0x3c2   :  { %v5358_v30 = vpop.eup %5357 }
 0x3c3   :  { %v2193_v31 = vmul.f32 %v5358_v30, %v5356_v43  ;;  %v8573_v43 = vld [vmem:[#allocation97_spill] sm:$0xff]  ;;  %v8574_v30 = vld [vmem:[#allocation96_spill] sm:$0xff] }
 0x3c5   :  { %v5360_v61 = vpop.eup %5359  ;;  %v7044_v24 = vsel %vm2237_vm2, %v2193_v31, %v6871_v8  ;;  %v8576_v31 = vld [vmem:[#allocation124_spill] sm:$0xff] }
 0x3c6   :  { %v5362_v41 = vpop.eup %5361  ;;  %v2206_v21 = vadd.f32 1.0, %v5360_v61  ;;  %v2261_v18 = vpack.c.bf16 %v7044_v24, %v7044_v24  ;;  %v8577_v61 = vld [vmem:[#allocation125_spill] sm:$0xff] }
 0x3c7   :  { %v2207_v33 = vadd.f32 1.0, %v5362_v41  ;;  %v5364_v8 = vpop.eup %5363  ;;  %v8578_v41 = vld [vmem:[#allocation126_spill] sm:$0xff] }
 0x3c8   :  { %5367 = vrcp.f32 %v2206_v21  ;;  %2295 = vmatmul.mubr.bf16.vlgmr.msra.gmra.mrb[72].mxu0 %v2261_v18  ;;  %2336 = vmatmul.mubr.bf16.vlgmr.msra.gmra.mrb[72].mxu1 %v2261_v18  ;;  %v5366_v40 = vpop.eup %5365  ;;  %v2209_v12 = vadd.f32 1.0, %v5364_v8  ;;  %v8579_v21 = vld [vmem:[#allocation127_spill] sm:$0xff]  ;;  %v8580_v18 = vld [vmem:[#allocation128_spill] sm:$0xff]  ;;  %v8581_v8 = vld [vmem:[#allocation129_spill] sm:$0xff] }
 0x3c9   :  { %5369 = vrcp.f32 %v2207_v33  ;;  %2350 = vmatpush1.bf16.msra.mxu0 %v6875_v53  ;;  %2391 = vmatpush1.bf16.msra.mxu1 %v6878_v26 }
 0x3ca   :  { %2351 = vmatprep.subr.bf16.mxu0 %v6881_v44  ;;  %2392 = vmatprep.subr.bf16.mxu1 %v6884_v45  ;;  %5371 = vrcp.f32 %v2209_v12 }
 0x3cb   :  { %2381 = vmatprep.mubr.bf16.mxu0 %v8425_v14  ;;  %2422 = vmatprep.mubr.bf16.mxu1 %v8425_v14 }
 0x3cd   :  { %2352 = vmatpush1.bf16.msra.mxu0 %v6889_v51  ;;  %2393 = vmatpush1.bf16.msra.mxu1 %v6892_v56 }
 0x3ce   :  { %2353 = vmatprep.subr.bf16.mxu0 %v6895_v57  ;;  %2394 = vmatprep.subr.bf16.mxu1 %v6898_v29 }
 0x3d1   :  { %2354 = vmatpush1.bf16.msra.mxu0 %v6901_v59  ;;  %2395 = vmatpush1.bf16.msra.mxu1 %v6904_v62 }
 0x3d2   :  { %v5368_v15 = vpop.eup %5367  ;;  %2355 = vmatprep.subr.bf16.mxu0 %v6907_v9  ;;  %2396 = vmatprep.subr.bf16.mxu1 %v8571_v48 }
 0x3d3   :  { %v5370_v35 = vpop.eup %5369  ;;  %v2227_v10 = vmul.f32 %v5368_v15, %v5366_v40  ;;  %v8582_v40 = vld [vmem:[#allocation130_spill] sm:$0xff]  ;;  %v8583_v15 = vld [vmem:[#allocation131_spill] sm:$0xff] }
 0x3d4   :  { %v2226_v20 = vmul.f32 %v5370_v35, %v6933_v55  ;;  %v5372_v33 = vpop.eup %5371 }
 0x3d5   :  { %2356 = vmatpush1.bf16.msra.mxu0 %v6916_v49  ;;  %2397 = vmatpush1.bf16.msra.mxu1 %v6919_v50 }
 0x3d6   :  { %v2228_v19 = vadd.f32 %v2227_v10, %v2226_v20  ;;  %2357 = vmatprep.subr.bf16.mxu0 %v6924_v28  ;;  %2398 = vmatprep.subr.bf16.mxu1 %v6927_v25  ;;  %v8585_v20 = vld [vmem:[#allocation112_spill] sm:$0xff] }
 0x3d8   :  { %5373 = vtanh.f32 %v2228_v19  ;;  %v7073_v22 = vsel %vm2244_vm3, %v2228_v19, %v6933_v55  ;;  %v8586_v19 = vld [vmem:[#allocation113_spill] sm:$0xff] }
 0x3d9   :  { %2358 = vmatpush1.bf16.msra.mxu0 %v8573_v43  ;;  %2399 = vmatpush1.bf16.msra.mxu1 %v8574_v30 }
 0x3da   :  { %2359 = vmatprep.subr.bf16.mxu0 %v8575_v60  ;;  %2400 = vmatprep.subr.bf16.mxu1 %v8576_v31 }
 0x3dd   :  { %2360 = vmatpush1.bf16.msra.mxu0 %v8577_v61  ;;  %2401 = vmatpush1.bf16.msra.mxu1 %v8578_v41 }
 0x3de   :  { %2361 = vmatprep.subr.bf16.mxu0 %v8579_v21  ;;  %2402 = vmatprep.subr.bf16.mxu1 %v8580_v18 }
 0x3e1   :  { %2362 = vmatpush1.bf16.msra.mxu0 %v8581_v8  ;;  %2403 = vmatpush1.bf16.msra.mxu1 %v6962_v39 }
 0x3e2   :  { %v5374_v55 = vpop.eup %5373  ;;  %2363 = vmatprep.subr.bf16.mxu0 %v8582_v40  ;;  %2404 = vmatprep.subr.bf16.mxu1 %v8583_v15 }
 0x3e3   :  { %v2230_v35 = vmul.f32 %v5374_v55, %v5372_v33  ;;  %v8587_v33 = vld [vmem:[#allocation114_spill] sm:$0xff]  ;;  %v8588_v55 = vld [vmem:[#allocation115_spill] sm:$0xff] }
 0x3e5   :  { %2364 = vmatpush1.bf16.msra.mxu0 %v6974_v32  ;;  %2405 = vmatpush1.bf16.msra.mxu1 %v6977_v27  ;;  %v7092_v10 = vsel %vm2244_vm3, %v2230_v35, %v6982_v58  ;;  %v8584_v58 = vld [vmem:[#allocation111_spill] sm:$0xff]  ;;  %v8589_v35 = vld [vmem:[#allocation116_spill] sm:$0xff] }
 0x3e6   :  { %v2348_v12 = vpack.c.bf16 %v7092_v10, %v7092_v10  ;;  %2540 = vmatprep.subr.bf16.mxu0 %v6743_v63  ;;  %2581 = vmatprep.subr.bf16.mxu1 %v6746_v1 }
 0x3e8   :  { %2382 = vmatmul.mubr.bf16.vlgmr.msra.gmra.mrb[76].mxu0 %v2348_v12  ;;  %2423 = vmatmul.mubr.bf16.vlgmr.msra.gmra.mrb[76].mxu1 %v2348_v12  ;;  %v8590_v12 = vld [vmem:[#allocation117_spill] sm:$0xff] }
 0x3e9   :  { %2541 = vmatpush1.bf16.msra.mxu0 %v6752_v0  ;;  %2582 = vmatpush1.bf16.msra.mxu1 %v6755_v2 }
 0x3ea   :  { %2542 = vmatprep.subr.bf16.mxu0 %v6758_v3  ;;  %2583 = vmatprep.subr.bf16.mxu1 %v6761_v4 }
 0x3eb   :  { %2572 = vmatprep.mubr.bf16.mxu0 %v8425_v14  ;;  %2613 = vmatprep.mubr.bf16.mxu1 %v8425_v14 }
 0x3ed   :  { %2543 = vmatpush1.bf16.msra.mxu0 %v6766_v5  ;;  %2584 = vmatpush1.bf16.msra.mxu1 %v6769_v6 }
 0x3ee   :  { %2544 = vmatprep.subr.bf16.mxu0 %v6772_v7  ;;  %2585 = vmatprep.subr.bf16.mxu1 %v6775_v11 }
 0x3f1   :  { %2545 = vmatpush1.bf16.msra.mxu0 %v6778_v13  ;;  %2586 = vmatpush1.bf16.msra.mxu1 %v6781_v46 }
 0x3f2   :  { %2546 = vmatprep.subr.bf16.mxu0 %v6784_v47  ;;  %2587 = vmatprep.subr.bf16.mxu1 %v6787_v52  ;;  %v8601_v52 = vld [vmem:[#allocation22_spill] sm:$0xff] }
 0x3f5   :  { %2547 = vmatpush1.bf16.msra.mxu0 %v6790_v54  ;;  %2588 = vmatpush1.bf16.msra.mxu1 %v6793_v37  ;;  %v8600_v54 = vld [vmem:[#allocation20_spill] sm:$0xff] }
 0x3f6   :  { %2548 = vmatprep.subr.bf16.mxu0 %v6796_v36  ;;  %2589 = vmatprep.subr.bf16.mxu1 %v6799_v34  ;;  %v8598_v34 = vld [vmem:[#allocation18_spill] sm:$0xff]  ;;  %v8599_v36 = vld [vmem:[#allocation21_spill] sm:$0xff] }
 0x3f9   :  { %2549 = vmatpush1.bf16.msra.mxu0 %v6802_v38  ;;  %2590 = vmatpush1.bf16.msra.mxu1 %v6805_v16  ;;  %v8593_v38 = vld [vmem:[#allocation120_spill] sm:$0xff]  ;;  %v8594_v16 = vld [vmem:[#allocation121_spill] sm:$0xff] }
 0x3fa   :  { %2550 = vmatprep.subr.bf16.mxu0 %v8584_v58  ;;  %2591 = vmatprep.subr.bf16.mxu1 %v8585_v20  ;;  %v8595_v58 = vld [vmem:[#allocation122_spill] sm:$0xff]  ;;  %v8596_v20 = vld [vmem:[#allocation123_spill] sm:$0xff] }
 0x3fd   :  { %2551 = vmatpush1.bf16.msra.mxu0 %v8586_v19  ;;  %2592 = vmatpush1.bf16.msra.mxu1 %v8587_v33  ;;  %v8597_v19 = vld [vmem:[#allocation132_spill] sm:$0xff] }
 0x3fe   :  { %2552 = vmatprep.subr.bf16.mxu0 %v8588_v55  ;;  %2593 = vmatprep.subr.bf16.mxu1 %v8589_v35 }
 0x401   :  { %2553 = vmatpush1.bf16.msra.mxu0 %v8590_v12  ;;  %2594 = vmatpush1.bf16.msra.mxu1 %v8591_v17 }
 0x402   :  { %2554 = vmatprep.subr.bf16.mxu0 %v8592_v42  ;;  %2595 = vmatprep.subr.bf16.mxu1 %v8593_v38 }
 0x405   :  { %2555 = vmatpush1.bf16.msra.mxu0 %v8594_v16  ;;  %2596 = vmatpush1.bf16.msra.mxu1 %v8595_v58 }
 0x406   :  { %2627 = vmatprep.subr.bf16.mxu0 %v8596_v20  ;;  %2668 = vmatprep.subr.bf16.mxu1 %v8597_v19 }
 0x49b   :  { %v2296_v33 = vpop.f32.mrb[72].mxu0  ;;  %v2337_v55 = vpop.f32.mrb[72].mxu1 }
 0x49c   :  { %v2344_v35 = vadd.f32 %v2296_v33, %v8598_v34  ;;  %v2346_v12 = vadd.f32 %v2337_v55, %v8599_v36  ;;  %v2298_v37 = vpop.f32.mrb[73].mxu0  ;;  %v2339_v17 = vpop.f32.mrb[73].mxu1 }
 0x49d   :  { %v2345_v42 = vadd.f32 %v2298_v37, %v8600_v54  ;;  %v2347_v38 = vadd.f32 %v2339_v17, %v8601_v52  ;;  %v2300_v47 = vpop.f32.mrb[74].mxu0  ;;  %v2341_v16 = vpop.f32.mrb[74].mxu1 }
 0x49e   :  { %v5040_v46 = vmul.f32 -1.442695, %v2344_v35  ;;  %v2301_v58 = vpop.f32.mrb[75].mxu0  ;;  %v2342_v13 = vpop.f32.mrb[75].mxu1  ;;  %v8605_v35 = vld [vmem:[#allocation88_spill] sm:$0xff] }
 0x49f   :  { %v5041_v20 = vmul.f32 -1.442695, %v2345_v42  ;;  %v5043_v19 = vmul.f32 -1.442695, %v2347_v38  ;;  %v7137_v42 = vpop.permute.xlu0 %2513 }
 0x4a0   :  { %5375 = vpow2.f32 %v5040_v46  ;;  %8602 = vst [vmem:[#allocation16_spill] sm:$0xff] %v7137_v42  ;;  %vm2515_vm4 = vcmp.eq.s32.totalorder %v7137_v42, 1  ;;  %v7482_v42 = vld [vmem:[#allocation8 + $0x68] ss:$16 sps:$4 sm:$0xff]  }
 0x4a1   :  { %5377 = vpow2.f32 %v5041_v20  ;;  %v8604_v20 = vld [vmem:[#allocation89_spill] sm:$0xff] }
 0x4a2   :  { %5379 = vpow2.f32 %v5043_v19 }
 0x4a3   :  { %5381 = vtanh.f32 %v2346_v12 }
 0x4aa   :  { %v5376_v11 = vpop.eup %5375 }
 0x4ab   :  { %v5378_v7 = vpop.eup %5377  ;;  %v2447_v34 = vadd.f32 1.0, %v5376_v11  ;;  %v8603_v11 = vld [vmem:[#allocation87_spill] sm:$0xff] }
 0x4ac   :  { %v2448_v36 = vadd.f32 1.0, %v5378_v7  ;;  %v5380_v54 = vpop.eup %5379 }
 0x4ad   :  { %5383 = vrcp.f32 %v2447_v34  ;;  %v5382_v37 = vpop.eup %5381  ;;  %v2450_v17 = vadd.f32 1.0, %v5380_v54  ;;  %v8606_v34 = vld [vmem:[#allocation91_spill] sm:$0xff] }
 0x4ae   :  { %5385 = vrcp.f32 %v2448_v36 }
 0x4af   :  { %5387 = vrcp.f32 %v2450_v17 }
 0x4b7   :  { %v5384_v52 = vpop.eup %5383 }
 0x4b8   :  { %v5386_v47 = vpop.eup %5385  ;;  %v2468_v16 = vmul.f32 %v5384_v52, %v5382_v37 }
 0x4b9   :  { %v2467_v13 = vmul.f32 %v5386_v47, %v7039_v23 }
 0x4bb   :  { %v2469_v46 = vadd.f32 %v2468_v16, %v2467_v13  ;;  %v2383_v38 = vpop.f32.mrb[76].mxu0  ;;  %v2424_v58 = vpop.f32.mrb[76].mxu1 }
 0x4bc   :  { %v2431_v7 = vadd.f32 %v2383_v38, %v8603_v11  ;;  %v2433_v19 = vadd.f32 %v2424_v58, %v8604_v20  ;;  %v2385_v33 = vpop.f32.mrb[77].mxu0  ;;  %v2426_v55 = vpop.f32.mrb[77].mxu1 }
 0x4bd   :  { %5389 = vtanh.f32 %v2469_v46  ;;  %v2432_v12 = vadd.f32 %v2385_v33, %v8605_v35  ;;  %v2434_v36 = vadd.f32 %v2426_v55, %v8606_v34  ;;  %v2387_v54 = vpop.f32.mrb[78].mxu0  ;;  %v2428_v37 = vpop.f32.mrb[78].mxu1  ;;  %v7147_v52 = vsel %vm2515_vm4, %v2469_v46, %v7039_v23 }
 0x4be   :  { %v5044_v47 = vmul.f32 -1.442695, %v2431_v7  ;;  %v2388_v16 = vpop.f32.mrb[79].mxu0  ;;  %v2429_v17 = vpop.f32.mrb[79].mxu1 }
 0x4bf   :  { %v5045_v13 = vmul.f32 -1.442695, %v2432_v12  ;;  %v5388_v38 = vpop.eup %5387  ;;  %v5047_v11 = vmul.f32 -1.442695, %v2434_v36 }
 0x4c0   :  { %5391 = vpow2.f32 %v5044_v47  ;;  %v7173_v47 = vpop.permute.xlu1 %2520 }
 0x4c1   :  { %5393 = vpow2.f32 %v5045_v13  ;;  %8607 = vst [vmem:[#allocation19_spill] sm:$0xff] %v7173_v47  ;;  %vm2522_vm5 = vcmp.eq.s32.totalorder %v7173_v47, 1 }
 0x4c2   :  { %5395 = vpow2.f32 %v5047_v11 }
 0x4c3   :  { %5397 = vtanh.f32 %v2433_v19 }
 0x4c7   :  { %v5390_v58 = vpop.eup %5389 }
 0x4c8   :  { %v2471_v20 = vmul.f32 %v5390_v58, %v5388_v38 }
 0x4ca   :  { %v5392_v33 = vpop.eup %5391  ;;  %v7152_v55 = vsel %vm2515_vm4, %v2471_v20, %v7044_v24  ;;  %v8615_v20 = vld [vmem:[#allocation106_spill] sm:$0xff] }
 0x4cb   :  { %v5394_v35 = vpop.eup %5393  ;;  %v2484_v34 = vadd.f32 1.0, %v5392_v33  ;;  %v2539_v23 = vpack.c.bf16 %v7152_v55, %v7152_v55  ;;  %v8616_v33 = vld [vmem:[#allocation107_spill] sm:$0xff] }
 0x4cc   :  { %v2485_v46 = vadd.f32 1.0, %v5394_v35  ;;  %v5396_v24 = vpop.eup %5395  ;;  %v8619_v35 = vld [vmem:[#allocation110_spill] sm:$0xff] }
 0x4cd   :  { %5399 = vrcp.f32 %v2484_v34  ;;  %2573 = vmatmul.mubr.bf16.vlgmr.msra.gmra.mrb[80].mxu0 %v2539_v23  ;;  %2614 = vmatmul.mubr.bf16.vlgmr.msra.gmra.mrb[80].mxu1 %v2539_v23  ;;  %v5398_v7 = vpop.eup %5397  ;;  %v2487_v54 = vadd.f32 1.0, %v5396_v24  ;;  %v8620_v34 = vld [vmem:[#allocation111_spill] sm:$0xff]  ;;  %v8621_v23 = vld [vmem:[#allocation112_spill] sm:$0xff]  ;;  %v8623_v24 = vld [vmem:[#allocation114_spill] sm:$0xff] }
 0x4ce   :  { %5401 = vrcp.f32 %v2485_v46  ;;  %2628 = vmatpush1.bf16.msra.mxu0 %v6875_v53  ;;  %2669 = vmatpush1.bf16.msra.mxu1 %v6878_v26  ;;  %v8622_v46 = vld [vmem:[#allocation113_spill] sm:$0xff] }
 0x4cf   :  { %2629 = vmatprep.subr.bf16.mxu0 %v6881_v44  ;;  %2670 = vmatprep.subr.bf16.mxu1 %v6884_v45  ;;  %5403 = vrcp.f32 %v2487_v54  ;;  %v8628_v54 = vld [vmem:[#allocation119_spill] sm:$0xff] }
 0x4d0   :  { %2659 = vmatprep.mubr.bf16.mxu0 %v8425_v14  ;;  %2700 = vmatprep.mubr.bf16.mxu1 %v8425_v14 }
 0x4d2   :  { %2630 = vmatpush1.bf16.msra.mxu0 %v6889_v51  ;;  %2671 = vmatpush1.bf16.msra.mxu1 %v6892_v56 }
 0x4d3   :  { %2631 = vmatprep.subr.bf16.mxu0 %v6895_v57  ;;  %2672 = vmatprep.subr.bf16.mxu1 %v6898_v29 }
 0x4d6   :  { %2632 = vmatpush1.bf16.msra.mxu0 %v6901_v59  ;;  %2673 = vmatpush1.bf16.msra.mxu1 %v6904_v62 }
 0x4d7   :  { %v5400_v19 = vpop.eup %5399  ;;  %2633 = vmatprep.subr.bf16.mxu0 %v6907_v9  ;;  %2674 = vmatprep.subr.bf16.mxu1 %v8571_v48 }
 0x4d8   :  { %v5402_v12 = vpop.eup %5401  ;;  %v2505_v36 = vmul.f32 %v5400_v19, %v5398_v7  ;;  %v8624_v7 = vld [vmem:[#allocation115_spill] sm:$0xff]  ;;  %v8625_v19 = vld [vmem:[#allocation116_spill] sm:$0xff] }
 0x4d9   :  { %v2504_v37 = vmul.f32 %v5402_v12, %v7073_v22  ;;  %v5404_v13 = vpop.eup %5403  ;;  %v8626_v12 = vld [vmem:[#allocation117_spill] sm:$0xff] }
 0x4da   :  { %2634 = vmatpush1.bf16.msra.mxu0 %v6916_v49  ;;  %2675 = vmatpush1.bf16.msra.mxu1 %v6919_v50 }
 0x4db   :  { %v2506_v16 = vadd.f32 %v2505_v36, %v2504_v37  ;;  %2635 = vmatprep.subr.bf16.mxu0 %v6924_v28  ;;  %2676 = vmatprep.subr.bf16.mxu1 %v6927_v25  ;;  %v8627_v36 = vld [vmem:[#allocation118_spill] sm:$0xff]  ;;  %v8629_v37 = vld [vmem:[#allocation120_spill] sm:$0xff] }
 0x4dd   :  { %5405 = vtanh.f32 %v2506_v16  ;;  %v7181_v17 = vsel %vm2522_vm5, %v2506_v16, %v7073_v22  ;;  %v8630_v16 = vld [vmem:[#allocation121_spill] sm:$0xff] }
 0x4de   :  { %2636 = vmatpush1.bf16.msra.mxu0 %v8573_v43  ;;  %2677 = vmatpush1.bf16.msra.mxu1 %v8574_v30 }
 0x4df   :  { %2637 = vmatprep.subr.bf16.mxu0 %v8575_v60  ;;  %2678 = vmatprep.subr.bf16.mxu1 %v8576_v31 }
 0x4e2   :  { %2638 = vmatpush1.bf16.msra.mxu0 %v8577_v61  ;;  %2679 = vmatpush1.bf16.msra.mxu1 %v8578_v41 }
 0x4e3   :  { %2639 = vmatprep.subr.bf16.mxu0 %v8579_v21  ;;  %2680 = vmatprep.subr.bf16.mxu1 %v8580_v18 }
 0x4e6   :  { %2640 = vmatpush1.bf16.msra.mxu0 %v8581_v8  ;;  %2681 = vmatpush1.bf16.msra.mxu1 %v6962_v39 }
 0x4e7   :  { %v5406_v22 = vpop.eup %5405  ;;  %2641 = vmatprep.subr.bf16.mxu0 %v8582_v40  ;;  %2682 = vmatprep.subr.bf16.mxu1 %v8583_v15 }
 0x4e8   :  { %v2508_v38 = vmul.f32 %v5406_v22, %v5404_v13  ;;  %v8631_v13 = vld [vmem:[#allocation122_spill] sm:$0xff]  ;;  %v8632_v22 = vld [vmem:[#allocation123_spill] sm:$0xff] }
 0x4ea   :  { %2642 = vmatpush1.bf16.msra.mxu0 %v6974_v32  ;;  %2683 = vmatpush1.bf16.msra.mxu1 %v6977_v27  ;;  %v7200_v58 = vsel %vm2522_vm5, %v2508_v38, %v7092_v10  ;;  %v8610_v10 = vld [vmem:[#allocation101_spill] sm:$0xff]  ;;  %v8633_v38 = vld [vmem:[#allocation132_spill] sm:$0xff] }
 0x4eb   :  { %v2626_v11 = vpack.c.bf16 %v7200_v58, %v7200_v58  ;;  %2818 = vmatprep.subr.bf16.mxu0 %v6743_v63  ;;  %2859 = vmatprep.subr.bf16.mxu1 %v6746_v1  ;;  %v8608_v63 = vld [vmem:[#allocation12_spill] sm:$0xff] }
 0x4ec   :  { %v8609_v1 = vld [vmem:[#allocation100_spill] sm:$0xff] }
 0x4ed   :  { %2660 = vmatmul.mubr.bf16.vlgmr.msra.gmra.mrb[84].mxu0 %v2626_v11  ;;  %2701 = vmatmul.mubr.bf16.vlgmr.msra.gmra.mrb[84].mxu1 %v2626_v11 }
 0x4ee   :  { %2819 = vmatpush1.bf16.msra.mxu0 %v6752_v0  ;;  %2860 = vmatpush1.bf16.msra.mxu1 %v6755_v2  ;;  %v8611_v0 = vld [vmem:[#allocation102_spill] sm:$0xff]  ;;  %v8612_v2 = vld [vmem:[#allocation103_spill] sm:$0xff] }
 0x4ef   :  { %2820 = vmatprep.subr.bf16.mxu0 %v6758_v3  ;;  %2861 = vmatprep.subr.bf16.mxu1 %v6761_v4  ;;  %v8613_v3 = vld [vmem:[#allocation104_spill] sm:$0xff]  ;;  %v8614_v4 = vld [vmem:[#allocation105_spill] sm:$0xff] }
 0x4f0   :  { %2850 = vmatprep.mubr.bf16.mxu0 %v8425_v14  ;;  %2891 = vmatprep.mubr.bf16.mxu1 %v8425_v14 }
 0x4f2   :  { %2821 = vmatpush1.bf16.msra.mxu0 %v6766_v5  ;;  %2862 = vmatpush1.bf16.msra.mxu1 %v6769_v6  ;;  %v8617_v5 = vld [vmem:[#allocation108_spill] sm:$0xff]  ;;  %v8618_v6 = vld [vmem:[#allocation109_spill] sm:$0xff] }
 0x4f3   :  { %2822 = vmatprep.subr.bf16.mxu0 %v8608_v63  ;;  %2863 = vmatprep.subr.bf16.mxu1 %v8609_v1  ;;  %v8634_v1 = vld [vmem:[#allocation23_spill] sm:$0xff] }
 0x4f6   :  { %2823 = vmatpush1.bf16.msra.mxu0 %v8610_v10  ;;  %2864 = vmatpush1.bf16.msra.mxu1 %v8611_v0  ;;  %v8635_v0 = vld [vmem:[#allocation25_spill] sm:$0xff] }
 0x4f7   :  { %2824 = vmatprep.subr.bf16.mxu0 %v8612_v2  ;;  %2865 = vmatprep.subr.bf16.mxu1 %v8613_v3 }
 0x4fa   :  { %2825 = vmatpush1.bf16.msra.mxu0 %v8614_v4  ;;  %2866 = vmatpush1.bf16.msra.mxu1 %v8615_v20  ;;  %v8636_v20 = vld [vmem:[#allocation24_spill] sm:$0xff] }
 0x4fb   :  { %2826 = vmatprep.subr.bf16.mxu0 %v8616_v33  ;;  %2867 = vmatprep.subr.bf16.mxu1 %v8617_v5  ;;  %v8637_v5 = vld [vmem:[#allocation27_spill] sm:$0xff] }
 0x4fe   :  { %2827 = vmatpush1.bf16.msra.mxu0 %v8618_v6  ;;  %2868 = vmatpush1.bf16.msra.mxu1 %v8619_v35 }
 0x4ff   :  { %2828 = vmatprep.subr.bf16.mxu0 %v8620_v34  ;;  %2869 = vmatprep.subr.bf16.mxu1 %v8621_v23 }
 0x502   :  { %2829 = vmatpush1.bf16.msra.mxu0 %v8622_v46  ;;  %2870 = vmatpush1.bf16.msra.mxu1 %v8623_v24 }
 0x503   :  { %2830 = vmatprep.subr.bf16.mxu0 %v8624_v7  ;;  %2871 = vmatprep.subr.bf16.mxu1 %v8625_v19 }
 0x506   :  { %2831 = vmatpush1.bf16.msra.mxu0 %v8626_v12  ;;  %2872 = vmatpush1.bf16.msra.mxu1 %v8627_v36 }
 0x507   :  { %2832 = vmatprep.subr.bf16.mxu0 %v8628_v54  ;;  %2873 = vmatprep.subr.bf16.mxu1 %v8629_v37 }
 0x50a   :  { %2833 = vmatpush1.bf16.msra.mxu0 %v8630_v16  ;;  %2874 = vmatpush1.bf16.msra.mxu1 %v8631_v13 }
 0x50b   :  { %2905 = vmatprep.subr.bf16.mxu0 %v8632_v22  ;;  %2946 = vmatprep.subr.bf16.mxu1 %v8633_v38 }
 0x5a0   :  { %v2574_v11 = vpop.f32.mrb[80].mxu0  ;;  %v2615_v63 = vpop.f32.mrb[80].mxu1 }
 0x5a1   :  { %v2622_v10 = vadd.f32 %v2574_v11, %v8634_v1  ;;  %v2624_v2 = vadd.f32 %v2615_v63, %v8635_v0  ;;  %v2576_v3 = vpop.f32.mrb[81].mxu0  ;;  %v2617_v4 = vpop.f32.mrb[81].mxu1 }
 0x5a2   :  { %v2623_v33 = vadd.f32 %v2576_v3, %v8636_v20  ;;  %v2625_v6 = vadd.f32 %v2617_v4, %v8637_v5  ;;  %v2578_v35 = vpop.f32.mrb[82].mxu0  ;;  %v2619_v34 = vpop.f32.mrb[82].mxu1  ;;  %v8640_v5 = vld [vmem:[#allocation85_spill] sm:$0xff] }
 0x5a3   :  { %v5048_v23 = vmul.f32 -1.442695, %v2622_v10  ;;  %v2579_v46 = vpop.f32.mrb[83].mxu0  ;;  %v2620_v24 = vpop.f32.mrb[83].mxu1 }
 0x5a4   :  { %v5049_v7 = vmul.f32 -1.442695, %v2623_v33  ;;  %v5051_v19 = vmul.f32 -1.442695, %v2625_v6  ;;  %v7245_v0 = vpop.permute.xlu0 %2791  ;;  %v8642_v24 = vld [vmem:[#allocation86_spill] sm:$0xff] }
 0x5a5   :  { %5407 = vpow2.f32 %v5048_v23  ;;  %8638 = vst [vmem:[#allocation90_spill] sm:$0xff] %v7245_v0  ;;  %vm2793_vm6 = vcmp.eq.s32.totalorder %v7245_v0, 1  ;;  %v8641_v23 = vld [vmem:[#allocation84_spill] sm:$0xff]  ;;  %v7485_v0 = vld [vmem:[#allocation8 + $0x84] ss:$16 sps:$4 sm:$0xff]  }
 0x5a6   :  { %5409 = vpow2.f32 %v5049_v7 }
 0x5a7   :  { %5411 = vpow2.f32 %v5051_v19 }
 0x5a8   :  { %5413 = vtanh.f32 %v2624_v2  ;;  %v8639_v2 = vld [vmem:[#allocation82_spill] sm:$0xff] }
 0x5af   :  { %v5408_v12 = vpop.eup %5407 }
 0x5b0   :  { %v5410_v36 = vpop.eup %5409  ;;  %v2725_v54 = vadd.f32 1.0, %v5408_v12 }
 0x5b1   :  { %v2726_v37 = vadd.f32 1.0, %v5410_v36  ;;  %v5412_v16 = vpop.eup %5411 }
 0x5b2   :  { %5415 = vrcp.f32 %v2725_v54  ;;  %v5414_v13 = vpop.eup %5413  ;;  %v2728_v1 = vadd.f32 1.0, %v5412_v16 }
 0x5b3   :  { %5417 = vrcp.f32 %v2726_v37 }
 0x5b4   :  { %5419 = vrcp.f32 %v2728_v1 }
 0x5bc   :  { %v5416_v22 = vpop.eup %5415 }
 0x5bd   :  { %v5418_v11 = vpop.eup %5417  ;;  %v2746_v63 = vmul.f32 %v5416_v22, %v5414_v13 }
 0x5be   :  { %v2745_v10 = vmul.f32 %v5418_v11, %v7147_v52  ;;  %v5420_v22 = vpop.eup %5419 }
 0x5c0   :  { %v2747_v3 = vadd.f32 %v2746_v63, %v2745_v10  ;;  %v2661_v4 = vpop.f32.mrb[84].mxu0  ;;  %v2702_v20 = vpop.f32.mrb[84].mxu1 }
 0x5c1   :  { %v2709_v33 = vadd.f32 %v2661_v4, %v8639_v2  ;;  %v2711_v6 = vadd.f32 %v2702_v20, %v8640_v5  ;;  %v2663_v35 = vpop.f32.mrb[85].mxu0  ;;  %v2704_v34 = vpop.f32.mrb[85].mxu1  ;;  %v7371_v5 = vld [vmem:[#allocation6 + $0x88] ss:$16 sps:$4 sm:$0xff]  }
 0x5c2   :  { %5421 = vtanh.f32 %v2747_v3  ;;  %v2710_v46 = vadd.f32 %v2663_v35, %v8641_v23  ;;  %v2712_v7 = vadd.f32 %v2704_v34, %v8642_v24  ;;  %v2665_v19 = vpop.f32.mrb[86].mxu0  ;;  %v2706_v12 = vpop.f32.mrb[86].mxu1  ;;  %v7255_v36 = vsel %vm2793_vm6, %v2747_v3, %v7147_v52  ;;  %8655 = vst [vmem:[#allocation129_spill] sm:$0xff] %v7371_v5  ;;  %v7377_v35 = vld [vmem:[#allocation6 + $0xac] ss:$16 sps:$4 sm:$0xff]  }
 0x5c3   :  { %v5052_v54 = vmul.f32 -1.442695, %v2709_v33  ;;  %v2666_v37 = vpop.f32.mrb[87].mxu0  ;;  %v2707_v16 = vpop.f32.mrb[87].mxu1  ;;  %v7368_v33 = vld [vmem:[#allocation6 + $0x80] ss:$16 sps:$4 sm:$0xff]  }
 0x5c4   :  { %v5053_v13 = vmul.f32 -1.442695, %v2710_v46  ;;  %v5055_v63 = vmul.f32 -1.442695, %v2712_v7  ;;  %8654 = vst [vmem:[#allocation128_spill] sm:$0xff] %v7368_v33  ;;  %8657 = vst [vmem:[#allocation131_spill] sm:$0xff] %v7377_v35 }
 0x5c5   :  { %5423 = vpow2.f32 %v5052_v54  ;;  %v7380_v34 = vld [vmem:[#allocation6 + $0xa0] ss:$16 sps:$4 sm:$0xff]   ;;  %v7383_v23 = vld [vmem:[#allocation6 + $0xa8] ss:$16 sps:$4 sm:$0xff]   ;;  %v7386_v46 = vld [vmem:[#allocation6 + $0xc4] ss:$16 sps:$4 sm:$0xff]  }
 0x5c6   :  { %5425 = vpow2.f32 %v5053_v13  ;;  %8658 = vst [vmem:[#allocation18_spill] sm:$0xff] %v7380_v34  ;;  %8659 = vst [vmem:[#allocation21_spill] sm:$0xff] %v7383_v23  ;;  %v7389_v24 = vld [vmem:[#allocation6 + $0xcc] ss:$16 sps:$4 sm:$0xff]   ;;  %v7392_v7 = vld [vmem:[#allocation6 + $0xc0] ss:$16 sps:$4 sm:$0xff]  }
 0x5c7   :  { %5427 = vpow2.f32 %v5055_v63  ;;  %8660 = vst [vmem:[#allocation20_spill] sm:$0xff] %v7386_v46  ;;  %8661 = vst [vmem:[#allocation22_spill] sm:$0xff] %v7389_v24  ;;  %v7395_v19 = vld [vmem:[#allocation6 + $0xc8] ss:$16 sps:$4 sm:$0xff]   ;;  %v7398_v12 = vld [vmem:[#allocation6 + $0xe4] ss:$16 sps:$4 sm:$0xff]  }
 0x5c8   :  { %5429 = vtanh.f32 %v2711_v6  ;;  %v7374_v6 = vld [vmem:[#allocation6 + $0xa4] ss:$16 sps:$4 sm:$0xff]   ;;  %8662 = vst [vmem:[#allocation87_spill] sm:$0xff] %v7392_v7  ;;  %8663 = vst [vmem:[#allocation89_spill] sm:$0xff] %v7395_v19  ;;  %v7401_v54 = vld [vmem:[#allocation6 + $0xec] ss:$16 sps:$4 sm:$0xff]  }
 0x5c9   :  { %8656 = vst [vmem:[#allocation130_spill] sm:$0xff] %v7374_v6  ;;  %8664 = vst [vmem:[#allocation88_spill] sm:$0xff] %v7398_v12  ;;  %v7404_v37 = vld [vmem:[#allocation6 + $0xe0] ss:$16 sps:$4 sm:$0xff]   ;;  %v7407_v16 = vld [vmem:[#allocation6 + $0xe8] ss:$16 sps:$4 sm:$0xff]  }
 0x5ca   :  { %8665 = vst [vmem:[#allocation91_spill] sm:$0xff] %v7401_v54  ;;  %8666 = vst [vmem:[#allocation12_spill] sm:$0xff] %v7404_v37  ;;  %v7410_v13 = vld [vmem:[#allocation8 + $0x4] ss:$16 sps:$4 sm:$0xff]   ;;  %v8669_v63 = vld [vmem:[#allocation26_spill] sm:$0xff] }
 0x5cb   :  { %8667 = vst [vmem:[#allocation100_spill] sm:$0xff] %v7407_v16  ;;  %8668 = vst [vmem:[#allocation101_spill] sm:$0xff] %v7410_v13 }
 0x5cc   :  { %v5422_v11 = vpop.eup %5421 }
 0x5cd   :  { %v2749_v1 = vmul.f32 %v5422_v11, %v5420_v22 }
 0x5cf   :  { %v5424_v10 = vpop.eup %5423  ;;  %v7260_v4 = vsel %vm2793_vm6, %v2749_v1, %v7152_v55 }
 0x5d0   :  { %v5426_v20 = vpop.eup %5425  ;;  %v2762_v2 = vadd.f32 1.0, %v5424_v10  ;;  %v2817_v52 = vpack.c.bf16 %v7260_v4, %v7260_v4  ;;  %v8670_v10 = vld [vmem:[#allocation29_spill] sm:$0xff] }
 0x5d1   :  { %v2763_v3 = vadd.f32 1.0, %v5426_v20  ;;  %v5428_v55 = vpop.eup %5427 }
 0x5d2   :  { %5431 = vrcp.f32 %v2762_v2  ;;  %2851 = vmatmul.mubr.bf16.vlgmr.msra.gmra.mrb[88].mxu0 %v2817_v52  ;;  %2892 = vmatmul.mubr.bf16.vlgmr.msra.gmra.mrb[88].mxu1 %v2817_v52 }
 0x5d3   :  { %5433 = vrcp.f32 %v2763_v3  ;;  %2906 = vmatpush1.bf16.msra.mxu0 %v6875_v53  ;;  %2947 = vmatpush1.bf16.msra.mxu1 %v6878_v26  ;;  %v5430_v53 = vpop.eup %5429  ;;  %v8671_v3 = vld [vmem:[#allocation28_spill] sm:$0xff] }
 0x5d4   :  { %2907 = vmatprep.subr.bf16.mxu0 %v6881_v44  ;;  %2948 = vmatprep.subr.bf16.mxu1 %v6884_v45 }
 0x5d5   :  { %2937 = vmatprep.mubr.bf16.mxu0 %v8425_v14  ;;  %2978 = vmatprep.mubr.bf16.mxu1 %v8425_v14 }
 0x5d7   :  { %2908 = vmatpush1.bf16.msra.mxu0 %v6889_v51  ;;  %2949 = vmatpush1.bf16.msra.mxu1 %v6892_v56  ;;  %v2765_v51 = vadd.f32 1.0, %v5428_v55 }
 0x5d8   :  { %2909 = vmatprep.subr.bf16.mxu0 %v6895_v57  ;;  %2950 = vmatprep.subr.bf16.mxu1 %v6898_v29  ;;  %v7281_v57 = vpop.permute.xlu1 %2798 }
 0x5d9   :  { %8643 = vst [vmem:[#allocation93_spill] sm:$0xff] %v7281_v57  ;;  %vm2800_vm7 = vcmp.eq.s32.totalorder %v7281_v57, 1  ;;  %5435 = vrcp.f32 %v2765_v51  ;;  %v7488_v57 = vld [vmem:[#allocation8 + $0x8c] ss:$16 sps:$4 sm:$0xff]  }
 0x5db   :  { %2910 = vmatpush1.bf16.msra.mxu0 %v6901_v59  ;;  %2951 = vmatpush1.bf16.msra.mxu1 %v6904_v62 }
 0x5dc   :  { %v5432_v26 = vpop.eup %5431  ;;  %2911 = vmatprep.subr.bf16.mxu0 %v6907_v9  ;;  %2952 = vmatprep.subr.bf16.mxu1 %v8571_v48  ;;  %v7324_v48 = vld [vmem:[#allocation6 + $0x24] ss:$16 sps:$4 sm:$0xff]  }
 0x5dd   :  { %v5434_v44 = vpop.eup %5433  ;;  %v2783_v45 = vmul.f32 %v5432_v26, %v5430_v53  ;;  %v8672_v53 = vld [vmem:[#allocation30_spill] sm:$0xff] }
 0x5de   :  { %v2782_v56 = vmul.f32 %v5434_v44, %v7181_v17 }
 0x5df   :  { %2912 = vmatpush1.bf16.msra.mxu0 %v6916_v49  ;;  %2953 = vmatpush1.bf16.msra.mxu1 %v6919_v50  ;;  %v7312_v50 = vld [vmem:[#allocation6 + $0x4] ss:$16 sps:$4 sm:$0xff]  }
 0x5e0   :  { %v2784_v29 = vadd.f32 %v2783_v45, %v2782_v56  ;;  %2913 = vmatprep.subr.bf16.mxu0 %v6924_v28  ;;  %2954 = vmatprep.subr.bf16.mxu1 %v6927_v25 }
 0x5e2   :  { %5437 = vtanh.f32 %v2784_v29  ;;  %v7289_v59 = vsel %vm2800_vm7, %v2784_v29, %v7181_v17  ;;  %v7362_v17 = vld [vmem:[#allocation6 + $0x84] ss:$16 sps:$4 sm:$0xff]  }
 0x5e3   :  { %2914 = vmatpush1.bf16.msra.mxu0 %v8573_v43  ;;  %2955 = vmatpush1.bf16.msra.mxu1 %v8574_v30  ;;  %v5436_v28 = vpop.eup %5435  ;;  %v7327_v43 = vld [vmem:[#allocation6 + $0x2c] ss:$16 sps:$4 sm:$0xff]   ;;  %v7332_v30 = vld [vmem:[#allocation6 + $0x20] ss:$16 sps:$4 sm:$0xff]   ;;  %8652 = vst [vmem:[#allocation126_spill] sm:$0xff] %v7362_v17 }
 0x5e4   :  { %2915 = vmatprep.subr.bf16.mxu0 %v8575_v60  ;;  %2956 = vmatprep.subr.bf16.mxu1 %v8576_v31  ;;  %v7335_v60 = vld [vmem:[#allocation6 + $0x28] ss:$16 sps:$4 sm:$0xff]   ;;  %v7338_v31 = vld [vmem:[#allocation6 + $0x44] ss:$16 sps:$4 sm:$0xff]  }
 0x5e5   :  { %8644 = vst [vmem:[#allocation92_spill] sm:$0xff] %v7338_v31 }
 0x5e7   :  { %2916 = vmatpush1.bf16.msra.mxu0 %v8577_v61  ;;  %2957 = vmatpush1.bf16.msra.mxu1 %v8578_v41  ;;  %v7341_v61 = vld [vmem:[#allocation6 + $0x4c] ss:$16 sps:$4 sm:$0xff]   ;;  %v7344_v41 = vld [vmem:[#allocation6 + $0x40] ss:$16 sps:$4 sm:$0xff]  }
 0x5e8   :  { %2917 = vmatprep.subr.bf16.mxu0 %v8579_v21  ;;  %2958 = vmatprep.subr.bf16.mxu1 %v8580_v18  ;;  %8645 = vst [vmem:[#allocation94_spill] sm:$0xff] %v7341_v61  ;;  %8646 = vst [vmem:[#allocation14_spill] sm:$0xff] %v7344_v41  ;;  %v7347_v21 = vld [vmem:[#allocation6 + $0x48] ss:$16 sps:$4 sm:$0xff]   ;;  %v7350_v18 = vld [vmem:[#allocation6 + $0x64] ss:$16 sps:$4 sm:$0xff]  }
 0x5e9   :  { %8647 = vst [vmem:[#allocation97_spill] sm:$0xff] %v7347_v21  ;;  %8648 = vst [vmem:[#allocation96_spill] sm:$0xff] %v7350_v18 }
 0x5eb   :  { %2918 = vmatpush1.bf16.msra.mxu0 %v8581_v8  ;;  %2959 = vmatpush1.bf16.msra.mxu1 %v6962_v39  ;;  %v7315_v39 = vld [vmem:[#allocation6 + $0xc] ss:$16 sps:$4 sm:$0xff]  }
 0x5ec   :  { %v5438_v62 = vpop.eup %5437  ;;  %2919 = vmatprep.subr.bf16.mxu0 %v8582_v40  ;;  %2960 = vmatprep.subr.bf16.mxu1 %v8583_v15  ;;  %v7353_v8 = vld [vmem:[#allocation6 + $0x6c] ss:$16 sps:$4 sm:$0xff]   ;;  %v7356_v40 = vld [vmem:[#allocation6 + $0x60] ss:$16 sps:$4 sm:$0xff]   ;;  %v7359_v15 = vld [vmem:[#allocation6 + $0x68] ss:$16 sps:$4 sm:$0xff]  }
 0x5ed   :  { %v2786_v9 = vmul.f32 %v5438_v62, %v5436_v28  ;;  %8649 = vst [vmem:[#allocation98_spill] sm:$0xff] %v7353_v8  ;;  %8650 = vst [vmem:[#allocation124_spill] sm:$0xff] %v7356_v40 }
 0x5ee   :  { %8651 = vst [vmem:[#allocation125_spill] sm:$0xff] %v7359_v15 }
 0x5ef   :  { %2920 = vmatpush1.bf16.msra.mxu0 %v6974_v32  ;;  %2961 = vmatpush1.bf16.msra.mxu1 %v6977_v27  ;;  %v7308_v25 = vsel %vm2800_vm7, %v2786_v9, %v7200_v58  ;;  %v7318_v32 = vld [vmem:[#allocation6] ss:$16 sps:$4 sm:$0xff]   ;;  %v7321_v27 = vld [vmem:[#allocation6 + $0x8] ss:$16 sps:$4 sm:$0xff]   ;;  %v7365_v58 = vld [vmem:[#allocation6 + $0x8c] ss:$16 sps:$4 sm:$0xff]  }
 0x5f0   :  { %v2904_v49 = vpack.c.bf16 %v7308_v25, %v7308_v25  ;;  %3094 = vmatprep.subr.bf16.mxu0 %v7312_v50  ;;  %3135 = vmatprep.subr.bf16.mxu1 %v7315_v39  ;;  %8653 = vst [vmem:[#allocation127_spill] sm:$0xff] %v7365_v58 }
 0x5f2   :  { %2938 = vmatmul.mubr.bf16.vlgmr.msra.gmra.mrb[92].mxu0 %v2904_v49  ;;  %2979 = vmatmul.mubr.bf16.vlgmr.msra.gmra.mrb[92].mxu1 %v2904_v49 }
 0x5f3   :  { %3095 = vmatpush1.bf16.msra.mxu0 %v7318_v32  ;;  %3136 = vmatpush1.bf16.msra.mxu1 %v7321_v27 }
 0x5f4   :  { %3096 = vmatprep.subr.bf16.mxu0 %v7324_v48  ;;  %3137 = vmatprep.subr.bf16.mxu1 %v7327_v43 }
 0x5f5   :  { %3126 = vmatprep.mubr.bf16.mxu0 %v8425_v14  ;;  %3167 = vmatprep.mubr.bf16.mxu1 %v8425_v14 }
 0x5f7   :  { %3097 = vmatpush1.bf16.msra.mxu0 %v7332_v30  ;;  %3138 = vmatpush1.bf16.msra.mxu1 %v7335_v60 }
 0x5f8   :  { %3098 = vmatprep.subr.bf16.mxu0 %v7338_v31  ;;  %3139 = vmatprep.subr.bf16.mxu1 %v7341_v61 }
 0x5fb   :  { %3099 = vmatpush1.bf16.msra.mxu0 %v7344_v41  ;;  %3140 = vmatpush1.bf16.msra.mxu1 %v7347_v21 }
 0x5fc   :  { %3100 = vmatprep.subr.bf16.mxu0 %v7350_v18  ;;  %3141 = vmatprep.subr.bf16.mxu1 %v7353_v8 }
 0x5ff   :  { %3101 = vmatpush1.bf16.msra.mxu0 %v7356_v40  ;;  %3142 = vmatpush1.bf16.msra.mxu1 %v7359_v15 }
 0x600   :  { %3102 = vmatprep.subr.bf16.mxu0 %v7362_v17  ;;  %3143 = vmatprep.subr.bf16.mxu1 %v7365_v58 }
 0x603   :  { %3103 = vmatpush1.bf16.msra.mxu0 %v7368_v33  ;;  %3144 = vmatpush1.bf16.msra.mxu1 %v7371_v5 }
 0x604   :  { %3104 = vmatprep.subr.bf16.mxu0 %v7374_v6  ;;  %3145 = vmatprep.subr.bf16.mxu1 %v7377_v35 }
 0x607   :  { %3105 = vmatpush1.bf16.msra.mxu0 %v7380_v34  ;;  %3146 = vmatpush1.bf16.msra.mxu1 %v7383_v23 }
 0x608   :  { %3106 = vmatprep.subr.bf16.mxu0 %v7386_v46  ;;  %3147 = vmatprep.subr.bf16.mxu1 %v7389_v24 }
 0x60b   :  { %3107 = vmatpush1.bf16.msra.mxu0 %v7392_v7  ;;  %3148 = vmatpush1.bf16.msra.mxu1 %v7395_v19 }
 0x60c   :  { %3108 = vmatprep.subr.bf16.mxu0 %v7398_v12  ;;  %3149 = vmatprep.subr.bf16.mxu1 %v7401_v54 }
 0x60f   :  { %3109 = vmatpush1.bf16.msra.mxu0 %v7404_v37  ;;  %3150 = vmatpush1.bf16.msra.mxu1 %v7407_v16 }
 0x610   :  { %3181 = vmatprep.subr.bf16.mxu0 %v7410_v13  ;;  %3222 = vmatprep.subr.bf16.mxu1 %v8633_v38 }
 0x6a5   :  { %v2852_v22 = vpop.f32.mrb[88].mxu0  ;;  %v2893_v11 = vpop.f32.mrb[88].mxu1 }
 0x6a6   :  { %v2900_v1 = vadd.f32 %v2852_v22, %v8669_v63  ;;  %v2902_v20 = vadd.f32 %v2893_v11, %v8670_v10  ;;  %v2854_v2 = vpop.f32.mrb[89].mxu0  ;;  %v2895_v52 = vpop.f32.mrb[89].mxu1 }
 0x6a7   :  { %v2901_v55 = vadd.f32 %v2854_v2, %v8671_v3  ;;  %v2903_v26 = vadd.f32 %v2895_v52, %v8672_v53  ;;  %v2856_v44 = vpop.f32.mrb[90].mxu0  ;;  %v2897_v45 = vpop.f32.mrb[90].mxu1 }
 0x6a8   :  { %v5056_v51 = vmul.f32 -1.442695, %v2900_v1  ;;  %v2857_v56 = vpop.f32.mrb[91].mxu0  ;;  %v2898_v29 = vpop.f32.mrb[91].mxu1 }
 0x6a9   :  { %v5057_v28 = vmul.f32 -1.442695, %v2901_v55  ;;  %v5059_v38 = vmul.f32 -1.442695, %v2903_v26  ;;  %v7418_v3 = vpop.permute.xlu0 %3069 }
 0x6aa   :  { %5439 = vpow2.f32 %v5056_v51  ;;  %8673 = vst [vmem:[#allocation102_spill] sm:$0xff] %v7418_v3  ;;  %vm3071_vm8 = vcmp.eq.s32.totalorder %v7418_v3, 1  ;;  %v8675_v51 = vld [vmem:[#allocation81_spill] sm:$0xff]  ;;  %v7536_v3 = vld [vmem:[#allocation8 + $0xe8] ss:$16 sps:$4 sm:$0xff]  }
 0x6ab   :  { %5441 = vpow2.f32 %v5057_v28 }
 0x6ac   :  { %5443 = vpow2.f32 %v5059_v38  ;;  %v8676_v38 = vld [vmem:[#allocation80_spill] sm:$0xff] }
 0x6ad   :  { %5445 = vtanh.f32 %v2902_v20  ;;  %v8674_v20 = vld [vmem:[#allocation79_spill] sm:$0xff] }
 0x6b4   :  { %v5440_v62 = vpop.eup %5439 }
 0x6b5   :  { %v5442_v9 = vpop.eup %5441  ;;  %v3003_v49 = vadd.f32 1.0, %v5440_v62 }
 0x6b6   :  { %v3004_v22 = vadd.f32 1.0, %v5442_v9  ;;  %v5444_v11 = vpop.eup %5443  ;;  %v8677_v9 = vld [vmem:[#allocation83_spill] sm:$0xff] }
 0x6b7   :  { %5447 = vrcp.f32 %v3003_v49  ;;  %v5446_v63 = vpop.eup %5445  ;;  %v3006_v1 = vadd.f32 1.0, %v5444_v11 }
 0x6b8   :  { %5449 = vrcp.f32 %v3004_v22 }
 0x6b9   :  { %5451 = vrcp.f32 %v3006_v1 }
 0x6c1   :  { %v5448_v10 = vpop.eup %5447 }
 0x6c2   :  { %v5450_v2 = vpop.eup %5449  ;;  %v3024_v52 = vmul.f32 %v5448_v10, %v5446_v63 }
 0x6c3   :  { %v3023_v55 = vmul.f32 %v5450_v2, %v7255_v36 }
 0x6c5   :  { %v3025_v53 = vadd.f32 %v3024_v52, %v3023_v55  ;;  %v2939_v26 = vpop.f32.mrb[92].mxu0  ;;  %v2980_v44 = vpop.f32.mrb[92].mxu1 }
 0x6c6   :  { %v2987_v45 = vadd.f32 %v2939_v26, %v8674_v20  ;;  %v2989_v56 = vadd.f32 %v2980_v44, %v8675_v51  ;;  %v2941_v29 = vpop.f32.mrb[93].mxu0  ;;  %v2982_v28 = vpop.f32.mrb[93].mxu1 }
 0x6c7   :  { %5453 = vtanh.f32 %v3025_v53  ;;  %v2988_v62 = vadd.f32 %v2941_v29, %v8676_v38  ;;  %v2990_v49 = vadd.f32 %v2982_v28, %v8677_v9  ;;  %v2943_v22 = vpop.f32.mrb[94].mxu0  ;;  %v2984_v11 = vpop.f32.mrb[94].mxu1  ;;  %v7429_v63 = vsel %vm3071_vm8, %v3025_v53, %v7255_v36  ;;  %v7447_v9 = vld [vmem:[#allocation8 + $0x2c] ss:$16 sps:$4 sm:$0xff]  }
 0x6c8   :  { %v5060_v10 = vmul.f32 -1.442695, %v2987_v45  ;;  %v2944_v2 = vpop.f32.mrb[95].mxu0  ;;  %v2985_v52 = vpop.f32.mrb[95].mxu1  ;;  %v7438_v45 = vld [vmem:[#allocation8] ss:$16 sps:$4 sm:$0xff]  }
 0x6c9   :  { %v5061_v1 = vmul.f32 -1.442695, %v2988_v62  ;;  %v5452_v55 = vpop.eup %5451  ;;  %v5063_v44 = vmul.f32 -1.442695, %v2990_v49  ;;  %v7441_v62 = vld [vmem:[#allocation8 + $0x8] ss:$16 sps:$4 sm:$0xff]  }
 0x6ca   :  { %5455 = vpow2.f32 %v5060_v10  ;;  %v7455_v49 = vld [vmem:[#allocation8 + $0x28] ss:$16 sps:$4 sm:$0xff]   ;;  %v7458_v22 = vld [vmem:[#allocation8 + $0x44] ss:$16 sps:$4 sm:$0xff]   ;;  %v7461_v11 = vld [vmem:[#allocation8 + $0x4c] ss:$16 sps:$4 sm:$0xff]  }
 0x6cb   :  { %5457 = vpow2.f32 %v5061_v1  ;;  %v7464_v52 = vld [vmem:[#allocation8 + $0x40] ss:$16 sps:$4 sm:$0xff]   ;;  %v7467_v1 = vld [vmem:[#allocation8 + $0x48] ss:$16 sps:$4 sm:$0xff]  }
 0x6cc   :  { %5459 = vpow2.f32 %v5063_v44  ;;  %v7473_v44 = vld [vmem:[#allocation8 + $0x6c] ss:$16 sps:$4 sm:$0xff]  }
 0x6cd   :  { %5461 = vtanh.f32 %v2989_v56  ;;  %v7452_v56 = vld [vmem:[#allocation8 + $0x20] ss:$16 sps:$4 sm:$0xff]  }
 0x6d1   :  { %v5454_v26 = vpop.eup %5453 }
 0x6d2   :  { %v3027_v20 = vmul.f32 %v5454_v26, %v5452_v55  ;;  %v7470_v26 = vld [vmem:[#allocation8 + $0x64] ss:$16 sps:$4 sm:$0xff]  }
 0x6d4   :  { %v5456_v51 = vpop.eup %5455  ;;  %v7434_v29 = vsel %vm3071_vm8, %v3027_v20, %v7260_v4  ;;  %v7444_v4 = vld [vmem:[#allocation8 + $0x24] ss:$16 sps:$4 sm:$0xff]  }
 0x6d5   :  { %v5458_v28 = vpop.eup %5457  ;;  %v3040_v38 = vadd.f32 1.0, %v5456_v51  ;;  %v3093_v36 = vpack.c.bf16 %v7434_v29, %v7434_v29 }
 0x6d6   :  { %v3041_v53 = vadd.f32 1.0, %v5458_v28  ;;  %v5460_v10 = vpop.eup %5459 }
 0x6d7   :  { %5463 = vrcp.f32 %v3040_v38  ;;  %3127 = vmatmul.mubr.bf16.vlgmr.msra.gmra.mrb[96].mxu0 %v3093_v36  ;;  %3168 = vmatmul.mubr.bf16.vlgmr.msra.gmra.mrb[96].mxu1 %v3093_v36  ;;  %v5462_v2 = vpop.eup %5461  ;;  %v3043_v28 = vadd.f32 1.0, %v5460_v10  ;;  %v7476_v38 = vpop.permute.xlu1 %3076 }
 0x6d8   :  { %5465 = vrcp.f32 %v3041_v53  ;;  %3182 = vmatpush1.bf16.msra.mxu0 %v7438_v45  ;;  %3223 = vmatpush1.bf16.msra.mxu1 %v7441_v62  ;;  %v7479_v53 = vld [vmem:[#allocation8 + $0x60] ss:$16 sps:$4 sm:$0xff]   ;;  %vm3078_vm9 = vcmp.eq.s32.totalorder %v7476_v38, 1 }
 0x6d9   :  { %3183 = vmatprep.subr.bf16.mxu0 %v7444_v4  ;;  %3224 = vmatprep.subr.bf16.mxu1 %v7447_v9  ;;  %5467 = vrcp.f32 %v3043_v28  ;;  %v7509_v28 = vld [vmem:[#allocation8 + $0xa0] ss:$16 sps:$4 sm:$0xff]  }
 0x6da   :  { %3213 = vmatprep.mubr.bf16.mxu0 %v8425_v14  ;;  %3254 = vmatprep.mubr.bf16.mxu1 %v8425_v14  ;;  %8682 = vst [vmem:[#allocation107_spill] sm:$0xff] %v7509_v28 }
 0x6dc   :  { %3184 = vmatpush1.bf16.msra.mxu0 %v7452_v56  ;;  %3225 = vmatpush1.bf16.msra.mxu1 %v7455_v49 }
 0x6dd   :  { %3185 = vmatprep.subr.bf16.mxu0 %v7458_v22  ;;  %3226 = vmatprep.subr.bf16.mxu1 %v7461_v11 }
 0x6e0   :  { %3186 = vmatpush1.bf16.msra.mxu0 %v7464_v52  ;;  %3227 = vmatpush1.bf16.msra.mxu1 %v7467_v1 }
 0x6e1   :  { %v5464_v55 = vpop.eup %5463  ;;  %3187 = vmatprep.subr.bf16.mxu0 %v7470_v26  ;;  %3228 = vmatprep.subr.bf16.mxu1 %v7473_v44 }
 0x6e2   :  { %v5466_v20 = vpop.eup %5465  ;;  %v3061_v51 = vmul.f32 %v5464_v55, %v5462_v2  ;;  %v7497_v2 = vld [vmem:[#allocation8 + $0x80] ss:$16 sps:$4 sm:$0xff]   ;;  %v7500_v55 = vld [vmem:[#allocation8 + $0x88] ss:$16 sps:$4 sm:$0xff]  }
 0x6e3   :  { %v3060_v36 = vmul.f32 %v5466_v20, %v7289_v59  ;;  %8678 = vst [vmem:[#allocation103_spill] sm:$0xff] %v7497_v2  ;;  %8679 = vst [vmem:[#allocation104_spill] sm:$0xff] %v7500_v55  ;;  %v7503_v20 = vld [vmem:[#allocation8 + $0xa4] ss:$16 sps:$4 sm:$0xff]  }
 0x6e4   :  { %3188 = vmatpush1.bf16.msra.mxu0 %v7479_v53  ;;  %3229 = vmatpush1.bf16.msra.mxu1 %v7482_v42  ;;  %8680 = vst [vmem:[#allocation105_spill] sm:$0xff] %v7503_v20 }
 0x6e5   :  { %v3062_v47 = vadd.f32 %v3061_v51, %v3060_v36  ;;  %3189 = vmatprep.subr.bf16.mxu0 %v7485_v0  ;;  %3230 = vmatprep.subr.bf16.mxu1 %v7488_v57  ;;  %v7506_v51 = vld [vmem:[#allocation8 + $0xac] ss:$16 sps:$4 sm:$0xff]  }
 0x6e6   :  { %8681 = vst [vmem:[#allocation106_spill] sm:$0xff] %v7506_v51  ;;  %v7518_v36 = vld [vmem:[#allocation8 + $0xcc] ss:$16 sps:$4 sm:$0xff]  }
 0x6e7   :  { %5469 = vtanh.f32 %v3062_v47  ;;  %v7495_v10 = vsel %vm3078_vm9, %v3062_v47, %v7289_v59  ;;  %v7512_v47 = vld [vmem:[#allocation8 + $0xa8] ss:$16 sps:$4 sm:$0xff]   ;;  %v7515_v59 = vld [vmem:[#allocation8 + $0xc4] ss:$16 sps:$4 sm:$0xff]   ;;  %8685 = vst [vmem:[#allocation110_spill] sm:$0xff] %v7518_v36 }
 0x6e8   :  { %3190 = vmatpush1.bf16.msra.mxu0 %v7497_v2  ;;  %3231 = vmatpush1.bf16.msra.mxu1 %v7500_v55  ;;  %8683 = vst [vmem:[#allocation108_spill] sm:$0xff] %v7512_v47  ;;  %8684 = vst [vmem:[#allocation109_spill] sm:$0xff] %v7515_v59  ;;  %v7521_v55 = vld [vmem:[#allocation8 + $0xc0] ss:$16 sps:$4 sm:$0xff]   ;;  %v7527_v2 = vld [vmem:[#allocation8 + $0xe4] ss:$16 sps:$4 sm:$0xff]  }
 0x6e9   :  { %3191 = vmatprep.subr.bf16.mxu0 %v7503_v20  ;;  %3232 = vmatprep.subr.bf16.mxu1 %v7506_v51  ;;  %v5468_v20 = vpop.eup %5467  ;;  %v7524_v51 = vld [vmem:[#allocation8 + $0xc8] ss:$16 sps:$4 sm:$0xff]   ;;  %8687 = vst [vmem:[#allocation112_spill] sm:$0xff] %v7527_v2 }
 0x6ea   :  { %8686 = vst [vmem:[#allocation111_spill] sm:$0xff] %v7524_v51 }
 0x6ec   :  { %3192 = vmatpush1.bf16.msra.mxu0 %v7509_v28  ;;  %3233 = vmatpush1.bf16.msra.mxu1 %v7512_v47  ;;  %v7530_v47 = vld [vmem:[#allocation8 + $0xec] ss:$16 sps:$4 sm:$0xff]  }
 0x6ed   :  { %3193 = vmatprep.subr.bf16.mxu0 %v7515_v59  ;;  %3234 = vmatprep.subr.bf16.mxu1 %v7518_v36  ;;  %v7533_v36 = vld [vmem:[#allocation8 + $0xe0] ss:$16 sps:$4 sm:$0xff]  }
 0x6f0   :  { %3194 = vmatpush1.bf16.msra.mxu0 %v7521_v55  ;;  %3235 = vmatpush1.bf16.msra.mxu1 %v7524_v51 }
 0x6f1   :  { %v5470_v28 = vpop.eup %5469  ;;  %3195 = vmatprep.subr.bf16.mxu0 %v7527_v2  ;;  %3236 = vmatprep.subr.bf16.mxu1 %v7530_v47 }
 0x6f2   :  { %v3064_v59 = vmul.f32 %v5470_v28, %v5468_v20  ;;  %v8689_v28 = vld [vmem:[#allocation31_spill] sm:$0xff] }
 0x6f4   :  { %3196 = vmatpush1.bf16.msra.mxu0 %v7533_v36  ;;  %3237 = vmatpush1.bf16.msra.mxu1 %v7536_v3  ;;  %v7542_v51 = vsel %vm3078_vm9, %v3064_v59, %v7308_v25  ;;  %v7581_v25 = vld [vmem:[#allocation8 + $0xc] ss:$16 sps:$4 sm:$0xff]  }
 0x6f5   :  { %v3180_v2 = vpack.c.bf16 %v7542_v51, %v7542_v51  ;;  %3358 = vmatprep.subr.bf16.mxu0 %v7312_v50  ;;  %3399 = vmatprep.subr.bf16.mxu1 %v7315_v39  ;;  %8688 = vst [vmem:[#allocation113_spill] sm:$0xff] %v7581_v25 }
 0x6f7   :  { %3214 = vmatmul.mubr.bf16.vlgmr.msra.gmra.mrb[100].mxu0 %v3180_v2  ;;  %3255 = vmatmul.mubr.bf16.vlgmr.msra.gmra.mrb[100].mxu1 %v3180_v2 }
 0x6f8   :  { %3359 = vmatpush1.bf16.msra.mxu0 %v7318_v32  ;;  %3400 = vmatpush1.bf16.msra.mxu1 %v7321_v27 }
 0x6f9   :  { %3360 = vmatprep.subr.bf16.mxu0 %v7324_v48  ;;  %3401 = vmatprep.subr.bf16.mxu1 %v7327_v43 }
 0x6fa   :  { %3390 = vmatprep.mubr.bf16.mxu0 %v8425_v14  ;;  %3431 = vmatprep.mubr.bf16.mxu1 %v8425_v14 }
 0x6fc   :  { %3361 = vmatpush1.bf16.msra.mxu0 %v7332_v30  ;;  %3402 = vmatpush1.bf16.msra.mxu1 %v7335_v60 }
 0x6fd   :  { %3362 = vmatprep.subr.bf16.mxu0 %v7338_v31  ;;  %3403 = vmatprep.subr.bf16.mxu1 %v7341_v61 }
 0x700   :  { %3363 = vmatpush1.bf16.msra.mxu0 %v7344_v41  ;;  %3404 = vmatpush1.bf16.msra.mxu1 %v7347_v21 }
 0x701   :  { %3364 = vmatprep.subr.bf16.mxu0 %v7350_v18  ;;  %3405 = vmatprep.subr.bf16.mxu1 %v7353_v8 }
 0x704   :  { %3365 = vmatpush1.bf16.msra.mxu0 %v7356_v40  ;;  %3406 = vmatpush1.bf16.msra.mxu1 %v7359_v15 }
 0x705   :  { %3366 = vmatprep.subr.bf16.mxu0 %v7362_v17  ;;  %3407 = vmatprep.subr.bf16.mxu1 %v7365_v58 }
 0x708   :  { %3367 = vmatpush1.bf16.msra.mxu0 %v7368_v33  ;;  %3408 = vmatpush1.bf16.msra.mxu1 %v7371_v5 }
 0x709   :  { %3368 = vmatprep.subr.bf16.mxu0 %v7374_v6  ;;  %3409 = vmatprep.subr.bf16.mxu1 %v7377_v35 }
 0x70c   :  { %3369 = vmatpush1.bf16.msra.mxu0 %v7380_v34  ;;  %3410 = vmatpush1.bf16.msra.mxu1 %v7383_v23  ;;  %v8692_v23 = vld [vmem:[#allocation35_spill] sm:$0xff] }
 0x70d   :  { %3370 = vmatprep.subr.bf16.mxu0 %v7386_v46  ;;  %3411 = vmatprep.subr.bf16.mxu1 %v7389_v24  ;;  %v8691_v46 = vld [vmem:[#allocation32_spill] sm:$0xff] }
 0x710   :  { %3371 = vmatpush1.bf16.msra.mxu0 %v7392_v7  ;;  %3412 = vmatpush1.bf16.msra.mxu1 %v7395_v19  ;;  %v8690_v7 = vld [vmem:[#allocation33_spill] sm:$0xff] }
 0x711   :  { %3372 = vmatprep.subr.bf16.mxu0 %v7398_v12  ;;  %3413 = vmatprep.subr.bf16.mxu1 %v7401_v54 }
 0x714   :  { %3373 = vmatpush1.bf16.msra.mxu0 %v7404_v37  ;;  %3414 = vmatpush1.bf16.msra.mxu1 %v7407_v16 }
 0x715   :  { %3445 = vmatprep.subr.bf16.mxu0 %v7410_v13  ;;  %3486 = vmatprep.subr.bf16.mxu1 %v7581_v25 }
 0x7aa   :  { %v3128_v2 = vpop.f32.mrb[96].mxu0  ;;  %v3169_v20 = vpop.f32.mrb[96].mxu1 }
 0x7ab   :  { %v3176_v59 = vadd.f32 %v3128_v2, %v8689_v28  ;;  %v3178_v19 = vadd.f32 %v3169_v20, %v8690_v7  ;;  %v3130_v24 = vpop.f32.mrb[97].mxu0  ;;  %v3171_v12 = vpop.f32.mrb[97].mxu1  ;;  %v8695_v20 = vld [vmem:[#allocation76_spill] sm:$0xff] }
 0x7ac   :  { %v3177_v54 = vadd.f32 %v3130_v24, %v8691_v46  ;;  %v3179_v37 = vadd.f32 %v3171_v12, %v8692_v23  ;;  %v3132_v34 = vpop.f32.mrb[98].mxu0  ;;  %v3173_v16 = vpop.f32.mrb[98].mxu1 }
 0x7ad   :  { %v5064_v35 = vmul.f32 -1.442695, %v3176_v59  ;;  %v3133_v13 = vpop.f32.mrb[99].mxu0  ;;  %v3174_v6 = vpop.f32.mrb[99].mxu1  ;;  %v8696_v59 = vld [vmem:[#allocation78_spill] sm:$0xff] }
 0x7ae   :  { %v5065_v5 = vmul.f32 -1.442695, %v3177_v54  ;;  %v5067_v25 = vmul.f32 -1.442695, %v3179_v37  ;;  %v8693_v37 = vld [vmem:[#allocation74_spill] sm:$0xff] }
 0x7af   :  { %5471 = vpow2.f32 %v5064_v35 }
 0x7b0   :  { %5473 = vpow2.f32 %v5065_v5 }
 0x7b1   :  { %5475 = vpow2.f32 %v5067_v25 }
 0x7b2   :  { %5477 = vtanh.f32 %v3178_v19 }
 0x7b9   :  { %v5472_v33 = vpop.eup %5471 }
 0x7ba   :  { %v5474_v58 = vpop.eup %5473  ;;  %v3279_v2 = vadd.f32 1.0, %v5472_v33  ;;  %v8694_v33 = vld [vmem:[#allocation77_spill] sm:$0xff] }
 0x7bb   :  { %v3280_v7 = vadd.f32 1.0, %v5474_v58  ;;  %v5476_v46 = vpop.eup %5475 }
 0x7bc   :  { %5479 = vrcp.f32 %v3279_v2  ;;  %v5478_v24 = vpop.eup %5477  ;;  %v3282_v16 = vadd.f32 1.0, %v5476_v46 }
 0x7bd   :  { %5481 = vrcp.f32 %v3280_v7 }
 0x7be   :  { %5483 = vrcp.f32 %v3282_v16 }
 0x7c6   :  { %v5480_v23 = vpop.eup %5479 }
 0x7c7   :  { %v5482_v34 = vpop.eup %5481  ;;  %v3300_v12 = vmul.f32 %v5480_v23, %v5478_v24 }
 0x7c8   :  { %v3299_v6 = vmul.f32 %v5482_v34, %v7429_v63 }
 0x7ca   :  { %v3301_v54 = vadd.f32 %v3300_v12, %v3299_v6  ;;  %v3215_v35 = vpop.f32.mrb[100].mxu0  ;;  %v3256_v5 = vpop.f32.mrb[100].mxu1 }
 0x7cb   :  { %v3263_v13 = vadd.f32 %v3215_v35, %v8693_v37  ;;  %v3265_v25 = vadd.f32 %v3256_v5, %v8694_v33  ;;  %v3217_v19 = vpop.f32.mrb[101].mxu0  ;;  %v3258_v58 = vpop.f32.mrb[101].mxu1 }
 0x7cc   :  { %5485 = vtanh.f32 %v3301_v54  ;;  %v3264_v28 = vadd.f32 %v3217_v19, %v8695_v20  ;;  %v3266_v2 = vadd.f32 %v3258_v58, %v8696_v59  ;;  %v3219_v7 = vpop.f32.mrb[102].mxu0  ;;  %v3260_v24 = vpop.f32.mrb[102].mxu1  ;;  %v7596_v46 = vsel %vm3078_vm9, %v3301_v54, %v7429_v63 }
 0x7cd   :  { %v5068_v23 = vmul.f32 -1.442695, %v3263_v13  ;;  %v3220_v34 = vpop.f32.mrb[103].mxu0  ;;  %v3261_v12 = vpop.f32.mrb[103].mxu1  ;;  %v8715_v24 = vld [vmem:[#allocation20_spill] sm:$0xff] }
 0x7ce   :  { %v5069_v16 = vmul.f32 -1.442695, %v3264_v28  ;;  %v5484_v6 = vpop.eup %5483  ;;  %v5071_v5 = vmul.f32 -1.442695, %v3266_v2  ;;  %v8698_v34 = vld [vmem:[#allocation103_spill] sm:$0xff]  ;;  %v8699_v12 = vld [vmem:[#allocation104_spill] sm:$0xff] }
 0x7cf   :  { %5487 = vpow2.f32 %v5068_v23 }
 0x7d0   :  { %5489 = vpow2.f32 %v5069_v16  ;;  %v8700_v16 = vld [vmem:[#allocation105_spill] sm:$0xff] }
 0x7d1   :  { %5491 = vpow2.f32 %v5071_v5  ;;  %v8703_v5 = vld [vmem:[#allocation108_spill] sm:$0xff] }
 0x7d2   :  { %5493 = vtanh.f32 %v3265_v25 }
 0x7d6   :  { %v5486_v35 = vpop.eup %5485 }
 0x7d7   :  { %v3303_v37 = vmul.f32 %v5486_v35, %v5484_v6  ;;  %v8701_v6 = vld [vmem:[#allocation106_spill] sm:$0xff]  ;;  %v8702_v35 = vld [vmem:[#allocation107_spill] sm:$0xff] }
 0x7d9   :  { %v5488_v33 = vpop.eup %5487  ;;  %v7601_v19 = vsel %vm3078_vm9, %v3303_v37, %v7434_v29  ;;  %v8704_v37 = vld [vmem:[#allocation109_spill] sm:$0xff] }
 0x7da   :  { %v5490_v58 = vpop.eup %5489  ;;  %v3316_v20 = vadd.f32 1.0, %v5488_v33  ;;  %v3357_v63 = vpack.c.bf16 %v7601_v19, %v7601_v19  ;;  %v8705_v33 = vld [vmem:[#allocation110_spill] sm:$0xff] }
 0x7db   :  { %v3317_v54 = vadd.f32 1.0, %v5490_v58  ;;  %v5492_v29 = vpop.eup %5491 }
 0x7dc   :  { %5495 = vrcp.f32 %v3316_v20  ;;  %3391 = vmatmul.mubr.bf16.vlgmr.msra.gmra.mrb[104].mxu0 %v3357_v63  ;;  %3432 = vmatmul.mubr.bf16.vlgmr.msra.gmra.mrb[104].mxu1 %v3357_v63  ;;  %v5494_v38 = vpop.eup %5493  ;;  %v3319_v59 = vadd.f32 1.0, %v5492_v29  ;;  %v8707_v63 = vld [vmem:[#allocation112_spill] sm:$0xff] }
 0x7dd   :  { %5497 = vrcp.f32 %v3317_v54  ;;  %3446 = vmatpush1.bf16.msra.mxu0 %v7438_v45  ;;  %3487 = vmatpush1.bf16.msra.mxu1 %v7441_v62 }
 0x7de   :  { %3447 = vmatprep.subr.bf16.mxu0 %v7444_v4  ;;  %3488 = vmatprep.subr.bf16.mxu1 %v7447_v9  ;;  %5499 = vrcp.f32 %v3319_v59  ;;  %v8712_v59 = vld [vmem:[#allocation131_spill] sm:$0xff] }
 0x7df   :  { %3477 = vmatprep.mubr.bf16.mxu0 %v8425_v14  ;;  %3518 = vmatprep.mubr.bf16.mxu1 %v8425_v14 }
 0x7e1   :  { %3448 = vmatpush1.bf16.msra.mxu0 %v7452_v56  ;;  %3489 = vmatpush1.bf16.msra.mxu1 %v7455_v49 }
 0x7e2   :  { %3449 = vmatprep.subr.bf16.mxu0 %v7458_v22  ;;  %3490 = vmatprep.subr.bf16.mxu1 %v7461_v11 }
 0x7e5   :  { %3450 = vmatpush1.bf16.msra.mxu0 %v7464_v52  ;;  %3491 = vmatpush1.bf16.msra.mxu1 %v7467_v1 }
 0x7e6   :  { %v5496_v13 = vpop.eup %5495  ;;  %3451 = vmatprep.subr.bf16.mxu0 %v7470_v26  ;;  %3492 = vmatprep.subr.bf16.mxu1 %v7473_v44 }
 0x7e7   :  { %v5498_v25 = vpop.eup %5497  ;;  %v3337_v28 = vmul.f32 %v5496_v13, %v5494_v38  ;;  %v8709_v13 = vld [vmem:[#allocation128_spill] sm:$0xff] }
 0x7e8   :  { %v3336_v2 = vmul.f32 %v5498_v25, %v7495_v10  ;;  %v5500_v58 = vpop.eup %5499  ;;  %v8710_v25 = vld [vmem:[#allocation129_spill] sm:$0xff] }
 0x7e9   :  { %3452 = vmatpush1.bf16.msra.mxu0 %v7479_v53  ;;  %3493 = vmatpush1.bf16.msra.mxu1 %v7482_v42 }
 0x7ea   :  { %v3338_v7 = vadd.f32 %v3337_v28, %v3336_v2  ;;  %3453 = vmatprep.subr.bf16.mxu0 %v7485_v0  ;;  %3494 = vmatprep.subr.bf16.mxu1 %v7488_v57  ;;  %v8711_v28 = vld [vmem:[#allocation130_spill] sm:$0xff] }
 0x7eb   :  { %v8713_v2 = vld [vmem:[#allocation18_spill] sm:$0xff] }
 0x7ec   :  { %5501 = vtanh.f32 %v3338_v7  ;;  %v7627_v23 = vsel %vm3071_vm8, %v3338_v7, %v7495_v10  ;;  %v8706_v10 = vld [vmem:[#allocation111_spill] sm:$0xff]  ;;  %v8714_v7 = vld [vmem:[#allocation21_spill] sm:$0xff] }
 0x7ed   :  { %3454 = vmatpush1.bf16.msra.mxu0 %v8698_v34  ;;  %3495 = vmatpush1.bf16.msra.mxu1 %v8699_v12 }
 0x7ee   :  { %3455 = vmatprep.subr.bf16.mxu0 %v8700_v16  ;;  %3496 = vmatprep.subr.bf16.mxu1 %v8701_v6 }
 0x7f1   :  { %3456 = vmatpush1.bf16.msra.mxu0 %v8702_v35  ;;  %3497 = vmatpush1.bf16.msra.mxu1 %v8703_v5 }
 0x7f2   :  { %3457 = vmatprep.subr.bf16.mxu0 %v8704_v37  ;;  %3498 = vmatprep.subr.bf16.mxu1 %v8705_v33 }
 0x7f5   :  { %3458 = vmatpush1.bf16.msra.mxu0 %v7521_v55  ;;  %3499 = vmatpush1.bf16.msra.mxu1 %v8706_v10 }
 0x7f6   :  { %v5502_v20 = vpop.eup %5501  ;;  %3459 = vmatprep.subr.bf16.mxu0 %v8707_v63  ;;  %3500 = vmatprep.subr.bf16.mxu1 %v7530_v47 }
 0x7f7   :  { %v3340_v54 = vmul.f32 %v5502_v20, %v5500_v58  ;;  %v8716_v58 = vld [vmem:[#allocation22_spill] sm:$0xff]  ;;  %v8717_v20 = vld [vmem:[#allocation87_spill] sm:$0xff] }
 0x7f9   :  { %3460 = vmatpush1.bf16.msra.mxu0 %v7533_v36  ;;  %3501 = vmatpush1.bf16.msra.mxu1 %v7536_v3  ;;  %v7646_v29 = vsel %vm3071_vm8, %v3340_v54, %v7542_v51  ;;  %v8708_v51 = vld [vmem:[#allocation127_spill] sm:$0xff]  ;;  %v8718_v54 = vld [vmem:[#allocation89_spill] sm:$0xff] }
 0x7fa   :  { %v3444_v38 = vpack.c.bf16 %v7646_v29, %v7646_v29  ;;  %3622 = vmatprep.subr.bf16.mxu0 %v7312_v50  ;;  %3663 = vmatprep.subr.bf16.mxu1 %v7315_v39 }
 0x7fc   :  { %3478 = vmatmul.mubr.bf16.vlgmr.msra.gmra.mrb[108].mxu0 %v3444_v38  ;;  %3519 = vmatmul.mubr.bf16.vlgmr.msra.gmra.mrb[108].mxu1 %v3444_v38  ;;  %v8719_v38 = vld [vmem:[#allocation88_spill] sm:$0xff] }
 0x7fd   :  { %3623 = vmatpush1.bf16.msra.mxu0 %v7318_v32  ;;  %3664 = vmatpush1.bf16.msra.mxu1 %v7321_v27 }
 0x7fe   :  { %3624 = vmatprep.subr.bf16.mxu0 %v7324_v48  ;;  %3665 = vmatprep.subr.bf16.mxu1 %v7327_v43 }
 0x7ff   :  { %3654 = vmatprep.mubr.bf16.mxu0 %v8425_v14  ;;  %3695 = vmatprep.mubr.bf16.mxu1 %v8425_v14 }
 0x801   :  { %3625 = vmatpush1.bf16.msra.mxu0 %v7332_v30  ;;  %3666 = vmatpush1.bf16.msra.mxu1 %v7335_v60 }
 0x802   :  { %3626 = vmatprep.subr.bf16.mxu0 %v7338_v31  ;;  %3667 = vmatprep.subr.bf16.mxu1 %v7341_v61 }
 0x805   :  { %3627 = vmatpush1.bf16.msra.mxu0 %v7344_v41  ;;  %3668 = vmatpush1.bf16.msra.mxu1 %v7347_v21 }
 0x806   :  { %3628 = vmatprep.subr.bf16.mxu0 %v7350_v18  ;;  %3669 = vmatprep.subr.bf16.mxu1 %v7353_v8  ;;  %v8728_v8 = vld [vmem:[#allocation38_spill] sm:$0xff] }
 0x809   :  { %3629 = vmatpush1.bf16.msra.mxu0 %v7356_v40  ;;  %3670 = vmatpush1.bf16.msra.mxu1 %v7359_v15  ;;  %v8727_v40 = vld [vmem:[#allocation36_spill] sm:$0xff] }
 0x80a   :  { %3630 = vmatprep.subr.bf16.mxu0 %v7362_v17  ;;  %3671 = vmatprep.subr.bf16.mxu1 %v8708_v51  ;;  %v8725_v51 = vld [vmem:[#allocation34_spill] sm:$0xff]  ;;  %v8726_v17 = vld [vmem:[#allocation37_spill] sm:$0xff] }
 0x80d   :  { %3631 = vmatpush1.bf16.msra.mxu0 %v8709_v13  ;;  %3672 = vmatpush1.bf16.msra.mxu1 %v8710_v25  ;;  %v8720_v13 = vld [vmem:[#allocation91_spill] sm:$0xff]  ;;  %v8721_v25 = vld [vmem:[#allocation12_spill] sm:$0xff] }
 0x80e   :  { %3632 = vmatprep.subr.bf16.mxu0 %v8711_v28  ;;  %3673 = vmatprep.subr.bf16.mxu1 %v8712_v59  ;;  %v8722_v28 = vld [vmem:[#allocation100_spill] sm:$0xff]  ;;  %v8723_v59 = vld [vmem:[#allocation101_spill] sm:$0xff] }
 0x811   :  { %3633 = vmatpush1.bf16.msra.mxu0 %v8713_v2  ;;  %3674 = vmatpush1.bf16.msra.mxu1 %v8714_v7  ;;  %v8724_v2 = vld [vmem:[#allocation113_spill] sm:$0xff] }
 0x812   :  { %3634 = vmatprep.subr.bf16.mxu0 %v8715_v24  ;;  %3675 = vmatprep.subr.bf16.mxu1 %v8716_v58 }
 0x815   :  { %3635 = vmatpush1.bf16.msra.mxu0 %v8717_v20  ;;  %3676 = vmatpush1.bf16.msra.mxu1 %v8718_v54 }
 0x816   :  { %3636 = vmatprep.subr.bf16.mxu0 %v8719_v38  ;;  %3677 = vmatprep.subr.bf16.mxu1 %v8720_v13 }
 0x819   :  { %3637 = vmatpush1.bf16.msra.mxu0 %v8721_v25  ;;  %3678 = vmatpush1.bf16.msra.mxu1 %v8722_v28 }
 0x81a   :  { %3709 = vmatprep.subr.bf16.mxu0 %v8723_v59  ;;  %3750 = vmatprep.subr.bf16.mxu1 %v8724_v2 }
 0x8af   :  { %v3392_v7 = vpop.f32.mrb[104].mxu0  ;;  %v3433_v24 = vpop.f32.mrb[104].mxu1 }
 0x8b0   :  { %v3440_v58 = vadd.f32 %v3392_v7, %v8725_v51  ;;  %v3442_v20 = vadd.f32 %v3433_v24, %v8726_v17  ;;  %v3394_v15 = vpop.f32.mrb[105].mxu0  ;;  %v3435_v54 = vpop.f32.mrb[105].mxu1 }
 0x8b1   :  { %v3441_v38 = vadd.f32 %v3394_v15, %v8727_v40  ;;  %v3443_v13 = vadd.f32 %v3435_v54, %v8728_v8  ;;  %v3396_v18 = vpop.f32.mrb[106].mxu0  ;;  %v3437_v25 = vpop.f32.mrb[106].mxu1 }
 0x8b2   :  { %v5072_v21 = vmul.f32 -1.442695, %v3440_v58  ;;  %v3397_v28 = vpop.f32.mrb[107].mxu0  ;;  %v3438_v41 = vpop.f32.mrb[107].mxu1 }
 0x8b3   :  { %v5073_v59 = vmul.f32 -1.442695, %v3441_v38  ;;  %v5075_v2 = vmul.f32 -1.442695, %v3443_v13  ;;  %v8729_v13 = vld [vmem:[#allocation71_spill] sm:$0xff] }
 0x8b4   :  { %5503 = vpow2.f32 %v5072_v21  ;;  %v8732_v38 = vld [vmem:[#allocation75_spill] sm:$0xff] }
 0x8b5   :  { %5505 = vpow2.f32 %v5073_v59 }
 0x8b6   :  { %5507 = vpow2.f32 %v5075_v2 }
 0x8b7   :  { %5509 = vtanh.f32 %v3442_v20  ;;  %v8731_v20 = vld [vmem:[#allocation72_spill] sm:$0xff] }
 0x8be   :  { %v5504_v61 = vpop.eup %5503 }
 0x8bf   :  { %v5506_v31 = vpop.eup %5505  ;;  %v3543_v51 = vadd.f32 1.0, %v5504_v61  ;;  %v8730_v61 = vld [vmem:[#allocation73_spill] sm:$0xff] }
 0x8c0   :  { %v3544_v17 = vadd.f32 1.0, %v5506_v31  ;;  %v5508_v40 = vpop.eup %5507 }
 0x8c1   :  { %5511 = vrcp.f32 %v3543_v51  ;;  %v5510_v15 = vpop.eup %5509  ;;  %v3546_v7 = vadd.f32 1.0, %v5508_v40 }
 0x8c2   :  { %5513 = vrcp.f32 %v3544_v17 }
 0x8c3   :  { %5515 = vrcp.f32 %v3546_v7 }
 0x8cb   :  { %v5512_v8 = vpop.eup %5511 }
 0x8cc   :  { %v5514_v18 = vpop.eup %5513  ;;  %v3564_v25 = vmul.f32 %v5512_v8, %v5510_v15 }
 0x8cd   :  { %v3563_v41 = vmul.f32 %v5514_v18, %v7596_v46 }
 0x8cf   :  { %v3565_v28 = vadd.f32 %v3564_v25, %v3563_v41  ;;  %v3479_v21 = vpop.f32.mrb[108].mxu0  ;;  %v3520_v59 = vpop.f32.mrb[108].mxu1 }
 0x8d0   :  { %v3527_v24 = vadd.f32 %v3479_v21, %v8729_v13  ;;  %v3529_v2 = vadd.f32 %v3520_v59, %v8730_v61  ;;  %v3481_v58 = vpop.f32.mrb[109].mxu0  ;;  %v3522_v31 = vpop.f32.mrb[109].mxu1 }
 0x8d1   :  { %5517 = vtanh.f32 %v3565_v28  ;;  %v3528_v54 = vadd.f32 %v3481_v58, %v8731_v20  ;;  %v3530_v51 = vadd.f32 %v3522_v31, %v8732_v38  ;;  %v3483_v17 = vpop.f32.mrb[110].mxu0  ;;  %v3524_v15 = vpop.f32.mrb[110].mxu1  ;;  %v7698_v8 = vsel %vm2800_vm7, %v3565_v28, %v7596_v46 }
 0x8d2   :  { %v5076_v18 = vmul.f32 -1.442695, %v3527_v24  ;;  %v3484_v25 = vpop.f32.mrb[111].mxu0  ;;  %v3525_v7 = vpop.f32.mrb[111].mxu1 }
 0x8d3   :  { %v5077_v41 = vmul.f32 -1.442695, %v3528_v54  ;;  %v5516_v21 = vpop.eup %5515  ;;  %v5079_v13 = vmul.f32 -1.442695, %v3530_v51 }
 0x8d4   :  { %5519 = vpow2.f32 %v5076_v18  ;;  %v8759_v18 = vld [vmem:[#allocation101_spill] sm:$0xff] }
 0x8d5   :  { %5521 = vpow2.f32 %v5077_v41 }
 0x8d6   :  { %5523 = vpow2.f32 %v5079_v13  ;;  %v8742_v13 = vld [vmem:[#allocation125_spill] sm:$0xff] }
 0x8d7   :  { %5525 = vtanh.f32 %v3529_v2 }
 0x8db   :  { %v5518_v59 = vpop.eup %5517 }
 0x8dc   :  { %v3567_v61 = vmul.f32 %v5518_v59, %v5516_v21 }
 0x8de   :  { %v5520_v58 = vpop.eup %5519  ;;  %v7703_v31 = vsel %vm2800_vm7, %v3567_v61, %v7601_v19  ;;  %v8743_v61 = vld [vmem:[#allocation126_spill] sm:$0xff] }
 0x8df   :  { %v5522_v20 = vpop.eup %5521  ;;  %v3580_v38 = vadd.f32 1.0, %v5520_v58  ;;  %v3621_v46 = vpack.c.bf16 %v7703_v31, %v7703_v31  ;;  %v8746_v58 = vld [vmem:[#allocation129_spill] sm:$0xff] }
 0x8e0   :  { %v3581_v28 = vadd.f32 1.0, %v5522_v20  ;;  %v5524_v19 = vpop.eup %5523  ;;  %v8747_v20 = vld [vmem:[#allocation130_spill] sm:$0xff] }
 0x8e1   :  { %5527 = vrcp.f32 %v3580_v38  ;;  %3655 = vmatmul.mubr.bf16.vlgmr.msra.gmra.mrb[112].mxu0 %v3621_v46  ;;  %3696 = vmatmul.mubr.bf16.vlgmr.msra.gmra.mrb[112].mxu1 %v3621_v46  ;;  %v5526_v24 = vpop.eup %5525  ;;  %v3583_v17 = vadd.f32 1.0, %v5524_v19  ;;  %v8748_v38 = vld [vmem:[#allocation131_spill] sm:$0xff]  ;;  %v8749_v46 = vld [vmem:[#allocation18_spill] sm:$0xff]  ;;  %v8751_v19 = vld [vmem:[#allocation20_spill] sm:$0xff] }
 0x8e2   :  { %5529 = vrcp.f32 %v3581_v28  ;;  %3710 = vmatpush1.bf16.msra.mxu0 %v7438_v45  ;;  %3751 = vmatpush1.bf16.msra.mxu1 %v7441_v62  ;;  %v8750_v28 = vld [vmem:[#allocation21_spill] sm:$0xff] }
 0x8e3   :  { %3711 = vmatprep.subr.bf16.mxu0 %v7444_v4  ;;  %3752 = vmatprep.subr.bf16.mxu1 %v7447_v9  ;;  %5531 = vrcp.f32 %v3583_v17  ;;  %v8756_v17 = vld [vmem:[#allocation91_spill] sm:$0xff] }
 0x8e4   :  { %3741 = vmatprep.mubr.bf16.mxu0 %v8425_v14  ;;  %3782 = vmatprep.mubr.bf16.mxu1 %v8425_v14 }
 0x8e6   :  { %3712 = vmatpush1.bf16.msra.mxu0 %v7452_v56  ;;  %3753 = vmatpush1.bf16.msra.mxu1 %v7455_v49 }
 0x8e7   :  { %3713 = vmatprep.subr.bf16.mxu0 %v7458_v22  ;;  %3754 = vmatprep.subr.bf16.mxu1 %v7461_v11 }
 0x8ea   :  { %3714 = vmatpush1.bf16.msra.mxu0 %v7464_v52  ;;  %3755 = vmatpush1.bf16.msra.mxu1 %v7467_v1 }
 0x8eb   :  { %v5528_v2 = vpop.eup %5527  ;;  %3715 = vmatprep.subr.bf16.mxu0 %v7470_v26  ;;  %3756 = vmatprep.subr.bf16.mxu1 %v7473_v44 }
 0x8ec   :  { %v5530_v54 = vpop.eup %5529  ;;  %v3601_v51 = vmul.f32 %v5528_v2, %v5526_v24  ;;  %v8752_v24 = vld [vmem:[#allocation22_spill] sm:$0xff]  ;;  %v8753_v2 = vld [vmem:[#allocation87_spill] sm:$0xff] }
 0x8ed   :  { %v3600_v15 = vmul.f32 %v5530_v54, %v7627_v23  ;;  %v5532_v7 = vpop.eup %5531  ;;  %v8754_v54 = vld [vmem:[#allocation89_spill] sm:$0xff] }
 0x8ee   :  { %3716 = vmatpush1.bf16.msra.mxu0 %v7479_v53  ;;  %3757 = vmatpush1.bf16.msra.mxu1 %v7482_v42 }
 0x8ef   :  { %v3602_v40 = vadd.f32 %v3601_v51, %v3600_v15  ;;  %3717 = vmatprep.subr.bf16.mxu0 %v7485_v0  ;;  %3758 = vmatprep.subr.bf16.mxu1 %v7488_v57  ;;  %v8755_v51 = vld [vmem:[#allocation88_spill] sm:$0xff] }
 0x8f0   :  { %v8757_v15 = vld [vmem:[#allocation12_spill] sm:$0xff] }
 0x8f1   :  { %5533 = vtanh.f32 %v3602_v40  ;;  %v7729_v25 = vsel %vm2793_vm6, %v3602_v40, %v7627_v23  ;;  %v8758_v40 = vld [vmem:[#allocation100_spill] sm:$0xff] }
 0x8f2   :  { %3718 = vmatpush1.bf16.msra.mxu0 %v8698_v34  ;;  %3759 = vmatpush1.bf16.msra.mxu1 %v8699_v12 }
 0x8f3   :  { %3719 = vmatprep.subr.bf16.mxu0 %v8700_v16  ;;  %3760 = vmatprep.subr.bf16.mxu1 %v8701_v6 }
 0x8f6   :  { %3720 = vmatpush1.bf16.msra.mxu0 %v8702_v35  ;;  %3761 = vmatpush1.bf16.msra.mxu1 %v8703_v5 }
 0x8f7   :  { %3721 = vmatprep.subr.bf16.mxu0 %v8704_v37  ;;  %3762 = vmatprep.subr.bf16.mxu1 %v8705_v33 }
 0x8fa   :  { %3722 = vmatpush1.bf16.msra.mxu0 %v7521_v55  ;;  %3763 = vmatpush1.bf16.msra.mxu1 %v8706_v10 }
 0x8fb   :  { %v5534_v23 = vpop.eup %5533  ;;  %3723 = vmatprep.subr.bf16.mxu0 %v8707_v63  ;;  %3764 = vmatprep.subr.bf16.mxu1 %v7530_v47 }
 0x8fc   :  { %v3604_v41 = vmul.f32 %v5534_v23, %v5532_v7  ;;  %v8760_v7 = vld [vmem:[#allocation113_spill] sm:$0xff] }
 0x8fe   :  { %3724 = vmatpush1.bf16.msra.mxu0 %v7533_v36  ;;  %3765 = vmatpush1.bf16.msra.mxu1 %v7536_v3  ;;  %v7748_v21 = vsel %vm2793_vm6, %v3604_v41, %v7646_v29  ;;  %v8737_v29 = vld [vmem:[#allocation14_spill] sm:$0xff] }
 0x8ff   :  { %v3708_v59 = vpack.c.bf16 %v7748_v21, %v7748_v21  ;;  %3886 = vmatprep.subr.bf16.mxu0 %v7312_v50  ;;  %3927 = vmatprep.subr.bf16.mxu1 %v7315_v39  ;;  %v8735_v50 = vld [vmem:[#allocation92_spill] sm:$0xff]  ;;  %v8736_v39 = vld [vmem:[#allocation94_spill] sm:$0xff] }
 0x901   :  { %3742 = vmatmul.mubr.bf16.vlgmr.msra.gmra.mrb[116].mxu0 %v3708_v59  ;;  %3783 = vmatmul.mubr.bf16.vlgmr.msra.gmra.mrb[116].mxu1 %v3708_v59  ;;  %v8761_v59 = vld [vmem:[#allocation39_spill] sm:$0xff] }
 0x902   :  { %3887 = vmatpush1.bf16.msra.mxu0 %v7318_v32  ;;  %3928 = vmatpush1.bf16.msra.mxu1 %v7321_v27  ;;  %v8738_v32 = vld [vmem:[#allocation97_spill] sm:$0xff]  ;;  %v8739_v27 = vld [vmem:[#allocation96_spill] sm:$0xff] }
 0x903   :  { %3888 = vmatprep.subr.bf16.mxu0 %v7324_v48  ;;  %3929 = vmatprep.subr.bf16.mxu1 %v7327_v43  ;;  %v8740_v48 = vld [vmem:[#allocation98_spill] sm:$0xff]  ;;  %v8741_v43 = vld [vmem:[#allocation124_spill] sm:$0xff] }
 0x904   :  { %3918 = vmatprep.mubr.bf16.mxu0 %v8425_v14  ;;  %3959 = vmatprep.mubr.bf16.mxu1 %v8425_v14 }
 0x906   :  { %3889 = vmatpush1.bf16.msra.mxu0 %v7332_v30  ;;  %3930 = vmatpush1.bf16.msra.mxu1 %v7335_v60  ;;  %v8744_v30 = vld [vmem:[#allocation127_spill] sm:$0xff]  ;;  %v8745_v60 = vld [vmem:[#allocation128_spill] sm:$0xff] }
 0x907   :  { %3890 = vmatprep.subr.bf16.mxu0 %v8735_v50  ;;  %3931 = vmatprep.subr.bf16.mxu1 %v8736_v39  ;;  %v8762_v39 = vld [vmem:[#allocation41_spill] sm:$0xff] }
 0x90a   :  { %3891 = vmatpush1.bf16.msra.mxu0 %v8737_v29  ;;  %3932 = vmatpush1.bf16.msra.mxu1 %v8738_v32 }
 0x90b   :  { %3892 = vmatprep.subr.bf16.mxu0 %v8739_v27  ;;  %3933 = vmatprep.subr.bf16.mxu1 %v8740_v48  ;;  %v8763_v48 = vld [vmem:[#allocation40_spill] sm:$0xff] }
 0x90e   :  { %3893 = vmatpush1.bf16.msra.mxu0 %v8741_v43  ;;  %3934 = vmatpush1.bf16.msra.mxu1 %v8742_v13  ;;  %v8764_v13 = vld [vmem:[#allocation43_spill] sm:$0xff] }
 0x90f   :  { %3894 = vmatprep.subr.bf16.mxu0 %v8743_v61  ;;  %3935 = vmatprep.subr.bf16.mxu1 %v8744_v30 }
 0x912   :  { %3895 = vmatpush1.bf16.msra.mxu0 %v8745_v60  ;;  %3936 = vmatpush1.bf16.msra.mxu1 %v8746_v58 }
 0x913   :  { %3896 = vmatprep.subr.bf16.mxu0 %v8747_v20  ;;  %3937 = vmatprep.subr.bf16.mxu1 %v8748_v38 }
 0x916   :  { %3897 = vmatpush1.bf16.msra.mxu0 %v8749_v46  ;;  %3938 = vmatpush1.bf16.msra.mxu1 %v8750_v28 }
 0x917   :  { %3898 = vmatprep.subr.bf16.mxu0 %v8751_v19  ;;  %3939 = vmatprep.subr.bf16.mxu1 %v8752_v24 }
 0x91a   :  { %3899 = vmatpush1.bf16.msra.mxu0 %v8753_v2  ;;  %3940 = vmatpush1.bf16.msra.mxu1 %v8754_v54 }
 0x91b   :  { %3900 = vmatprep.subr.bf16.mxu0 %v8755_v51  ;;  %3941 = vmatprep.subr.bf16.mxu1 %v8756_v17 }
 0x91e   :  { %3901 = vmatpush1.bf16.msra.mxu0 %v8757_v15  ;;  %3942 = vmatpush1.bf16.msra.mxu1 %v8758_v40 }
 0x91f   :  { %3973 = vmatprep.subr.bf16.mxu0 %v8759_v18  ;;  %4014 = vmatprep.subr.bf16.mxu1 %v8760_v7 }
 0x9b4   :  { %v3656_v23 = vpop.f32.mrb[112].mxu0  ;;  %v3697_v41 = vpop.f32.mrb[112].mxu1 }
 0x9b5   :  { %v3704_v50 = vadd.f32 %v3656_v23, %v8761_v59  ;;  %v3706_v29 = vadd.f32 %v3697_v41, %v8762_v39  ;;  %v3658_v32 = vpop.f32.mrb[113].mxu0  ;;  %v3699_v27 = vpop.f32.mrb[113].mxu1 }
 0x9b6   :  { %v3705_v43 = vadd.f32 %v3658_v32, %v8763_v48  ;;  %v3707_v61 = vadd.f32 %v3699_v27, %v8764_v13  ;;  %v3660_v30 = vpop.f32.mrb[114].mxu0  ;;  %v3701_v60 = vpop.f32.mrb[114].mxu1  ;;  %v8765_v32 = vld [vmem:[#allocation66_spill] sm:$0xff]  ;;  %v8766_v48 = vld [vmem:[#allocation69_spill] sm:$0xff] }
 0x9b7   :  { %v5080_v58 = vmul.f32 -1.442695, %v3704_v50  ;;  %v3661_v20 = vpop.f32.mrb[115].mxu0  ;;  %v3702_v38 = vpop.f32.mrb[115].mxu1  ;;  %v8768_v60 = vld [vmem:[#allocation70_spill] sm:$0xff] }
 0x9b8   :  { %v5081_v46 = vmul.f32 -1.442695, %v3705_v43  ;;  %v5083_v28 = vmul.f32 -1.442695, %v3707_v61  ;;  %v8767_v61 = vld [vmem:[#allocation68_spill] sm:$0xff] }
 0x9b9   :  { %5535 = vpow2.f32 %v5080_v58 }
 0x9ba   :  { %5537 = vpow2.f32 %v5081_v46  ;;  %v7949_v46 = vld [vmem:[#allocation6 + $0xe8] ss:$16 sps:$4 sm:$0xff]  }
 0x9bb   :  { %5539 = vpow2.f32 %v5083_v28 }
 0x9bc   :  { %5541 = vtanh.f32 %v3706_v29 }
 0x9c3   :  { %v5536_v19 = vpop.eup %5535 }
 0x9c4   :  { %v5538_v24 = vpop.eup %5537  ;;  %v3807_v2 = vadd.f32 1.0, %v5536_v19 }
 0x9c5   :  { %v3808_v54 = vadd.f32 1.0, %v5538_v24  ;;  %v5540_v51 = vpop.eup %5539 }
 0x9c6   :  { %5543 = vrcp.f32 %v3807_v2  ;;  %v5542_v17 = vpop.eup %5541  ;;  %v3810_v23 = vadd.f32 1.0, %v5540_v51 }
 0x9c7   :  { %5545 = vrcp.f32 %v3808_v54 }
 0x9c8   :  { %5547 = vrcp.f32 %v3810_v23 }
 0x9d0   :  { %v5544_v15 = vpop.eup %5543 }
 0x9d1   :  { %v5546_v40 = vpop.eup %5545  ;;  %v3828_v18 = vmul.f32 %v5544_v15, %v5542_v17 }
 0x9d2   :  { %v3827_v41 = vmul.f32 %v5546_v40, %v7698_v8  ;;  %v5548_v51 = vpop.eup %5547 }
 0x9d4   :  { %v3829_v59 = vadd.f32 %v3828_v18, %v3827_v41  ;;  %v3743_v50 = vpop.f32.mrb[116].mxu0  ;;  %v3784_v39 = vpop.f32.mrb[116].mxu1 }
 0x9d5   :  { %v3791_v27 = vadd.f32 %v3743_v50, %v8765_v32  ;;  %v3793_v43 = vadd.f32 %v3784_v39, %v8766_v48  ;;  %v3745_v29 = vpop.f32.mrb[117].mxu0  ;;  %v3786_v13 = vpop.f32.mrb[117].mxu1  ;;  %v7910_v39 = vld [vmem:[#allocation6 + $0x80] ss:$16 sps:$4 sm:$0xff]   ;;  %v7913_v32 = vld [vmem:[#allocation6 + $0x88] ss:$16 sps:$4 sm:$0xff]  }
 0x9d6   :  { %5549 = vtanh.f32 %v3829_v59  ;;  %v3792_v30 = vadd.f32 %v3745_v29, %v8767_v61  ;;  %v3794_v58 = vadd.f32 %v3786_v13, %v8768_v60  ;;  %v3747_v20 = vpop.f32.mrb[118].mxu0  ;;  %v3788_v38 = vpop.f32.mrb[118].mxu1  ;;  %v7800_v28 = vsel %vm2522_vm5, %v3829_v59, %v7698_v8  ;;  %v7919_v48 = vld [vmem:[#allocation6 + $0xac] ss:$16 sps:$4 sm:$0xff]   ;;  %v7925_v29 = vld [vmem:[#allocation6 + $0xa8] ss:$16 sps:$4 sm:$0xff]  }
 0x9d7   :  { %v5084_v19 = vmul.f32 -1.442695, %v3791_v27  ;;  %v3748_v24 = vpop.f32.mrb[119].mxu0  ;;  %v3789_v2 = vpop.f32.mrb[119].mxu1  ;;  %v7916_v27 = vld [vmem:[#allocation6 + $0xa4] ss:$16 sps:$4 sm:$0xff]  }
 0x9d8   :  { %v5085_v54 = vmul.f32 -1.442695, %v3792_v30  ;;  %v5087_v15 = vmul.f32 -1.442695, %v3794_v58  ;;  %v7928_v13 = vld [vmem:[#allocation6 + $0xc4] ss:$16 sps:$4 sm:$0xff]  }
 0x9d9   :  { %5551 = vpow2.f32 %v5084_v19  ;;  %v7931_v61 = vld [vmem:[#allocation6 + $0xcc] ss:$16 sps:$4 sm:$0xff]   ;;  %v7934_v30 = vld [vmem:[#allocation6 + $0xc0] ss:$16 sps:$4 sm:$0xff]   ;;  %v7937_v60 = vld [vmem:[#allocation6 + $0xc8] ss:$16 sps:$4 sm:$0xff]  }
 0x9da   :  { %5553 = vpow2.f32 %v5085_v54  ;;  %v7940_v58 = vld [vmem:[#allocation6 + $0xe4] ss:$16 sps:$4 sm:$0xff]   ;;  %v7943_v20 = vld [vmem:[#allocation6 + $0xec] ss:$16 sps:$4 sm:$0xff]   ;;  %v7946_v38 = vld [vmem:[#allocation6 + $0xe0] ss:$16 sps:$4 sm:$0xff]  }
 0x9db   :  { %5555 = vpow2.f32 %v5087_v15  ;;  %v7952_v19 = vld [vmem:[#allocation8 + $0x4] ss:$16 sps:$4 sm:$0xff]   ;;  %v8771_v54 = vld [vmem:[#allocation42_spill] sm:$0xff] }
 0x9dc   :  { %5557 = vtanh.f32 %v3793_v43  ;;  %v7922_v43 = vld [vmem:[#allocation6 + $0xa0] ss:$16 sps:$4 sm:$0xff]  }
 0x9e0   :  { %v5550_v17 = vpop.eup %5549 }
 0x9e1   :  { %v3831_v40 = vmul.f32 %v5550_v17, %v5548_v51  ;;  %v8772_v17 = vld [vmem:[#allocation45_spill] sm:$0xff] }
 0x9e3   :  { %v5552_v18 = vpop.eup %5551  ;;  %v7805_v23 = vsel %vm2522_vm5, %v3831_v40, %v7703_v31 }
 0x9e4   :  { %v5554_v41 = vpop.eup %5553  ;;  %v3844_v50 = vadd.f32 1.0, %v5552_v18  ;;  %v3885_v8 = vpack.c.bf16 %v7805_v23, %v7805_v23 }
 0x9e5   :  { %v3845_v59 = vadd.f32 1.0, %v5554_v41  ;;  %v5556_v31 = vpop.eup %5555  ;;  %v8773_v41 = vld [vmem:[#allocation44_spill] sm:$0xff] }
 0x9e6   :  { %5559 = vrcp.f32 %v3844_v50  ;;  %3919 = vmatmul.mubr.bf16.vlgmr.msra.gmra.mrb[120].mxu0 %v3885_v8  ;;  %3960 = vmatmul.mubr.bf16.vlgmr.msra.gmra.mrb[120].mxu1 %v3885_v8  ;;  %v8774_v8 = vld [vmem:[#allocation46_spill] sm:$0xff] }
 0x9e7   :  { %5561 = vrcp.f32 %v3845_v59  ;;  %3974 = vmatpush1.bf16.msra.mxu0 %v7438_v45  ;;  %4015 = vmatpush1.bf16.msra.mxu1 %v7441_v62  ;;  %v5558_v45 = vpop.eup %5557 }
 0x9e8   :  { %3975 = vmatprep.subr.bf16.mxu0 %v7444_v4  ;;  %4016 = vmatprep.subr.bf16.mxu1 %v7447_v9 }
 0x9e9   :  { %4005 = vmatprep.mubr.bf16.mxu0 %v8425_v14  ;;  %4046 = vmatprep.mubr.bf16.mxu1 %v8425_v14 }
 0x9eb   :  { %3976 = vmatpush1.bf16.msra.mxu0 %v7452_v56  ;;  %4017 = vmatpush1.bf16.msra.mxu1 %v7455_v49  ;;  %v3847_v56 = vadd.f32 1.0, %v5556_v31 }
 0x9ec   :  { %3977 = vmatprep.subr.bf16.mxu0 %v7458_v22  ;;  %4018 = vmatprep.subr.bf16.mxu1 %v7461_v11 }
 0x9ed   :  { %5563 = vrcp.f32 %v3847_v56 }
 0x9ef   :  { %3978 = vmatpush1.bf16.msra.mxu0 %v7464_v52  ;;  %4019 = vmatpush1.bf16.msra.mxu1 %v7467_v1 }
 0x9f0   :  { %v5560_v62 = vpop.eup %5559  ;;  %3979 = vmatprep.subr.bf16.mxu0 %v7470_v26  ;;  %4020 = vmatprep.subr.bf16.mxu1 %v7473_v44  ;;  %v7854_v44 = vld [vmem:[#allocation6 + $0x4] ss:$16 sps:$4 sm:$0xff]  }
 0x9f1   :  { %v5562_v4 = vpop.eup %5561  ;;  %v3865_v9 = vmul.f32 %v5560_v62, %v5558_v45 }
 0x9f2   :  { %v3864_v49 = vmul.f32 %v5562_v4, %v7729_v25 }
 0x9f3   :  { %3980 = vmatpush1.bf16.msra.mxu0 %v7479_v53  ;;  %4021 = vmatpush1.bf16.msra.mxu1 %v7482_v42  ;;  %v7857_v53 = vld [vmem:[#allocation6 + $0xc] ss:$16 sps:$4 sm:$0xff]  }
 0x9f4   :  { %v3866_v22 = vadd.f32 %v3865_v9, %v3864_v49  ;;  %3981 = vmatprep.subr.bf16.mxu0 %v7485_v0  ;;  %4022 = vmatprep.subr.bf16.mxu1 %v7488_v57 }
 0x9f6   :  { %5565 = vtanh.f32 %v3866_v22  ;;  %v7831_v52 = vsel %vm2515_vm4, %v3866_v22, %v7729_v25  ;;  %v7904_v25 = vld [vmem:[#allocation6 + $0x84] ss:$16 sps:$4 sm:$0xff]  }
 0x9f7   :  { %3982 = vmatpush1.bf16.msra.mxu0 %v8698_v34  ;;  %4023 = vmatpush1.bf16.msra.mxu1 %v8699_v12  ;;  %v5564_v42 = vpop.eup %5563  ;;  %v7874_v34 = vld [vmem:[#allocation6 + $0x20] ss:$16 sps:$4 sm:$0xff]   ;;  %v7877_v12 = vld [vmem:[#allocation6 + $0x28] ss:$16 sps:$4 sm:$0xff]  }
 0x9f8   :  { %3983 = vmatprep.subr.bf16.mxu0 %v8700_v16  ;;  %4024 = vmatprep.subr.bf16.mxu1 %v8701_v6  ;;  %v7880_v16 = vld [vmem:[#allocation6 + $0x44] ss:$16 sps:$4 sm:$0xff]   ;;  %v7883_v6 = vld [vmem:[#allocation6 + $0x4c] ss:$16 sps:$4 sm:$0xff]  }
 0x9fb   :  { %3984 = vmatpush1.bf16.msra.mxu0 %v8702_v35  ;;  %4025 = vmatpush1.bf16.msra.mxu1 %v8703_v5  ;;  %v7886_v35 = vld [vmem:[#allocation6 + $0x40] ss:$16 sps:$4 sm:$0xff]   ;;  %v7889_v5 = vld [vmem:[#allocation6 + $0x48] ss:$16 sps:$4 sm:$0xff]  }
 0x9fc   :  { %3985 = vmatprep.subr.bf16.mxu0 %v8704_v37  ;;  %4026 = vmatprep.subr.bf16.mxu1 %v8705_v33  ;;  %v7892_v37 = vld [vmem:[#allocation6 + $0x64] ss:$16 sps:$4 sm:$0xff]   ;;  %v7895_v33 = vld [vmem:[#allocation6 + $0x6c] ss:$16 sps:$4 sm:$0xff]  }
 0x9ff   :  { %3986 = vmatpush1.bf16.msra.mxu0 %v7521_v55  ;;  %4027 = vmatpush1.bf16.msra.mxu1 %v8706_v10  ;;  %v7860_v55 = vld [vmem:[#allocation6] ss:$16 sps:$4 sm:$0xff]  }
 0xa00   :  { %v5566_v0 = vpop.eup %5565  ;;  %3987 = vmatprep.subr.bf16.mxu0 %v8707_v63  ;;  %4028 = vmatprep.subr.bf16.mxu1 %v7530_v47  ;;  %v7866_v47 = vld [vmem:[#allocation6 + $0x24] ss:$16 sps:$4 sm:$0xff]   ;;  %v7898_v10 = vld [vmem:[#allocation6 + $0x60] ss:$16 sps:$4 sm:$0xff]   ;;  %v7901_v63 = vld [vmem:[#allocation6 + $0x68] ss:$16 sps:$4 sm:$0xff]  }
 0xa01   :  { %v3868_v57 = vmul.f32 %v5566_v0, %v5564_v42 }
 0xa03   :  { %3988 = vmatpush1.bf16.msra.mxu0 %v7533_v36  ;;  %4029 = vmatpush1.bf16.msra.mxu1 %v7536_v3  ;;  %v7850_v1 = vsel %vm2515_vm4, %v3868_v57, %v7748_v21  ;;  %v7863_v3 = vld [vmem:[#allocation6 + $0x8] ss:$16 sps:$4 sm:$0xff]   ;;  %v7869_v36 = vld [vmem:[#allocation6 + $0x2c] ss:$16 sps:$4 sm:$0xff]  }
 0xa04   :  { %v3972_v26 = vpack.c.bf16 %v7850_v1, %v7850_v1  ;;  %4150 = vmatprep.subr.bf16.mxu0 %v7854_v44  ;;  %4191 = vmatprep.subr.bf16.mxu1 %v7857_v53  ;;  %v7907_v21 = vld [vmem:[#allocation6 + $0x8c] ss:$16 sps:$4 sm:$0xff]  }
 0xa06   :  { %4006 = vmatmul.mubr.bf16.vlgmr.msra.gmra.mrb[124].mxu0 %v3972_v26  ;;  %4047 = vmatmul.mubr.bf16.vlgmr.msra.gmra.mrb[124].mxu1 %v3972_v26 }
 0xa07   :  { %4151 = vmatpush1.bf16.msra.mxu0 %v7860_v55  ;;  %4192 = vmatpush1.bf16.msra.mxu1 %v7863_v3 }
 0xa08   :  { %4152 = vmatprep.subr.bf16.mxu0 %v7866_v47  ;;  %4193 = vmatprep.subr.bf16.mxu1 %v7869_v36 }
 0xa09   :  { %4182 = vmatprep.mubr.bf16.mxu0 %v8425_v14  ;;  %4223 = vmatprep.mubr.bf16.mxu1 %v8425_v14 }
 0xa0b   :  { %4153 = vmatpush1.bf16.msra.mxu0 %v7874_v34  ;;  %4194 = vmatpush1.bf16.msra.mxu1 %v7877_v12 }
 0xa0c   :  { %4154 = vmatprep.subr.bf16.mxu0 %v7880_v16  ;;  %4195 = vmatprep.subr.bf16.mxu1 %v7883_v6 }
 0xa0f   :  { %4155 = vmatpush1.bf16.msra.mxu0 %v7886_v35  ;;  %4196 = vmatpush1.bf16.msra.mxu1 %v7889_v5 }
 0xa10   :  { %4156 = vmatprep.subr.bf16.mxu0 %v7892_v37  ;;  %4197 = vmatprep.subr.bf16.mxu1 %v7895_v33 }
 0xa13   :  { %4157 = vmatpush1.bf16.msra.mxu0 %v7898_v10  ;;  %4198 = vmatpush1.bf16.msra.mxu1 %v7901_v63 }
 0xa14   :  { %4158 = vmatprep.subr.bf16.mxu0 %v7904_v25  ;;  %4199 = vmatprep.subr.bf16.mxu1 %v7907_v21 }
 0xa17   :  { %4159 = vmatpush1.bf16.msra.mxu0 %v7910_v39  ;;  %4200 = vmatpush1.bf16.msra.mxu1 %v7913_v32 }
 0xa18   :  { %4160 = vmatprep.subr.bf16.mxu0 %v7916_v27  ;;  %4201 = vmatprep.subr.bf16.mxu1 %v7919_v48 }
 0xa1b   :  { %4161 = vmatpush1.bf16.msra.mxu0 %v7922_v43  ;;  %4202 = vmatpush1.bf16.msra.mxu1 %v7925_v29 }
 0xa1c   :  { %4162 = vmatprep.subr.bf16.mxu0 %v7928_v13  ;;  %4203 = vmatprep.subr.bf16.mxu1 %v7931_v61 }
 0xa1f   :  { %4163 = vmatpush1.bf16.msra.mxu0 %v7934_v30  ;;  %4204 = vmatpush1.bf16.msra.mxu1 %v7937_v60 }
 0xa20   :  { %4164 = vmatprep.subr.bf16.mxu0 %v7940_v58  ;;  %4205 = vmatprep.subr.bf16.mxu1 %v7943_v20 }
 0xa23   :  { %4165 = vmatpush1.bf16.msra.mxu0 %v7946_v38  ;;  %4206 = vmatpush1.bf16.msra.mxu1 %v7949_v46 }
 0xa24   :  { %4237 = vmatprep.subr.bf16.mxu0 %v7952_v19  ;;  %4278 = vmatprep.subr.bf16.mxu1 %v8760_v7 }
 0xab9   :  { %v3920_v24 = vpop.f32.mrb[120].mxu0  ;;  %v3961_v2 = vpop.f32.mrb[120].mxu1 }
 0xaba   :  { %v3968_v51 = vadd.f32 %v3920_v24, %v8771_v54  ;;  %v3970_v15 = vadd.f32 %v3961_v2, %v8772_v17  ;;  %v3922_v40 = vpop.f32.mrb[121].mxu0  ;;  %v3963_v18 = vpop.f32.mrb[121].mxu1 }
 0xabb   :  { %v3969_v50 = vadd.f32 %v3922_v40, %v8773_v41  ;;  %v3971_v59 = vadd.f32 %v3963_v18, %v8774_v8  ;;  %v3924_v31 = vpop.f32.mrb[122].mxu0  ;;  %v3965_v45 = vpop.f32.mrb[122].mxu1  ;;  %v8775_v41 = vld [vmem:[#allocation63_spill] sm:$0xff]  ;;  %v8776_v8 = vld [vmem:[#allocation65_spill] sm:$0xff] }
 0xabc   :  { %v5088_v62 = vmul.f32 -1.442695, %v3968_v51  ;;  %v3925_v4 = vpop.f32.mrb[123].mxu0  ;;  %v3966_v9 = vpop.f32.mrb[123].mxu1  ;;  %v8777_v45 = vld [vmem:[#allocation64_spill] sm:$0xff] }
 0xabd   :  { %v5089_v56 = vmul.f32 -1.442695, %v3969_v50  ;;  %v5091_v7 = vmul.f32 -1.442695, %v3971_v59  ;;  %v8778_v4 = vld [vmem:[#allocation67_spill] sm:$0xff] }
 0xabe   :  { %5567 = vpow2.f32 %v5088_v62 }
 0xabf   :  { %5569 = vpow2.f32 %v5089_v56 }
 0xac0   :  { %5571 = vpow2.f32 %v5091_v7 }
 0xac1   :  { %5573 = vtanh.f32 %v3970_v15 }
 0xac8   :  { %v5568_v49 = vpop.eup %5567 }
 0xac9   :  { %v5570_v22 = vpop.eup %5569  ;;  %v4071_v11 = vadd.f32 1.0, %v5568_v49 }
 0xaca   :  { %v4072_v42 = vadd.f32 1.0, %v5570_v22  ;;  %v5572_v0 = vpop.eup %5571 }
 0xacb   :  { %5575 = vrcp.f32 %v4071_v11  ;;  %v5574_v57 = vpop.eup %5573  ;;  %v4074_v54 = vadd.f32 1.0, %v5572_v0 }
 0xacc   :  { %5577 = vrcp.f32 %v4072_v42 }
 0xacd   :  { %5579 = vrcp.f32 %v4074_v54 }
 0xad5   :  { %v5576_v26 = vpop.eup %5575 }
 0xad6   :  { %v5578_v24 = vpop.eup %5577  ;;  %v4092_v2 = vmul.f32 %v5576_v26, %v5574_v57 }
 0xad7   :  { %v4091_v51 = vmul.f32 %v5578_v24, %v7800_v28  ;;  %v5580_v26 = vpop.eup %5579 }
 0xad9   :  { %v4093_v17 = vadd.f32 %v4092_v2, %v4091_v51  ;;  %v4007_v40 = vpop.f32.mrb[124].mxu0  ;;  %v4048_v18 = vpop.f32.mrb[124].mxu1 }
 0xada   :  { %v4055_v50 = vadd.f32 %v4007_v40, %v8775_v41  ;;  %v4057_v59 = vadd.f32 %v4048_v18, %v8776_v8  ;;  %v4009_v15 = vpop.f32.mrb[125].mxu0  ;;  %v4050_v31 = vpop.f32.mrb[125].mxu1  ;;  %v7980_v8 = vld [vmem:[#allocation8 + $0x8] ss:$16 sps:$4 sm:$0xff]  }
 0xadb   :  { %5581 = vtanh.f32 %v4093_v17  ;;  %v4056_v62 = vadd.f32 %v4009_v15, %v8777_v45  ;;  %v4058_v9 = vadd.f32 %v4050_v31, %v8778_v4  ;;  %v4011_v56 = vpop.f32.mrb[126].mxu0  ;;  %v4052_v7 = vpop.f32.mrb[126].mxu1  ;;  %v7968_v22 = vsel %vm2244_vm3, %v4093_v17, %v7800_v28  ;;  %v7986_v15 = vld [vmem:[#allocation8 + $0x2c] ss:$16 sps:$4 sm:$0xff]   ;;  %v7994_v31 = vld [vmem:[#allocation8 + $0x28] ss:$16 sps:$4 sm:$0xff]  }
 0xadc   :  { %v5092_v11 = vmul.f32 -1.442695, %v4055_v50  ;;  %v4012_v42 = vpop.f32.mrb[127].mxu0  ;;  %v4053_v0 = vpop.f32.mrb[127].mxu1  ;;  %v7977_v50 = vld [vmem:[#allocation8] ss:$16 sps:$4 sm:$0xff]  }
 0xadd   :  { %v5093_v57 = vmul.f32 -1.442695, %v4056_v62  ;;  %v5095_v2 = vmul.f32 -1.442695, %v4058_v9  ;;  %v7997_v45 = vld [vmem:[#allocation8 + $0x44] ss:$16 sps:$4 sm:$0xff]  }
 0xade   :  { %5583 = vpow2.f32 %v5092_v11  ;;  %v8000_v62 = vld [vmem:[#allocation8 + $0x4c] ss:$16 sps:$4 sm:$0xff]   ;;  %v8003_v56 = vld [vmem:[#allocation8 + $0x40] ss:$16 sps:$4 sm:$0xff]   ;;  %v8006_v7 = vld [vmem:[#allocation8 + $0x48] ss:$16 sps:$4 sm:$0xff]  }
 0xadf   :  { %5585 = vpow2.f32 %v5093_v57  ;;  %v8009_v11 = vld [vmem:[#allocation8 + $0x64] ss:$16 sps:$4 sm:$0xff]   ;;  %v8012_v42 = vld [vmem:[#allocation8 + $0x6c] ss:$16 sps:$4 sm:$0xff]  }
 0xae0   :  { %5587 = vpow2.f32 %v5095_v2  ;;  %v8016_v2 = vld [vmem:[#allocation8 + $0x60] ss:$16 sps:$4 sm:$0xff]  }
 0xae1   :  { %5589 = vtanh.f32 %v4057_v59  ;;  %v7991_v59 = vld [vmem:[#allocation8 + $0x20] ss:$16 sps:$4 sm:$0xff]  }
 0xae5   :  { %v5582_v24 = vpop.eup %5581 }
 0xae6   :  { %v4095_v54 = vmul.f32 %v5582_v24, %v5580_v26 }
 0xae8   :  { %v5584_v51 = vpop.eup %5583  ;;  %v7973_v40 = vsel %vm2244_vm3, %v4095_v54, %v7805_v23  ;;  %v7983_v23 = vld [vmem:[#allocation8 + $0x24] ss:$16 sps:$4 sm:$0xff]   ;;  %v8019_v54 = vld [vmem:[#allocation8 + $0x68] ss:$16 sps:$4 sm:$0xff]  }
 0xae9   :  { %v5586_v18 = vpop.eup %5585  ;;  %v4108_v41 = vadd.f32 1.0, %v5584_v51  ;;  %v4149_v28 = vpack.c.bf16 %v7973_v40, %v7973_v40 }
 0xaea   :  { %v4109_v17 = vadd.f32 1.0, %v5586_v18  ;;  %v5588_v4 = vpop.eup %5587  ;;  %v8022_v18 = vld [vmem:[#allocation8 + $0x84] ss:$16 sps:$4 sm:$0xff]  }
 0xaeb   :  { %5591 = vrcp.f32 %v4108_v41  ;;  %4183 = vmatmul.mubr.bf16.vlgmr.msra.gmra.mrb[128].mxu0 %v4149_v28  ;;  %4224 = vmatmul.mubr.bf16.vlgmr.msra.gmra.mrb[128].mxu1 %v4149_v28  ;;  %v5590_v9 = vpop.eup %5589  ;;  %v4111_v26 = vadd.f32 1.0, %v5588_v4  ;;  %v8025_v41 = vld [vmem:[#allocation8 + $0x8c] ss:$16 sps:$4 sm:$0xff]   ;;  %v8033_v4 = vld [vmem:[#allocation8 + $0x80] ss:$16 sps:$4 sm:$0xff]  }
 0xaec   :  { %5593 = vrcp.f32 %v4109_v17  ;;  %4238 = vmatpush1.bf16.msra.mxu0 %v7977_v50  ;;  %4279 = vmatpush1.bf16.msra.mxu1 %v7980_v8  ;;  %8781 = vst [vmem:[#allocation114_spill] sm:$0xff] %v8033_v4  ;;  %v8795_v28 = vld [vmem:[#allocation58_spill] sm:$0xff] }
 0xaed   :  { %4239 = vmatprep.subr.bf16.mxu0 %v7983_v23  ;;  %4280 = vmatprep.subr.bf16.mxu1 %v7986_v15  ;;  %5595 = vrcp.f32 %v4111_v26  ;;  %v8051_v26 = vld [vmem:[#allocation8 + $0xc4] ss:$16 sps:$4 sm:$0xff]  }
 0xaee   :  { %4269 = vmatprep.mubr.bf16.mxu0 %v8425_v14  ;;  %4310 = vmatprep.mubr.bf16.mxu1 %v8425_v14  ;;  %8787 = vst [vmem:[#allocation120_spill] sm:$0xff] %v8051_v26 }
 0xaf0   :  { %4240 = vmatpush1.bf16.msra.mxu0 %v7991_v59  ;;  %4281 = vmatpush1.bf16.msra.mxu1 %v7994_v31 }
 0xaf1   :  { %4241 = vmatprep.subr.bf16.mxu0 %v7997_v45  ;;  %4282 = vmatprep.subr.bf16.mxu1 %v8000_v62 }
 0xaf4   :  { %4242 = vmatpush1.bf16.msra.mxu0 %v8003_v56  ;;  %4283 = vmatpush1.bf16.msra.mxu1 %v8006_v7 }
 0xaf5   :  { %v5592_v49 = vpop.eup %5591  ;;  %4243 = vmatprep.subr.bf16.mxu0 %v8009_v11  ;;  %4284 = vmatprep.subr.bf16.mxu1 %v8012_v42 }
 0xaf6   :  { %v5594_v0 = vpop.eup %5593  ;;  %v4129_v57 = vmul.f32 %v5592_v49, %v5590_v9  ;;  %v8036_v9 = vld [vmem:[#allocation8 + $0x88] ss:$16 sps:$4 sm:$0xff]   ;;  %v8039_v49 = vld [vmem:[#allocation8 + $0xa4] ss:$16 sps:$4 sm:$0xff]  }
 0xaf7   :  { %v4128_v24 = vmul.f32 %v5594_v0, %v7831_v52  ;;  %8782 = vst [vmem:[#allocation115_spill] sm:$0xff] %v8036_v9  ;;  %8783 = vst [vmem:[#allocation116_spill] sm:$0xff] %v8039_v49  ;;  %v8042_v0 = vld [vmem:[#allocation8 + $0xac] ss:$16 sps:$4 sm:$0xff]  }
 0xaf8   :  { %4244 = vmatpush1.bf16.msra.mxu0 %v8016_v2  ;;  %4285 = vmatpush1.bf16.msra.mxu1 %v8019_v54  ;;  %8784 = vst [vmem:[#allocation117_spill] sm:$0xff] %v8042_v0 }
 0xaf9   :  { %v4130_v51 = vadd.f32 %v4129_v57, %v4128_v24  ;;  %4245 = vmatprep.subr.bf16.mxu0 %v8022_v18  ;;  %4286 = vmatprep.subr.bf16.mxu1 %v8025_v41  ;;  %v8045_v57 = vld [vmem:[#allocation8 + $0xa0] ss:$16 sps:$4 sm:$0xff]   ;;  %v8054_v24 = vld [vmem:[#allocation8 + $0xcc] ss:$16 sps:$4 sm:$0xff]  }
 0xafa   :  { %8785 = vst [vmem:[#allocation118_spill] sm:$0xff] %v8045_v57  ;;  %8788 = vst [vmem:[#allocation121_spill] sm:$0xff] %v8054_v24 }
 0xafb   :  { %5597 = vtanh.f32 %v4130_v51  ;;  %v8031_v17 = vsel %vm2237_vm2, %v4130_v51, %v7831_v52  ;;  %v8048_v52 = vld [vmem:[#allocation8 + $0xa8] ss:$16 sps:$4 sm:$0xff]   ;;  %v5596_v51 = vpop.eup %5595 }
 0xafc   :  { %4246 = vmatpush1.bf16.msra.mxu0 %v8033_v4  ;;  %4287 = vmatpush1.bf16.msra.mxu1 %v8036_v9  ;;  %8786 = vst [vmem:[#allocation119_spill] sm:$0xff] %v8048_v52  ;;  %v8063_v9 = vld [vmem:[#allocation8 + $0xe4] ss:$16 sps:$4 sm:$0xff]   ;;  %v8072_v4 = vld [vmem:[#allocation8 + $0xe8] ss:$16 sps:$4 sm:$0xff]  }
 0xafd   :  { %4247 = vmatprep.subr.bf16.mxu0 %v8039_v49  ;;  %4288 = vmatprep.subr.bf16.mxu1 %v8042_v0  ;;  %v8057_v49 = vld [vmem:[#allocation8 + $0xc0] ss:$16 sps:$4 sm:$0xff]   ;;  %v8060_v0 = vld [vmem:[#allocation8 + $0xc8] ss:$16 sps:$4 sm:$0xff]   ;;  %8790 = vst [vmem:[#allocation123_spill] sm:$0xff] %v8063_v9 }
 0xafe   :  { %8789 = vst [vmem:[#allocation122_spill] sm:$0xff] %v8060_v0 }
 0xb00   :  { %4248 = vmatpush1.bf16.msra.mxu0 %v8045_v57  ;;  %4289 = vmatpush1.bf16.msra.mxu1 %v8048_v52  ;;  %v8066_v52 = vld [vmem:[#allocation8 + $0xec] ss:$16 sps:$4 sm:$0xff]  }
 0xb01   :  { %4249 = vmatprep.subr.bf16.mxu0 %v8051_v26  ;;  %4290 = vmatprep.subr.bf16.mxu1 %v8054_v24  ;;  %v8069_v24 = vld [vmem:[#allocation8 + $0xe0] ss:$16 sps:$4 sm:$0xff]  }
 0xb04   :  { %4250 = vmatpush1.bf16.msra.mxu0 %v8057_v49  ;;  %4291 = vmatpush1.bf16.msra.mxu1 %v8060_v0 }
 0xb05   :  { %v5598_v57 = vpop.eup %5597  ;;  %4251 = vmatprep.subr.bf16.mxu0 %v8063_v9  ;;  %4292 = vmatprep.subr.bf16.mxu1 %v8066_v52 }
 0xb06   :  { %v4132_v26 = vmul.f32 %v5598_v57, %v5596_v51  ;;  %v8796_v57 = vld [vmem:[#allocation61_spill] sm:$0xff] }
 0xb08   :  { %4252 = vmatpush1.bf16.msra.mxu0 %v8069_v24  ;;  %4293 = vmatpush1.bf16.msra.mxu1 %v8072_v4  ;;  %v8078_v0 = vsel %vm2237_vm2, %v4132_v26, %v7850_v1  ;;  %v5854_v1 = vld [vmem:[#allocation8 + $0xc] ss:$16 sps:$4 sm:$0xff]  }
 0xb09   :  { %v4236_v9 = vpack.c.bf16 %v8078_v0, %v8078_v0  ;;  %4414 = vmatprep.subr.bf16.mxu0 %v7854_v44  ;;  %4455 = vmatprep.subr.bf16.mxu1 %v7857_v53 }
 0xb0b   :  { %4270 = vmatmul.mubr.bf16.vlgmr.msra.gmra.mrb[132].mxu0 %v4236_v9  ;;  %4311 = vmatmul.mubr.bf16.vlgmr.msra.gmra.mrb[132].mxu1 %v4236_v9 }
 0xb0c   :  { %4415 = vmatpush1.bf16.msra.mxu0 %v7860_v55  ;;  %4456 = vmatpush1.bf16.msra.mxu1 %v7863_v3  ;;  %v8791_v55 = vld [vmem:[#allocation47_spill] sm:$0xff] }
 0xb0d   :  { %4416 = vmatprep.subr.bf16.mxu0 %v7866_v47  ;;  %4457 = vmatprep.subr.bf16.mxu1 %v7869_v36  ;;  %v8792_v47 = vld [vmem:[#allocation49_spill] sm:$0xff] }
 0xb0e   :  { %4446 = vmatprep.mubr.bf16.mxu0 %v8425_v14  ;;  %4487 = vmatprep.mubr.bf16.mxu1 %v8425_v14 }
 0xb10   :  { %4417 = vmatpush1.bf16.msra.mxu0 %v7874_v34  ;;  %4458 = vmatpush1.bf16.msra.mxu1 %v7877_v12 }
 0xb11   :  { %4418 = vmatprep.subr.bf16.mxu0 %v7880_v16  ;;  %4459 = vmatprep.subr.bf16.mxu1 %v7883_v6  ;;  %v8793_v16 = vld [vmem:[#allocation48_spill] sm:$0xff] }
 0xb14   :  { %4419 = vmatpush1.bf16.msra.mxu0 %v7886_v35  ;;  %4460 = vmatpush1.bf16.msra.mxu1 %v7889_v5  ;;  %v8794_v35 = vld [vmem:[#allocation51_spill] sm:$0xff] }
 0xb15   :  { %4420 = vmatprep.subr.bf16.mxu0 %v7892_v37  ;;  %4461 = vmatprep.subr.bf16.mxu1 %v7895_v33 }
 0xb18   :  { %4421 = vmatpush1.bf16.msra.mxu0 %v7898_v10  ;;  %4462 = vmatpush1.bf16.msra.mxu1 %v7901_v63 }
 0xb19   :  { %4422 = vmatprep.subr.bf16.mxu0 %v7904_v25  ;;  %4463 = vmatprep.subr.bf16.mxu1 %v7907_v21 }
 0xb1c   :  { %4423 = vmatpush1.bf16.msra.mxu0 %v7910_v39  ;;  %4464 = vmatpush1.bf16.msra.mxu1 %v7913_v32 }
 0xb1d   :  { %4424 = vmatprep.subr.bf16.mxu0 %v7916_v27  ;;  %4465 = vmatprep.subr.bf16.mxu1 %v7919_v48 }
 0xb20   :  { %4425 = vmatpush1.bf16.msra.mxu0 %v7922_v43  ;;  %4466 = vmatpush1.bf16.msra.mxu1 %v7925_v29 }
 0xb21   :  { %4426 = vmatprep.subr.bf16.mxu0 %v7928_v13  ;;  %4467 = vmatprep.subr.bf16.mxu1 %v7931_v61 }
 0xb24   :  { %4427 = vmatpush1.bf16.msra.mxu0 %v7934_v30  ;;  %4468 = vmatpush1.bf16.msra.mxu1 %v7937_v60 }
 0xb25   :  { %4428 = vmatprep.subr.bf16.mxu0 %v7940_v58  ;;  %4469 = vmatprep.subr.bf16.mxu1 %v7943_v20 }
 0xb28   :  { %4429 = vmatpush1.bf16.msra.mxu0 %v7946_v38  ;;  %4470 = vmatpush1.bf16.msra.mxu1 %v7949_v46 }
 0xb29   :  { %4501 = vmatprep.subr.bf16.mxu0 %v7952_v19  ;;  %4542 = vmatprep.subr.bf16.mxu1 %v5854_v1 }
 0xbbe   :  { %v4184_v44 = vpop.f32.mrb[128].mxu0  ;;  %v4225_v53 = vpop.f32.mrb[128].mxu1 }
 0xbbf   :  { %v4232_v3 = vadd.f32 %v4184_v44, %v8791_v55  ;;  %v4234_v36 = vadd.f32 %v4225_v53, %v8792_v47  ;;  %v4186_v34 = vpop.f32.mrb[129].mxu0  ;;  %v4227_v12 = vpop.f32.mrb[129].mxu1  ;;  %v8797_v44 = vld [vmem:[#allocation60_spill] sm:$0xff]  ;;  %v8798_v55 = vld [vmem:[#allocation62_spill] sm:$0xff] }
 0xbc0   :  { %v4233_v6 = vadd.f32 %v4186_v34, %v8793_v16  ;;  %v4235_v5 = vadd.f32 %v4227_v12, %v8794_v35  ;;  %v4188_v37 = vpop.f32.mrb[130].mxu0  ;;  %v4229_v33 = vpop.f32.mrb[130].mxu1 }
 0xbc1   :  { %v5096_v10 = vmul.f32 -1.442695, %v4232_v3  ;;  %v4189_v63 = vpop.f32.mrb[131].mxu0  ;;  %v4230_v25 = vpop.f32.mrb[131].mxu1 }
 0xbc2   :  { %v5097_v21 = vmul.f32 -1.442695, %v4233_v6  ;;  %v5099_v39 = vmul.f32 -1.442695, %v4235_v5 }
 0xbc3   :  { %5599 = vpow2.f32 %v5096_v10 }
 0xbc4   :  { %5601 = vpow2.f32 %v5097_v21 }
 0xbc5   :  { %5603 = vpow2.f32 %v5099_v39 }
 0xbc6   :  { %5605 = vtanh.f32 %v4234_v36 }
 0xbcd   :  { %v5600_v32 = vpop.eup %5599 }
 0xbce   :  { %v5602_v27 = vpop.eup %5601  ;;  %v4335_v48 = vadd.f32 1.0, %v5600_v32 }
 0xbcf   :  { %v4336_v43 = vadd.f32 1.0, %v5602_v27  ;;  %v5604_v29 = vpop.eup %5603 }
 0xbd0   :  { %5607 = vrcp.f32 %v4335_v48  ;;  %v5606_v13 = vpop.eup %5605  ;;  %v4338_v58 = vadd.f32 1.0, %v5604_v29  ;;  %v8810_v29 = vld [vmem:[#allocation123_spill] sm:$0xff] }
 0xbd1   :  { %5609 = vrcp.f32 %v4336_v43 }
 0xbd2   :  { %5611 = vrcp.f32 %v4338_v58  ;;  %v5269_v58 = vld [vmem:[%s8259_s6 + $0x58] sm:$0xff]  }
 0xbda   :  { %v5608_v61 = vpop.eup %5607 }
 0xbdb   :  { %v5610_v30 = vpop.eup %5609  ;;  %v4356_v60 = vmul.f32 %v5608_v61, %v5606_v13 }
 0xbdc   :  { %v4355_v20 = vmul.f32 %v5610_v30, %v7968_v22  ;;  %v5612_v37 = vpop.eup %5611  ;;  %v5263_v30 = vld [vmem:[%s8259_s6 + $0x40] sm:$0xff]  }
 0xbde   :  { %v4357_v38 = vadd.f32 %v4356_v60, %v4355_v20  ;;  %v4271_v46 = vpop.f32.mrb[132].mxu0  ;;  %v4312_v19 = vpop.f32.mrb[132].mxu1  ;;  %v5268_v60 = vld [vmem:[%s8259_s6 + $0x10] sm:$0xff]   ;;  %v5270_v20 = vld [vmem:[%s8259_s6 + $0x18] sm:$0xff]  }
 0xbdf   :  { %v4319_v9 = vadd.f32 %v4271_v46, %v8795_v28  ;;  %v4321_v26 = vadd.f32 %v4312_v19, %v8796_v57  ;;  %v4273_v51 = vpop.f32.mrb[133].mxu0  ;;  %v4314_v1 = vpop.f32.mrb[133].mxu1  ;;  %v5272_v46 = vld [vmem:[%s8259_s6 + $0x20] sm:$0xff]   ;;  %v5273_v19 = vld [vmem:[%s8259_s6 + $0x68] sm:$0xff]   ;;  %v5276_v57 = vld [vmem:[%s8259_s6 + $0x30] sm:$0xff]  }
 0xbe0   :  { %5613 = vtanh.f32 %v4357_v38  ;;  %v4320_v53 = vadd.f32 %v4273_v51, %v8797_v44  ;;  %v4322_v3 = vadd.f32 %v4314_v1, %v8798_v55  ;;  %v4275_v47 = vpop.f32.mrb[134].mxu0  ;;  %v4316_v36 = vpop.f32.mrb[134].mxu1  ;;  %v8129_v12 = vsel %vm1966_vm1, %v4357_v38, %v7968_v22  ;;  %v5271_v38 = vld [vmem:[%s8259_s6 + $0x60] sm:$0xff]   ;;  %v5274_v28 = vld [vmem:[%s8259_s6 + $0x28] sm:$0xff]   ;;  %v5278_v51 = vld [vmem:[%s8259_s6 + $0x38] sm:$0xff]  }
 0xbe1   :  { %v5100_v16 = vmul.f32 -1.442695, %v4319_v9  ;;  %v4276_v6 = vpop.f32.mrb[135].mxu0  ;;  %v4317_v35 = vpop.f32.mrb[135].mxu1  ;;  %v5275_v9 = vld [vmem:[%s8259_s6 + $0x70] sm:$0xff]  }
 0xbe2   :  { %v5101_v5 = vmul.f32 -1.442695, %v4320_v53  ;;  %v5103_v10 = vmul.f32 -1.442695, %v4322_v3  ;;  %v8811_v53 = vld [vmem:[#allocation50_spill] sm:$0xff]  ;;  %v8812_v3 = vld [vmem:[#allocation53_spill] sm:$0xff] }
 0xbe3   :  { %5615 = vpow2.f32 %v5100_v16  ;;  %v8813_v16 = vld [vmem:[#allocation52_spill] sm:$0xff]  ;;  %v8814_v35 = vld [vmem:[#allocation54_spill] sm:$0xff] }
 0xbe4   :  { %5617 = vpow2.f32 %v5101_v5 }
 0xbe5   :  { %5619 = vpow2.f32 %v5103_v10 }
 0xbe6   :  { %5621 = vtanh.f32 %v4321_v26  ;;  %v5277_v26 = vld [vmem:[%s8259_s6 + $0x78] sm:$0xff]  }
 0xbea   :  { %v5614_v33 = vpop.eup %5613 }
 0xbeb   :  { %v4359_v63 = vmul.f32 %v5614_v33, %v5612_v37 }
 0xbed   :  { %v5616_v25 = vpop.eup %5615  ;;  %v8134_v21 = vsel %vm1966_vm1, %v4359_v63, %v7973_v40 }
 0xbee   :  { %v5618_v39 = vpop.eup %5617  ;;  %v4372_v32 = vadd.f32 1.0, %v5616_v25  ;;  %v4413_v22 = vpack.c.bf16 %v8134_v21, %v8134_v21 }
 0xbef   :  { %v4373_v27 = vadd.f32 1.0, %v5618_v39  ;;  %v5620_v40 = vpop.eup %5619 }
 0xbf0   :  { %5623 = vrcp.f32 %v4372_v32  ;;  %4447 = vmatmul.mubr.bf16.vlgmr.msra.gmra.mrb[136].mxu0 %v4413_v22  ;;  %4488 = vmatmul.mubr.bf16.vlgmr.msra.gmra.mrb[136].mxu1 %v4413_v22 }
 0xbf1   :  { %5625 = vrcp.f32 %v4373_v27  ;;  %4502 = vmatpush1.bf16.msra.mxu0 %v7977_v50  ;;  %4543 = vmatpush1.bf16.msra.mxu1 %v7980_v8  ;;  %v5622_v50 = vpop.eup %5621 }
 0xbf2   :  { %4503 = vmatprep.subr.bf16.mxu0 %v7983_v23  ;;  %4544 = vmatprep.subr.bf16.mxu1 %v7986_v15  ;;  %v4375_v15 = vadd.f32 1.0, %v5620_v40 }
 0xbf3   :  { %4533 = vmatprep.mubr.bf16.mxu0 %v8425_v14  ;;  %4574 = vmatprep.mubr.bf16.mxu1 %v8425_v14 }
 0xbf4   :  { %5627 = vrcp.f32 %v4375_v15 }
 0xbf5   :  { %4504 = vmatpush1.bf16.msra.mxu0 %v7991_v59  ;;  %4545 = vmatpush1.bf16.msra.mxu1 %v7994_v31 }
 0xbf6   :  { %4505 = vmatprep.subr.bf16.mxu0 %v7997_v45  ;;  %4546 = vmatprep.subr.bf16.mxu1 %v8000_v62 }
 0xbf9   :  { %4506 = vmatpush1.bf16.msra.mxu0 %v8003_v56  ;;  %4547 = vmatpush1.bf16.msra.mxu1 %v8006_v7  ;;  %v8801_v56 = vld [vmem:[#allocation114_spill] sm:$0xff]  ;;  %v8802_v7 = vld [vmem:[#allocation115_spill] sm:$0xff] }
 0xbfa   :  { %v5624_v8 = vpop.eup %5623  ;;  %4507 = vmatprep.subr.bf16.mxu0 %v8009_v11  ;;  %4548 = vmatprep.subr.bf16.mxu1 %v8012_v42  ;;  %v8803_v11 = vld [vmem:[#allocation116_spill] sm:$0xff]  ;;  %v8804_v42 = vld [vmem:[#allocation117_spill] sm:$0xff] }
 0xbfb   :  { %v5626_v14 = vpop.eup %5625  ;;  %v4393_v23 = vmul.f32 %v5624_v8, %v5622_v50 }
 0xbfc   :  { %v4392_v59 = vmul.f32 %v5626_v14, %v8031_v17 }
 0xbfd   :  { %4508 = vmatpush1.bf16.msra.mxu0 %v8016_v2  ;;  %4549 = vmatpush1.bf16.msra.mxu1 %v8019_v54  ;;  %v8805_v2 = vld [vmem:[#allocation118_spill] sm:$0xff]  ;;  %v8806_v54 = vld [vmem:[#allocation119_spill] sm:$0xff] }
 0xbfe   :  { %v4394_v31 = vadd.f32 %v4393_v23, %v4392_v59  ;;  %4509 = vmatprep.subr.bf16.mxu0 %v8022_v18  ;;  %4550 = vmatprep.subr.bf16.mxu1 %v8025_v41  ;;  %v8807_v18 = vld [vmem:[#allocation120_spill] sm:$0xff]  ;;  %v8808_v41 = vld [vmem:[#allocation121_spill] sm:$0xff]  ;;  %v5628_v48 = vpop.eup %5627 }
 0xc00   :  { %5629 = vtanh.f32 %v4394_v31  ;;  %v8160_v62 = vsel %vm1959_vm0, %v4394_v31, %v8031_v17  ;;  %v8809_v17 = vld [vmem:[#allocation122_spill] sm:$0xff] }
 0xc01   :  { %4510 = vmatpush1.bf16.msra.mxu0 %v8801_v56  ;;  %4551 = vmatpush1.bf16.msra.mxu1 %v8802_v7 }
 0xc02   :  { %4511 = vmatprep.subr.bf16.mxu0 %v8803_v11  ;;  %4552 = vmatprep.subr.bf16.mxu1 %v8804_v42  ;;  %v8815_v42 = vld [vmem:[#allocation55_spill] sm:$0xff] }
 0xc05   :  { %4512 = vmatpush1.bf16.msra.mxu0 %v8805_v2  ;;  %4553 = vmatpush1.bf16.msra.mxu1 %v8806_v54  ;;  %v8816_v54 = vld [vmem:[#allocation57_spill] sm:$0xff] }
 0xc06   :  { %4513 = vmatprep.subr.bf16.mxu0 %v8807_v18  ;;  %4554 = vmatprep.subr.bf16.mxu1 %v8808_v41 }
 0xc09   :  { %4514 = vmatpush1.bf16.msra.mxu0 %v8057_v49  ;;  %4555 = vmatpush1.bf16.msra.mxu1 %v8809_v17  ;;  %v8817_v17 = vld [vmem:[#allocation56_spill] sm:$0xff] }
 0xc0a   :  { %v5630_v43 = vpop.eup %5629  ;;  %4515 = vmatprep.subr.bf16.mxu0 %v8810_v29  ;;  %4556 = vmatprep.subr.bf16.mxu1 %v8066_v52  ;;  %v5264_v52 = vld [vmem:[%s8259_s6] sm:$0xff]  }
 0xc0b   :  { %v4396_v13 = vmul.f32 %v5630_v43, %v5628_v48  ;;  %v8818_v29 = vld [vmem:[#allocation59_spill] sm:$0xff] }
 0xc0d   :  { %4516 = vmatpush1.bf16.msra.mxu0 %v8069_v24  ;;  %4557 = vmatpush1.bf16.msra.mxu1 %v8072_v4  ;;  %v8179_v61 = vsel %vm1959_vm0, %v4396_v13, %v8078_v0  ;;  %v5265_v4 = vld [vmem:[%s8259_s6 + $0x48] sm:$0xff]   ;;  %v5267_v24 = vld [vmem:[%s8259_s6 + $0x50] sm:$0xff]  }
 0xc0e   :  { %v4500_v49 = vpack.c.bf16 %v8179_v61, %v8179_v61  ;;  %5129 = vmatprep.subr.bf16.mxu0 %v5263_v30  ;;  %v5266_v0 = vld [vmem:[%s8259_s6 + $0x8] sm:$0xff]  }
 0xc10   :  { %4534 = vmatmul.mubr.bf16.vlgmr.msra.gmra.mrb[140].mxu0 %v4500_v49  ;;  %4575 = vmatmul.mubr.bf16.vlgmr.msra.gmra.mrb[140].mxu1 %v4500_v49 }
 0xc11   :  { %5130 = vmatpush3.bf16.msra.mxu0 %v5264_v52 }
 0xc12   :  { %5131 = vmatprep.subr.bf16.mxu0 %v5265_v4 }
 0xc15   :  { %5132 = vmatpush3.bf16.msra.mxu0 %v5266_v0 }
 0xc16   :  { %5133 = vmatprep.subr.bf16.mxu0 %v5267_v24 }
 0xc19   :  { %5134 = vmatpush3.bf16.msra.mxu0 %v5268_v60 }
 0xc1a   :  { %5135 = vmatprep.subr.bf16.mxu0 %v5269_v58 }
 0xc1d   :  { %5136 = vmatpush3.bf16.msra.mxu0 %v5270_v20 }
 0xc1e   :  { %5137 = vmatprep.subr.bf16.mxu0 %v5271_v38 }
 0xc21   :  { %5138 = vmatpush3.bf16.msra.mxu0 %v5272_v46 }
 0xc22   :  { %5139 = vmatprep.subr.bf16.mxu0 %v5273_v19 }
 0xc25   :  { %5140 = vmatpush3.bf16.msra.mxu0 %v5274_v28 }
 0xc26   :  { %5141 = vmatprep.subr.bf16.mxu0 %v5275_v9 }
 0xc29   :  { %5142 = vmatpush3.bf16.msra.mxu0 %v5276_v57 }
 0xc2a   :  { %5143 = vmatprep.subr.bf16.mxu0 %v5277_v26 }
 0xc2d   :  { %5144 = vmatpush3.bf16.msra.mxu0 %v5278_v51 }
 0xcc3   :  { %v4448_v1 = vpop.f32.mrb[136].mxu0  ;;  %v4489_v44 = vpop.f32.mrb[136].mxu1 }
 0xcc4   :  { %v4496_v55 = vadd.f32 %v4448_v1, %v8811_v53  ;;  %v4498_v47 = vadd.f32 %v4489_v44, %v8812_v3  ;;  %v4450_v36 = vpop.f32.mrb[137].mxu0  ;;  %v4491_v34 = vpop.f32.mrb[137].mxu1 }
 0xcc5   :  { %v4497_v6 = vadd.f32 %v4450_v36, %v8813_v16  ;;  %v4499_v5 = vadd.f32 %v4491_v34, %v8814_v35  ;;  %v4452_v37 = vpop.f32.mrb[138].mxu0  ;;  %v4493_v33 = vpop.f32.mrb[138].mxu1 }
 0xcc6   :  { %v5104_v10 = vmul.f32 -1.442695, %v4496_v55  ;;  %v4453_v63 = vpop.f32.mrb[139].mxu0  ;;  %v4494_v25 = vpop.f32.mrb[139].mxu1 }
 0xcc7   :  { %v5105_v39 = vmul.f32 -1.442695, %v4497_v6  ;;  %v5107_v32 = vmul.f32 -1.442695, %v4499_v5 }
 0xcc8   :  { %5631 = vpow2.f32 %v5104_v10 }
 0xcc9   :  { %5633 = vpow2.f32 %v5105_v39 }
 0xcca   :  { %5635 = vpow2.f32 %v5107_v32 }
 0xccb   :  { %5637 = vtanh.f32 %v4498_v47 }
 0xcd2   :  { %v5632_v22 = vpop.eup %5631 }
 0xcd3   :  { %v5634_v27 = vpop.eup %5633  ;;  %v4599_v40 = vadd.f32 1.0, %v5632_v22 }
 0xcd4   :  { %v4600_v50 = vadd.f32 1.0, %v5634_v27  ;;  %v5636_v8 = vpop.eup %5635 }
 0xcd5   :  { %5639 = vrcp.f32 %v4599_v40  ;;  %v5638_v14 = vpop.eup %5637  ;;  %v4602_v31 = vadd.f32 1.0, %v5636_v8 }
 0xcd6   :  { %5641 = vrcp.f32 %v4600_v50 }
 0xcd7   :  { %5643 = vrcp.f32 %v4602_v31 }
 0xcdf   :  { %v5640_v23 = vpop.eup %5639 }
 0xce0   :  { %v5642_v15 = vpop.eup %5641  ;;  %v4620_v59 = vmul.f32 %v5640_v23, %v5638_v14 }
 0xce1   :  { %v4619_v45 = vmul.f32 %v5642_v15, %v8129_v12  ;;  %v5644_v24 = vpop.eup %5643 }
 0xce3   :  { %v4621_v56 = vadd.f32 %v4620_v59, %v4619_v45  ;;  %v4535_v7 = vpop.f32.mrb[140].mxu0  ;;  %v4576_v11 = vpop.f32.mrb[140].mxu1 }
 0xce4   :  { %v4583_v2 = vadd.f32 %v4535_v7, %v8815_v42  ;;  %v4585_v18 = vadd.f32 %v4576_v11, %v8816_v54  ;;  %v4537_v41 = vpop.f32.mrb[141].mxu0  ;;  %v4578_v48 = vpop.f32.mrb[141].mxu1 }
 0xce5   :  { %5645 = vtanh.f32 %v4621_v56  ;;  %v4584_v43 = vadd.f32 %v4537_v41, %v8817_v17  ;;  %v4586_v13 = vadd.f32 %v4578_v48, %v8818_v29  ;;  %v4539_v49 = vpop.f32.mrb[142].mxu0  ;;  %v4580_v30 = vpop.f32.mrb[142].mxu1 }
 0xce6   :  { %v5108_v52 = vmul.f32 -1.442695, %v4583_v2  ;;  %v4540_v4 = vpop.f32.mrb[143].mxu0  ;;  %v4581_v12 = vpop.f32.mrb[143].mxu1 }
 0xce7   :  { %v5109_v0 = vmul.f32 -1.442695, %v4584_v43  ;;  %v5111_v58 = vmul.f32 -1.442695, %v4586_v13 }
 0xce8   :  { %5647 = vpow2.f32 %v5108_v52 }
 0xce9   :  { %5649 = vpow2.f32 %v5109_v0 }
 0xcea   :  { %5651 = vpow2.f32 %v5111_v58 }
 0xceb   :  { %5653 = vtanh.f32 %v4585_v18 }
 0xcef   :  { %v5646_v60 = vpop.eup %5645 }
 0xcf0   :  { %v4623_v20 = vmul.f32 %v5646_v60, %v5644_v24 }
 0xcf2   :  { %v5648_v38 = vpop.eup %5647  ;;  %v4661_v16 = vsel %vm1688_vm14, %v4623_v20, %v8134_v21 }
 0xcf3   :  { %v5650_v46 = vpop.eup %5649  ;;  %v4636_v19 = vadd.f32 1.0, %v5648_v38  ;;  %v4663_v37 = vpack.c.bf16 %v4661_v16, %v4661_v16 }
 0xcf4   :  { %v4637_v28 = vadd.f32 1.0, %v5650_v46  ;;  %v5652_v9 = vpop.eup %5651 }
 0xcf5   :  { %5655 = vrcp.f32 %v4636_v19  ;;  %v5654_v57 = vpop.eup %5653  ;;  %v4639_v44 = vadd.f32 1.0, %v5652_v9 }
 0xcf6   :  { %5657 = vrcp.f32 %v4637_v28 }
 0xcf7   :  { %5659 = vrcp.f32 %v4639_v44 }
 0xcff   :  { %v5656_v26 = vpop.eup %5655 }
 0xd00   :  { %v5658_v51 = vpop.eup %5657  ;;  %v4657_v1 = vmul.f32 %v5656_v26, %v5654_v57 }
 0xd01   :  { %v4656_v53 = vmul.f32 %v5658_v51, %v8160_v62  ;;  %v5660_v3 = vpop.eup %5659  ;;  %v5112_v62 = vld [vmem:[%s8260_s7] ss:$0 sm:$0xff] }
 0xd03   :  { %v4658_v55 = vadd.f32 %v4657_v1, %v4656_v53 }
 0xd05   :  { %5661 = vtanh.f32 %v4658_v55 }
 0xd0f   :  { %v5662_v47 = vpop.eup %5661 }
 0xd10   :  { %v4660_v36 = vmul.f32 %v5662_v47, %v5660_v3 }
 0xd12   :  { %v4662_v35 = vsel %vm1681_vm12, %v4660_v36, %v8179_v61 }
 0xd13   :  { %v4664_v5 = vpack.c.bf16 %v4662_v35, %v4662_v35 }
 0xd15   :  { %4832 = vmatprep.mubr.bf16.mxu0 %v4664_v5 }
 0xd16   :  { %4833 = vmatmul.mubr.bf16.vlgmr.msra.gmra.mrb[144].mxu0 %v4663_v37 }
 0xde9   :  { %v5145_v33 = vpop.f32.mrb[144].mxu0 }
 0xdea   :  { %v5146_v10 = vpop.f32.mrb[145].mxu0 }
 0xdeb   :  { %v5147_v63 = vadd.f32 %v5146_v10, %v5145_v33  ;;  %v5148_v25 = vpop.f32.mrb[146].mxu0 }
 0xdec   :  { %v5149_v39 = vpop.f32.mrb[147].mxu0 }
 0xded   :  { %v4835_v32 = vadd.f32 %v5147_v63, %v5112_v62 }
 0xdef   :  { %4841 = vst.msk [vmem:[%s8261_s8] sm:$0xff] %vm4840_vm10, %v4835_v32 }
 0xdf0   :  { %4846 = vsyncpa [#allocation5], 1 }
 0xdf1   :  { %4847 = vsyncpa [#allocation7], 1 }

</bundles_post_ra>
